<compile_context>
chip_gen: v6e
topology: v6e:2x2x1
jax: 0.10.0
libtpu: 0.0.40
codegen_flags: <defaults>
</compile_context>

<pallas_src>
import functools

import jax
import jax.numpy as jnp
from jax.experimental import pallas as pl
from jax.experimental.pallas import tpu as pltpu

EPS = 1e-6

BLOCK_KEYS = ('ln1_w', 'ln1_b', 'qkv_w', 'qkv_b', 'proj_w', 'proj_b',
              'ln2_w', 'ln2_b', 'fc1_w', 'fc1_b', 'fc2_w', 'fc2_b')


# ------------------------------------------------------------------
# Shared in-kernel math
# ------------------------------------------------------------------
def _layernorm(x, w, b):
    mu = jnp.mean(x, axis=-1, keepdims=True)
    var = jnp.mean(jnp.square(x - mu), axis=-1, keepdims=True)
    return (x - mu) * jax.lax.rsqrt(var + EPS) * w + b


def _block_body(x, w, *, num_heads, seq_len, s_real):
    """Pre-norm ViT block on x: (n_seq*seq_len, dmodel) f32, padded tokens masked."""
    (ln1_w, ln1_b, qkv_w, qkv_b, proj_w, proj_b,
     ln2_w, ln2_b, fc1_w, fc1_b, fc2_w, fc2_b) = w
    rows, dmodel = x.shape
    n_seq = rows // seq_len
    hd = dmodel // num_heads
    scale = 1.0 / float(hd) ** 0.5

    # key mask for padded tokens (shared by all sequences / heads)
    col = jax.lax.broadcasted_iota(jnp.int32, (1, seq_len), 1)
    key_bias = jnp.where(col < s_real, 0.0, -1e30).astype(jnp.float32)

    # --- attention branch ---
    xn = _layernorm(x, ln1_w, ln1_b).astype(jnp.bfloat16)
    qkv = (jnp.dot(xn, qkv_w, preferred_element_type=jnp.float32)
           + qkv_b).astype(jnp.bfloat16)                       # (rows, 3*dmodel)

    attn_parts = []
    for s in range(n_seq):                                     # static unroll
        r0 = s * seq_len
        acc = jnp.zeros((seq_len, dmodel), jnp.float32)
        for h in range(num_heads):                             # static unroll
            q = qkv[r0:r0 + seq_len, h * hd:(h + 1) * hd]
            k = qkv[r0:r0 + seq_len, dmodel + h * hd:dmodel + (h + 1) * hd]
            v = qkv[r0:r0 + seq_len, 2 * dmodel + h * hd:2 * dmodel + (h + 1) * hd]
            att = jax.lax.dot_general(q, k, (((1,), (1,)), ((), ())),
                                      preferred_element_type=jnp.float32) * scale
            att = att + key_bias
            att = att - jnp.max(att, axis=-1, keepdims=True)
            e = jnp.exp(att)
            p = e * pl.reciprocal(jnp.sum(e, axis=-1, keepdims=True), approx=True)
            ctx = jnp.dot(p.astype(jnp.bfloat16), v,
                          preferred_element_type=jnp.float32)
            # accumulate per-head output directly through the proj matmul
            acc = acc + jnp.dot(ctx.astype(jnp.bfloat16),
                                proj_w[h * hd:(h + 1) * hd, :],
                                preferred_element_type=jnp.float32)
        attn_parts.append(acc)
    attn = attn_parts[0] if n_seq == 1 else jnp.concatenate(attn_parts, axis=0)
    x = x + attn + proj_b

    # --- MLP branch ---
    xn2 = _layernorm(x, ln2_w, ln2_b).astype(jnp.bfloat16)
    hmid = jnp.dot(xn2, fc1_w, preferred_element_type=jnp.float32) + fc1_b
    # TODO(synk): nn.GELU default is exact (erf) GELU; tanh approximation used for robust TPU lowering.
    hmid = jax.nn.gelu(hmid, approximate=True).astype(jnp.bfloat16)
    hout = jnp.dot(hmid, fc2_w, preferred_element_type=jnp.float32) + fc2_b
    return x + hout


# ------------------------------------------------------------------
# Kernels
# ------------------------------------------------------------------
def embed_kernel(patch_ref, pw_ref, pb_ref, cls_ref, pos_ref, out_ref, *,
                 batch, n_patch, seq_len):
    """patch linear + cls concat + pos add, writes (batch*seq_len, D) tokens."""
    emb = jnp.dot(patch_ref[...].astype(jnp.bfloat16), pw_ref[...],
                  preferred_element_type=jnp.float32) + pb_ref[...]
    cls = cls_ref[...]                       # (1, D)
    pos = pos_ref[...]                       # (seq_len, D), pad rows are zero
    d = pos.shape[1]
    n_pad = seq_len - 1 - n_patch
    for b in range(batch):                   # static unroll
        base = b * seq_len
        out_ref[base:base + 1, :] = cls + pos[0:1, :]
        out_ref[base + 1:base + 1 + n_patch, :] = (
            emb[b * n_patch:(b + 1) * n_patch, :] + pos[1:1 + n_patch, :])
        if n_pad > 0:
            out_ref[base + 1 + n_patch:base + seq_len, :] = jnp.zeros(
                (n_pad, d), jnp.float32)


def backbone_kernel(tok_ref, *rest, num_heads, seq_len, s_real):
    """grid=(depth,); resident tokens in scratch; final LayerNorm fused at last step."""
    block_refs = rest[:12]
    norm_w_ref, norm_b_ref, out_ref, x_scr = rest[12], rest[13], rest[14], rest[15]
    g = pl.program_id(0)

    @pl.when(g == 0)
    def _():
        x_scr[...] = tok_ref[...]

    w = [r[0] for r in block_refs]
    x = _block_body(x_scr[...], w, num_heads=num_heads,
                    seq_len=seq_len, s_real=s_real)
    x_scr[...] = x

    @pl.when(g == pl.num_programs(0) - 1)
    def _():
        out_ref[...] = _layernorm(x_scr[...], norm_w_ref[...], norm_b_ref[...])


def branch_kernel(x_ref, *rest, num_heads, seq_len, s_real):
    """grid=(4,); one of {block1a_p,block2a,block3a,block4a} + its mlp projection."""
    block_refs = rest[:12]
    mlp_w_ref, mlp_b_ref, out_ref = rest[12], rest[13], rest[14]
    w = [r[0] for r in block_refs]
    y = _block_body(x_ref[...], w, num_heads=num_heads,
                    seq_len=seq_len, s_real=s_real)
    z = jnp.dot(y.astype(jnp.bfloat16), mlp_w_ref[0],
                preferred_element_type=jnp.float32) + mlp_b_ref[0]
    out_ref[0] = z


def tail_kernel(seq_ref, *rest, num_heads, seq_len, s_real, batch):
    """grid=(4,); shared block1b_p + linearh1p head + softmax on the cls token."""
    block_refs = rest[:12]
    head_w_ref, head_b_ref = rest[12], rest[13]
    logit_ref, soft_ref = rest[14], rest[15]
    w = [r[...] for r in block_refs]
    y = _block_body(seq_ref[0], w, num_heads=num_heads,
                    seq_len=seq_len, s_real=s_real)
    cls_rows = jnp.concatenate(
        [y[b * seq_len:b * seq_len + 1, :] for b in range(batch)], axis=0)
    logits = jnp.dot(cls_rows.astype(jnp.bfloat16), head_w_ref[...],
                     preferred_element_type=jnp.float32) + head_b_ref[...]
    logit_ref[0] = logits
    m = jnp.max(logits, axis=-1, keepdims=True)
    e = jnp.exp(logits - m)
    soft_ref[0] = e * pl.reciprocal(jnp.sum(e, axis=-1, keepdims=True), approx=True)


# ------------------------------------------------------------------
# BlockSpec helpers + wrappers
# ------------------------------------------------------------------
def _stacked_spec(shape):
    ndim = len(shape)
    return pl.BlockSpec((1,) + tuple(shape[1:]),
                        lambda g, _n=ndim - 1: (g,) + (0,) * _n)


def _const_spec(shape):
    ndim = len(shape)
    return pl.BlockSpec(tuple(shape), lambda g, _n=ndim: (0,) * _n)


def run_embed(patches, pw, pb, cls, pos, *, batch, n_patch, seq_len):
    d = pos.shape[1]
    return pl.pallas_call(
        functools.partial(embed_kernel, batch=batch, n_patch=n_patch,
                          seq_len=seq_len),
        out_shape=jax.ShapeDtypeStruct((batch * seq_len, d), jnp.float32),
    )(patches, pw, pb, cls, pos)


def run_backbone(tok, blocks, norm_w, norm_b, *, num_heads, seq_len, s_real):
    depth = blocks['qkv_w'].shape[0]
    bs, d = tok.shape
    block_args = [blocks[k] for k in BLOCK_KEYS]
    in_specs = ([_const_spec(tok.shape)]
                + [_stacked_spec(a.shape) for a in block_args]
                + [_const_spec(norm_w.shape), _const_spec(norm_b.shape)])
    return pl.pallas_call(
        functools.partial(backbone_kernel, num_heads=num_heads,
                          seq_len=seq_len, s_real=s_real),
        out_shape=jax.ShapeDtypeStruct((bs, d), jnp.float32),
        grid=(depth,),
        in_specs=in_specs,
        out_specs=_const_spec((bs, d)),
        scratch_shapes=[pltpu.VMEM((bs, d), jnp.float32)],
        compiler_params=pltpu.CompilerParams(dimension_semantics=("arbitrary",)),
    )(tok, *block_args, norm_w, norm_b)


def run_branches(f, blocks, *, num_heads, seq_len, s_real):
    n_branch = blocks['qkv_w'].shape[0]
    bs, _ = f.shape
    dr = blocks['mlp_w'].shape[2]
    block_args = ([blocks[k] for k in BLOCK_KEYS]
                  + [blocks['mlp_w'], blocks['mlp_b']])
    in_specs = ([_const_spec(f.shape)]
                + [_stacked_spec(a.shape) for a in block_args])
    return pl.pallas_call(
        functools.partial(branch_kernel, num_heads=num_heads,
                          seq_len=seq_len, s_real=s_real),
        out_shape=jax.ShapeDtypeStruct((n_branch, bs, dr), jnp.float32),
        grid=(n_branch,),
        in_specs=in_specs,
        out_specs=pl.BlockSpec((1, bs, dr), lambda g: (g, 0, 0)),
        compiler_params=pltpu.CompilerParams(dimension_semantics=("parallel",)),
    )(f, *block_args)


def run_tail(seqs, block, head_w, head_b, *, num_heads, seq_len, s_real, batch):
    n_seq, bs, dr = seqs.shape
    n_cls = head_w.shape[1]
    block_args = [block[k] for k in BLOCK_KEYS]
    in_specs = ([pl.BlockSpec((1, bs, dr), lambda g: (g, 0, 0))]
                + [_const_spec(a.shape) for a in block_args]
                + [_const_spec(head_w.shape), _const_spec(head_b.shape)])
    out_specs = (pl.BlockSpec((1, batch, n_cls), lambda g: (g, 0, 0)),
                 pl.BlockSpec((1, batch, n_cls), lambda g: (g, 0, 0)))
    return pl.pallas_call(
        functools.partial(tail_kernel, num_heads=num_heads, seq_len=seq_len,
                          s_real=s_real, batch=batch),
        out_shape=(jax.ShapeDtypeStruct((n_seq, batch, n_cls), jnp.float32),
                   jax.ShapeDtypeStruct((n_seq, batch, n_cls), jnp.float32)),
        grid=(n_seq,),
        in_specs=in_specs,
        out_specs=out_specs,
        compiler_params=pltpu.CompilerParams(dimension_semantics=("parallel",)),
    )(seqs, *block_args, head_w, head_b)


# ------------------------------------------------------------------
# Model forward (forward_features + Model_SL_SSL.testp path)
# ------------------------------------------------------------------
def model_testp(x_img, params):
    B, C, H, W = x_img.shape
    P = params['patch']
    n_patch = (H // P) * (W // P)
    s_real = n_patch + 1
    s_pad = params['seq_pad']
    dr = params['dim_r']

    # patch extraction == Conv2d(C, D, kernel=P, stride=P) on NCHW input
    patches = (x_img.reshape(B, C, H // P, P, W // P, P)
               .transpose(0, 2, 4, 1, 3, 5)
               .reshape(B * n_patch, C * P * P))

    tok = run_embed(patches, params['patch_w'], params['patch_b'],
                    params['cls_token'], params['pos_embed'],
                    batch=B, n_patch=n_patch, seq_len=s_pad)       # (B*s_pad, D)

    f = run_backbone(tok, params['backbone_blocks'],
                     params['norm_w'], params['norm_b'],
                     num_heads=params['heads_a'], seq_len=s_pad, s_real=s_real)

    # 4 branch blocks + their mlp projections fused into one call (grid=4)
    h = run_branches(f, params['branch_blocks'],
                     num_heads=params['heads_a'], seq_len=s_pad, s_real=s_real)
    h = h.reshape(4, B, s_pad, dr)
    cls_tokens = h[:, :, 0, :]                        # h1cp, h2c, h3c, h4c
    h1pp = h[0][:, 1:1 + n_patch]                     # real patch tokens of h1p

    pad = jnp.zeros((B, s_pad - 1 - n_patch, dr), jnp.float32)
    seqs = jnp.stack(
        [jnp.concatenate([cls_tokens[i][:, None, :], h1pp, pad], axis=1)
         for i in range(4)], axis=0).reshape(4, B * s_pad, dr)

    logits_all, soft_all = run_tail(
        seqs, params['tail_block'], params['head_w'], params['head_b'],
        num_heads=params['heads_b'], seq_len=s_pad, s_real=s_real, batch=B)

    h1nt_soft = soft_all[0] + soft_all[1] + soft_all[2] + soft_all[3]
    return logits_all[0], soft_all[0], h1nt_soft


# ------------------------------------------------------------------
# Parameter init (deterministic, synthetic; matmul weights stored in bf16)
# ------------------------------------------------------------------
def trunc_normal(key, shape, std=0.02):
    return (std * jax.random.truncated_normal(key, -2.0, 2.0, shape)).astype(jnp.float32)


def init_block_stack(key, n, dim, mlp_ratio=4.0):
    m = int(dim * mlp_ratio)
    k = jax.random.split(key, 4)
    bf16, f32 = jnp.bfloat16, jnp.float32
    return dict(
        ln1_w=jnp.ones((n, 1, dim), f32), ln1_b=jnp.zeros((n, 1, dim), f32),
        qkv_w=trunc_normal(k[0], (n, dim, 3 * dim)).astype(bf16),
        qkv_b=jnp.zeros((n, 1, 3 * dim), f32),
        proj_w=trunc_normal(k[1], (n, dim, dim)).astype(bf16),
        proj_b=jnp.zeros((n, 1, dim), f32),
        ln2_w=jnp.ones((n, 1, dim), f32), ln2_b=jnp.zeros((n, 1, dim), f32),
        fc1_w=trunc_normal(k[2], (n, dim, m)).astype(bf16),
        fc1_b=jnp.zeros((n, 1, m), f32),
        fc2_w=trunc_normal(k[3], (n, m, dim)).astype(bf16),
        fc2_b=jnp.zeros((n, 1, dim), f32),
    )


def init_block_single(key, dim, mlp_ratio=4.0):
    m = int(dim * mlp_ratio)
    k = jax.random.split(key, 4)
    bf16, f32 = jnp.bfloat16, jnp.float32
    return dict(
        ln1_w=jnp.ones((1, dim), f32), ln1_b=jnp.zeros((1, dim), f32),
        qkv_w=trunc_normal(k[0], (dim, 3 * dim)).astype(bf16),
        qkv_b=jnp.zeros((1, 3 * dim), f32),
        proj_w=trunc_normal(k[1], (dim, dim)).astype(bf16),
        proj_b=jnp.zeros((1, dim), f32),
        ln2_w=jnp.ones((1, dim), f32), ln2_b=jnp.zeros((1, dim), f32),
        fc1_w=trunc_normal(k[2], (dim, m)).astype(bf16),
        fc1_b=jnp.zeros((1, m), f32),
        fc2_w=trunc_normal(k[3], (m, dim)).astype(bf16),
        fc2_b=jnp.zeros((1, dim), f32),
    )


# ------------------------------------------------------------------
if __name__ == "__main__":
    key = jax.random.PRNGKey(0)
    B, C, H, W, P = 2, 3, 32, 32, 16
    D, DR, HEADS_A, HEADS_B, DEPTH = 64, 32, 4, 4, 2
    NUM_PLANT = 14
    N_PATCH = (H // P) * (W // P)     # 4
    S_REAL = N_PATCH + 1              # cls + patches = 5
    S_PAD = 8                         # pad token axis to a sublane multiple

    ks = jax.random.split(key, 10)
    f32, bf16 = jnp.float32, jnp.bfloat16

    pos_real = trunc_normal(ks[2], (S_REAL, D))
    pos_embed = jnp.zeros((S_PAD, D), f32).at[:S_REAL].set(pos_real)

    backbone_blocks = init_block_stack(ks[3], DEPTH, D)
    branch_blocks = init_block_stack(ks[4], 4, D)   # block1a_p, block2a, block3a, block4a
    branch_blocks['mlp_w'] = trunc_normal(ks[5], (4, D, DR)).astype(bf16)  # mlp1p/2/3/4
    branch_blocks['mlp_b'] = jnp.zeros((4, 1, DR), f32)
    tail_block = init_block_single(ks[6], DR)       # block1b_p (shared by the 4 seqs)

    params = dict(
        patch=P, dim=D, dim_r=DR, heads_a=HEADS_A, heads_b=HEADS_B, seq_pad=S_PAD,
        patch_w=trunc_normal(ks[0], (C * P * P, D)).astype(bf16),
        patch_b=jnp.zeros((1, D), f32),
        cls_token=trunc_normal(ks[1], (1, D)),
        pos_embed=pos_embed,
        backbone_blocks=backbone_blocks,
        norm_w=jnp.ones((1, D), f32), norm_b=jnp.zeros((1, D), f32),
        branch_blocks=branch_blocks,
        tail_block=tail_block,
        head_w=trunc_normal(ks[7], (DR, NUM_PLANT)).astype(bf16),
        head_b=jnp.zeros((1, NUM_PLANT), f32),
    )

    x_img = jax.random.normal(ks[8], (B, C, H, W), dtype=f32)

    fwd = jax.jit(lambda img: model_testp(img, params))
    out = fwd(x_img)
    jax.block_until_ready(out)
    assert out[0].shape == (B, NUM_PLANT)
    assert out[1].shape == (B, NUM_PLANT)
    assert out[2].shape == (B, NUM_PLANT)
    print("KERNEL_OK")
</pallas_src>

<mosaic_0001>
module attributes {stable_mosaic.version = 11 : i64} {
  func.func @embed_kernel(%arg0: memref<8x768xf32, #tpu.memory_space<vmem>>, %arg1: memref<768x64xbf16, #tpu.memory_space<vmem>>, %arg2: memref<1x64xf32, #tpu.memory_space<vmem>>, %arg3: memref<1x64xf32, #tpu.memory_space<vmem>>, %arg4: memref<8x64xf32, #tpu.memory_space<vmem>>, %arg5: memref<16x64xf32, #tpu.memory_space<vmem>>) attributes {dimension_semantics = [], scalar_prefetch = 0 : i64, scratch_operands = 0 : i64, tpu.core_type = #tpu.core_type<tc>} {
    %c0 = arith.constant 0 : index
    %c0_0 = arith.constant 0 : index
    %0 = vector.load %arg0[%c0, %c0_0] : memref<8x768xf32, #tpu.memory_space<vmem>>, vector<8x768xf32>
    %1 = arith.truncf %0 : vector<8x768xf32> to vector<8x768xbf16>
    %c0_1 = arith.constant 0 : index
    %c0_2 = arith.constant 0 : index
    %2 = vector.load %arg1[%c0_1, %c0_2] : memref<768x64xbf16, #tpu.memory_space<vmem>>, vector<768x64xbf16>
    %cst = arith.constant dense<0.000000e+00> : vector<8x64xf32>
    %3 = tpu.matmul %1, %2, %cst {dimension_numbers = #tpu.dot_dimension_numbers<[1], [0], [0], [1], [0, 0, 1, 1], [], []>} : vector<8x768xbf16>, vector<768x64xbf16>, vector<8x64xf32> -> vector<8x64xf32>
    %c0_3 = arith.constant 0 : index
    %c0_4 = arith.constant 0 : index
    %4 = vector.load %arg2[%c0_3, %c0_4] : memref<1x64xf32, #tpu.memory_space<vmem>>, vector<1x64xf32>
    %5 = vector.broadcast %4 : vector<1x64xf32> to vector<8x64xf32>
    %6 = arith.addf %3, %5 : vector<8x64xf32>
    %c0_5 = arith.constant 0 : index
    %c0_6 = arith.constant 0 : index
    %7 = vector.load %arg3[%c0_5, %c0_6] : memref<1x64xf32, #tpu.memory_space<vmem>>, vector<1x64xf32>
    %c0_7 = arith.constant 0 : index
    %c0_8 = arith.constant 0 : index
    %8 = vector.load %arg4[%c0_7, %c0_8] : memref<8x64xf32, #tpu.memory_space<vmem>>, vector<8x64xf32>
    %9 = vector.extract_strided_slice %8 {offsets = [0, 0], sizes = [1, 64], strides = [1, 1]} : vector<8x64xf32> to vector<1x64xf32>
    %10 = arith.addf %7, %9 : vector<1x64xf32>
    %c0_9 = arith.constant 0 : index
    %c0_10 = arith.constant 0 : index
    %11 = vector.load %arg5[%c0_9, %c0_10] : memref<16x64xf32, #tpu.memory_space<vmem>>, vector<1x64xf32>
    tpu.vector_store %arg5[%c0_9, %c0_10], %10 {strides = array<i32>} : memref<16x64xf32, #tpu.memory_space<vmem>>, vector<1x64xf32>,
    %12 = vector.extract_strided_slice %6 {offsets = [0, 0], sizes = [4, 64], strides = [1, 1]} : vector<8x64xf32> to vector<4x64xf32>
    %13 = vector.extract_strided_slice %8 {offsets = [1, 0], sizes = [4, 64], strides = [1, 1]} : vector<8x64xf32> to vector<4x64xf32>
    %14 = arith.addf %12, %13 : vector<4x64xf32>
    %c1 = arith.constant 1 : index
    %c0_11 = arith.constant 0 : index
    %15 = vector.load %arg5[%c1, %c0_11] : memref<16x64xf32, #tpu.memory_space<vmem>>, vector<4x64xf32>
    tpu.vector_store %arg5[%c1, %c0_11], %14 {strides = array<i32>} : memref<16x64xf32, #tpu.memory_space<vmem>>, vector<4x64xf32>,
    %cst_12 = arith.constant 0.000000e+00 : f32
    %16 = vector.broadcast %cst_12 : f32 to vector<3x64xf32>
    %c5 = arith.constant 5 : index
    %c0_13 = arith.constant 0 : index
    %17 = vector.load %arg5[%c5, %c0_13] : memref<16x64xf32, #tpu.memory_space<vmem>>, vector<3x64xf32>
    tpu.vector_store %arg5[%c5, %c0_13], %16 {strides = array<i32>} : memref<16x64xf32, #tpu.memory_space<vmem>>, vector<3x64xf32>,
    %18 = vector.extract_strided_slice %8 {offsets = [0, 0], sizes = [1, 64], strides = [1, 1]} : vector<8x64xf32> to vector<1x64xf32>
    %19 = arith.addf %7, %18 : vector<1x64xf32>
    %c8 = arith.constant 8 : index
    %c0_14 = arith.constant 0 : index
    %20 = vector.load %arg5[%c8, %c0_14] : memref<16x64xf32, #tpu.memory_space<vmem>>, vector<1x64xf32>
    tpu.vector_store %arg5[%c8, %c0_14], %19 {strides = array<i32>} : memref<16x64xf32, #tpu.memory_space<vmem>>, vector<1x64xf32>,
    %21 = vector.extract_strided_slice %6 {offsets = [4, 0], sizes = [4, 64], strides = [1, 1]} : vector<8x64xf32> to vector<4x64xf32>
    %22 = vector.extract_strided_slice %8 {offsets = [1, 0], sizes = [4, 64], strides = [1, 1]} : vector<8x64xf32> to vector<4x64xf32>
    %23 = arith.addf %21, %22 : vector<4x64xf32>
    %c9 = arith.constant 9 : index
    %c0_15 = arith.constant 0 : index
    %24 = vector.load %arg5[%c9, %c0_15] : memref<16x64xf32, #tpu.memory_space<vmem>>, vector<4x64xf32>
    tpu.vector_store %arg5[%c9, %c0_15], %23 {strides = array<i32>} : memref<16x64xf32, #tpu.memory_space<vmem>>, vector<4x64xf32>,
    %cst_16 = arith.constant 0.000000e+00 : f32
    %25 = vector.broadcast %cst_16 : f32 to vector<3x64xf32>
    %c13 = arith.constant 13 : index
    %c0_17 = arith.constant 0 : index
    %26 = vector.load %arg5[%c13, %c0_17] : memref<16x64xf32, #tpu.memory_space<vmem>>, vector<3x64xf32>
    tpu.vector_store %arg5[%c13, %c0_17], %25 {strides = array<i32>} : memref<16x64xf32, #tpu.memory_space<vmem>>, vector<3x64xf32>,
    return
  }
}

module attributes {stable_mosaic.version = 11 : i64} {
  func.func @backbone_kernel(%arg0: i32, %arg1: memref<16x64xf32, #tpu.memory_space<vmem>>, %arg2: memref<1x1x64xf32, #tpu.memory_space<vmem>>, %arg3: memref<1x1x64xf32, #tpu.memory_space<vmem>>, %arg4: memref<1x64x192xbf16, #tpu.memory_space<vmem>>, %arg5: memref<1x1x192xf32, #tpu.memory_space<vmem>>, %arg6: memref<1x64x64xbf16, #tpu.memory_space<vmem>>, %arg7: memref<1x1x64xf32, #tpu.memory_space<vmem>>, %arg8: memref<1x1x64xf32, #tpu.memory_space<vmem>>, %arg9: memref<1x1x64xf32, #tpu.memory_space<vmem>>, %arg10: memref<1x64x256xbf16, #tpu.memory_space<vmem>>, %arg11: memref<1x1x256xf32, #tpu.memory_space<vmem>>, %arg12: memref<1x256x64xbf16, #tpu.memory_space<vmem>>, %arg13: memref<1x1x64xf32, #tpu.memory_space<vmem>>, %arg14: memref<1x64xf32, #tpu.memory_space<vmem>>, %arg15: memref<1x64xf32, #tpu.memory_space<vmem>>, %arg16: memref<16x64xf32, #tpu.memory_space<vmem>>, %arg17: memref<16x64xf32, #tpu.memory_space<vmem>>) attributes {dimension_semantics = [#tpu.dimension_semantics<arbitrary>], iteration_bounds = array<i64: 2>, scalar_prefetch = 0 : i64, scratch_operands = 1 : i64, tpu.core_type = #tpu.core_type<tc>, window_params = [{pipeline_mode = #tpu.pipeline_mode<synchronous>, transform_indices = @transform_0, window_bounds = array<i64: 16, 64>}, {transform_indices = @transform_1, window_bounds = array<i64: 1, 1, 64>}, {transform_indices = @transform_2, window_bounds = array<i64: 1, 1, 64>}, {transform_indices = @transform_3, window_bounds = array<i64: 1, 64, 192>}, {transform_indices = @transform_4, window_bounds = array<i64: 1, 1, 192>}, {transform_indices = @transform_5, window_bounds = array<i64: 1, 64, 64>}, {transform_indices = @transform_6, window_bounds = array<i64: 1, 1, 64>}, {transform_indices = @transform_7, window_bounds = array<i64: 1, 1, 64>}, {transform_indices = @transform_8, window_bounds = array<i64: 1, 1, 64>}, {transform_indices = @transform_9, window_bounds = array<i64: 1, 64, 256>}, {transform_indices = @transform_10, window_bounds = array<i64: 1, 1, 256>}, {transform_indices = @transform_11, window_bounds = array<i64: 1, 256, 64>}, {transform_indices = @transform_12, window_bounds = array<i64: 1, 1, 64>}, {pipeline_mode = #tpu.pipeline_mode<synchronous>, transform_indices = @transform_13, window_bounds = array<i64: 1, 64>}, {pipeline_mode = #tpu.pipeline_mode<synchronous>, transform_indices = @transform_14, window_bounds = array<i64: 1, 64>}, {pipeline_mode = #tpu.pipeline_mode<synchronous>, transform_indices = @transform_15, window_bounds = array<i64: 16, 64>}]} {
    %c0_i32 = arith.constant 0 : i32
    %0 = arith.cmpi eq, %arg0, %c0_i32 : i32
    %1 = arith.extui %0 : i1 to i32
    %c0_i32_0 = arith.constant 0 : i32
    %2 = arith.cmpi ne, %1, %c0_i32_0 : i32
    scf.if %2 {
      %c0_109 = arith.constant 0 : index
      %c0_110 = arith.constant 0 : index
      %307 = vector.load %arg1[%c0_109, %c0_110] : memref<16x64xf32, #tpu.memory_space<vmem>>, vector<16x64xf32>
      %c0_111 = arith.constant 0 : index
      %c0_112 = arith.constant 0 : index
      %308 = vector.load %arg17[%c0_111, %c0_112] : memref<16x64xf32, #tpu.memory_space<vmem>>, vector<16x64xf32>
      tpu.vector_store %arg17[%c0_111, %c0_112], %307 {strides = array<i32>} : memref<16x64xf32, #tpu.memory_space<vmem>>, vector<16x64xf32>,
    } else {
    }
    %c0 = arith.constant 0 : index
    %c0_1 = arith.constant 0 : index
    %c0_2 = arith.constant 0 : index
    %3 = vector.load %arg2[%c0, %c0_1, %c0_2] : memref<1x1x64xf32, #tpu.memory_space<vmem>>, vector<1x1x64xf32>
    %4 = vector.shape_cast %3 : vector<1x1x64xf32> to vector<1x64xf32>
    %c0_3 = arith.constant 0 : index
    %c0_4 = arith.constant 0 : index
    %c0_5 = arith.constant 0 : index
    %5 = vector.load %arg3[%c0_3, %c0_4, %c0_5] : memref<1x1x64xf32, #tpu.memory_space<vmem>>, vector<1x1x64xf32>
    %6 = vector.shape_cast %5 : vector<1x1x64xf32> to vector<1x64xf32>
    %c0_6 = arith.constant 0 : index
    %c0_7 = arith.constant 0 : index
    %c0_8 = arith.constant 0 : index
    %7 = vector.load %arg4[%c0_6, %c0_7, %c0_8] : memref<1x64x192xbf16, #tpu.memory_space<vmem>>, vector<1x64x192xbf16>
    %8 = vector.shape_cast %7 : vector<1x64x192xbf16> to vector<64x192xbf16>
    %c0_9 = arith.constant 0 : index
    %c0_10 = arith.constant 0 : index
    %c0_11 = arith.constant 0 : index
    %9 = vector.load %arg5[%c0_9, %c0_10, %c0_11] : memref<1x1x192xf32, #tpu.memory_space<vmem>>, vector<1x1x192xf32>
    %10 = vector.shape_cast %9 : vector<1x1x192xf32> to vector<1x192xf32>
    %c0_12 = arith.constant 0 : index
    %c0_13 = arith.constant 0 : index
    %c0_14 = arith.constant 0 : index
    %11 = vector.load %arg6[%c0_12, %c0_13, %c0_14] : memref<1x64x64xbf16, #tpu.memory_space<vmem>>, vector<1x64x64xbf16>
    %12 = vector.shape_cast %11 : vector<1x64x64xbf16> to vector<64x64xbf16>
    %c0_15 = arith.constant 0 : index
    %c0_16 = arith.constant 0 : index
    %c0_17 = arith.constant 0 : index
    %13 = vector.load %arg7[%c0_15, %c0_16, %c0_17] : memref<1x1x64xf32, #tpu.memory_space<vmem>>, vector<1x1x64xf32>
    %14 = vector.shape_cast %13 : vector<1x1x64xf32> to vector<1x64xf32>
    %c0_18 = arith.constant 0 : index
    %c0_19 = arith.constant 0 : index
    %c0_20 = arith.constant 0 : index
    %15 = vector.load %arg8[%c0_18, %c0_19, %c0_20] : memref<1x1x64xf32, #tpu.memory_space<vmem>>, vector<1x1x64xf32>
    %16 = vector.shape_cast %15 : vector<1x1x64xf32> to vector<1x64xf32>
    %c0_21 = arith.constant 0 : index
    %c0_22 = arith.constant 0 : index
    %c0_23 = arith.constant 0 : index
    %17 = vector.load %arg9[%c0_21, %c0_22, %c0_23] : memref<1x1x64xf32, #tpu.memory_space<vmem>>, vector<1x1x64xf32>
    %18 = vector.shape_cast %17 : vector<1x1x64xf32> to vector<1x64xf32>
    %c0_24 = arith.constant 0 : index
    %c0_25 = arith.constant 0 : index
    %c0_26 = arith.constant 0 : index
    %19 = vector.load %arg10[%c0_24, %c0_25, %c0_26] : memref<1x64x256xbf16, #tpu.memory_space<vmem>>, vector<1x64x256xbf16>
    %20 = vector.shape_cast %19 : vector<1x64x256xbf16> to vector<64x256xbf16>
    %c0_27 = arith.constant 0 : index
    %c0_28 = arith.constant 0 : index
    %c0_29 = arith.constant 0 : index
    %21 = vector.load %arg11[%c0_27, %c0_28, %c0_29] : memref<1x1x256xf32, #tpu.memory_space<vmem>>, vector<1x1x256xf32>
    %22 = vector.shape_cast %21 : vector<1x1x256xf32> to vector<1x256xf32>
    %c0_30 = arith.constant 0 : index
    %c0_31 = arith.constant 0 : index
    %c0_32 = arith.constant 0 : index
    %23 = vector.load %arg12[%c0_30, %c0_31, %c0_32] : memref<1x256x64xbf16, #tpu.memory_space<vmem>>, vector<1x256x64xbf16>
    %24 = vector.shape_cast %23 : vector<1x256x64xbf16> to vector<256x64xbf16>
    %c0_33 = arith.constant 0 : index
    %c0_34 = arith.constant 0 : index
    %c0_35 = arith.constant 0 : index
    %25 = vector.load %arg13[%c0_33, %c0_34, %c0_35] : memref<1x1x64xf32, #tpu.memory_space<vmem>>, vector<1x1x64xf32>
    %26 = vector.shape_cast %25 : vector<1x1x64xf32> to vector<1x64xf32>
    %c0_36 = arith.constant 0 : index
    %c0_37 = arith.constant 0 : index
    %27 = vector.load %arg17[%c0_36, %c0_37] : memref<16x64xf32, #tpu.memory_space<vmem>>, vector<16x64xf32>
    %28 = tpu.iota {dimensions = array<i32: 1>} : vector<1x8xi32>
    %c5_i32 = arith.constant 5 : i32
    %29 = vector.broadcast %c5_i32 : i32 to vector<1x8xi32>
    %30 = arith.cmpi slt, %28, %29 : vector<1x8xi32>
    %cst = arith.constant 0.000000e+00 : f32
    %cst_38 = arith.constant -1.000000e+30 : f32
    %31 = vector.broadcast %cst : f32 to vector<1x8xf32>
    %32 = vector.broadcast %cst_38 : f32 to vector<1x8xf32>
    %33 = arith.select %30, %31, %32 : vector<1x8xi1>, vector<1x8xf32>
    %cst_39 = arith.constant dense<0.000000e+00> : vector<16xf32>
    %34 = vector.multi_reduction <add>, %27, %cst_39 [1] : vector<16x64xf32> to vector<16xf32>
    %35 = vector.shape_cast %34 : vector<16xf32> to vector<16x1xf32>
    %cst_40 = arith.constant 6.400000e+01 : f32
    %36 = vector.broadcast %cst_40 : f32 to vector<16x1xf32>
    %37 = arith.divf %35, %36 : vector<16x1xf32>
    %38 = vector.broadcast %37 : vector<16x1xf32> to vector<16x64xf32>
    %39 = arith.subf %27, %38 : vector<16x64xf32>
    %40 = arith.mulf %39, %39 : vector<16x64xf32>
    %cst_41 = arith.constant dense<0.000000e+00> : vector<16xf32>
    %41 = vector.multi_reduction <add>, %40, %cst_41 [1] : vector<16x64xf32> to vector<16xf32>
    %42 = vector.shape_cast %41 : vector<16xf32> to vector<16x1xf32>
    %cst_42 = arith.constant 6.400000e+01 : f32
    %43 = vector.broadcast %cst_42 : f32 to vector<16x1xf32>
    %44 = arith.divf %42, %43 : vector<16x1xf32>
    %45 = vector.broadcast %37 : vector<16x1xf32> to vector<16x64xf32>
    %46 = arith.subf %27, %45 : vector<16x64xf32>
    %cst_43 = arith.constant 9.99999997E-7 : f32
    %47 = vector.broadcast %cst_43 : f32 to vector<16x1xf32>
    %48 = arith.addf %44, %47 : vector<16x1xf32>
    %49 = math.rsqrt %48 : vector<16x1xf32>
    %50 = vector.broadcast %49 : vector<16x1xf32> to vector<16x64xf32>
    %51 = arith.mulf %46, %50 : vector<16x64xf32>
    %52 = vector.broadcast %4 : vector<1x64xf32> to vector<16x64xf32>
    %53 = arith.mulf %51, %52 : vector<16x64xf32>
    %54 = vector.broadcast %6 : vector<1x64xf32> to vector<16x64xf32>
    %55 = arith.addf %53, %54 : vector<16x64xf32>
    %56 = arith.truncf %55 : vector<16x64xf32> to vector<16x64xbf16>
    %cst_44 = arith.constant dense<0.000000e+00> : vector<16x192xf32>
    %57 = tpu.matmul %56, %8, %cst_44 {dimension_numbers = #tpu.dot_dimension_numbers<[1], [0], [0], [1], [0, 0, 1, 1], [], []>} : vector<16x64xbf16>, vector<64x192xbf16>, vector<16x192xf32> -> vector<16x192xf32>
    %58 = vector.broadcast %10 : vector<1x192xf32> to vector<16x192xf32>
    %59 = arith.addf %57, %58 : vector<16x192xf32>
    %60 = arith.truncf %59 : vector<16x192xf32> to vector<16x192xbf16>
    %cst_45 = arith.constant 0.000000e+00 : f32
    %61 = vector.broadcast %cst_45 : f32 to vector<8x64xf32>
    %62 = vector.extract_strided_slice %60 {offsets = [0, 0], sizes = [8, 16], strides = [1, 1]} : vector<16x192xbf16> to vector<8x16xbf16>
    %63 = vector.extract_strided_slice %60 {offsets = [0, 64], sizes = [8, 16], strides = [1, 1]} : vector<16x192xbf16> to vector<8x16xbf16>
    %64 = vector.extract_strided_slice %60 {offsets = [0, 128], sizes = [8, 16], strides = [1, 1]} : vector<16x192xbf16> to vector<8x16xbf16>
    %cst_46 = arith.constant dense<0.000000e+00> : vector<8x8xf32>
    %65 = tpu.matmul %62, %63, %cst_46 {dimension_numbers = #tpu.dot_dimension_numbers<[1], [1], [0], [0], [0, 0, 1, 0], [], []>} : vector<8x16xbf16>, vector<8x16xbf16>, vector<8x8xf32> -> vector<8x8xf32>
    %cst_47 = arith.constant 2.500000e-01 : f32
    %66 = vector.broadcast %cst_47 : f32 to vector<8x8xf32>
    %67 = arith.mulf %65, %66 : vector<8x8xf32>
    %68 = vector.broadcast %33 : vector<1x8xf32> to vector<8x8xf32>
    %69 = arith.addf %67, %68 : vector<8x8xf32>
    %cst_48 = arith.constant dense<0xFF800000> : vector<8xf32>
    %70 = vector.multi_reduction <maximumf>, %69, %cst_48 [1] : vector<8x8xf32> to vector<8xf32>
    %71 = vector.shape_cast %70 : vector<8xf32> to vector<8x1xf32>
    %72 = vector.broadcast %71 : vector<8x1xf32> to vector<8x8xf32>
    %73 = arith.subf %69, %72 : vector<8x8xf32>
    %74 = math.exp %73 : vector<8x8xf32>
    %cst_49 = arith.constant dense<0.000000e+00> : vector<8xf32>
    %75 = vector.multi_reduction <add>, %74, %cst_49 [1] : vector<8x8xf32> to vector<8xf32>
    %76 = vector.shape_cast %75 : vector<8xf32> to vector<8x1xf32>
    %77 = tpu.reciprocal %76 {approx = true} : vector<8x1xf32> -> vector<8x1xf32>
    %78 = vector.broadcast %77 : vector<8x1xf32> to vector<8x8xf32>
    %79 = arith.mulf %74, %78 : vector<8x8xf32>
    %80 = arith.truncf %79 : vector<8x8xf32> to vector<8x8xbf16>
    %cst_50 = arith.constant dense<0.000000e+00> : vector<8x16xf32>
    %81 = tpu.matmul %80, %64, %cst_50 {dimension_numbers = #tpu.dot_dimension_numbers<[1], [0], [0], [1], [0, 0, 1, 1], [], []>} : vector<8x8xbf16>, vector<8x16xbf16>, vector<8x16xf32> -> vector<8x16xf32>
    %82 = arith.truncf %81 : vector<8x16xf32> to vector<8x16xbf16>
    %83 = vector.extract_strided_slice %12 {offsets = [0, 0], sizes = [16, 64], strides = [1, 1]} : vector<64x64xbf16> to vector<16x64xbf16>
    %cst_51 = arith.constant dense<0.000000e+00> : vector<8x64xf32>
    %84 = tpu.matmul %82, %83, %cst_51 {dimension_numbers = #tpu.dot_dimension_numbers<[1], [0], [0], [1], [0, 0, 1, 1], [], []>} : vector<8x16xbf16>, vector<16x64xbf16>, vector<8x64xf32> -> vector<8x64xf32>
    %85 = arith.addf %61, %84 : vector<8x64xf32>
    %86 = vector.extract_strided_slice %60 {offsets = [0, 16], sizes = [8, 16], strides = [1, 1]} : vector<16x192xbf16> to vector<8x16xbf16>
    %87 = vector.extract_strided_slice %60 {offsets = [0, 80], sizes = [8, 16], strides = [1, 1]} : vector<16x192xbf16> to vector<8x16xbf16>
    %88 = vector.extract_strided_slice %60 {offsets = [0, 144], sizes = [8, 16], strides = [1, 1]} : vector<16x192xbf16> to vector<8x16xbf16>
    %cst_52 = arith.constant dense<0.000000e+00> : vector<8x8xf32>
    %89 = tpu.matmul %86, %87, %cst_52 {dimension_numbers = #tpu.dot_dimension_numbers<[1], [1], [0], [0], [0, 0, 1, 0], [], []>} : vector<8x16xbf16>, vector<8x16xbf16>, vector<8x8xf32> -> vector<8x8xf32>
    %cst_53 = arith.constant 2.500000e-01 : f32
    %90 = vector.broadcast %cst_53 : f32 to vector<8x8xf32>
    %91 = arith.mulf %89, %90 : vector<8x8xf32>
    %92 = vector.broadcast %33 : vector<1x8xf32> to vector<8x8xf32>
    %93 = arith.addf %91, %92 : vector<8x8xf32>
    %cst_54 = arith.constant dense<0xFF800000> : vector<8xf32>
    %94 = vector.multi_reduction <maximumf>, %93, %cst_54 [1] : vector<8x8xf32> to vector<8xf32>
    %95 = vector.shape_cast %94 : vector<8xf32> to vector<8x1xf32>
    %96 = vector.broadcast %95 : vector<8x1xf32> to vector<8x8xf32>
    %97 = arith.subf %93, %96 : vector<8x8xf32>
    %98 = math.exp %97 : vector<8x8xf32>
    %cst_55 = arith.constant dense<0.000000e+00> : vector<8xf32>
    %99 = vector.multi_reduction <add>, %98, %cst_55 [1] : vector<8x8xf32> to vector<8xf32>
    %100 = vector.shape_cast %99 : vector<8xf32> to vector<8x1xf32>
    %101 = tpu.reciprocal %100 {approx = true} : vector<8x1xf32> -> vector<8x1xf32>
    %102 = vector.broadcast %101 : vector<8x1xf32> to vector<8x8xf32>
    %103 = arith.mulf %98, %102 : vector<8x8xf32>
    %104 = arith.truncf %103 : vector<8x8xf32> to vector<8x8xbf16>
    %cst_56 = arith.constant dense<0.000000e+00> : vector<8x16xf32>
    %105 = tpu.matmul %104, %88, %cst_56 {dimension_numbers = #tpu.dot_dimension_numbers<[1], [0], [0], [1], [0, 0, 1, 1], [], []>} : vector<8x8xbf16>, vector<8x16xbf16>, vector<8x16xf32> -> vector<8x16xf32>
    %106 = arith.truncf %105 : vector<8x16xf32> to vector<8x16xbf16>
    %107 = vector.extract_strided_slice %12 {offsets = [16, 0], sizes = [16, 64], strides = [1, 1]} : vector<64x64xbf16> to vector<16x64xbf16>
    %cst_57 = arith.constant dense<0.000000e+00> : vector<8x64xf32>
    %108 = tpu.matmul %106, %107, %cst_57 {dimension_numbers = #tpu.dot_dimension_numbers<[1], [0], [0], [1], [0, 0, 1, 1], [], []>} : vector<8x16xbf16>, vector<16x64xbf16>, vector<8x64xf32> -> vector<8x64xf32>
    %109 = arith.addf %85, %108 : vector<8x64xf32>
    %110 = vector.extract_strided_slice %60 {offsets = [0, 32], sizes = [8, 16], strides = [1, 1]} : vector<16x192xbf16> to vector<8x16xbf16>
    %111 = vector.extract_strided_slice %60 {offsets = [0, 96], sizes = [8, 16], strides = [1, 1]} : vector<16x192xbf16> to vector<8x16xbf16>
    %112 = vector.extract_strided_slice %60 {offsets = [0, 160], sizes = [8, 16], strides = [1, 1]} : vector<16x192xbf16> to vector<8x16xbf16>
    %cst_58 = arith.constant dense<0.000000e+00> : vector<8x8xf32>
    %113 = tpu.matmul %110, %111, %cst_58 {dimension_numbers = #tpu.dot_dimension_numbers<[1], [1], [0], [0], [0, 0, 1, 0], [], []>} : vector<8x16xbf16>, vector<8x16xbf16>, vector<8x8xf32> -> vector<8x8xf32>
    %cst_59 = arith.constant 2.500000e-01 : f32
    %114 = vector.broadcast %cst_59 : f32 to vector<8x8xf32>
    %115 = arith.mulf %113, %114 : vector<8x8xf32>
    %116 = vector.broadcast %33 : vector<1x8xf32> to vector<8x8xf32>
    %117 = arith.addf %115, %116 : vector<8x8xf32>
    %cst_60 = arith.constant dense<0xFF800000> : vector<8xf32>
    %118 = vector.multi_reduction <maximumf>, %117, %cst_60 [1] : vector<8x8xf32> to vector<8xf32>
    %119 = vector.shape_cast %118 : vector<8xf32> to vector<8x1xf32>
    %120 = vector.broadcast %119 : vector<8x1xf32> to vector<8x8xf32>
    %121 = arith.subf %117, %120 : vector<8x8xf32>
    %122 = math.exp %121 : vector<8x8xf32>
    %cst_61 = arith.constant dense<0.000000e+00> : vector<8xf32>
    %123 = vector.multi_reduction <add>, %122, %cst_61 [1] : vector<8x8xf32> to vector<8xf32>
    %124 = vector.shape_cast %123 : vector<8xf32> to vector<8x1xf32>
    %125 = tpu.reciprocal %124 {approx = true} : vector<8x1xf32> -> vector<8x1xf32>
    %126 = vector.broadcast %125 : vector<8x1xf32> to vector<8x8xf32>
    %127 = arith.mulf %122, %126 : vector<8x8xf32>
    %128 = arith.truncf %127 : vector<8x8xf32> to vector<8x8xbf16>
    %cst_62 = arith.constant dense<0.000000e+00> : vector<8x16xf32>
    %129 = tpu.matmul %128, %112, %cst_62 {dimension_numbers = #tpu.dot_dimension_numbers<[1], [0], [0], [1], [0, 0, 1, 1], [], []>} : vector<8x8xbf16>, vector<8x16xbf16>, vector<8x16xf32> -> vector<8x16xf32>
    %130 = arith.truncf %129 : vector<8x16xf32> to vector<8x16xbf16>
    %131 = vector.extract_strided_slice %12 {offsets = [32, 0], sizes = [16, 64], strides = [1, 1]} : vector<64x64xbf16> to vector<16x64xbf16>
    %cst_63 = arith.constant dense<0.000000e+00> : vector<8x64xf32>
    %132 = tpu.matmul %130, %131, %cst_63 {dimension_numbers = #tpu.dot_dimension_numbers<[1], [0], [0], [1], [0, 0, 1, 1], [], []>} : vector<8x16xbf16>, vector<16x64xbf16>, vector<8x64xf32> -> vector<8x64xf32>
    %133 = arith.addf %109, %132 : vector<8x64xf32>
    %134 = vector.extract_strided_slice %60 {offsets = [0, 48], sizes = [8, 16], strides = [1, 1]} : vector<16x192xbf16> to vector<8x16xbf16>
    %135 = vector.extract_strided_slice %60 {offsets = [0, 112], sizes = [8, 16], strides = [1, 1]} : vector<16x192xbf16> to vector<8x16xbf16>
    %136 = vector.extract_strided_slice %60 {offsets = [0, 176], sizes = [8, 16], strides = [1, 1]} : vector<16x192xbf16> to vector<8x16xbf16>
    %cst_64 = arith.constant dense<0.000000e+00> : vector<8x8xf32>
    %137 = tpu.matmul %134, %135, %cst_64 {dimension_numbers = #tpu.dot_dimension_numbers<[1], [1], [0], [0], [0, 0, 1, 0], [], []>} : vector<8x16xbf16>, vector<8x16xbf16>, vector<8x8xf32> -> vector<8x8xf32>
    %cst_65 = arith.constant 2.500000e-01 : f32
    %138 = vector.broadcast %cst_65 : f32 to vector<8x8xf32>
    %139 = arith.mulf %137, %138 : vector<8x8xf32>
    %140 = vector.broadcast %33 : vector<1x8xf32> to vector<8x8xf32>
    %141 = arith.addf %139, %140 : vector<8x8xf32>
    %cst_66 = arith.constant dense<0xFF800000> : vector<8xf32>
    %142 = vector.multi_reduction <maximumf>, %141, %cst_66 [1] : vector<8x8xf32> to vector<8xf32>
    %143 = vector.shape_cast %142 : vector<8xf32> to vector<8x1xf32>
    %144 = vector.broadcast %143 : vector<8x1xf32> to vector<8x8xf32>
    %145 = arith.subf %141, %144 : vector<8x8xf32>
    %146 = math.exp %145 : vector<8x8xf32>
    %cst_67 = arith.constant dense<0.000000e+00> : vector<8xf32>
    %147 = vector.multi_reduction <add>, %146, %cst_67 [1] : vector<8x8xf32> to vector<8xf32>
    %148 = vector.shape_cast %147 : vector<8xf32> to vector<8x1xf32>
    %149 = tpu.reciprocal %148 {approx = true} : vector<8x1xf32> -> vector<8x1xf32>
    %150 = vector.broadcast %149 : vector<8x1xf32> to vector<8x8xf32>
    %151 = arith.mulf %146, %150 : vector<8x8xf32>
    %152 = arith.truncf %151 : vector<8x8xf32> to vector<8x8xbf16>
    %cst_68 = arith.constant dense<0.000000e+00> : vector<8x16xf32>
    %153 = tpu.matmul %152, %136, %cst_68 {dimension_numbers = #tpu.dot_dimension_numbers<[1], [0], [0], [1], [0, 0, 1, 1], [], []>} : vector<8x8xbf16>, vector<8x16xbf16>, vector<8x16xf32> -> vector<8x16xf32>
    %154 = arith.truncf %153 : vector<8x16xf32> to vector<8x16xbf16>
    %155 = vector.extract_strided_slice %12 {offsets = [48, 0], sizes = [16, 64], strides = [1, 1]} : vector<64x64xbf16> to vector<16x64xbf16>
    %cst_69 = arith.constant dense<0.000000e+00> : vector<8x64xf32>
    %156 = tpu.matmul %154, %155, %cst_69 {dimension_numbers = #tpu.dot_dimension_numbers<[1], [0], [0], [1], [0, 0, 1, 1], [], []>} : vector<8x16xbf16>, vector<16x64xbf16>, vector<8x64xf32> -> vector<8x64xf32>
    %157 = arith.addf %133, %156 : vector<8x64xf32>
    %cst_70 = arith.constant 0.000000e+00 : f32
    %158 = vector.broadcast %cst_70 : f32 to vector<8x64xf32>
    %159 = vector.extract_strided_slice %60 {offsets = [8, 0], sizes = [8, 16], strides = [1, 1]} : vector<16x192xbf16> to vector<8x16xbf16>
    %160 = vector.extract_strided_slice %60 {offsets = [8, 64], sizes = [8, 16], strides = [1, 1]} : vector<16x192xbf16> to vector<8x16xbf16>
    %161 = vector.extract_strided_slice %60 {offsets = [8, 128], sizes = [8, 16], strides = [1, 1]} : vector<16x192xbf16> to vector<8x16xbf16>
    %cst_71 = arith.constant dense<0.000000e+00> : vector<8x8xf32>
    %162 = tpu.matmul %159, %160, %cst_71 {dimension_numbers = #tpu.dot_dimension_numbers<[1], [1], [0], [0], [0, 0, 1, 0], [], []>} : vector<8x16xbf16>, vector<8x16xbf16>, vector<8x8xf32> -> vector<8x8xf32>
    %cst_72 = arith.constant 2.500000e-01 : f32
    %163 = vector.broadcast %cst_72 : f32 to vector<8x8xf32>
    %164 = arith.mulf %162, %163 : vector<8x8xf32>
    %165 = vector.broadcast %33 : vector<1x8xf32> to vector<8x8xf32>
    %166 = arith.addf %164, %165 : vector<8x8xf32>
    %cst_73 = arith.constant dense<0xFF800000> : vector<8xf32>
    %167 = vector.multi_reduction <maximumf>, %166, %cst_73 [1] : vector<8x8xf32> to vector<8xf32>
    %168 = vector.shape_cast %167 : vector<8xf32> to vector<8x1xf32>
    %169 = vector.broadcast %168 : vector<8x1xf32> to vector<8x8xf32>
    %170 = arith.subf %166, %169 : vector<8x8xf32>
    %171 = math.exp %170 : vector<8x8xf32>
    %cst_74 = arith.constant dense<0.000000e+00> : vector<8xf32>
    %172 = vector.multi_reduction <add>, %171, %cst_74 [1] : vector<8x8xf32> to vector<8xf32>
    %173 = vector.shape_cast %172 : vector<8xf32> to vector<8x1xf32>
    %174 = tpu.reciprocal %173 {approx = true} : vector<8x1xf32> -> vector<8x1xf32>
    %175 = vector.broadcast %174 : vector<8x1xf32> to vector<8x8xf32>
    %176 = arith.mulf %171, %175 : vector<8x8xf32>
    %177 = arith.truncf %176 : vector<8x8xf32> to vector<8x8xbf16>
    %cst_75 = arith.constant dense<0.000000e+00> : vector<8x16xf32>
    %178 = tpu.matmul %177, %161, %cst_75 {dimension_numbers = #tpu.dot_dimension_numbers<[1], [0], [0], [1], [0, 0, 1, 1], [], []>} : vector<8x8xbf16>, vector<8x16xbf16>, vector<8x16xf32> -> vector<8x16xf32>
    %179 = arith.truncf %178 : vector<8x16xf32> to vector<8x16xbf16>
    %180 = vector.extract_strided_slice %12 {offsets = [0, 0], sizes = [16, 64], strides = [1, 1]} : vector<64x64xbf16> to vector<16x64xbf16>
    %cst_76 = arith.constant dense<0.000000e+00> : vector<8x64xf32>
    %181 = tpu.matmul %179, %180, %cst_76 {dimension_numbers = #tpu.dot_dimension_numbers<[1], [0], [0], [1], [0, 0, 1, 1], [], []>} : vector<8x16xbf16>, vector<16x64xbf16>, vector<8x64xf32> -> vector<8x64xf32>
    %182 = arith.addf %158, %181 : vector<8x64xf32>
    %183 = vector.extract_strided_slice %60 {offsets = [8, 16], sizes = [8, 16], strides = [1, 1]} : vector<16x192xbf16> to vector<8x16xbf16>
    %184 = vector.extract_strided_slice %60 {offsets = [8, 80], sizes = [8, 16], strides = [1, 1]} : vector<16x192xbf16> to vector<8x16xbf16>
    %185 = vector.extract_strided_slice %60 {offsets = [8, 144], sizes = [8, 16], strides = [1, 1]} : vector<16x192xbf16> to vector<8x16xbf16>
    %cst_77 = arith.constant dense<0.000000e+00> : vector<8x8xf32>
    %186 = tpu.matmul %183, %184, %cst_77 {dimension_numbers = #tpu.dot_dimension_numbers<[1], [1], [0], [0], [0, 0, 1, 0], [], []>} : vector<8x16xbf16>, vector<8x16xbf16>, vector<8x8xf32> -> vector<8x8xf32>
    %cst_78 = arith.constant 2.500000e-01 : f32
    %187 = vector.broadcast %cst_78 : f32 to vector<8x8xf32>
    %188 = arith.mulf %186, %187 : vector<8x8xf32>
    %189 = vector.broadcast %33 : vector<1x8xf32> to vector<8x8xf32>
    %190 = arith.addf %188, %189 : vector<8x8xf32>
    %cst_79 = arith.constant dense<0xFF800000> : vector<8xf32>
    %191 = vector.multi_reduction <maximumf>, %190, %cst_79 [1] : vector<8x8xf32> to vector<8xf32>
    %192 = vector.shape_cast %191 : vector<8xf32> to vector<8x1xf32>
    %193 = vector.broadcast %192 : vector<8x1xf32> to vector<8x8xf32>
    %194 = arith.subf %190, %193 : vector<8x8xf32>
    %195 = math.exp %194 : vector<8x8xf32>
    %cst_80 = arith.constant dense<0.000000e+00> : vector<8xf32>
    %196 = vector.multi_reduction <add>, %195, %cst_80 [1] : vector<8x8xf32> to vector<8xf32>
    %197 = vector.shape_cast %196 : vector<8xf32> to vector<8x1xf32>
    %198 = tpu.reciprocal %197 {approx = true} : vector<8x1xf32> -> vector<8x1xf32>
    %199 = vector.broadcast %198 : vector<8x1xf32> to vector<8x8xf32>
    %200 = arith.mulf %195, %199 : vector<8x8xf32>
    %201 = arith.truncf %200 : vector<8x8xf32> to vector<8x8xbf16>
    %cst_81 = arith.constant dense<0.000000e+00> : vector<8x16xf32>
    %202 = tpu.matmul %201, %185, %cst_81 {dimension_numbers = #tpu.dot_dimension_numbers<[1], [0], [0], [1], [0, 0, 1, 1], [], []>} : vector<8x8xbf16>, vector<8x16xbf16>, vector<8x16xf32> -> vector<8x16xf32>
    %203 = arith.truncf %202 : vector<8x16xf32> to vector<8x16xbf16>
    %204 = vector.extract_strided_slice %12 {offsets = [16, 0], sizes = [16, 64], strides = [1, 1]} : vector<64x64xbf16> to vector<16x64xbf16>
    %cst_82 = arith.constant dense<0.000000e+00> : vector<8x64xf32>
    %205 = tpu.matmul %203, %204, %cst_82 {dimension_numbers = #tpu.dot_dimension_numbers<[1], [0], [0], [1], [0, 0, 1, 1], [], []>} : vector<8x16xbf16>, vector<16x64xbf16>, vector<8x64xf32> -> vector<8x64xf32>
    %206 = arith.addf %182, %205 : vector<8x64xf32>
    %207 = vector.extract_strided_slice %60 {offsets = [8, 32], sizes = [8, 16], strides = [1, 1]} : vector<16x192xbf16> to vector<8x16xbf16>
    %208 = vector.extract_strided_slice %60 {offsets = [8, 96], sizes = [8, 16], strides = [1, 1]} : vector<16x192xbf16> to vector<8x16xbf16>
    %209 = vector.extract_strided_slice %60 {offsets = [8, 160], sizes = [8, 16], strides = [1, 1]} : vector<16x192xbf16> to vector<8x16xbf16>
    %cst_83 = arith.constant dense<0.000000e+00> : vector<8x8xf32>
    %210 = tpu.matmul %207, %208, %cst_83 {dimension_numbers = #tpu.dot_dimension_numbers<[1], [1], [0], [0], [0, 0, 1, 0], [], []>} : vector<8x16xbf16>, vector<8x16xbf16>, vector<8x8xf32> -> vector<8x8xf32>
    %cst_84 = arith.constant 2.500000e-01 : f32
    %211 = vector.broadcast %cst_84 : f32 to vector<8x8xf32>
    %212 = arith.mulf %210, %211 : vector<8x8xf32>
    %213 = vector.broadcast %33 : vector<1x8xf32> to vector<8x8xf32>
    %214 = arith.addf %212, %213 : vector<8x8xf32>
    %cst_85 = arith.constant dense<0xFF800000> : vector<8xf32>
    %215 = vector.multi_reduction <maximumf>, %214, %cst_85 [1] : vector<8x8xf32> to vector<8xf32>
    %216 = vector.shape_cast %215 : vector<8xf32> to vector<8x1xf32>
    %217 = vector.broadcast %216 : vector<8x1xf32> to vector<8x8xf32>
    %218 = arith.subf %214, %217 : vector<8x8xf32>
    %219 = math.exp %218 : vector<8x8xf32>
    %cst_86 = arith.constant dense<0.000000e+00> : vector<8xf32>
    %220 = vector.multi_reduction <add>, %219, %cst_86 [1] : vector<8x8xf32> to vector<8xf32>
    %221 = vector.shape_cast %220 : vector<8xf32> to vector<8x1xf32>
    %222 = tpu.reciprocal %221 {approx = true} : vector<8x1xf32> -> vector<8x1xf32>
    %223 = vector.broadcast %222 : vector<8x1xf32> to vector<8x8xf32>
    %224 = arith.mulf %219, %223 : vector<8x8xf32>
    %225 = arith.truncf %224 : vector<8x8xf32> to vector<8x8xbf16>
    %cst_87 = arith.constant dense<0.000000e+00> : vector<8x16xf32>
    %226 = tpu.matmul %225, %209, %cst_87 {dimension_numbers = #tpu.dot_dimension_numbers<[1], [0], [0], [1], [0, 0, 1, 1], [], []>} : vector<8x8xbf16>, vector<8x16xbf16>, vector<8x16xf32> -> vector<8x16xf32>
    %227 = arith.truncf %226 : vector<8x16xf32> to vector<8x16xbf16>
    %228 = vector.extract_strided_slice %12 {offsets = [32, 0], sizes = [16, 64], strides = [1, 1]} : vector<64x64xbf16> to vector<16x64xbf16>
    %cst_88 = arith.constant dense<0.000000e+00> : vector<8x64xf32>
    %229 = tpu.matmul %227, %228, %cst_88 {dimension_numbers = #tpu.dot_dimension_numbers<[1], [0], [0], [1], [0, 0, 1, 1], [], []>} : vector<8x16xbf16>, vector<16x64xbf16>, vector<8x64xf32> -> vector<8x64xf32>
    %230 = arith.addf %206, %229 : vector<8x64xf32>
    %231 = vector.extract_strided_slice %60 {offsets = [8, 48], sizes = [8, 16], strides = [1, 1]} : vector<16x192xbf16> to vector<8x16xbf16>
    %232 = vector.extract_strided_slice %60 {offsets = [8, 112], sizes = [8, 16], strides = [1, 1]} : vector<16x192xbf16> to vector<8x16xbf16>
    %233 = vector.extract_strided_slice %60 {offsets = [8, 176], sizes = [8, 16], strides = [1, 1]} : vector<16x192xbf16> to vector<8x16xbf16>
    %cst_89 = arith.constant dense<0.000000e+00> : vector<8x8xf32>
    %234 = tpu.matmul %231, %232, %cst_89 {dimension_numbers = #tpu.dot_dimension_numbers<[1], [1], [0], [0], [0, 0, 1, 0], [], []>} : vector<8x16xbf16>, vector<8x16xbf16>, vector<8x8xf32> -> vector<8x8xf32>
    %cst_90 = arith.constant 2.500000e-01 : f32
    %235 = vector.broadcast %cst_90 : f32 to vector<8x8xf32>
    %236 = arith.mulf %234, %235 : vector<8x8xf32>
    %237 = vector.broadcast %33 : vector<1x8xf32> to vector<8x8xf32>
    %238 = arith.addf %236, %237 : vector<8x8xf32>
    %cst_91 = arith.constant dense<0xFF800000> : vector<8xf32>
    %239 = vector.multi_reduction <maximumf>, %238, %cst_91 [1] : vector<8x8xf32> to vector<8xf32>
    %240 = vector.shape_cast %239 : vector<8xf32> to vector<8x1xf32>
    %241 = vector.broadcast %240 : vector<8x1xf32> to vector<8x8xf32>
    %242 = arith.subf %238, %241 : vector<8x8xf32>
    %243 = math.exp %242 : vector<8x8xf32>
    %cst_92 = arith.constant dense<0.000000e+00> : vector<8xf32>
    %244 = vector.multi_reduction <add>, %243, %cst_92 [1] : vector<8x8xf32> to vector<8xf32>
    %245 = vector.shape_cast %244 : vector<8xf32> to vector<8x1xf32>
    %246 = tpu.reciprocal %245 {approx = true} : vector<8x1xf32> -> vector<8x1xf32>
    %247 = vector.broadcast %246 : vector<8x1xf32> to vector<8x8xf32>
    %248 = arith.mulf %243, %247 : vector<8x8xf32>
    %249 = arith.truncf %248 : vector<8x8xf32> to vector<8x8xbf16>
    %cst_93 = arith.constant dense<0.000000e+00> : vector<8x16xf32>
    %250 = tpu.matmul %249, %233, %cst_93 {dimension_numbers = #tpu.dot_dimension_numbers<[1], [0], [0], [1], [0, 0, 1, 1], [], []>} : vector<8x8xbf16>, vector<8x16xbf16>, vector<8x16xf32> -> vector<8x16xf32>
    %251 = arith.truncf %250 : vector<8x16xf32> to vector<8x16xbf16>
    %252 = vector.extract_strided_slice %12 {offsets = [48, 0], sizes = [16, 64], strides = [1, 1]} : vector<64x64xbf16> to vector<16x64xbf16>
    %cst_94 = arith.constant dense<0.000000e+00> : vector<8x64xf32>
    %253 = tpu.matmul %251, %252, %cst_94 {dimension_numbers = #tpu.dot_dimension_numbers<[1], [0], [0], [1], [0, 0, 1, 1], [], []>} : vector<8x16xbf16>, vector<16x64xbf16>, vector<8x64xf32> -> vector<8x64xf32>
    %254 = arith.addf %230, %253 : vector<8x64xf32>
    %255 = tpu.concatenate %157, %254 in 0 : vector<8x64xf32>, vector<8x64xf32> -> vector<16x64xf32>
    %256 = arith.addf %27, %255 : vector<16x64xf32>
    %257 = vector.broadcast %14 : vector<1x64xf32> to vector<16x64xf32>
    %258 = arith.addf %256, %257 : vector<16x64xf32>
    %cst_95 = arith.constant dense<0.000000e+00> : vector<16xf32>
    %259 = vector.multi_reduction <add>, %258, %cst_95 [1] : vector<16x64xf32> to vector<16xf32>
    %260 = vector.shape_cast %259 : vector<16xf32> to vector<16x1xf32>
    %cst_96 = arith.constant 6.400000e+01 : f32
    %261 = vector.broadcast %cst_96 : f32 to vector<16x1xf32>
    %262 = arith.divf %260, %261 : vector<16x1xf32>
    %263 = vector.broadcast %262 : vector<16x1xf32> to vector<16x64xf32>
    %264 = arith.subf %258, %263 : vector<16x64xf32>
    %265 = arith.mulf %264, %264 : vector<16x64xf32>
    %cst_97 = arith.constant dense<0.000000e+00> : vector<16xf32>
    %266 = vector.multi_reduction <add>, %265, %cst_97 [1] : vector<16x64xf32> to vector<16xf32>
    %267 = vector.shape_cast %266 : vector<16xf32> to vector<16x1xf32>
    %cst_98 = arith.constant 6.400000e+01 : f32
    %268 = vector.broadcast %cst_98 : f32 to vector<16x1xf32>
    %269 = arith.divf %267, %268 : vector<16x1xf32>
    %270 = vector.broadcast %262 : vector<16x1xf32> to vector<16x64xf32>
    %271 = arith.subf %258, %270 : vector<16x64xf32>
    %cst_99 = arith.constant 9.99999997E-7 : f32
    %272 = vector.broadcast %cst_99 : f32 to vector<16x1xf32>
    %273 = arith.addf %269, %272 : vector<16x1xf32>
    %274 = math.rsqrt %273 : vector<16x1xf32>
    %275 = vector.broadcast %274 : vector<16x1xf32> to vector<16x64xf32>
    %276 = arith.mulf %271, %275 : vector<16x64xf32>
    %277 = vector.broadcast %16 : vector<1x64xf32> to vector<16x64xf32>
    %278 = arith.mulf %276, %277 : vector<16x64xf32>
    %279 = vector.broadcast %18 : vector<1x64xf32> to vector<16x64xf32>
    %280 = arith.addf %278, %279 : vector<16x64xf32>
    %281 = arith.truncf %280 : vector<16x64xf32> to vector<16x64xbf16>
    %cst_100 = arith.constant dense<0.000000e+00> : vector<16x256xf32>
    %282 = tpu.matmul %281, %20, %cst_100 {dimension_numbers = #tpu.dot_dimension_numbers<[1], [0], [0], [1], [0, 0, 1, 1], [], []>} : vector<16x64xbf16>, vector<64x256xbf16>, vector<16x256xf32> -> vector<16x256xf32>
    %283 = vector.broadcast %22 : vector<1x256xf32> to vector<16x256xf32>
    %284 = arith.addf %282, %283 : vector<16x256xf32>
    %285 = arith.mulf %284, %284 : vector<16x256xf32>
    %286 = arith.mulf %284, %285 : vector<16x256xf32>
    %cst_101 = arith.constant 4.471500e-02 : f32
    %287 = vector.broadcast %cst_101 : f32 to vector<16x256xf32>
    %288 = arith.mulf %287, %286 : vector<16x256xf32>
    %289 = arith.addf %284, %288 : vector<16x256xf32>
    %cst_102 = arith.constant 0.797884583 : f32
    %290 = vector.broadcast %cst_102 : f32 to vector<16x256xf32>
    %291 = arith.mulf %290, %289 : vector<16x256xf32>
    %292 = math.tanh %291 : vector<16x256xf32>
    %cst_103 = arith.constant 1.000000e+00 : f32
    %293 = vector.broadcast %cst_103 : f32 to vector<16x256xf32>
    %294 = arith.addf %293, %292 : vector<16x256xf32>
    %cst_104 = arith.constant 5.000000e-01 : f32
    %295 = vector.broadcast %cst_104 : f32 to vector<16x256xf32>
    %296 = arith.mulf %295, %294 : vector<16x256xf32>
    %297 = arith.mulf %284, %296 : vector<16x256xf32>
    %298 = arith.truncf %297 : vector<16x256xf32> to vector<16x256xbf16>
    %cst_105 = arith.constant dense<0.000000e+00> : vector<16x64xf32>
    %299 = tpu.matmul %298, %24, %cst_105 {dimension_numbers = #tpu.dot_dimension_numbers<[1], [0], [0], [1], [0, 0, 1, 1], [], []>} : vector<16x256xbf16>, vector<256x64xbf16>, vector<16x64xf32> -> vector<16x64xf32>
    %300 = vector.broadcast %26 : vector<1x64xf32> to vector<16x64xf32>
    %301 = arith.addf %299, %300 : vector<16x64xf32>
    %302 = arith.addf %258, %301 : vector<16x64xf32>
    %c0_106 = arith.constant 0 : index
    %c0_107 = arith.constant 0 : index
    %303 = vector.load %arg17[%c0_106, %c0_107] : memref<16x64xf32, #tpu.memory_space<vmem>>, vector<16x64xf32>
    tpu.vector_store %arg17[%c0_106, %c0_107], %302 {strides = array<i32>} : memref<16x64xf32, #tpu.memory_space<vmem>>, vector<16x64xf32>,
    %c1_i32 = arith.constant 1 : i32
    %304 = arith.cmpi eq, %arg0, %c1_i32 : i32
    %305 = arith.extui %304 : i1 to i32
    %c0_i32_108 = arith.constant 0 : i32
    %306 = arith.cmpi ne, %305, %c0_i32_108 : i32
    scf.if %306 {
      %c0_109 = arith.constant 0 : index
      %c0_110 = arith.constant 0 : index
      %307 = vector.load %arg17[%c0_109, %c0_110] : memref<16x64xf32, #tpu.memory_space<vmem>>, vector<16x64xf32>
      %c0_111 = arith.constant 0 : index
      %c0_112 = arith.constant 0 : index
      %308 = vector.load %arg14[%c0_111, %c0_112] : memref<1x64xf32, #tpu.memory_space<vmem>>, vector<1x64xf32>
      %c0_113 = arith.constant 0 : index
      %c0_114 = arith.constant 0 : index
      %309 = vector.load %arg15[%c0_113, %c0_114] : memref<1x64xf32, #tpu.memory_space<vmem>>, vector<1x64xf32>
      %cst_115 = arith.constant dense<0.000000e+00> : vector<16xf32>
      %310 = vector.multi_reduction <add>, %307, %cst_115 [1] : vector<16x64xf32> to vector<16xf32>
      %311 = vector.shape_cast %310 : vector<16xf32> to vector<16x1xf32>
      %cst_116 = arith.constant 6.400000e+01 : f32
      %312 = vector.broadcast %cst_116 : f32 to vector<16x1xf32>
      %313 = arith.divf %311, %312 : vector<16x1xf32>
      %314 = vector.broadcast %313 : vector<16x1xf32> to vector<16x64xf32>
      %315 = arith.subf %307, %314 : vector<16x64xf32>
      %316 = arith.mulf %315, %315 : vector<16x64xf32>
      %cst_117 = arith.constant dense<0.000000e+00> : vector<16xf32>
      %317 = vector.multi_reduction <add>, %316, %cst_117 [1] : vector<16x64xf32> to vector<16xf32>
      %318 = vector.shape_cast %317 : vector<16xf32> to vector<16x1xf32>
      %cst_118 = arith.constant 6.400000e+01 : f32
      %319 = vector.broadcast %cst_118 : f32 to vector<16x1xf32>
      %320 = arith.divf %318, %319 : vector<16x1xf32>
      %321 = vector.broadcast %313 : vector<16x1xf32> to vector<16x64xf32>
      %322 = arith.subf %307, %321 : vector<16x64xf32>
      %cst_119 = arith.constant 9.99999997E-7 : f32
      %323 = vector.broadcast %cst_119 : f32 to vector<16x1xf32>
      %324 = arith.addf %320, %323 : vector<16x1xf32>
      %325 = math.rsqrt %324 : vector<16x1xf32>
      %326 = vector.broadcast %325 : vector<16x1xf32> to vector<16x64xf32>
      %327 = arith.mulf %322, %326 : vector<16x64xf32>
      %328 = vector.broadcast %308 : vector<1x64xf32> to vector<16x64xf32>
      %329 = arith.mulf %327, %328 : vector<16x64xf32>
      %330 = vector.broadcast %309 : vector<1x64xf32> to vector<16x64xf32>
      %331 = arith.addf %329, %330 : vector<16x64xf32>
      %c0_120 = arith.constant 0 : index
      %c0_121 = arith.constant 0 : index
      %332 = vector.load %arg16[%c0_120, %c0_121] : memref<16x64xf32, #tpu.memory_space<vmem>>, vector<16x64xf32>
      tpu.vector_store %arg16[%c0_120, %c0_121], %331 {strides = array<i32>} : memref<16x64xf32, #tpu.memory_space<vmem>>, vector<16x64xf32>,
    } else {
    }
    return
  }
  func.func @transform_0(%arg0: i32) -> (i32, i32) {
    %c0_i32 = arith.constant 0 : i32
    %c0_i32_0 = arith.constant 0 : i32
    %c0_i32_1 = arith.constant 0 : i32
    return %c0_i32, %c0_i32_0 : i32, i32
  }
  func.func @transform_1(%arg0: i32) -> (i32, i32, i32) {
    %c0_i32 = arith.constant 0 : i32
    %c0_i32_0 = arith.constant 0 : i32
    %c0_i32_1 = arith.constant 0 : i32
    return %arg0, %c0_i32, %c0_i32_0 : i32, i32, i32
  }
  func.func @transform_2(%arg0: i32) -> (i32, i32, i32) {
    %c0_i32 = arith.constant 0 : i32
    %c0_i32_0 = arith.constant 0 : i32
    %c0_i32_1 = arith.constant 0 : i32
    return %arg0, %c0_i32, %c0_i32_0 : i32, i32, i32
  }
  func.func @transform_3(%arg0: i32) -> (i32, i32, i32) {
    %c0_i32 = arith.constant 0 : i32
    %c0_i32_0 = arith.constant 0 : i32
    %c0_i32_1 = arith.constant 0 : i32
    return %arg0, %c0_i32, %c0_i32_0 : i32, i32, i32
  }
  func.func @transform_4(%arg0: i32) -> (i32, i32, i32) {
    %c0_i32 = arith.constant 0 : i32
    %c0_i32_0 = arith.constant 0 : i32
    %c0_i32_1 = arith.constant 0 : i32
    return %arg0, %c0_i32, %c0_i32_0 : i32, i32, i32
  }
  func.func @transform_5(%arg0: i32) -> (i32, i32, i32) {
    %c0_i32 = arith.constant 0 : i32
    %c0_i32_0 = arith.constant 0 : i32
    %c0_i32_1 = arith.constant 0 : i32
    return %arg0, %c0_i32, %c0_i32_0 : i32, i32, i32
  }
  func.func @transform_6(%arg0: i32) -> (i32, i32, i32) {
    %c0_i32 = arith.constant 0 : i32
    %c0_i32_0 = arith.constant 0 : i32
    %c0_i32_1 = arith.constant 0 : i32
    return %arg0, %c0_i32, %c0_i32_0 : i32, i32, i32
  }
  func.func @transform_7(%arg0: i32) -> (i32, i32, i32) {
    %c0_i32 = arith.constant 0 : i32
    %c0_i32_0 = arith.constant 0 : i32
    %c0_i32_1 = arith.constant 0 : i32
    return %arg0, %c0_i32, %c0_i32_0 : i32, i32, i32
  }
  func.func @transform_8(%arg0: i32) -> (i32, i32, i32) {
    %c0_i32 = arith.constant 0 : i32
    %c0_i32_0 = arith.constant 0 : i32
    %c0_i32_1 = arith.constant 0 : i32
    return %arg0, %c0_i32, %c0_i32_0 : i32, i32, i32
  }
  func.func @transform_9(%arg0: i32) -> (i32, i32, i32) {
    %c0_i32 = arith.constant 0 : i32
    %c0_i32_0 = arith.constant 0 : i32
    %c0_i32_1 = arith.constant 0 : i32
    return %arg0, %c0_i32, %c0_i32_0 : i32, i32, i32
  }
  func.func @transform_10(%arg0: i32) -> (i32, i32, i32) {
    %c0_i32 = arith.constant 0 : i32
    %c0_i32_0 = arith.constant 0 : i32
    %c0_i32_1 = arith.constant 0 : i32
    return %arg0, %c0_i32, %c0_i32_0 : i32, i32, i32
  }
  func.func @transform_11(%arg0: i32) -> (i32, i32, i32) {
    %c0_i32 = arith.constant 0 : i32
    %c0_i32_0 = arith.constant 0 : i32
    %c0_i32_1 = arith.constant 0 : i32
    return %arg0, %c0_i32, %c0_i32_0 : i32, i32, i32
  }
  func.func @transform_12(%arg0: i32) -> (i32, i32, i32) {
    %c0_i32 = arith.constant 0 : i32
    %c0_i32_0 = arith.constant 0 : i32
    %c0_i32_1 = arith.constant 0 : i32
    return %arg0, %c0_i32, %c0_i32_0 : i32, i32, i32
  }
  func.func @transform_13(%arg0: i32) -> (i32, i32) {
    %c0_i32 = arith.constant 0 : i32
    %c0_i32_0 = arith.constant 0 : i32
    %c0_i32_1 = arith.constant 0 : i32
    return %c0_i32, %c0_i32_0 : i32, i32
  }
  func.func @transform_14(%arg0: i32) -> (i32, i32) {
    %c0_i32 = arith.constant 0 : i32
    %c0_i32_0 = arith.constant 0 : i32
    %c0_i32_1 = arith.constant 0 : i32
    return %c0_i32, %c0_i32_0 : i32, i32
  }
  func.func @transform_15(%arg0: i32) -> (i32, i32) {
    %c0_i32 = arith.constant 0 : i32
    %c0_i32_0 = arith.constant 0 : i32
    %c0_i32_1 = arith.constant 0 : i32
    return %c0_i32, %c0_i32_0 : i32, i32
  }
}

module attributes {stable_mosaic.version = 11 : i64} {
  func.func @branch_kernel(%arg0: i32, %arg1: memref<16x64xf32, #tpu.memory_space<vmem>>, %arg2: memref<1x1x64xf32, #tpu.memory_space<vmem>>, %arg3: memref<1x1x64xf32, #tpu.memory_space<vmem>>, %arg4: memref<1x64x192xbf16, #tpu.memory_space<vmem>>, %arg5: memref<1x1x192xf32, #tpu.memory_space<vmem>>, %arg6: memref<1x64x64xbf16, #tpu.memory_space<vmem>>, %arg7: memref<1x1x64xf32, #tpu.memory_space<vmem>>, %arg8: memref<1x1x64xf32, #tpu.memory_space<vmem>>, %arg9: memref<1x1x64xf32, #tpu.memory_space<vmem>>, %arg10: memref<1x64x256xbf16, #tpu.memory_space<vmem>>, %arg11: memref<1x1x256xf32, #tpu.memory_space<vmem>>, %arg12: memref<1x256x64xbf16, #tpu.memory_space<vmem>>, %arg13: memref<1x1x64xf32, #tpu.memory_space<vmem>>, %arg14: memref<1x64x32xbf16, #tpu.memory_space<vmem>>, %arg15: memref<1x1x32xf32, #tpu.memory_space<vmem>>, %arg16: memref<1x16x32xf32, #tpu.memory_space<vmem>>) attributes {dimension_semantics = [#tpu.dimension_semantics<parallel>], iteration_bounds = array<i64: 4>, scalar_prefetch = 0 : i64, scratch_operands = 0 : i64, tpu.core_type = #tpu.core_type<tc>, window_params = [{pipeline_mode = #tpu.pipeline_mode<synchronous>, transform_indices = @transform_0, window_bounds = array<i64: 16, 64>}, {transform_indices = @transform_1, window_bounds = array<i64: 1, 1, 64>}, {transform_indices = @transform_2, window_bounds = array<i64: 1, 1, 64>}, {transform_indices = @transform_3, window_bounds = array<i64: 1, 64, 192>}, {transform_indices = @transform_4, window_bounds = array<i64: 1, 1, 192>}, {transform_indices = @transform_5, window_bounds = array<i64: 1, 64, 64>}, {transform_indices = @transform_6, window_bounds = array<i64: 1, 1, 64>}, {transform_indices = @transform_7, window_bounds = array<i64: 1, 1, 64>}, {transform_indices = @transform_8, window_bounds = array<i64: 1, 1, 64>}, {transform_indices = @transform_9, window_bounds = array<i64: 1, 64, 256>}, {transform_indices = @transform_10, window_bounds = array<i64: 1, 1, 256>}, {transform_indices = @transform_11, window_bounds = array<i64: 1, 256, 64>}, {transform_indices = @transform_12, window_bounds = array<i64: 1, 1, 64>}, {transform_indices = @transform_13, window_bounds = array<i64: 1, 64, 32>}, {transform_indices = @transform_14, window_bounds = array<i64: 1, 1, 32>}, {transform_indices = @transform_15, window_bounds = array<i64: 1, 16, 32>}]} {
    %c0 = arith.constant 0 : index
    %c0_0 = arith.constant 0 : index
    %c0_1 = arith.constant 0 : index
    %0 = vector.load %arg2[%c0, %c0_0, %c0_1] : memref<1x1x64xf32, #tpu.memory_space<vmem>>, vector<1x1x64xf32>
    %1 = vector.shape_cast %0 : vector<1x1x64xf32> to vector<1x64xf32>
    %c0_2 = arith.constant 0 : index
    %c0_3 = arith.constant 0 : index
    %c0_4 = arith.constant 0 : index
    %2 = vector.load %arg3[%c0_2, %c0_3, %c0_4] : memref<1x1x64xf32, #tpu.memory_space<vmem>>, vector<1x1x64xf32>
    %3 = vector.shape_cast %2 : vector<1x1x64xf32> to vector<1x64xf32>
    %c0_5 = arith.constant 0 : index
    %c0_6 = arith.constant 0 : index
    %c0_7 = arith.constant 0 : index
    %4 = vector.load %arg4[%c0_5, %c0_6, %c0_7] : memref<1x64x192xbf16, #tpu.memory_space<vmem>>, vector<1x64x192xbf16>
    %5 = vector.shape_cast %4 : vector<1x64x192xbf16> to vector<64x192xbf16>
    %c0_8 = arith.constant 0 : index
    %c0_9 = arith.constant 0 : index
    %c0_10 = arith.constant 0 : index
    %6 = vector.load %arg5[%c0_8, %c0_9, %c0_10] : memref<1x1x192xf32, #tpu.memory_space<vmem>>, vector<1x1x192xf32>
    %7 = vector.shape_cast %6 : vector<1x1x192xf32> to vector<1x192xf32>
    %c0_11 = arith.constant 0 : index
    %c0_12 = arith.constant 0 : index
    %c0_13 = arith.constant 0 : index
    %8 = vector.load %arg6[%c0_11, %c0_12, %c0_13] : memref<1x64x64xbf16, #tpu.memory_space<vmem>>, vector<1x64x64xbf16>
    %9 = vector.shape_cast %8 : vector<1x64x64xbf16> to vector<64x64xbf16>
    %c0_14 = arith.constant 0 : index
    %c0_15 = arith.constant 0 : index
    %c0_16 = arith.constant 0 : index
    %10 = vector.load %arg7[%c0_14, %c0_15, %c0_16] : memref<1x1x64xf32, #tpu.memory_space<vmem>>, vector<1x1x64xf32>
    %11 = vector.shape_cast %10 : vector<1x1x64xf32> to vector<1x64xf32>
    %c0_17 = arith.constant 0 : index
    %c0_18 = arith.constant 0 : index
    %c0_19 = arith.constant 0 : index
    %12 = vector.load %arg8[%c0_17, %c0_18, %c0_19] : memref<1x1x64xf32, #tpu.memory_space<vmem>>, vector<1x1x64xf32>
    %13 = vector.shape_cast %12 : vector<1x1x64xf32> to vector<1x64xf32>
    %c0_20 = arith.constant 0 : index
    %c0_21 = arith.constant 0 : index
    %c0_22 = arith.constant 0 : index
    %14 = vector.load %arg9[%c0_20, %c0_21, %c0_22] : memref<1x1x64xf32, #tpu.memory_space<vmem>>, vector<1x1x64xf32>
    %15 = vector.shape_cast %14 : vector<1x1x64xf32> to vector<1x64xf32>
    %c0_23 = arith.constant 0 : index
    %c0_24 = arith.constant 0 : index
    %c0_25 = arith.constant 0 : index
    %16 = vector.load %arg10[%c0_23, %c0_24, %c0_25] : memref<1x64x256xbf16, #tpu.memory_space<vmem>>, vector<1x64x256xbf16>
    %17 = vector.shape_cast %16 : vector<1x64x256xbf16> to vector<64x256xbf16>
    %c0_26 = arith.constant 0 : index
    %c0_27 = arith.constant 0 : index
    %c0_28 = arith.constant 0 : index
    %18 = vector.load %arg11[%c0_26, %c0_27, %c0_28] : memref<1x1x256xf32, #tpu.memory_space<vmem>>, vector<1x1x256xf32>
    %19 = vector.shape_cast %18 : vector<1x1x256xf32> to vector<1x256xf32>
    %c0_29 = arith.constant 0 : index
    %c0_30 = arith.constant 0 : index
    %c0_31 = arith.constant 0 : index
    %20 = vector.load %arg12[%c0_29, %c0_30, %c0_31] : memref<1x256x64xbf16, #tpu.memory_space<vmem>>, vector<1x256x64xbf16>
    %21 = vector.shape_cast %20 : vector<1x256x64xbf16> to vector<256x64xbf16>
    %c0_32 = arith.constant 0 : index
    %c0_33 = arith.constant 0 : index
    %c0_34 = arith.constant 0 : index
    %22 = vector.load %arg13[%c0_32, %c0_33, %c0_34] : memref<1x1x64xf32, #tpu.memory_space<vmem>>, vector<1x1x64xf32>
    %23 = vector.shape_cast %22 : vector<1x1x64xf32> to vector<1x64xf32>
    %c0_35 = arith.constant 0 : index
    %c0_36 = arith.constant 0 : index
    %24 = vector.load %arg1[%c0_35, %c0_36] : memref<16x64xf32, #tpu.memory_space<vmem>>, vector<16x64xf32>
    %25 = tpu.iota {dimensions = array<i32: 1>} : vector<1x8xi32>
    %c5_i32 = arith.constant 5 : i32
    %26 = vector.broadcast %c5_i32 : i32 to vector<1x8xi32>
    %27 = arith.cmpi slt, %25, %26 : vector<1x8xi32>
    %cst = arith.constant 0.000000e+00 : f32
    %cst_37 = arith.constant -1.000000e+30 : f32
    %28 = vector.broadcast %cst : f32 to vector<1x8xf32>
    %29 = vector.broadcast %cst_37 : f32 to vector<1x8xf32>
    %30 = arith.select %27, %28, %29 : vector<1x8xi1>, vector<1x8xf32>
    %cst_38 = arith.constant dense<0.000000e+00> : vector<16xf32>
    %31 = vector.multi_reduction <add>, %24, %cst_38 [1] : vector<16x64xf32> to vector<16xf32>
    %32 = vector.shape_cast %31 : vector<16xf32> to vector<16x1xf32>
    %cst_39 = arith.constant 6.400000e+01 : f32
    %33 = vector.broadcast %cst_39 : f32 to vector<16x1xf32>
    %34 = arith.divf %32, %33 : vector<16x1xf32>
    %35 = vector.broadcast %34 : vector<16x1xf32> to vector<16x64xf32>
    %36 = arith.subf %24, %35 : vector<16x64xf32>
    %37 = arith.mulf %36, %36 : vector<16x64xf32>
    %cst_40 = arith.constant dense<0.000000e+00> : vector<16xf32>
    %38 = vector.multi_reduction <add>, %37, %cst_40 [1] : vector<16x64xf32> to vector<16xf32>
    %39 = vector.shape_cast %38 : vector<16xf32> to vector<16x1xf32>
    %cst_41 = arith.constant 6.400000e+01 : f32
    %40 = vector.broadcast %cst_41 : f32 to vector<16x1xf32>
    %41 = arith.divf %39, %40 : vector<16x1xf32>
    %42 = vector.broadcast %34 : vector<16x1xf32> to vector<16x64xf32>
    %43 = arith.subf %24, %42 : vector<16x64xf32>
    %cst_42 = arith.constant 9.99999997E-7 : f32
    %44 = vector.broadcast %cst_42 : f32 to vector<16x1xf32>
    %45 = arith.addf %41, %44 : vector<16x1xf32>
    %46 = math.rsqrt %45 : vector<16x1xf32>
    %47 = vector.broadcast %46 : vector<16x1xf32> to vector<16x64xf32>
    %48 = arith.mulf %43, %47 : vector<16x64xf32>
    %49 = vector.broadcast %1 : vector<1x64xf32> to vector<16x64xf32>
    %50 = arith.mulf %48, %49 : vector<16x64xf32>
    %51 = vector.broadcast %3 : vector<1x64xf32> to vector<16x64xf32>
    %52 = arith.addf %50, %51 : vector<16x64xf32>
    %53 = arith.truncf %52 : vector<16x64xf32> to vector<16x64xbf16>
    %cst_43 = arith.constant dense<0.000000e+00> : vector<16x192xf32>
    %54 = tpu.matmul %53, %5, %cst_43 {dimension_numbers = #tpu.dot_dimension_numbers<[1], [0], [0], [1], [0, 0, 1, 1], [], []>} : vector<16x64xbf16>, vector<64x192xbf16>, vector<16x192xf32> -> vector<16x192xf32>
    %55 = vector.broadcast %7 : vector<1x192xf32> to vector<16x192xf32>
    %56 = arith.addf %54, %55 : vector<16x192xf32>
    %57 = arith.truncf %56 : vector<16x192xf32> to vector<16x192xbf16>
    %cst_44 = arith.constant 0.000000e+00 : f32
    %58 = vector.broadcast %cst_44 : f32 to vector<8x64xf32>
    %59 = vector.extract_strided_slice %57 {offsets = [0, 0], sizes = [8, 16], strides = [1, 1]} : vector<16x192xbf16> to vector<8x16xbf16>
    %60 = vector.extract_strided_slice %57 {offsets = [0, 64], sizes = [8, 16], strides = [1, 1]} : vector<16x192xbf16> to vector<8x16xbf16>
    %61 = vector.extract_strided_slice %57 {offsets = [0, 128], sizes = [8, 16], strides = [1, 1]} : vector<16x192xbf16> to vector<8x16xbf16>
    %cst_45 = arith.constant dense<0.000000e+00> : vector<8x8xf32>
    %62 = tpu.matmul %59, %60, %cst_45 {dimension_numbers = #tpu.dot_dimension_numbers<[1], [1], [0], [0], [0, 0, 1, 0], [], []>} : vector<8x16xbf16>, vector<8x16xbf16>, vector<8x8xf32> -> vector<8x8xf32>
    %cst_46 = arith.constant 2.500000e-01 : f32
    %63 = vector.broadcast %cst_46 : f32 to vector<8x8xf32>
    %64 = arith.mulf %62, %63 : vector<8x8xf32>
    %65 = vector.broadcast %30 : vector<1x8xf32> to vector<8x8xf32>
    %66 = arith.addf %64, %65 : vector<8x8xf32>
    %cst_47 = arith.constant dense<0xFF800000> : vector<8xf32>
    %67 = vector.multi_reduction <maximumf>, %66, %cst_47 [1] : vector<8x8xf32> to vector<8xf32>
    %68 = vector.shape_cast %67 : vector<8xf32> to vector<8x1xf32>
    %69 = vector.broadcast %68 : vector<8x1xf32> to vector<8x8xf32>
    %70 = arith.subf %66, %69 : vector<8x8xf32>
    %71 = math.exp %70 : vector<8x8xf32>
    %cst_48 = arith.constant dense<0.000000e+00> : vector<8xf32>
    %72 = vector.multi_reduction <add>, %71, %cst_48 [1] : vector<8x8xf32> to vector<8xf32>
    %73 = vector.shape_cast %72 : vector<8xf32> to vector<8x1xf32>
    %74 = tpu.reciprocal %73 {approx = true} : vector<8x1xf32> -> vector<8x1xf32>
    %75 = vector.broadcast %74 : vector<8x1xf32> to vector<8x8xf32>
    %76 = arith.mulf %71, %75 : vector<8x8xf32>
    %77 = arith.truncf %76 : vector<8x8xf32> to vector<8x8xbf16>
    %cst_49 = arith.constant dense<0.000000e+00> : vector<8x16xf32>
    %78 = tpu.matmul %77, %61, %cst_49 {dimension_numbers = #tpu.dot_dimension_numbers<[1], [0], [0], [1], [0, 0, 1, 1], [], []>} : vector<8x8xbf16>, vector<8x16xbf16>, vector<8x16xf32> -> vector<8x16xf32>
    %79 = arith.truncf %78 : vector<8x16xf32> to vector<8x16xbf16>
    %80 = vector.extract_strided_slice %9 {offsets = [0, 0], sizes = [16, 64], strides = [1, 1]} : vector<64x64xbf16> to vector<16x64xbf16>
    %cst_50 = arith.constant dense<0.000000e+00> : vector<8x64xf32>
    %81 = tpu.matmul %79, %80, %cst_50 {dimension_numbers = #tpu.dot_dimension_numbers<[1], [0], [0], [1], [0, 0, 1, 1], [], []>} : vector<8x16xbf16>, vector<16x64xbf16>, vector<8x64xf32> -> vector<8x64xf32>
    %82 = arith.addf %58, %81 : vector<8x64xf32>
    %83 = vector.extract_strided_slice %57 {offsets = [0, 16], sizes = [8, 16], strides = [1, 1]} : vector<16x192xbf16> to vector<8x16xbf16>
    %84 = vector.extract_strided_slice %57 {offsets = [0, 80], sizes = [8, 16], strides = [1, 1]} : vector<16x192xbf16> to vector<8x16xbf16>
    %85 = vector.extract_strided_slice %57 {offsets = [0, 144], sizes = [8, 16], strides = [1, 1]} : vector<16x192xbf16> to vector<8x16xbf16>
    %cst_51 = arith.constant dense<0.000000e+00> : vector<8x8xf32>
    %86 = tpu.matmul %83, %84, %cst_51 {dimension_numbers = #tpu.dot_dimension_numbers<[1], [1], [0], [0], [0, 0, 1, 0], [], []>} : vector<8x16xbf16>, vector<8x16xbf16>, vector<8x8xf32> -> vector<8x8xf32>
    %cst_52 = arith.constant 2.500000e-01 : f32
    %87 = vector.broadcast %cst_52 : f32 to vector<8x8xf32>
    %88 = arith.mulf %86, %87 : vector<8x8xf32>
    %89 = vector.broadcast %30 : vector<1x8xf32> to vector<8x8xf32>
    %90 = arith.addf %88, %89 : vector<8x8xf32>
    %cst_53 = arith.constant dense<0xFF800000> : vector<8xf32>
    %91 = vector.multi_reduction <maximumf>, %90, %cst_53 [1] : vector<8x8xf32> to vector<8xf32>
    %92 = vector.shape_cast %91 : vector<8xf32> to vector<8x1xf32>
    %93 = vector.broadcast %92 : vector<8x1xf32> to vector<8x8xf32>
    %94 = arith.subf %90, %93 : vector<8x8xf32>
    %95 = math.exp %94 : vector<8x8xf32>
    %cst_54 = arith.constant dense<0.000000e+00> : vector<8xf32>
    %96 = vector.multi_reduction <add>, %95, %cst_54 [1] : vector<8x8xf32> to vector<8xf32>
    %97 = vector.shape_cast %96 : vector<8xf32> to vector<8x1xf32>
    %98 = tpu.reciprocal %97 {approx = true} : vector<8x1xf32> -> vector<8x1xf32>
    %99 = vector.broadcast %98 : vector<8x1xf32> to vector<8x8xf32>
    %100 = arith.mulf %95, %99 : vector<8x8xf32>
    %101 = arith.truncf %100 : vector<8x8xf32> to vector<8x8xbf16>
    %cst_55 = arith.constant dense<0.000000e+00> : vector<8x16xf32>
    %102 = tpu.matmul %101, %85, %cst_55 {dimension_numbers = #tpu.dot_dimension_numbers<[1], [0], [0], [1], [0, 0, 1, 1], [], []>} : vector<8x8xbf16>, vector<8x16xbf16>, vector<8x16xf32> -> vector<8x16xf32>
    %103 = arith.truncf %102 : vector<8x16xf32> to vector<8x16xbf16>
    %104 = vector.extract_strided_slice %9 {offsets = [16, 0], sizes = [16, 64], strides = [1, 1]} : vector<64x64xbf16> to vector<16x64xbf16>
    %cst_56 = arith.constant dense<0.000000e+00> : vector<8x64xf32>
    %105 = tpu.matmul %103, %104, %cst_56 {dimension_numbers = #tpu.dot_dimension_numbers<[1], [0], [0], [1], [0, 0, 1, 1], [], []>} : vector<8x16xbf16>, vector<16x64xbf16>, vector<8x64xf32> -> vector<8x64xf32>
    %106 = arith.addf %82, %105 : vector<8x64xf32>
    %107 = vector.extract_strided_slice %57 {offsets = [0, 32], sizes = [8, 16], strides = [1, 1]} : vector<16x192xbf16> to vector<8x16xbf16>
    %108 = vector.extract_strided_slice %57 {offsets = [0, 96], sizes = [8, 16], strides = [1, 1]} : vector<16x192xbf16> to vector<8x16xbf16>
    %109 = vector.extract_strided_slice %57 {offsets = [0, 160], sizes = [8, 16], strides = [1, 1]} : vector<16x192xbf16> to vector<8x16xbf16>
    %cst_57 = arith.constant dense<0.000000e+00> : vector<8x8xf32>
    %110 = tpu.matmul %107, %108, %cst_57 {dimension_numbers = #tpu.dot_dimension_numbers<[1], [1], [0], [0], [0, 0, 1, 0], [], []>} : vector<8x16xbf16>, vector<8x16xbf16>, vector<8x8xf32> -> vector<8x8xf32>
    %cst_58 = arith.constant 2.500000e-01 : f32
    %111 = vector.broadcast %cst_58 : f32 to vector<8x8xf32>
    %112 = arith.mulf %110, %111 : vector<8x8xf32>
    %113 = vector.broadcast %30 : vector<1x8xf32> to vector<8x8xf32>
    %114 = arith.addf %112, %113 : vector<8x8xf32>
    %cst_59 = arith.constant dense<0xFF800000> : vector<8xf32>
    %115 = vector.multi_reduction <maximumf>, %114, %cst_59 [1] : vector<8x8xf32> to vector<8xf32>
    %116 = vector.shape_cast %115 : vector<8xf32> to vector<8x1xf32>
    %117 = vector.broadcast %116 : vector<8x1xf32> to vector<8x8xf32>
    %118 = arith.subf %114, %117 : vector<8x8xf32>
    %119 = math.exp %118 : vector<8x8xf32>
    %cst_60 = arith.constant dense<0.000000e+00> : vector<8xf32>
    %120 = vector.multi_reduction <add>, %119, %cst_60 [1] : vector<8x8xf32> to vector<8xf32>
    %121 = vector.shape_cast %120 : vector<8xf32> to vector<8x1xf32>
    %122 = tpu.reciprocal %121 {approx = true} : vector<8x1xf32> -> vector<8x1xf32>
    %123 = vector.broadcast %122 : vector<8x1xf32> to vector<8x8xf32>
    %124 = arith.mulf %119, %123 : vector<8x8xf32>
    %125 = arith.truncf %124 : vector<8x8xf32> to vector<8x8xbf16>
    %cst_61 = arith.constant dense<0.000000e+00> : vector<8x16xf32>
    %126 = tpu.matmul %125, %109, %cst_61 {dimension_numbers = #tpu.dot_dimension_numbers<[1], [0], [0], [1], [0, 0, 1, 1], [], []>} : vector<8x8xbf16>, vector<8x16xbf16>, vector<8x16xf32> -> vector<8x16xf32>
    %127 = arith.truncf %126 : vector<8x16xf32> to vector<8x16xbf16>
    %128 = vector.extract_strided_slice %9 {offsets = [32, 0], sizes = [16, 64], strides = [1, 1]} : vector<64x64xbf16> to vector<16x64xbf16>
    %cst_62 = arith.constant dense<0.000000e+00> : vector<8x64xf32>
    %129 = tpu.matmul %127, %128, %cst_62 {dimension_numbers = #tpu.dot_dimension_numbers<[1], [0], [0], [1], [0, 0, 1, 1], [], []>} : vector<8x16xbf16>, vector<16x64xbf16>, vector<8x64xf32> -> vector<8x64xf32>
    %130 = arith.addf %106, %129 : vector<8x64xf32>
    %131 = vector.extract_strided_slice %57 {offsets = [0, 48], sizes = [8, 16], strides = [1, 1]} : vector<16x192xbf16> to vector<8x16xbf16>
    %132 = vector.extract_strided_slice %57 {offsets = [0, 112], sizes = [8, 16], strides = [1, 1]} : vector<16x192xbf16> to vector<8x16xbf16>
    %133 = vector.extract_strided_slice %57 {offsets = [0, 176], sizes = [8, 16], strides = [1, 1]} : vector<16x192xbf16> to vector<8x16xbf16>
    %cst_63 = arith.constant dense<0.000000e+00> : vector<8x8xf32>
    %134 = tpu.matmul %131, %132, %cst_63 {dimension_numbers = #tpu.dot_dimension_numbers<[1], [1], [0], [0], [0, 0, 1, 0], [], []>} : vector<8x16xbf16>, vector<8x16xbf16>, vector<8x8xf32> -> vector<8x8xf32>
    %cst_64 = arith.constant 2.500000e-01 : f32
    %135 = vector.broadcast %cst_64 : f32 to vector<8x8xf32>
    %136 = arith.mulf %134, %135 : vector<8x8xf32>
    %137 = vector.broadcast %30 : vector<1x8xf32> to vector<8x8xf32>
    %138 = arith.addf %136, %137 : vector<8x8xf32>
    %cst_65 = arith.constant dense<0xFF800000> : vector<8xf32>
    %139 = vector.multi_reduction <maximumf>, %138, %cst_65 [1] : vector<8x8xf32> to vector<8xf32>
    %140 = vector.shape_cast %139 : vector<8xf32> to vector<8x1xf32>
    %141 = vector.broadcast %140 : vector<8x1xf32> to vector<8x8xf32>
    %142 = arith.subf %138, %141 : vector<8x8xf32>
    %143 = math.exp %142 : vector<8x8xf32>
    %cst_66 = arith.constant dense<0.000000e+00> : vector<8xf32>
    %144 = vector.multi_reduction <add>, %143, %cst_66 [1] : vector<8x8xf32> to vector<8xf32>
    %145 = vector.shape_cast %144 : vector<8xf32> to vector<8x1xf32>
    %146 = tpu.reciprocal %145 {approx = true} : vector<8x1xf32> -> vector<8x1xf32>
    %147 = vector.broadcast %146 : vector<8x1xf32> to vector<8x8xf32>
    %148 = arith.mulf %143, %147 : vector<8x8xf32>
    %149 = arith.truncf %148 : vector<8x8xf32> to vector<8x8xbf16>
    %cst_67 = arith.constant dense<0.000000e+00> : vector<8x16xf32>
    %150 = tpu.matmul %149, %133, %cst_67 {dimension_numbers = #tpu.dot_dimension_numbers<[1], [0], [0], [1], [0, 0, 1, 1], [], []>} : vector<8x8xbf16>, vector<8x16xbf16>, vector<8x16xf32> -> vector<8x16xf32>
    %151 = arith.truncf %150 : vector<8x16xf32> to vector<8x16xbf16>
    %152 = vector.extract_strided_slice %9 {offsets = [48, 0], sizes = [16, 64], strides = [1, 1]} : vector<64x64xbf16> to vector<16x64xbf16>
    %cst_68 = arith.constant dense<0.000000e+00> : vector<8x64xf32>
    %153 = tpu.matmul %151, %152, %cst_68 {dimension_numbers = #tpu.dot_dimension_numbers<[1], [0], [0], [1], [0, 0, 1, 1], [], []>} : vector<8x16xbf16>, vector<16x64xbf16>, vector<8x64xf32> -> vector<8x64xf32>
    %154 = arith.addf %130, %153 : vector<8x64xf32>
    %cst_69 = arith.constant 0.000000e+00 : f32
    %155 = vector.broadcast %cst_69 : f32 to vector<8x64xf32>
    %156 = vector.extract_strided_slice %57 {offsets = [8, 0], sizes = [8, 16], strides = [1, 1]} : vector<16x192xbf16> to vector<8x16xbf16>
    %157 = vector.extract_strided_slice %57 {offsets = [8, 64], sizes = [8, 16], strides = [1, 1]} : vector<16x192xbf16> to vector<8x16xbf16>
    %158 = vector.extract_strided_slice %57 {offsets = [8, 128], sizes = [8, 16], strides = [1, 1]} : vector<16x192xbf16> to vector<8x16xbf16>
    %cst_70 = arith.constant dense<0.000000e+00> : vector<8x8xf32>
    %159 = tpu.matmul %156, %157, %cst_70 {dimension_numbers = #tpu.dot_dimension_numbers<[1], [1], [0], [0], [0, 0, 1, 0], [], []>} : vector<8x16xbf16>, vector<8x16xbf16>, vector<8x8xf32> -> vector<8x8xf32>
    %cst_71 = arith.constant 2.500000e-01 : f32
    %160 = vector.broadcast %cst_71 : f32 to vector<8x8xf32>
    %161 = arith.mulf %159, %160 : vector<8x8xf32>
    %162 = vector.broadcast %30 : vector<1x8xf32> to vector<8x8xf32>
    %163 = arith.addf %161, %162 : vector<8x8xf32>
    %cst_72 = arith.constant dense<0xFF800000> : vector<8xf32>
    %164 = vector.multi_reduction <maximumf>, %163, %cst_72 [1] : vector<8x8xf32> to vector<8xf32>
    %165 = vector.shape_cast %164 : vector<8xf32> to vector<8x1xf32>
    %166 = vector.broadcast %165 : vector<8x1xf32> to vector<8x8xf32>
    %167 = arith.subf %163, %166 : vector<8x8xf32>
    %168 = math.exp %167 : vector<8x8xf32>
    %cst_73 = arith.constant dense<0.000000e+00> : vector<8xf32>
    %169 = vector.multi_reduction <add>, %168, %cst_73 [1] : vector<8x8xf32> to vector<8xf32>
    %170 = vector.shape_cast %169 : vector<8xf32> to vector<8x1xf32>
    %171 = tpu.reciprocal %170 {approx = true} : vector<8x1xf32> -> vector<8x1xf32>
    %172 = vector.broadcast %171 : vector<8x1xf32> to vector<8x8xf32>
    %173 = arith.mulf %168, %172 : vector<8x8xf32>
    %174 = arith.truncf %173 : vector<8x8xf32> to vector<8x8xbf16>
    %cst_74 = arith.constant dense<0.000000e+00> : vector<8x16xf32>
    %175 = tpu.matmul %174, %158, %cst_74 {dimension_numbers = #tpu.dot_dimension_numbers<[1], [0], [0], [1], [0, 0, 1, 1], [], []>} : vector<8x8xbf16>, vector<8x16xbf16>, vector<8x16xf32> -> vector<8x16xf32>
    %176 = arith.truncf %175 : vector<8x16xf32> to vector<8x16xbf16>
    %177 = vector.extract_strided_slice %9 {offsets = [0, 0], sizes = [16, 64], strides = [1, 1]} : vector<64x64xbf16> to vector<16x64xbf16>
    %cst_75 = arith.constant dense<0.000000e+00> : vector<8x64xf32>
    %178 = tpu.matmul %176, %177, %cst_75 {dimension_numbers = #tpu.dot_dimension_numbers<[1], [0], [0], [1], [0, 0, 1, 1], [], []>} : vector<8x16xbf16>, vector<16x64xbf16>, vector<8x64xf32> -> vector<8x64xf32>
    %179 = arith.addf %155, %178 : vector<8x64xf32>
    %180 = vector.extract_strided_slice %57 {offsets = [8, 16], sizes = [8, 16], strides = [1, 1]} : vector<16x192xbf16> to vector<8x16xbf16>
    %181 = vector.extract_strided_slice %57 {offsets = [8, 80], sizes = [8, 16], strides = [1, 1]} : vector<16x192xbf16> to vector<8x16xbf16>
    %182 = vector.extract_strided_slice %57 {offsets = [8, 144], sizes = [8, 16], strides = [1, 1]} : vector<16x192xbf16> to vector<8x16xbf16>
    %cst_76 = arith.constant dense<0.000000e+00> : vector<8x8xf32>
    %183 = tpu.matmul %180, %181, %cst_76 {dimension_numbers = #tpu.dot_dimension_numbers<[1], [1], [0], [0], [0, 0, 1, 0], [], []>} : vector<8x16xbf16>, vector<8x16xbf16>, vector<8x8xf32> -> vector<8x8xf32>
    %cst_77 = arith.constant 2.500000e-01 : f32
    %184 = vector.broadcast %cst_77 : f32 to vector<8x8xf32>
    %185 = arith.mulf %183, %184 : vector<8x8xf32>
    %186 = vector.broadcast %30 : vector<1x8xf32> to vector<8x8xf32>
    %187 = arith.addf %185, %186 : vector<8x8xf32>
    %cst_78 = arith.constant dense<0xFF800000> : vector<8xf32>
    %188 = vector.multi_reduction <maximumf>, %187, %cst_78 [1] : vector<8x8xf32> to vector<8xf32>
    %189 = vector.shape_cast %188 : vector<8xf32> to vector<8x1xf32>
    %190 = vector.broadcast %189 : vector<8x1xf32> to vector<8x8xf32>
    %191 = arith.subf %187, %190 : vector<8x8xf32>
    %192 = math.exp %191 : vector<8x8xf32>
    %cst_79 = arith.constant dense<0.000000e+00> : vector<8xf32>
    %193 = vector.multi_reduction <add>, %192, %cst_79 [1] : vector<8x8xf32> to vector<8xf32>
    %194 = vector.shape_cast %193 : vector<8xf32> to vector<8x1xf32>
    %195 = tpu.reciprocal %194 {approx = true} : vector<8x1xf32> -> vector<8x1xf32>
    %196 = vector.broadcast %195 : vector<8x1xf32> to vector<8x8xf32>
    %197 = arith.mulf %192, %196 : vector<8x8xf32>
    %198 = arith.truncf %197 : vector<8x8xf32> to vector<8x8xbf16>
    %cst_80 = arith.constant dense<0.000000e+00> : vector<8x16xf32>
    %199 = tpu.matmul %198, %182, %cst_80 {dimension_numbers = #tpu.dot_dimension_numbers<[1], [0], [0], [1], [0, 0, 1, 1], [], []>} : vector<8x8xbf16>, vector<8x16xbf16>, vector<8x16xf32> -> vector<8x16xf32>
    %200 = arith.truncf %199 : vector<8x16xf32> to vector<8x16xbf16>
    %201 = vector.extract_strided_slice %9 {offsets = [16, 0], sizes = [16, 64], strides = [1, 1]} : vector<64x64xbf16> to vector<16x64xbf16>
    %cst_81 = arith.constant dense<0.000000e+00> : vector<8x64xf32>
    %202 = tpu.matmul %200, %201, %cst_81 {dimension_numbers = #tpu.dot_dimension_numbers<[1], [0], [0], [1], [0, 0, 1, 1], [], []>} : vector<8x16xbf16>, vector<16x64xbf16>, vector<8x64xf32> -> vector<8x64xf32>
    %203 = arith.addf %179, %202 : vector<8x64xf32>
    %204 = vector.extract_strided_slice %57 {offsets = [8, 32], sizes = [8, 16], strides = [1, 1]} : vector<16x192xbf16> to vector<8x16xbf16>
    %205 = vector.extract_strided_slice %57 {offsets = [8, 96], sizes = [8, 16], strides = [1, 1]} : vector<16x192xbf16> to vector<8x16xbf16>
    %206 = vector.extract_strided_slice %57 {offsets = [8, 160], sizes = [8, 16], strides = [1, 1]} : vector<16x192xbf16> to vector<8x16xbf16>
    %cst_82 = arith.constant dense<0.000000e+00> : vector<8x8xf32>
    %207 = tpu.matmul %204, %205, %cst_82 {dimension_numbers = #tpu.dot_dimension_numbers<[1], [1], [0], [0], [0, 0, 1, 0], [], []>} : vector<8x16xbf16>, vector<8x16xbf16>, vector<8x8xf32> -> vector<8x8xf32>
    %cst_83 = arith.constant 2.500000e-01 : f32
    %208 = vector.broadcast %cst_83 : f32 to vector<8x8xf32>
    %209 = arith.mulf %207, %208 : vector<8x8xf32>
    %210 = vector.broadcast %30 : vector<1x8xf32> to vector<8x8xf32>
    %211 = arith.addf %209, %210 : vector<8x8xf32>
    %cst_84 = arith.constant dense<0xFF800000> : vector<8xf32>
    %212 = vector.multi_reduction <maximumf>, %211, %cst_84 [1] : vector<8x8xf32> to vector<8xf32>
    %213 = vector.shape_cast %212 : vector<8xf32> to vector<8x1xf32>
    %214 = vector.broadcast %213 : vector<8x1xf32> to vector<8x8xf32>
    %215 = arith.subf %211, %214 : vector<8x8xf32>
    %216 = math.exp %215 : vector<8x8xf32>
    %cst_85 = arith.constant dense<0.000000e+00> : vector<8xf32>
    %217 = vector.multi_reduction <add>, %216, %cst_85 [1] : vector<8x8xf32> to vector<8xf32>
    %218 = vector.shape_cast %217 : vector<8xf32> to vector<8x1xf32>
    %219 = tpu.reciprocal %218 {approx = true} : vector<8x1xf32> -> vector<8x1xf32>
    %220 = vector.broadcast %219 : vector<8x1xf32> to vector<8x8xf32>
    %221 = arith.mulf %216, %220 : vector<8x8xf32>
    %222 = arith.truncf %221 : vector<8x8xf32> to vector<8x8xbf16>
    %cst_86 = arith.constant dense<0.000000e+00> : vector<8x16xf32>
    %223 = tpu.matmul %222, %206, %cst_86 {dimension_numbers = #tpu.dot_dimension_numbers<[1], [0], [0], [1], [0, 0, 1, 1], [], []>} : vector<8x8xbf16>, vector<8x16xbf16>, vector<8x16xf32> -> vector<8x16xf32>
    %224 = arith.truncf %223 : vector<8x16xf32> to vector<8x16xbf16>
    %225 = vector.extract_strided_slice %9 {offsets = [32, 0], sizes = [16, 64], strides = [1, 1]} : vector<64x64xbf16> to vector<16x64xbf16>
    %cst_87 = arith.constant dense<0.000000e+00> : vector<8x64xf32>
    %226 = tpu.matmul %224, %225, %cst_87 {dimension_numbers = #tpu.dot_dimension_numbers<[1], [0], [0], [1], [0, 0, 1, 1], [], []>} : vector<8x16xbf16>, vector<16x64xbf16>, vector<8x64xf32> -> vector<8x64xf32>
    %227 = arith.addf %203, %226 : vector<8x64xf32>
    %228 = vector.extract_strided_slice %57 {offsets = [8, 48], sizes = [8, 16], strides = [1, 1]} : vector<16x192xbf16> to vector<8x16xbf16>
    %229 = vector.extract_strided_slice %57 {offsets = [8, 112], sizes = [8, 16], strides = [1, 1]} : vector<16x192xbf16> to vector<8x16xbf16>
    %230 = vector.extract_strided_slice %57 {offsets = [8, 176], sizes = [8, 16], strides = [1, 1]} : vector<16x192xbf16> to vector<8x16xbf16>
    %cst_88 = arith.constant dense<0.000000e+00> : vector<8x8xf32>
    %231 = tpu.matmul %228, %229, %cst_88 {dimension_numbers = #tpu.dot_dimension_numbers<[1], [1], [0], [0], [0, 0, 1, 0], [], []>} : vector<8x16xbf16>, vector<8x16xbf16>, vector<8x8xf32> -> vector<8x8xf32>
    %cst_89 = arith.constant 2.500000e-01 : f32
    %232 = vector.broadcast %cst_89 : f32 to vector<8x8xf32>
    %233 = arith.mulf %231, %232 : vector<8x8xf32>
    %234 = vector.broadcast %30 : vector<1x8xf32> to vector<8x8xf32>
    %235 = arith.addf %233, %234 : vector<8x8xf32>
    %cst_90 = arith.constant dense<0xFF800000> : vector<8xf32>
    %236 = vector.multi_reduction <maximumf>, %235, %cst_90 [1] : vector<8x8xf32> to vector<8xf32>
    %237 = vector.shape_cast %236 : vector<8xf32> to vector<8x1xf32>
    %238 = vector.broadcast %237 : vector<8x1xf32> to vector<8x8xf32>
    %239 = arith.subf %235, %238 : vector<8x8xf32>
    %240 = math.exp %239 : vector<8x8xf32>
    %cst_91 = arith.constant dense<0.000000e+00> : vector<8xf32>
    %241 = vector.multi_reduction <add>, %240, %cst_91 [1] : vector<8x8xf32> to vector<8xf32>
    %242 = vector.shape_cast %241 : vector<8xf32> to vector<8x1xf32>
    %243 = tpu.reciprocal %242 {approx = true} : vector<8x1xf32> -> vector<8x1xf32>
    %244 = vector.broadcast %243 : vector<8x1xf32> to vector<8x8xf32>
    %245 = arith.mulf %240, %244 : vector<8x8xf32>
    %246 = arith.truncf %245 : vector<8x8xf32> to vector<8x8xbf16>
    %cst_92 = arith.constant dense<0.000000e+00> : vector<8x16xf32>
    %247 = tpu.matmul %246, %230, %cst_92 {dimension_numbers = #tpu.dot_dimension_numbers<[1], [0], [0], [1], [0, 0, 1, 1], [], []>} : vector<8x8xbf16>, vector<8x16xbf16>, vector<8x16xf32> -> vector<8x16xf32>
    %248 = arith.truncf %247 : vector<8x16xf32> to vector<8x16xbf16>
    %249 = vector.extract_strided_slice %9 {offsets = [48, 0], sizes = [16, 64], strides = [1, 1]} : vector<64x64xbf16> to vector<16x64xbf16>
    %cst_93 = arith.constant dense<0.000000e+00> : vector<8x64xf32>
    %250 = tpu.matmul %248, %249, %cst_93 {dimension_numbers = #tpu.dot_dimension_numbers<[1], [0], [0], [1], [0, 0, 1, 1], [], []>} : vector<8x16xbf16>, vector<16x64xbf16>, vector<8x64xf32> -> vector<8x64xf32>
    %251 = arith.addf %227, %250 : vector<8x64xf32>
    %252 = tpu.concatenate %154, %251 in 0 : vector<8x64xf32>, vector<8x64xf32> -> vector<16x64xf32>
    %253 = arith.addf %24, %252 : vector<16x64xf32>
    %254 = vector.broadcast %11 : vector<1x64xf32> to vector<16x64xf32>
    %255 = arith.addf %253, %254 : vector<16x64xf32>
    %cst_94 = arith.constant dense<0.000000e+00> : vector<16xf32>
    %256 = vector.multi_reduction <add>, %255, %cst_94 [1] : vector<16x64xf32> to vector<16xf32>
    %257 = vector.shape_cast %256 : vector<16xf32> to vector<16x1xf32>
    %cst_95 = arith.constant 6.400000e+01 : f32
    %258 = vector.broadcast %cst_95 : f32 to vector<16x1xf32>
    %259 = arith.divf %257, %258 : vector<16x1xf32>
    %260 = vector.broadcast %259 : vector<16x1xf32> to vector<16x64xf32>
    %261 = arith.subf %255, %260 : vector<16x64xf32>
    %262 = arith.mulf %261, %261 : vector<16x64xf32>
    %cst_96 = arith.constant dense<0.000000e+00> : vector<16xf32>
    %263 = vector.multi_reduction <add>, %262, %cst_96 [1] : vector<16x64xf32> to vector<16xf32>
    %264 = vector.shape_cast %263 : vector<16xf32> to vector<16x1xf32>
    %cst_97 = arith.constant 6.400000e+01 : f32
    %265 = vector.broadcast %cst_97 : f32 to vector<16x1xf32>
    %266 = arith.divf %264, %265 : vector<16x1xf32>
    %267 = vector.broadcast %259 : vector<16x1xf32> to vector<16x64xf32>
    %268 = arith.subf %255, %267 : vector<16x64xf32>
    %cst_98 = arith.constant 9.99999997E-7 : f32
    %269 = vector.broadcast %cst_98 : f32 to vector<16x1xf32>
    %270 = arith.addf %266, %269 : vector<16x1xf32>
    %271 = math.rsqrt %270 : vector<16x1xf32>
    %272 = vector.broadcast %271 : vector<16x1xf32> to vector<16x64xf32>
    %273 = arith.mulf %268, %272 : vector<16x64xf32>
    %274 = vector.broadcast %13 : vector<1x64xf32> to vector<16x64xf32>
    %275 = arith.mulf %273, %274 : vector<16x64xf32>
    %276 = vector.broadcast %15 : vector<1x64xf32> to vector<16x64xf32>
    %277 = arith.addf %275, %276 : vector<16x64xf32>
    %278 = arith.truncf %277 : vector<16x64xf32> to vector<16x64xbf16>
    %cst_99 = arith.constant dense<0.000000e+00> : vector<16x256xf32>
    %279 = tpu.matmul %278, %17, %cst_99 {dimension_numbers = #tpu.dot_dimension_numbers<[1], [0], [0], [1], [0, 0, 1, 1], [], []>} : vector<16x64xbf16>, vector<64x256xbf16>, vector<16x256xf32> -> vector<16x256xf32>
    %280 = vector.broadcast %19 : vector<1x256xf32> to vector<16x256xf32>
    %281 = arith.addf %279, %280 : vector<16x256xf32>
    %282 = arith.mulf %281, %281 : vector<16x256xf32>
    %283 = arith.mulf %281, %282 : vector<16x256xf32>
    %cst_100 = arith.constant 4.471500e-02 : f32
    %284 = vector.broadcast %cst_100 : f32 to vector<16x256xf32>
    %285 = arith.mulf %284, %283 : vector<16x256xf32>
    %286 = arith.addf %281, %285 : vector<16x256xf32>
    %cst_101 = arith.constant 0.797884583 : f32
    %287 = vector.broadcast %cst_101 : f32 to vector<16x256xf32>
    %288 = arith.mulf %287, %286 : vector<16x256xf32>
    %289 = math.tanh %288 : vector<16x256xf32>
    %cst_102 = arith.constant 1.000000e+00 : f32
    %290 = vector.broadcast %cst_102 : f32 to vector<16x256xf32>
    %291 = arith.addf %290, %289 : vector<16x256xf32>
    %cst_103 = arith.constant 5.000000e-01 : f32
    %292 = vector.broadcast %cst_103 : f32 to vector<16x256xf32>
    %293 = arith.mulf %292, %291 : vector<16x256xf32>
    %294 = arith.mulf %281, %293 : vector<16x256xf32>
    %295 = arith.truncf %294 : vector<16x256xf32> to vector<16x256xbf16>
    %cst_104 = arith.constant dense<0.000000e+00> : vector<16x64xf32>
    %296 = tpu.matmul %295, %21, %cst_104 {dimension_numbers = #tpu.dot_dimension_numbers<[1], [0], [0], [1], [0, 0, 1, 1], [], []>} : vector<16x256xbf16>, vector<256x64xbf16>, vector<16x64xf32> -> vector<16x64xf32>
    %297 = vector.broadcast %23 : vector<1x64xf32> to vector<16x64xf32>
    %298 = arith.addf %296, %297 : vector<16x64xf32>
    %299 = arith.addf %255, %298 : vector<16x64xf32>
    %300 = arith.truncf %299 : vector<16x64xf32> to vector<16x64xbf16>
    %c0_105 = arith.constant 0 : index
    %c0_106 = arith.constant 0 : index
    %c0_107 = arith.constant 0 : index
    %301 = vector.load %arg14[%c0_105, %c0_106, %c0_107] : memref<1x64x32xbf16, #tpu.memory_space<vmem>>, vector<1x64x32xbf16>
    %302 = vector.shape_cast %301 : vector<1x64x32xbf16> to vector<64x32xbf16>
    %cst_108 = arith.constant dense<0.000000e+00> : vector<16x32xf32>
    %303 = tpu.matmul %300, %302, %cst_108 {dimension_numbers = #tpu.dot_dimension_numbers<[1], [0], [0], [1], [0, 0, 1, 1], [], []>} : vector<16x64xbf16>, vector<64x32xbf16>, vector<16x32xf32> -> vector<16x32xf32>
    %c0_109 = arith.constant 0 : index
    %c0_110 = arith.constant 0 : index
    %c0_111 = arith.constant 0 : index
    %304 = vector.load %arg15[%c0_109, %c0_110, %c0_111] : memref<1x1x32xf32, #tpu.memory_space<vmem>>, vector<1x1x32xf32>
    %305 = vector.shape_cast %304 : vector<1x1x32xf32> to vector<1x32xf32>
    %306 = vector.broadcast %305 : vector<1x32xf32> to vector<16x32xf32>
    %307 = arith.addf %303, %306 : vector<16x32xf32>
    %c0_112 = arith.constant 0 : index
    %c0_113 = arith.constant 0 : index
    %c0_114 = arith.constant 0 : index
    %308 = vector.load %arg16[%c0_112, %c0_113, %c0_114] : memref<1x16x32xf32, #tpu.memory_space<vmem>>, vector<1x16x32xf32>
    %309 = vector.shape_cast %308 : vector<1x16x32xf32> to vector<16x32xf32>
    %310 = vector.shape_cast %307 : vector<16x32xf32> to vector<1x16x32xf32>
    tpu.vector_store %arg16[%c0_112, %c0_113, %c0_114], %310 {strides = array<i32>} : memref<1x16x32xf32, #tpu.memory_space<vmem>>, vector<1x16x32xf32>,
    return
  }
  func.func @transform_0(%arg0: i32) -> (i32, i32) {
    %c0_i32 = arith.constant 0 : i32
    %c0_i32_0 = arith.constant 0 : i32
    %c0_i32_1 = arith.constant 0 : i32
    return %c0_i32, %c0_i32_0 : i32, i32
  }
  func.func @transform_1(%arg0: i32) -> (i32, i32, i32) {
    %c0_i32 = arith.constant 0 : i32
    %c0_i32_0 = arith.constant 0 : i32
    %c0_i32_1 = arith.constant 0 : i32
    return %arg0, %c0_i32, %c0_i32_0 : i32, i32, i32
  }
  func.func @transform_2(%arg0: i32) -> (i32, i32, i32) {
    %c0_i32 = arith.constant 0 : i32
    %c0_i32_0 = arith.constant 0 : i32
    %c0_i32_1 = arith.constant 0 : i32
    return %arg0, %c0_i32, %c0_i32_0 : i32, i32, i32
  }
  func.func @transform_3(%arg0: i32) -> (i32, i32, i32) {
    %c0_i32 = arith.constant 0 : i32
    %c0_i32_0 = arith.constant 0 : i32
    %c0_i32_1 = arith.constant 0 : i32
    return %arg0, %c0_i32, %c0_i32_0 : i32, i32, i32
  }
  func.func @transform_4(%arg0: i32) -> (i32, i32, i32) {
    %c0_i32 = arith.constant 0 : i32
    %c0_i32_0 = arith.constant 0 : i32
    %c0_i32_1 = arith.constant 0 : i32
    return %arg0, %c0_i32, %c0_i32_0 : i32, i32, i32
  }
  func.func @transform_5(%arg0: i32) -> (i32, i32, i32) {
    %c0_i32 = arith.constant 0 : i32
    %c0_i32_0 = arith.constant 0 : i32
    %c0_i32_1 = arith.constant 0 : i32
    return %arg0, %c0_i32, %c0_i32_0 : i32, i32, i32
  }
  func.func @transform_6(%arg0: i32) -> (i32, i32, i32) {
    %c0_i32 = arith.constant 0 : i32
    %c0_i32_0 = arith.constant 0 : i32
    %c0_i32_1 = arith.constant 0 : i32
    return %arg0, %c0_i32, %c0_i32_0 : i32, i32, i32
  }
  func.func @transform_7(%arg0: i32) -> (i32, i32, i32) {
    %c0_i32 = arith.constant 0 : i32
    %c0_i32_0 = arith.constant 0 : i32
    %c0_i32_1 = arith.constant 0 : i32
    return %arg0, %c0_i32, %c0_i32_0 : i32, i32, i32
  }
  func.func @transform_8(%arg0: i32) -> (i32, i32, i32) {
    %c0_i32 = arith.constant 0 : i32
    %c0_i32_0 = arith.constant 0 : i32
    %c0_i32_1 = arith.constant 0 : i32
    return %arg0, %c0_i32, %c0_i32_0 : i32, i32, i32
  }
  func.func @transform_9(%arg0: i32) -> (i32, i32, i32) {
    %c0_i32 = arith.constant 0 : i32
    %c0_i32_0 = arith.constant 0 : i32
    %c0_i32_1 = arith.constant 0 : i32
    return %arg0, %c0_i32, %c0_i32_0 : i32, i32, i32
  }
  func.func @transform_10(%arg0: i32) -> (i32, i32, i32) {
    %c0_i32 = arith.constant 0 : i32
    %c0_i32_0 = arith.constant 0 : i32
    %c0_i32_1 = arith.constant 0 : i32
    return %arg0, %c0_i32, %c0_i32_0 : i32, i32, i32
  }
  func.func @transform_11(%arg0: i32) -> (i32, i32, i32) {
    %c0_i32 = arith.constant 0 : i32
    %c0_i32_0 = arith.constant 0 : i32
    %c0_i32_1 = arith.constant 0 : i32
    return %arg0, %c0_i32, %c0_i32_0 : i32, i32, i32
  }
  func.func @transform_12(%arg0: i32) -> (i32, i32, i32) {
    %c0_i32 = arith.constant 0 : i32
    %c0_i32_0 = arith.constant 0 : i32
    %c0_i32_1 = arith.constant 0 : i32
    return %arg0, %c0_i32, %c0_i32_0 : i32, i32, i32
  }
  func.func @transform_13(%arg0: i32) -> (i32, i32, i32) {
    %c0_i32 = arith.constant 0 : i32
    %c0_i32_0 = arith.constant 0 : i32
    %c0_i32_1 = arith.constant 0 : i32
    return %arg0, %c0_i32, %c0_i32_0 : i32, i32, i32
  }
  func.func @transform_14(%arg0: i32) -> (i32, i32, i32) {
    %c0_i32 = arith.constant 0 : i32
    %c0_i32_0 = arith.constant 0 : i32
    %c0_i32_1 = arith.constant 0 : i32
    return %arg0, %c0_i32, %c0_i32_0 : i32, i32, i32
  }
  func.func @transform_15(%arg0: i32) -> (i32, i32, i32) {
    %c0_i32 = arith.constant 0 : i32
    %c0_i32_0 = arith.constant 0 : i32
    %c0_i32_1 = arith.constant 0 : i32
    return %arg0, %c0_i32, %c0_i32_0 : i32, i32, i32
  }
}

module attributes {stable_mosaic.version = 11 : i64} {
  func.func @tail_kernel(%arg0: i32, %arg1: memref<1x16x32xf32, #tpu.memory_space<vmem>>, %arg2: memref<1x32xf32, #tpu.memory_space<vmem>>, %arg3: memref<1x32xf32, #tpu.memory_space<vmem>>, %arg4: memref<32x96xbf16, #tpu.memory_space<vmem>>, %arg5: memref<1x96xf32, #tpu.memory_space<vmem>>, %arg6: memref<32x32xbf16, #tpu.memory_space<vmem>>, %arg7: memref<1x32xf32, #tpu.memory_space<vmem>>, %arg8: memref<1x32xf32, #tpu.memory_space<vmem>>, %arg9: memref<1x32xf32, #tpu.memory_space<vmem>>, %arg10: memref<32x128xbf16, #tpu.memory_space<vmem>>, %arg11: memref<1x128xf32, #tpu.memory_space<vmem>>, %arg12: memref<128x32xbf16, #tpu.memory_space<vmem>>, %arg13: memref<1x32xf32, #tpu.memory_space<vmem>>, %arg14: memref<32x14xbf16, #tpu.memory_space<vmem>>, %arg15: memref<1x14xf32, #tpu.memory_space<vmem>>, %arg16: memref<1x2x14xf32, #tpu.memory_space<vmem>>, %arg17: memref<1x2x14xf32, #tpu.memory_space<vmem>>) attributes {dimension_semantics = [#tpu.dimension_semantics<parallel>], iteration_bounds = array<i64: 4>, scalar_prefetch = 0 : i64, scratch_operands = 0 : i64, tpu.core_type = #tpu.core_type<tc>, window_params = [{transform_indices = @transform_0, window_bounds = array<i64: 1, 16, 32>}, {pipeline_mode = #tpu.pipeline_mode<synchronous>, transform_indices = @transform_1, window_bounds = array<i64: 1, 32>}, {pipeline_mode = #tpu.pipeline_mode<synchronous>, transform_indices = @transform_2, window_bounds = array<i64: 1, 32>}, {pipeline_mode = #tpu.pipeline_mode<synchronous>, transform_indices = @transform_3, window_bounds = array<i64: 32, 96>}, {pipeline_mode = #tpu.pipeline_mode<synchronous>, transform_indices = @transform_4, window_bounds = array<i64: 1, 96>}, {pipeline_mode = #tpu.pipeline_mode<synchronous>, transform_indices = @transform_5, window_bounds = array<i64: 32, 32>}, {pipeline_mode = #tpu.pipeline_mode<synchronous>, transform_indices = @transform_6, window_bounds = array<i64: 1, 32>}, {pipeline_mode = #tpu.pipeline_mode<synchronous>, transform_indices = @transform_7, window_bounds = array<i64: 1, 32>}, {pipeline_mode = #tpu.pipeline_mode<synchronous>, transform_indices = @transform_8, window_bounds = array<i64: 1, 32>}, {pipeline_mode = #tpu.pipeline_mode<synchronous>, transform_indices = @transform_9, window_bounds = array<i64: 32, 128>}, {pipeline_mode = #tpu.pipeline_mode<synchronous>, transform_indices = @transform_10, window_bounds = array<i64: 1, 128>}, {pipeline_mode = #tpu.pipeline_mode<synchronous>, transform_indices = @transform_11, window_bounds = array<i64: 128, 32>}, {pipeline_mode = #tpu.pipeline_mode<synchronous>, transform_indices = @transform_12, window_bounds = array<i64: 1, 32>}, {pipeline_mode = #tpu.pipeline_mode<synchronous>, transform_indices = @transform_13, window_bounds = array<i64: 32, 14>}, {pipeline_mode = #tpu.pipeline_mode<synchronous>, transform_indices = @transform_14, window_bounds = array<i64: 1, 14>}, {transform_indices = @transform_15, window_bounds = array<i64: 1, 2, 14>}, {transform_indices = @transform_16, window_bounds = array<i64: 1, 2, 14>}]} {
    %c0 = arith.constant 0 : index
    %c0_0 = arith.constant 0 : index
    %0 = vector.load %arg2[%c0, %c0_0] : memref<1x32xf32, #tpu.memory_space<vmem>>, vector<1x32xf32>
    %c0_1 = arith.constant 0 : index
    %c0_2 = arith.constant 0 : index
    %1 = vector.load %arg3[%c0_1, %c0_2] : memref<1x32xf32, #tpu.memory_space<vmem>>, vector<1x32xf32>
    %c0_3 = arith.constant 0 : index
    %c0_4 = arith.constant 0 : index
    %2 = vector.load %arg4[%c0_3, %c0_4] : memref<32x96xbf16, #tpu.memory_space<vmem>>, vector<32x96xbf16>
    %c0_5 = arith.constant 0 : index
    %c0_6 = arith.constant 0 : index
    %3 = vector.load %arg5[%c0_5, %c0_6] : memref<1x96xf32, #tpu.memory_space<vmem>>, vector<1x96xf32>
    %c0_7 = arith.constant 0 : index
    %c0_8 = arith.constant 0 : index
    %4 = vector.load %arg6[%c0_7, %c0_8] : memref<32x32xbf16, #tpu.memory_space<vmem>>, vector<32x32xbf16>
    %c0_9 = arith.constant 0 : index
    %c0_10 = arith.constant 0 : index
    %5 = vector.load %arg7[%c0_9, %c0_10] : memref<1x32xf32, #tpu.memory_space<vmem>>, vector<1x32xf32>
    %c0_11 = arith.constant 0 : index
    %c0_12 = arith.constant 0 : index
    %6 = vector.load %arg8[%c0_11, %c0_12] : memref<1x32xf32, #tpu.memory_space<vmem>>, vector<1x32xf32>
    %c0_13 = arith.constant 0 : index
    %c0_14 = arith.constant 0 : index
    %7 = vector.load %arg9[%c0_13, %c0_14] : memref<1x32xf32, #tpu.memory_space<vmem>>, vector<1x32xf32>
    %c0_15 = arith.constant 0 : index
    %c0_16 = arith.constant 0 : index
    %8 = vector.load %arg10[%c0_15, %c0_16] : memref<32x128xbf16, #tpu.memory_space<vmem>>, vector<32x128xbf16>
    %c0_17 = arith.constant 0 : index
    %c0_18 = arith.constant 0 : index
    %9 = vector.load %arg11[%c0_17, %c0_18] : memref<1x128xf32, #tpu.memory_space<vmem>>, vector<1x128xf32>
    %c0_19 = arith.constant 0 : index
    %c0_20 = arith.constant 0 : index
    %10 = vector.load %arg12[%c0_19, %c0_20] : memref<128x32xbf16, #tpu.memory_space<vmem>>, vector<128x32xbf16>
    %c0_21 = arith.constant 0 : index
    %c0_22 = arith.constant 0 : index
    %11 = vector.load %arg13[%c0_21, %c0_22] : memref<1x32xf32, #tpu.memory_space<vmem>>, vector<1x32xf32>
    %c0_23 = arith.constant 0 : index
    %c0_24 = arith.constant 0 : index
    %c0_25 = arith.constant 0 : index
    %12 = vector.load %arg1[%c0_23, %c0_24, %c0_25] : memref<1x16x32xf32, #tpu.memory_space<vmem>>, vector<1x16x32xf32>
    %13 = vector.shape_cast %12 : vector<1x16x32xf32> to vector<16x32xf32>
    %14 = tpu.iota {dimensions = array<i32: 1>} : vector<1x8xi32>
    %c5_i32 = arith.constant 5 : i32
    %15 = vector.broadcast %c5_i32 : i32 to vector<1x8xi32>
    %16 = arith.cmpi slt, %14, %15 : vector<1x8xi32>
    %cst = arith.constant 0.000000e+00 : f32
    %cst_26 = arith.constant -1.000000e+30 : f32
    %17 = vector.broadcast %cst : f32 to vector<1x8xf32>
    %18 = vector.broadcast %cst_26 : f32 to vector<1x8xf32>
    %19 = arith.select %16, %17, %18 : vector<1x8xi1>, vector<1x8xf32>
    %cst_27 = arith.constant dense<0.000000e+00> : vector<16xf32>
    %20 = vector.multi_reduction <add>, %13, %cst_27 [1] : vector<16x32xf32> to vector<16xf32>
    %21 = vector.shape_cast %20 : vector<16xf32> to vector<16x1xf32>
    %cst_28 = arith.constant 3.200000e+01 : f32
    %22 = vector.broadcast %cst_28 : f32 to vector<16x1xf32>
    %23 = arith.divf %21, %22 : vector<16x1xf32>
    %24 = vector.broadcast %23 : vector<16x1xf32> to vector<16x32xf32>
    %25 = arith.subf %13, %24 : vector<16x32xf32>
    %26 = arith.mulf %25, %25 : vector<16x32xf32>
    %cst_29 = arith.constant dense<0.000000e+00> : vector<16xf32>
    %27 = vector.multi_reduction <add>, %26, %cst_29 [1] : vector<16x32xf32> to vector<16xf32>
    %28 = vector.shape_cast %27 : vector<16xf32> to vector<16x1xf32>
    %cst_30 = arith.constant 3.200000e+01 : f32
    %29 = vector.broadcast %cst_30 : f32 to vector<16x1xf32>
    %30 = arith.divf %28, %29 : vector<16x1xf32>
    %31 = vector.broadcast %23 : vector<16x1xf32> to vector<16x32xf32>
    %32 = arith.subf %13, %31 : vector<16x32xf32>
    %cst_31 = arith.constant 9.99999997E-7 : f32
    %33 = vector.broadcast %cst_31 : f32 to vector<16x1xf32>
    %34 = arith.addf %30, %33 : vector<16x1xf32>
    %35 = math.rsqrt %34 : vector<16x1xf32>
    %36 = vector.broadcast %35 : vector<16x1xf32> to vector<16x32xf32>
    %37 = arith.mulf %32, %36 : vector<16x32xf32>
    %38 = vector.broadcast %0 : vector<1x32xf32> to vector<16x32xf32>
    %39 = arith.mulf %37, %38 : vector<16x32xf32>
    %40 = vector.broadcast %1 : vector<1x32xf32> to vector<16x32xf32>
    %41 = arith.addf %39, %40 : vector<16x32xf32>
    %42 = arith.truncf %41 : vector<16x32xf32> to vector<16x32xbf16>
    %cst_32 = arith.constant dense<0.000000e+00> : vector<16x96xf32>
    %43 = tpu.matmul %42, %2, %cst_32 {dimension_numbers = #tpu.dot_dimension_numbers<[1], [0], [0], [1], [0, 0, 1, 1], [], []>} : vector<16x32xbf16>, vector<32x96xbf16>, vector<16x96xf32> -> vector<16x96xf32>
    %44 = vector.broadcast %3 : vector<1x96xf32> to vector<16x96xf32>
    %45 = arith.addf %43, %44 : vector<16x96xf32>
    %46 = arith.truncf %45 : vector<16x96xf32> to vector<16x96xbf16>
    %cst_33 = arith.constant 0.000000e+00 : f32
    %47 = vector.broadcast %cst_33 : f32 to vector<8x32xf32>
    %48 = vector.extract_strided_slice %46 {offsets = [0, 0], sizes = [8, 8], strides = [1, 1]} : vector<16x96xbf16> to vector<8x8xbf16>
    %49 = vector.extract_strided_slice %46 {offsets = [0, 32], sizes = [8, 8], strides = [1, 1]} : vector<16x96xbf16> to vector<8x8xbf16>
    %50 = vector.extract_strided_slice %46 {offsets = [0, 64], sizes = [8, 8], strides = [1, 1]} : vector<16x96xbf16> to vector<8x8xbf16>
    %cst_34 = arith.constant dense<0.000000e+00> : vector<8x8xf32>
    %51 = tpu.matmul %48, %49, %cst_34 {dimension_numbers = #tpu.dot_dimension_numbers<[1], [1], [0], [0], [0, 0, 1, 0], [], []>} : vector<8x8xbf16>, vector<8x8xbf16>, vector<8x8xf32> -> vector<8x8xf32>
    %cst_35 = arith.constant 0.353553385 : f32
    %52 = vector.broadcast %cst_35 : f32 to vector<8x8xf32>
    %53 = arith.mulf %51, %52 : vector<8x8xf32>
    %54 = vector.broadcast %19 : vector<1x8xf32> to vector<8x8xf32>
    %55 = arith.addf %53, %54 : vector<8x8xf32>
    %cst_36 = arith.constant dense<0xFF800000> : vector<8xf32>
    %56 = vector.multi_reduction <maximumf>, %55, %cst_36 [1] : vector<8x8xf32> to vector<8xf32>
    %57 = vector.shape_cast %56 : vector<8xf32> to vector<8x1xf32>
    %58 = vector.broadcast %57 : vector<8x1xf32> to vector<8x8xf32>
    %59 = arith.subf %55, %58 : vector<8x8xf32>
    %60 = math.exp %59 : vector<8x8xf32>
    %cst_37 = arith.constant dense<0.000000e+00> : vector<8xf32>
    %61 = vector.multi_reduction <add>, %60, %cst_37 [1] : vector<8x8xf32> to vector<8xf32>
    %62 = vector.shape_cast %61 : vector<8xf32> to vector<8x1xf32>
    %63 = tpu.reciprocal %62 {approx = true} : vector<8x1xf32> -> vector<8x1xf32>
    %64 = vector.broadcast %63 : vector<8x1xf32> to vector<8x8xf32>
    %65 = arith.mulf %60, %64 : vector<8x8xf32>
    %66 = arith.truncf %65 : vector<8x8xf32> to vector<8x8xbf16>
    %cst_38 = arith.constant dense<0.000000e+00> : vector<8x8xf32>
    %67 = tpu.matmul %66, %50, %cst_38 {dimension_numbers = #tpu.dot_dimension_numbers<[1], [0], [0], [1], [0, 0, 1, 1], [], []>} : vector<8x8xbf16>, vector<8x8xbf16>, vector<8x8xf32> -> vector<8x8xf32>
    %68 = arith.truncf %67 : vector<8x8xf32> to vector<8x8xbf16>
    %69 = vector.extract_strided_slice %4 {offsets = [0, 0], sizes = [8, 32], strides = [1, 1]} : vector<32x32xbf16> to vector<8x32xbf16>
    %cst_39 = arith.constant dense<0.000000e+00> : vector<8x32xf32>
    %70 = tpu.matmul %68, %69, %cst_39 {dimension_numbers = #tpu.dot_dimension_numbers<[1], [0], [0], [1], [0, 0, 1, 1], [], []>} : vector<8x8xbf16>, vector<8x32xbf16>, vector<8x32xf32> -> vector<8x32xf32>
    %71 = arith.addf %47, %70 : vector<8x32xf32>
    %72 = vector.extract_strided_slice %46 {offsets = [0, 8], sizes = [8, 8], strides = [1, 1]} : vector<16x96xbf16> to vector<8x8xbf16>
    %73 = vector.extract_strided_slice %46 {offsets = [0, 40], sizes = [8, 8], strides = [1, 1]} : vector<16x96xbf16> to vector<8x8xbf16>
    %74 = vector.extract_strided_slice %46 {offsets = [0, 72], sizes = [8, 8], strides = [1, 1]} : vector<16x96xbf16> to vector<8x8xbf16>
    %cst_40 = arith.constant dense<0.000000e+00> : vector<8x8xf32>
    %75 = tpu.matmul %72, %73, %cst_40 {dimension_numbers = #tpu.dot_dimension_numbers<[1], [1], [0], [0], [0, 0, 1, 0], [], []>} : vector<8x8xbf16>, vector<8x8xbf16>, vector<8x8xf32> -> vector<8x8xf32>
    %cst_41 = arith.constant 0.353553385 : f32
    %76 = vector.broadcast %cst_41 : f32 to vector<8x8xf32>
    %77 = arith.mulf %75, %76 : vector<8x8xf32>
    %78 = vector.broadcast %19 : vector<1x8xf32> to vector<8x8xf32>
    %79 = arith.addf %77, %78 : vector<8x8xf32>
    %cst_42 = arith.constant dense<0xFF800000> : vector<8xf32>
    %80 = vector.multi_reduction <maximumf>, %79, %cst_42 [1] : vector<8x8xf32> to vector<8xf32>
    %81 = vector.shape_cast %80 : vector<8xf32> to vector<8x1xf32>
    %82 = vector.broadcast %81 : vector<8x1xf32> to vector<8x8xf32>
    %83 = arith.subf %79, %82 : vector<8x8xf32>
    %84 = math.exp %83 : vector<8x8xf32>
    %cst_43 = arith.constant dense<0.000000e+00> : vector<8xf32>
    %85 = vector.multi_reduction <add>, %84, %cst_43 [1] : vector<8x8xf32> to vector<8xf32>
    %86 = vector.shape_cast %85 : vector<8xf32> to vector<8x1xf32>
    %87 = tpu.reciprocal %86 {approx = true} : vector<8x1xf32> -> vector<8x1xf32>
    %88 = vector.broadcast %87 : vector<8x1xf32> to vector<8x8xf32>
    %89 = arith.mulf %84, %88 : vector<8x8xf32>
    %90 = arith.truncf %89 : vector<8x8xf32> to vector<8x8xbf16>
    %cst_44 = arith.constant dense<0.000000e+00> : vector<8x8xf32>
    %91 = tpu.matmul %90, %74, %cst_44 {dimension_numbers = #tpu.dot_dimension_numbers<[1], [0], [0], [1], [0, 0, 1, 1], [], []>} : vector<8x8xbf16>, vector<8x8xbf16>, vector<8x8xf32> -> vector<8x8xf32>
    %92 = arith.truncf %91 : vector<8x8xf32> to vector<8x8xbf16>
    %93 = vector.extract_strided_slice %4 {offsets = [8, 0], sizes = [8, 32], strides = [1, 1]} : vector<32x32xbf16> to vector<8x32xbf16>
    %cst_45 = arith.constant dense<0.000000e+00> : vector<8x32xf32>
    %94 = tpu.matmul %92, %93, %cst_45 {dimension_numbers = #tpu.dot_dimension_numbers<[1], [0], [0], [1], [0, 0, 1, 1], [], []>} : vector<8x8xbf16>, vector<8x32xbf16>, vector<8x32xf32> -> vector<8x32xf32>
    %95 = arith.addf %71, %94 : vector<8x32xf32>
    %96 = vector.extract_strided_slice %46 {offsets = [0, 16], sizes = [8, 8], strides = [1, 1]} : vector<16x96xbf16> to vector<8x8xbf16>
    %97 = vector.extract_strided_slice %46 {offsets = [0, 48], sizes = [8, 8], strides = [1, 1]} : vector<16x96xbf16> to vector<8x8xbf16>
    %98 = vector.extract_strided_slice %46 {offsets = [0, 80], sizes = [8, 8], strides = [1, 1]} : vector<16x96xbf16> to vector<8x8xbf16>
    %cst_46 = arith.constant dense<0.000000e+00> : vector<8x8xf32>
    %99 = tpu.matmul %96, %97, %cst_46 {dimension_numbers = #tpu.dot_dimension_numbers<[1], [1], [0], [0], [0, 0, 1, 0], [], []>} : vector<8x8xbf16>, vector<8x8xbf16>, vector<8x8xf32> -> vector<8x8xf32>
    %cst_47 = arith.constant 0.353553385 : f32
    %100 = vector.broadcast %cst_47 : f32 to vector<8x8xf32>
    %101 = arith.mulf %99, %100 : vector<8x8xf32>
    %102 = vector.broadcast %19 : vector<1x8xf32> to vector<8x8xf32>
    %103 = arith.addf %101, %102 : vector<8x8xf32>
    %cst_48 = arith.constant dense<0xFF800000> : vector<8xf32>
    %104 = vector.multi_reduction <maximumf>, %103, %cst_48 [1] : vector<8x8xf32> to vector<8xf32>
    %105 = vector.shape_cast %104 : vector<8xf32> to vector<8x1xf32>
    %106 = vector.broadcast %105 : vector<8x1xf32> to vector<8x8xf32>
    %107 = arith.subf %103, %106 : vector<8x8xf32>
    %108 = math.exp %107 : vector<8x8xf32>
    %cst_49 = arith.constant dense<0.000000e+00> : vector<8xf32>
    %109 = vector.multi_reduction <add>, %108, %cst_49 [1] : vector<8x8xf32> to vector<8xf32>
    %110 = vector.shape_cast %109 : vector<8xf32> to vector<8x1xf32>
    %111 = tpu.reciprocal %110 {approx = true} : vector<8x1xf32> -> vector<8x1xf32>
    %112 = vector.broadcast %111 : vector<8x1xf32> to vector<8x8xf32>
    %113 = arith.mulf %108, %112 : vector<8x8xf32>
    %114 = arith.truncf %113 : vector<8x8xf32> to vector<8x8xbf16>
    %cst_50 = arith.constant dense<0.000000e+00> : vector<8x8xf32>
    %115 = tpu.matmul %114, %98, %cst_50 {dimension_numbers = #tpu.dot_dimension_numbers<[1], [0], [0], [1], [0, 0, 1, 1], [], []>} : vector<8x8xbf16>, vector<8x8xbf16>, vector<8x8xf32> -> vector<8x8xf32>
    %116 = arith.truncf %115 : vector<8x8xf32> to vector<8x8xbf16>
    %117 = vector.extract_strided_slice %4 {offsets = [16, 0], sizes = [8, 32], strides = [1, 1]} : vector<32x32xbf16> to vector<8x32xbf16>
    %cst_51 = arith.constant dense<0.000000e+00> : vector<8x32xf32>
    %118 = tpu.matmul %116, %117, %cst_51 {dimension_numbers = #tpu.dot_dimension_numbers<[1], [0], [0], [1], [0, 0, 1, 1], [], []>} : vector<8x8xbf16>, vector<8x32xbf16>, vector<8x32xf32> -> vector<8x32xf32>
    %119 = arith.addf %95, %118 : vector<8x32xf32>
    %120 = vector.extract_strided_slice %46 {offsets = [0, 24], sizes = [8, 8], strides = [1, 1]} : vector<16x96xbf16> to vector<8x8xbf16>
    %121 = vector.extract_strided_slice %46 {offsets = [0, 56], sizes = [8, 8], strides = [1, 1]} : vector<16x96xbf16> to vector<8x8xbf16>
    %122 = vector.extract_strided_slice %46 {offsets = [0, 88], sizes = [8, 8], strides = [1, 1]} : vector<16x96xbf16> to vector<8x8xbf16>
    %cst_52 = arith.constant dense<0.000000e+00> : vector<8x8xf32>
    %123 = tpu.matmul %120, %121, %cst_52 {dimension_numbers = #tpu.dot_dimension_numbers<[1], [1], [0], [0], [0, 0, 1, 0], [], []>} : vector<8x8xbf16>, vector<8x8xbf16>, vector<8x8xf32> -> vector<8x8xf32>
    %cst_53 = arith.constant 0.353553385 : f32
    %124 = vector.broadcast %cst_53 : f32 to vector<8x8xf32>
    %125 = arith.mulf %123, %124 : vector<8x8xf32>
    %126 = vector.broadcast %19 : vector<1x8xf32> to vector<8x8xf32>
    %127 = arith.addf %125, %126 : vector<8x8xf32>
    %cst_54 = arith.constant dense<0xFF800000> : vector<8xf32>
    %128 = vector.multi_reduction <maximumf>, %127, %cst_54 [1] : vector<8x8xf32> to vector<8xf32>
    %129 = vector.shape_cast %128 : vector<8xf32> to vector<8x1xf32>
    %130 = vector.broadcast %129 : vector<8x1xf32> to vector<8x8xf32>
    %131 = arith.subf %127, %130 : vector<8x8xf32>
    %132 = math.exp %131 : vector<8x8xf32>
    %cst_55 = arith.constant dense<0.000000e+00> : vector<8xf32>
    %133 = vector.multi_reduction <add>, %132, %cst_55 [1] : vector<8x8xf32> to vector<8xf32>
    %134 = vector.shape_cast %133 : vector<8xf32> to vector<8x1xf32>
    %135 = tpu.reciprocal %134 {approx = true} : vector<8x1xf32> -> vector<8x1xf32>
    %136 = vector.broadcast %135 : vector<8x1xf32> to vector<8x8xf32>
    %137 = arith.mulf %132, %136 : vector<8x8xf32>
    %138 = arith.truncf %137 : vector<8x8xf32> to vector<8x8xbf16>
    %cst_56 = arith.constant dense<0.000000e+00> : vector<8x8xf32>
    %139 = tpu.matmul %138, %122, %cst_56 {dimension_numbers = #tpu.dot_dimension_numbers<[1], [0], [0], [1], [0, 0, 1, 1], [], []>} : vector<8x8xbf16>, vector<8x8xbf16>, vector<8x8xf32> -> vector<8x8xf32>
    %140 = arith.truncf %139 : vector<8x8xf32> to vector<8x8xbf16>
    %141 = vector.extract_strided_slice %4 {offsets = [24, 0], sizes = [8, 32], strides = [1, 1]} : vector<32x32xbf16> to vector<8x32xbf16>
    %cst_57 = arith.constant dense<0.000000e+00> : vector<8x32xf32>
    %142 = tpu.matmul %140, %141, %cst_57 {dimension_numbers = #tpu.dot_dimension_numbers<[1], [0], [0], [1], [0, 0, 1, 1], [], []>} : vector<8x8xbf16>, vector<8x32xbf16>, vector<8x32xf32> -> vector<8x32xf32>
    %143 = arith.addf %119, %142 : vector<8x32xf32>
    %cst_58 = arith.constant 0.000000e+00 : f32
    %144 = vector.broadcast %cst_58 : f32 to vector<8x32xf32>
    %145 = vector.extract_strided_slice %46 {offsets = [8, 0], sizes = [8, 8], strides = [1, 1]} : vector<16x96xbf16> to vector<8x8xbf16>
    %146 = vector.extract_strided_slice %46 {offsets = [8, 32], sizes = [8, 8], strides = [1, 1]} : vector<16x96xbf16> to vector<8x8xbf16>
    %147 = vector.extract_strided_slice %46 {offsets = [8, 64], sizes = [8, 8], strides = [1, 1]} : vector<16x96xbf16> to vector<8x8xbf16>
    %cst_59 = arith.constant dense<0.000000e+00> : vector<8x8xf32>
    %148 = tpu.matmul %145, %146, %cst_59 {dimension_numbers = #tpu.dot_dimension_numbers<[1], [1], [0], [0], [0, 0, 1, 0], [], []>} : vector<8x8xbf16>, vector<8x8xbf16>, vector<8x8xf32> -> vector<8x8xf32>
    %cst_60 = arith.constant 0.353553385 : f32
    %149 = vector.broadcast %cst_60 : f32 to vector<8x8xf32>
    %150 = arith.mulf %148, %149 : vector<8x8xf32>
    %151 = vector.broadcast %19 : vector<1x8xf32> to vector<8x8xf32>
    %152 = arith.addf %150, %151 : vector<8x8xf32>
    %cst_61 = arith.constant dense<0xFF800000> : vector<8xf32>
    %153 = vector.multi_reduction <maximumf>, %152, %cst_61 [1] : vector<8x8xf32> to vector<8xf32>
    %154 = vector.shape_cast %153 : vector<8xf32> to vector<8x1xf32>
    %155 = vector.broadcast %154 : vector<8x1xf32> to vector<8x8xf32>
    %156 = arith.subf %152, %155 : vector<8x8xf32>
    %157 = math.exp %156 : vector<8x8xf32>
    %cst_62 = arith.constant dense<0.000000e+00> : vector<8xf32>
    %158 = vector.multi_reduction <add>, %157, %cst_62 [1] : vector<8x8xf32> to vector<8xf32>
    %159 = vector.shape_cast %158 : vector<8xf32> to vector<8x1xf32>
    %160 = tpu.reciprocal %159 {approx = true} : vector<8x1xf32> -> vector<8x1xf32>
    %161 = vector.broadcast %160 : vector<8x1xf32> to vector<8x8xf32>
    %162 = arith.mulf %157, %161 : vector<8x8xf32>
    %163 = arith.truncf %162 : vector<8x8xf32> to vector<8x8xbf16>
    %cst_63 = arith.constant dense<0.000000e+00> : vector<8x8xf32>
    %164 = tpu.matmul %163, %147, %cst_63 {dimension_numbers = #tpu.dot_dimension_numbers<[1], [0], [0], [1], [0, 0, 1, 1], [], []>} : vector<8x8xbf16>, vector<8x8xbf16>, vector<8x8xf32> -> vector<8x8xf32>
    %165 = arith.truncf %164 : vector<8x8xf32> to vector<8x8xbf16>
    %166 = vector.extract_strided_slice %4 {offsets = [0, 0], sizes = [8, 32], strides = [1, 1]} : vector<32x32xbf16> to vector<8x32xbf16>
    %cst_64 = arith.constant dense<0.000000e+00> : vector<8x32xf32>
    %167 = tpu.matmul %165, %166, %cst_64 {dimension_numbers = #tpu.dot_dimension_numbers<[1], [0], [0], [1], [0, 0, 1, 1], [], []>} : vector<8x8xbf16>, vector<8x32xbf16>, vector<8x32xf32> -> vector<8x32xf32>
    %168 = arith.addf %144, %167 : vector<8x32xf32>
    %169 = vector.extract_strided_slice %46 {offsets = [8, 8], sizes = [8, 8], strides = [1, 1]} : vector<16x96xbf16> to vector<8x8xbf16>
    %170 = vector.extract_strided_slice %46 {offsets = [8, 40], sizes = [8, 8], strides = [1, 1]} : vector<16x96xbf16> to vector<8x8xbf16>
    %171 = vector.extract_strided_slice %46 {offsets = [8, 72], sizes = [8, 8], strides = [1, 1]} : vector<16x96xbf16> to vector<8x8xbf16>
    %cst_65 = arith.constant dense<0.000000e+00> : vector<8x8xf32>
    %172 = tpu.matmul %169, %170, %cst_65 {dimension_numbers = #tpu.dot_dimension_numbers<[1], [1], [0], [0], [0, 0, 1, 0], [], []>} : vector<8x8xbf16>, vector<8x8xbf16>, vector<8x8xf32> -> vector<8x8xf32>
    %cst_66 = arith.constant 0.353553385 : f32
    %173 = vector.broadcast %cst_66 : f32 to vector<8x8xf32>
    %174 = arith.mulf %172, %173 : vector<8x8xf32>
    %175 = vector.broadcast %19 : vector<1x8xf32> to vector<8x8xf32>
    %176 = arith.addf %174, %175 : vector<8x8xf32>
    %cst_67 = arith.constant dense<0xFF800000> : vector<8xf32>
    %177 = vector.multi_reduction <maximumf>, %176, %cst_67 [1] : vector<8x8xf32> to vector<8xf32>
    %178 = vector.shape_cast %177 : vector<8xf32> to vector<8x1xf32>
    %179 = vector.broadcast %178 : vector<8x1xf32> to vector<8x8xf32>
    %180 = arith.subf %176, %179 : vector<8x8xf32>
    %181 = math.exp %180 : vector<8x8xf32>
    %cst_68 = arith.constant dense<0.000000e+00> : vector<8xf32>
    %182 = vector.multi_reduction <add>, %181, %cst_68 [1] : vector<8x8xf32> to vector<8xf32>
    %183 = vector.shape_cast %182 : vector<8xf32> to vector<8x1xf32>
    %184 = tpu.reciprocal %183 {approx = true} : vector<8x1xf32> -> vector<8x1xf32>
    %185 = vector.broadcast %184 : vector<8x1xf32> to vector<8x8xf32>
    %186 = arith.mulf %181, %185 : vector<8x8xf32>
    %187 = arith.truncf %186 : vector<8x8xf32> to vector<8x8xbf16>
    %cst_69 = arith.constant dense<0.000000e+00> : vector<8x8xf32>
    %188 = tpu.matmul %187, %171, %cst_69 {dimension_numbers = #tpu.dot_dimension_numbers<[1], [0], [0], [1], [0, 0, 1, 1], [], []>} : vector<8x8xbf16>, vector<8x8xbf16>, vector<8x8xf32> -> vector<8x8xf32>
    %189 = arith.truncf %188 : vector<8x8xf32> to vector<8x8xbf16>
    %190 = vector.extract_strided_slice %4 {offsets = [8, 0], sizes = [8, 32], strides = [1, 1]} : vector<32x32xbf16> to vector<8x32xbf16>
    %cst_70 = arith.constant dense<0.000000e+00> : vector<8x32xf32>
    %191 = tpu.matmul %189, %190, %cst_70 {dimension_numbers = #tpu.dot_dimension_numbers<[1], [0], [0], [1], [0, 0, 1, 1], [], []>} : vector<8x8xbf16>, vector<8x32xbf16>, vector<8x32xf32> -> vector<8x32xf32>
    %192 = arith.addf %168, %191 : vector<8x32xf32>
    %193 = vector.extract_strided_slice %46 {offsets = [8, 16], sizes = [8, 8], strides = [1, 1]} : vector<16x96xbf16> to vector<8x8xbf16>
    %194 = vector.extract_strided_slice %46 {offsets = [8, 48], sizes = [8, 8], strides = [1, 1]} : vector<16x96xbf16> to vector<8x8xbf16>
    %195 = vector.extract_strided_slice %46 {offsets = [8, 80], sizes = [8, 8], strides = [1, 1]} : vector<16x96xbf16> to vector<8x8xbf16>
    %cst_71 = arith.constant dense<0.000000e+00> : vector<8x8xf32>
    %196 = tpu.matmul %193, %194, %cst_71 {dimension_numbers = #tpu.dot_dimension_numbers<[1], [1], [0], [0], [0, 0, 1, 0], [], []>} : vector<8x8xbf16>, vector<8x8xbf16>, vector<8x8xf32> -> vector<8x8xf32>
    %cst_72 = arith.constant 0.353553385 : f32
    %197 = vector.broadcast %cst_72 : f32 to vector<8x8xf32>
    %198 = arith.mulf %196, %197 : vector<8x8xf32>
    %199 = vector.broadcast %19 : vector<1x8xf32> to vector<8x8xf32>
    %200 = arith.addf %198, %199 : vector<8x8xf32>
    %cst_73 = arith.constant dense<0xFF800000> : vector<8xf32>
    %201 = vector.multi_reduction <maximumf>, %200, %cst_73 [1] : vector<8x8xf32> to vector<8xf32>
    %202 = vector.shape_cast %201 : vector<8xf32> to vector<8x1xf32>
    %203 = vector.broadcast %202 : vector<8x1xf32> to vector<8x8xf32>
    %204 = arith.subf %200, %203 : vector<8x8xf32>
    %205 = math.exp %204 : vector<8x8xf32>
    %cst_74 = arith.constant dense<0.000000e+00> : vector<8xf32>
    %206 = vector.multi_reduction <add>, %205, %cst_74 [1] : vector<8x8xf32> to vector<8xf32>
    %207 = vector.shape_cast %206 : vector<8xf32> to vector<8x1xf32>
    %208 = tpu.reciprocal %207 {approx = true} : vector<8x1xf32> -> vector<8x1xf32>
    %209 = vector.broadcast %208 : vector<8x1xf32> to vector<8x8xf32>
    %210 = arith.mulf %205, %209 : vector<8x8xf32>
    %211 = arith.truncf %210 : vector<8x8xf32> to vector<8x8xbf16>
    %cst_75 = arith.constant dense<0.000000e+00> : vector<8x8xf32>
    %212 = tpu.matmul %211, %195, %cst_75 {dimension_numbers = #tpu.dot_dimension_numbers<[1], [0], [0], [1], [0, 0, 1, 1], [], []>} : vector<8x8xbf16>, vector<8x8xbf16>, vector<8x8xf32> -> vector<8x8xf32>
    %213 = arith.truncf %212 : vector<8x8xf32> to vector<8x8xbf16>
    %214 = vector.extract_strided_slice %4 {offsets = [16, 0], sizes = [8, 32], strides = [1, 1]} : vector<32x32xbf16> to vector<8x32xbf16>
    %cst_76 = arith.constant dense<0.000000e+00> : vector<8x32xf32>
    %215 = tpu.matmul %213, %214, %cst_76 {dimension_numbers = #tpu.dot_dimension_numbers<[1], [0], [0], [1], [0, 0, 1, 1], [], []>} : vector<8x8xbf16>, vector<8x32xbf16>, vector<8x32xf32> -> vector<8x32xf32>
    %216 = arith.addf %192, %215 : vector<8x32xf32>
    %217 = vector.extract_strided_slice %46 {offsets = [8, 24], sizes = [8, 8], strides = [1, 1]} : vector<16x96xbf16> to vector<8x8xbf16>
    %218 = vector.extract_strided_slice %46 {offsets = [8, 56], sizes = [8, 8], strides = [1, 1]} : vector<16x96xbf16> to vector<8x8xbf16>
    %219 = vector.extract_strided_slice %46 {offsets = [8, 88], sizes = [8, 8], strides = [1, 1]} : vector<16x96xbf16> to vector<8x8xbf16>
    %cst_77 = arith.constant dense<0.000000e+00> : vector<8x8xf32>
    %220 = tpu.matmul %217, %218, %cst_77 {dimension_numbers = #tpu.dot_dimension_numbers<[1], [1], [0], [0], [0, 0, 1, 0], [], []>} : vector<8x8xbf16>, vector<8x8xbf16>, vector<8x8xf32> -> vector<8x8xf32>
    %cst_78 = arith.constant 0.353553385 : f32
    %221 = vector.broadcast %cst_78 : f32 to vector<8x8xf32>
    %222 = arith.mulf %220, %221 : vector<8x8xf32>
    %223 = vector.broadcast %19 : vector<1x8xf32> to vector<8x8xf32>
    %224 = arith.addf %222, %223 : vector<8x8xf32>
    %cst_79 = arith.constant dense<0xFF800000> : vector<8xf32>
    %225 = vector.multi_reduction <maximumf>, %224, %cst_79 [1] : vector<8x8xf32> to vector<8xf32>
    %226 = vector.shape_cast %225 : vector<8xf32> to vector<8x1xf32>
    %227 = vector.broadcast %226 : vector<8x1xf32> to vector<8x8xf32>
    %228 = arith.subf %224, %227 : vector<8x8xf32>
    %229 = math.exp %228 : vector<8x8xf32>
    %cst_80 = arith.constant dense<0.000000e+00> : vector<8xf32>
    %230 = vector.multi_reduction <add>, %229, %cst_80 [1] : vector<8x8xf32> to vector<8xf32>
    %231 = vector.shape_cast %230 : vector<8xf32> to vector<8x1xf32>
    %232 = tpu.reciprocal %231 {approx = true} : vector<8x1xf32> -> vector<8x1xf32>
    %233 = vector.broadcast %232 : vector<8x1xf32> to vector<8x8xf32>
    %234 = arith.mulf %229, %233 : vector<8x8xf32>
    %235 = arith.truncf %234 : vector<8x8xf32> to vector<8x8xbf16>
    %cst_81 = arith.constant dense<0.000000e+00> : vector<8x8xf32>
    %236 = tpu.matmul %235, %219, %cst_81 {dimension_numbers = #tpu.dot_dimension_numbers<[1], [0], [0], [1], [0, 0, 1, 1], [], []>} : vector<8x8xbf16>, vector<8x8xbf16>, vector<8x8xf32> -> vector<8x8xf32>
    %237 = arith.truncf %236 : vector<8x8xf32> to vector<8x8xbf16>
    %238 = vector.extract_strided_slice %4 {offsets = [24, 0], sizes = [8, 32], strides = [1, 1]} : vector<32x32xbf16> to vector<8x32xbf16>
    %cst_82 = arith.constant dense<0.000000e+00> : vector<8x32xf32>
    %239 = tpu.matmul %237, %238, %cst_82 {dimension_numbers = #tpu.dot_dimension_numbers<[1], [0], [0], [1], [0, 0, 1, 1], [], []>} : vector<8x8xbf16>, vector<8x32xbf16>, vector<8x32xf32> -> vector<8x32xf32>
    %240 = arith.addf %216, %239 : vector<8x32xf32>
    %241 = tpu.concatenate %143, %240 in 0 : vector<8x32xf32>, vector<8x32xf32> -> vector<16x32xf32>
    %242 = arith.addf %13, %241 : vector<16x32xf32>
    %243 = vector.broadcast %5 : vector<1x32xf32> to vector<16x32xf32>
    %244 = arith.addf %242, %243 : vector<16x32xf32>
    %cst_83 = arith.constant dense<0.000000e+00> : vector<16xf32>
    %245 = vector.multi_reduction <add>, %244, %cst_83 [1] : vector<16x32xf32> to vector<16xf32>
    %246 = vector.shape_cast %245 : vector<16xf32> to vector<16x1xf32>
    %cst_84 = arith.constant 3.200000e+01 : f32
    %247 = vector.broadcast %cst_84 : f32 to vector<16x1xf32>
    %248 = arith.divf %246, %247 : vector<16x1xf32>
    %249 = vector.broadcast %248 : vector<16x1xf32> to vector<16x32xf32>
    %250 = arith.subf %244, %249 : vector<16x32xf32>
    %251 = arith.mulf %250, %250 : vector<16x32xf32>
    %cst_85 = arith.constant dense<0.000000e+00> : vector<16xf32>
    %252 = vector.multi_reduction <add>, %251, %cst_85 [1] : vector<16x32xf32> to vector<16xf32>
    %253 = vector.shape_cast %252 : vector<16xf32> to vector<16x1xf32>
    %cst_86 = arith.constant 3.200000e+01 : f32
    %254 = vector.broadcast %cst_86 : f32 to vector<16x1xf32>
    %255 = arith.divf %253, %254 : vector<16x1xf32>
    %256 = vector.broadcast %248 : vector<16x1xf32> to vector<16x32xf32>
    %257 = arith.subf %244, %256 : vector<16x32xf32>
    %cst_87 = arith.constant 9.99999997E-7 : f32
    %258 = vector.broadcast %cst_87 : f32 to vector<16x1xf32>
    %259 = arith.addf %255, %258 : vector<16x1xf32>
    %260 = math.rsqrt %259 : vector<16x1xf32>
    %261 = vector.broadcast %260 : vector<16x1xf32> to vector<16x32xf32>
    %262 = arith.mulf %257, %261 : vector<16x32xf32>
    %263 = vector.broadcast %6 : vector<1x32xf32> to vector<16x32xf32>
    %264 = arith.mulf %262, %263 : vector<16x32xf32>
    %265 = vector.broadcast %7 : vector<1x32xf32> to vector<16x32xf32>
    %266 = arith.addf %264, %265 : vector<16x32xf32>
    %267 = arith.truncf %266 : vector<16x32xf32> to vector<16x32xbf16>
    %cst_88 = arith.constant dense<0.000000e+00> : vector<16x128xf32>
    %268 = tpu.matmul %267, %8, %cst_88 {dimension_numbers = #tpu.dot_dimension_numbers<[1], [0], [0], [1], [0, 0, 1, 1], [], []>} : vector<16x32xbf16>, vector<32x128xbf16>, vector<16x128xf32> -> vector<16x128xf32>
    %269 = vector.broadcast %9 : vector<1x128xf32> to vector<16x128xf32>
    %270 = arith.addf %268, %269 : vector<16x128xf32>
    %271 = arith.mulf %270, %270 : vector<16x128xf32>
    %272 = arith.mulf %270, %271 : vector<16x128xf32>
    %cst_89 = arith.constant 4.471500e-02 : f32
    %273 = vector.broadcast %cst_89 : f32 to vector<16x128xf32>
    %274 = arith.mulf %273, %272 : vector<16x128xf32>
    %275 = arith.addf %270, %274 : vector<16x128xf32>
    %cst_90 = arith.constant 0.797884583 : f32
    %276 = vector.broadcast %cst_90 : f32 to vector<16x128xf32>
    %277 = arith.mulf %276, %275 : vector<16x128xf32>
    %278 = math.tanh %277 : vector<16x128xf32>
    %cst_91 = arith.constant 1.000000e+00 : f32
    %279 = vector.broadcast %cst_91 : f32 to vector<16x128xf32>
    %280 = arith.addf %279, %278 : vector<16x128xf32>
    %cst_92 = arith.constant 5.000000e-01 : f32
    %281 = vector.broadcast %cst_92 : f32 to vector<16x128xf32>
    %282 = arith.mulf %281, %280 : vector<16x128xf32>
    %283 = arith.mulf %270, %282 : vector<16x128xf32>
    %284 = arith.truncf %283 : vector<16x128xf32> to vector<16x128xbf16>
    %cst_93 = arith.constant dense<0.000000e+00> : vector<16x32xf32>
    %285 = tpu.matmul %284, %10, %cst_93 {dimension_numbers = #tpu.dot_dimension_numbers<[1], [0], [0], [1], [0, 0, 1, 1], [], []>} : vector<16x128xbf16>, vector<128x32xbf16>, vector<16x32xf32> -> vector<16x32xf32>
    %286 = vector.broadcast %11 : vector<1x32xf32> to vector<16x32xf32>
    %287 = arith.addf %285, %286 : vector<16x32xf32>
    %288 = arith.addf %244, %287 : vector<16x32xf32>
    %289 = vector.extract_strided_slice %288 {offsets = [0, 0], sizes = [1, 32], strides = [1, 1]} : vector<16x32xf32> to vector<1x32xf32>
    %290 = vector.extract_strided_slice %288 {offsets = [8, 0], sizes = [1, 32], strides = [1, 1]} : vector<16x32xf32> to vector<1x32xf32>
    %291 = tpu.concatenate %289, %290 in 0 : vector<1x32xf32>, vector<1x32xf32> -> vector<2x32xf32>
    %292 = arith.truncf %291 : vector<2x32xf32> to vector<2x32xbf16>
    %c0_94 = arith.constant 0 : index
    %c0_95 = arith.constant 0 : index
    %293 = vector.load %arg14[%c0_94, %c0_95] : memref<32x14xbf16, #tpu.memory_space<vmem>>, vector<32x14xbf16>
    %cst_96 = arith.constant dense<0.000000e+00> : vector<2x14xf32>
    %294 = tpu.matmul %292, %293, %cst_96 {dimension_numbers = #tpu.dot_dimension_numbers<[1], [0], [0], [1], [0, 0, 1, 1], [], []>} : vector<2x32xbf16>, vector<32x14xbf16>, vector<2x14xf32> -> vector<2x14xf32>
    %c0_97 = arith.constant 0 : index
    %c0_98 = arith.constant 0 : index
    %295 = vector.load %arg15[%c0_97, %c0_98] : memref<1x14xf32, #tpu.memory_space<vmem>>, vector<1x14xf32>
    %296 = vector.broadcast %295 : vector<1x14xf32> to vector<2x14xf32>
    %297 = arith.addf %294, %296 : vector<2x14xf32>
    %c0_99 = arith.constant 0 : index
    %c0_100 = arith.constant 0 : index
    %c0_101 = arith.constant 0 : index
    %298 = vector.load %arg16[%c0_99, %c0_100, %c0_101] : memref<1x2x14xf32, #tpu.memory_space<vmem>>, vector<1x2x14xf32>
    %299 = vector.shape_cast %298 : vector<1x2x14xf32> to vector<2x14xf32>
    %300 = vector.shape_cast %297 : vector<2x14xf32> to vector<1x2x14xf32>
    tpu.vector_store %arg16[%c0_99, %c0_100, %c0_101], %300 {strides = array<i32>} : memref<1x2x14xf32, #tpu.memory_space<vmem>>, vector<1x2x14xf32>,
    %cst_102 = arith.constant dense<0xFF800000> : vector<2xf32>
    %301 = vector.multi_reduction <maximumf>, %297, %cst_102 [1] : vector<2x14xf32> to vector<2xf32>
    %302 = vector.shape_cast %301 : vector<2xf32> to vector<2x1xf32>
    %303 = vector.broadcast %302 : vector<2x1xf32> to vector<2x14xf32>
    %304 = arith.subf %297, %303 : vector<2x14xf32>
    %305 = math.exp %304 : vector<2x14xf32>
    %cst_103 = arith.constant dense<0.000000e+00> : vector<2xf32>
    %306 = vector.multi_reduction <add>, %305, %cst_103 [1] : vector<2x14xf32> to vector<2xf32>
    %307 = vector.shape_cast %306 : vector<2xf32> to vector<2x1xf32>
    %308 = tpu.reciprocal %307 {approx = true} : vector<2x1xf32> -> vector<2x1xf32>
    %309 = vector.broadcast %308 : vector<2x1xf32> to vector<2x14xf32>
    %310 = arith.mulf %305, %309 : vector<2x14xf32>
    %c0_104 = arith.constant 0 : index
    %c0_105 = arith.constant 0 : index
    %c0_106 = arith.constant 0 : index
    %311 = vector.load %arg17[%c0_104, %c0_105, %c0_106] : memref<1x2x14xf32, #tpu.memory_space<vmem>>, vector<1x2x14xf32>
    %312 = vector.shape_cast %311 : vector<1x2x14xf32> to vector<2x14xf32>
    %313 = vector.shape_cast %310 : vector<2x14xf32> to vector<1x2x14xf32>
    tpu.vector_store %arg17[%c0_104, %c0_105, %c0_106], %313 {strides = array<i32>} : memref<1x2x14xf32, #tpu.memory_space<vmem>>, vector<1x2x14xf32>,
    return
  }
  func.func @transform_0(%arg0: i32) -> (i32, i32, i32) {
    %c0_i32 = arith.constant 0 : i32
    %c0_i32_0 = arith.constant 0 : i32
    %c0_i32_1 = arith.constant 0 : i32
    return %arg0, %c0_i32, %c0_i32_0 : i32, i32, i32
  }
  func.func @transform_1(%arg0: i32) -> (i32, i32) {
    %c0_i32 = arith.constant 0 : i32
    %c0_i32_0 = arith.constant 0 : i32
    %c0_i32_1 = arith.constant 0 : i32
    return %c0_i32, %c0_i32_0 : i32, i32
  }
  func.func @transform_2(%arg0: i32) -> (i32, i32) {
    %c0_i32 = arith.constant 0 : i32
    %c0_i32_0 = arith.constant 0 : i32
    %c0_i32_1 = arith.constant 0 : i32
    return %c0_i32, %c0_i32_0 : i32, i32
  }
  func.func @transform_3(%arg0: i32) -> (i32, i32) {
    %c0_i32 = arith.constant 0 : i32
    %c0_i32_0 = arith.constant 0 : i32
    %c0_i32_1 = arith.constant 0 : i32
    return %c0_i32, %c0_i32_0 : i32, i32
  }
  func.func @transform_4(%arg0: i32) -> (i32, i32) {
    %c0_i32 = arith.constant 0 : i32
    %c0_i32_0 = arith.constant 0 : i32
    %c0_i32_1 = arith.constant 0 : i32
    return %c0_i32, %c0_i32_0 : i32, i32
  }
  func.func @transform_5(%arg0: i32) -> (i32, i32) {
    %c0_i32 = arith.constant 0 : i32
    %c0_i32_0 = arith.constant 0 : i32
    %c0_i32_1 = arith.constant 0 : i32
    return %c0_i32, %c0_i32_0 : i32, i32
  }
  func.func @transform_6(%arg0: i32) -> (i32, i32) {
    %c0_i32 = arith.constant 0 : i32
    %c0_i32_0 = arith.constant 0 : i32
    %c0_i32_1 = arith.constant 0 : i32
    return %c0_i32, %c0_i32_0 : i32, i32
  }
  func.func @transform_7(%arg0: i32) -> (i32, i32) {
    %c0_i32 = arith.constant 0 : i32
    %c0_i32_0 = arith.constant 0 : i32
    %c0_i32_1 = arith.constant 0 : i32
    return %c0_i32, %c0_i32_0 : i32, i32
  }
  func.func @transform_8(%arg0: i32) -> (i32, i32) {
    %c0_i32 = arith.constant 0 : i32
    %c0_i32_0 = arith.constant 0 : i32
    %c0_i32_1 = arith.constant 0 : i32
    return %c0_i32, %c0_i32_0 : i32, i32
  }
  func.func @transform_9(%arg0: i32) -> (i32, i32) {
    %c0_i32 = arith.constant 0 : i32
    %c0_i32_0 = arith.constant 0 : i32
    %c0_i32_1 = arith.constant 0 : i32
    return %c0_i32, %c0_i32_0 : i32, i32
  }
  func.func @transform_10(%arg0: i32) -> (i32, i32) {
    %c0_i32 = arith.constant 0 : i32
    %c0_i32_0 = arith.constant 0 : i32
    %c0_i32_1 = arith.constant 0 : i32
    return %c0_i32, %c0_i32_0 : i32, i32
  }
  func.func @transform_11(%arg0: i32) -> (i32, i32) {
    %c0_i32 = arith.constant 0 : i32
    %c0_i32_0 = arith.constant 0 : i32
    %c0_i32_1 = arith.constant 0 : i32
    return %c0_i32, %c0_i32_0 : i32, i32
  }
  func.func @transform_12(%arg0: i32) -> (i32, i32) {
    %c0_i32 = arith.constant 0 : i32
    %c0_i32_0 = arith.constant 0 : i32
    %c0_i32_1 = arith.constant 0 : i32
    return %c0_i32, %c0_i32_0 : i32, i32
  }
  func.func @transform_13(%arg0: i32) -> (i32, i32) {
    %c0_i32 = arith.constant 0 : i32
    %c0_i32_0 = arith.constant 0 : i32
    %c0_i32_1 = arith.constant 0 : i32
    return %c0_i32, %c0_i32_0 : i32, i32
  }
  func.func @transform_14(%arg0: i32) -> (i32, i32) {
    %c0_i32 = arith.constant 0 : i32
    %c0_i32_0 = arith.constant 0 : i32
    %c0_i32_1 = arith.constant 0 : i32
    return %c0_i32, %c0_i32_0 : i32, i32
  }
  func.func @transform_15(%arg0: i32) -> (i32, i32, i32) {
    %c0_i32 = arith.constant 0 : i32
    %c0_i32_0 = arith.constant 0 : i32
    %c0_i32_1 = arith.constant 0 : i32
    return %arg0, %c0_i32, %c0_i32_0 : i32, i32, i32
  }
  func.func @transform_16(%arg0: i32) -> (i32, i32, i32) {
    %c0_i32 = arith.constant 0 : i32
    %c0_i32_0 = arith.constant 0 : i32
    %c0_i32_1 = arith.constant 0 : i32
    return %arg0, %c0_i32, %c0_i32_0 : i32, i32, i32
  }
}

</mosaic_0001>

<bundles_post_ra>
// kernel: _lambda_.4
= control target key start
LH: loop header
LB: loop body
LE: loop exit
PB: predicated region body
PF: predicated region fallthrough
CT: control target
= control target key end

     0   :  { %vm547_vm0 = vcmask 516096   ;;  %vm555_vm1 = vcmask 518144   ;;  %v732_v63 = vmov 0.0   ;;  %vm553_vm2 = vcmask 519168   ;;  %s952_s1 = inlined_call_operand.vmem [shape: bf16[768,64], index: 1, kind: input, shape index: {}]   ;;  %s953_s0 = inlined_call_operand.vmem [shape: f32[8,768], index: 0, kind: input, shape index: {}]   ;;  %s954_s3 = inlined_call_operand.vmem [shape: f32[1,64], index: 3, kind: input, shape index: {}]   ;;  %s955_s4 = inlined_call_operand.vmem [shape: f32[8,64], index: 4, kind: input, shape index: {}]   ;;  %s956_s5 = inlined_call_operand.vmem [shape: f32[16,64], index: 5, kind: output, shape index: {}]   ;;  %s957_s2 = inlined_call_operand.vmem [shape: f32[1,64], index: 2, kind: input, shape index: {}]  }
   0x1   :  { %v684_v0 = vld [vmem:[%s952_s1 + $0x78] sm:$0xff]   ;;  %v688_v4 = vld [vmem:[%s952_s1 + $0x70] sm:$0xff]   ;;  %v692_v8 = vld [vmem:[%s952_s1 + $0x68] sm:$0xff]   ;;  %556 = vst.msk [vmem:[%s956_s5 + $0x5] sm:$0x7] %vm555_vm1, %v732_v63  ;;  %vm561_vm3 = vcmask 523268  }
   0x2   :  { %v685_v1 = vld [vmem:[%s952_s1 + $0x38] sm:$0xff]   ;;  %617 = vmatprep.subr.bf16.mxu0 %v684_v0  ;;  %v689_v5 = vld [vmem:[%s952_s1 + $0x30] sm:$0xff]   ;;  %v693_v9 = vld [vmem:[%s952_s1 + $0x28] sm:$0xff]   ;;  %563 = vst.msk [vmem:[%s956_s5 + $0xd] sm:$0x7] %vm555_vm1, %v732_v63 }
   0x3   :  { %v686_v2 = vld [vmem:[%s952_s1 + $0xf8] sm:$0xff]   ;;  %618 = vmatpush3.bf16.msra.mxu0 %v685_v1  ;;  %v690_v6 = vld [vmem:[%s952_s1 + $0xf0] sm:$0xff]   ;;  %v694_v10 = vld [vmem:[%s952_s1 + $0xe8] sm:$0xff]  }
   0x4   :  { %v687_v3 = vld [vmem:[%s952_s1 + $0xb8] sm:$0xff]   ;;  %639 = vmatprep.subr.bf16.mxu1 %v686_v2  ;;  %619 = vmatprep.subr.bf16.mxu0 %v688_v4  ;;  %v691_v7 = vld [vmem:[%s952_s1 + $0xb0] sm:$0xff]   ;;  %v695_v11 = vld [vmem:[%s952_s1 + $0xa8] sm:$0xff]  }
   0x5   :  { %640 = vmatpush3.bf16.msra.mxu1 %v687_v3  ;;  %v696_v12 = vld [vmem:[%s952_s1 + $0x60] sm:$0xff]   ;;  %v700_v16 = vld [vmem:[%s952_s1 + $0x58] sm:$0xff]   ;;  %v704_v20 = vld [vmem:[%s952_s1 + $0x50] sm:$0xff]  }
   0x6   :  { %641 = vmatprep.subr.bf16.mxu1 %v690_v6  ;;  %v697_v13 = vld [vmem:[%s952_s1 + $0x20] sm:$0xff]   ;;  %v701_v17 = vld [vmem:[%s952_s1 + $0x18] sm:$0xff]   ;;  %v705_v21 = vld [vmem:[%s952_s1 + $0x10] sm:$0xff]  }
   0x7   :  { %620 = vmatpush3.bf16.msra.mxu0 %v689_v5  ;;  %v698_v14 = vld [vmem:[%s952_s1 + $0xe0] sm:$0xff]   ;;  %v702_v18 = vld [vmem:[%s952_s1 + $0xd8] sm:$0xff]   ;;  %v706_v22 = vld [vmem:[%s952_s1 + $0xd0] sm:$0xff]  }
   0x8   :  { %621 = vmatprep.subr.bf16.mxu0 %v692_v8  ;;  %v699_v15 = vld [vmem:[%s952_s1 + $0xa0] sm:$0xff]   ;;  %v703_v19 = vld [vmem:[%s952_s1 + $0x98] sm:$0xff]   ;;  %v707_v23 = vld [vmem:[%s952_s1 + $0x90] sm:$0xff]  }
   0x9   :  { %642 = vmatpush3.bf16.msra.mxu1 %v691_v7  ;;  %v708_v24 = vld [vmem:[%s952_s1 + $0x48] sm:$0xff]   ;;  %v712_v28 = vld [vmem:[%s952_s1 + $0x40] sm:$0xff]   ;;  %v716_v36 = vld [vmem:[%s952_s1 + $0x178] sm:$0xff]  }
   0xa   :  { %643 = vmatprep.subr.bf16.mxu1 %v694_v10  ;;  %v709_v25 = vld [vmem:[%s952_s1 + $0x8] sm:$0xff]   ;;  %v713_v29 = vld [vmem:[%s952_s1] sm:$0xff]   ;;  %v24_v37 = vld [vmem:[%s953_s0 + $0x18] sm:$0xff] }
   0xb   :  { %622 = vmatpush3.bf16.msra.mxu0 %v693_v9  ;;  %v710_v26 = vld [vmem:[%s952_s1 + $0xc8] sm:$0xff]   ;;  %v714_v30 = vld [vmem:[%s952_s1 + $0xc0] sm:$0xff]   ;;  %v30_v38 = vpack.c.bf16 %v24_v37, %v24_v37  ;;  %v717_v39 = vld [vmem:[%s952_s1 + $0x138] sm:$0xff]  }
   0xc   :  { %623 = vmatprep.subr.bf16.mxu0 %v696_v12  ;;  %v711_v27 = vld [vmem:[%s952_s1 + $0x88] sm:$0xff]   ;;  %v715_v33 = vld [vmem:[%s952_s1 + $0x80] sm:$0xff]   ;;  %v23_v40 = vld [vmem:[%s953_s0 + $0x10] sm:$0xff] }
   0xd   :  { %644 = vmatpush3.bf16.msra.mxu1 %v695_v11  ;;  %v22_v31 = vld [vmem:[%s953_s0 + $0x8] sm:$0xff]  ;;  %v21_v34 = vld [vmem:[%s953_s0] sm:$0xff]  ;;  %496 = vmatprep.mubr.bf16.mxu1 %v30_v38  ;;  %v29_v41 = vpack.c.bf16 %v23_v40, %v23_v40  ;;  %v718_v42 = vld [vmem:[%s952_s1 + $0x170] sm:$0xff]  }
   0xe   :  { %645 = vmatprep.subr.bf16.mxu1 %v698_v14  ;;  %v28_v32 = vpack.c.bf16 %v22_v31, %v22_v31  ;;  %v27_v35 = vpack.c.bf16 %v21_v34, %v21_v34  ;;  %v719_v43 = vld [vmem:[%s952_s1 + $0x130] sm:$0xff]   ;;  %v720_v44 = vld [vmem:[%s952_s1 + $0x168] sm:$0xff]   ;;  %v722_v46 = vld [vmem:[%s952_s1 + $0x160] sm:$0xff]  }
   0xf   :  { %624 = vmatpush3.bf16.msra.mxu0 %v697_v13  ;;  %v721_v45 = vld [vmem:[%s952_s1 + $0x128] sm:$0xff]   ;;  %v723_v47 = vld [vmem:[%s952_s1 + $0x120] sm:$0xff]   ;;  %v724_v48 = vld [vmem:[%s952_s1 + $0x158] sm:$0xff]  }
  0x10   :  { %625 = vmatprep.subr.bf16.mxu0 %v700_v16  ;;  %456 = vmatprep.mubr.bf16.mxu0 %v28_v32  ;;  %v725_v49 = vld [vmem:[%s952_s1 + $0x118] sm:$0xff]   ;;  %v726_v50 = vld [vmem:[%s952_s1 + $0x150] sm:$0xff]   ;;  %v26_v51 = vld [vmem:[%s953_s0 + $0x28] sm:$0xff] }
  0x11   :  { %646 = vmatpush3.bf16.msra.mxu1 %v699_v15  ;;  %v32_v52 = vpack.c.bf16 %v26_v51, %v26_v51  ;;  %v727_v53 = vld [vmem:[%s952_s1 + $0x110] sm:$0xff]   ;;  %v728_v54 = vld [vmem:[%s952_s1 + $0x148] sm:$0xff]   ;;  %v730_v56 = vld [vmem:[%s952_s1 + $0x140] sm:$0xff]  }
  0x12   :  { %647 = vmatprep.subr.bf16.mxu1 %v702_v18  ;;  %v729_v55 = vld [vmem:[%s952_s1 + $0x108] sm:$0xff]   ;;  %v731_v57 = vld [vmem:[%s952_s1 + $0x100] sm:$0xff]  }
  0x13   :  { %626 = vmatpush3.bf16.msra.mxu0 %v701_v17  ;;  %v25_v58 = vld [vmem:[%s953_s0 + $0x20] sm:$0xff] }
  0x14   :  { %627 = vmatprep.subr.bf16.mxu0 %v704_v20  ;;  %v31_v59 = vpack.c.bf16 %v25_v58, %v25_v58  ;;  %v544_v60 = vld [vmem:[%s954_s3] sm:$0x1] }
  0x15   :  { %648 = vmatpush3.bf16.msra.mxu1 %v703_v19  ;;  %v545_v61 = vld [vmem:[%s955_s4] sm:$0xff] }
  0x16   :  { %649 = vmatprep.subr.bf16.mxu1 %v706_v22  ;;  %v546_v62 = vadd.f32 %v545_v61, %v544_v60  ;;  %v568_v9 = vld [vmem:[%s957_s2] ss:$0 sm:$0xff]  ;;  %v550_v16 = vrot.slane %v545_v61, 1  ;;  %v558_v17 = vrot.slane %v545_v61, 5 }
  0x17   :  { %628 = vmatpush3.bf16.msra.mxu0 %v705_v21 }
  0x18   :  { %629 = vmatprep.subr.bf16.mxu0 %v708_v24  ;;  %548 = vst.msk [vmem:[%s956_s5] sm:$0x1] %vm547_vm0, %v546_v62  ;;  %557 = vst.msk [vmem:[%s956_s5 + $0x8] sm:$0x1] %vm547_vm0, %v546_v62 }
  0x19   :  { %650 = vmatpush3.bf16.msra.mxu1 %v707_v23 }
  0x1a   :  { %651 = vmatprep.subr.bf16.mxu1 %v710_v26 }
  0x1b   :  { %630 = vmatpush3.bf16.msra.mxu0 %v709_v25 }
  0x1c   :  { %631 = vmatprep.subr.bf16.mxu0 %v712_v28 }
  0x1d   :  { %652 = vmatpush3.bf16.msra.mxu1 %v711_v27 }
  0x1e   :  { %653 = vmatprep.subr.bf16.mxu1 %v714_v30 }
  0x1f   :  { %632 = vmatpush3.bf16.msra.mxu0 %v713_v29 }
  0x20   :  { %661 = vmatprep.subr.bf16.mxu0 %v716_v36 }
  0x21   :  { %654 = vmatpush3.bf16.msra.mxu1 %v715_v33 }
  0x22   :  { %457 = vmatmul.mubr.bf16.vlgmr.msra.gmra.mxu0 %v27_v35 }
  0x23   :  { %662 = vmatpush3.bf16.msra.mxu0 %v717_v39  ;;  %536 = vmatprep.mubr.bf16.mxu0 %v32_v52 }
  0x24   :  { %497 = vmatmul.mubr.bf16.vlgmr.msra.gmra.mxu1 %v29_v41  ;;  %663 = vmatprep.subr.bf16.mxu0 %v718_v42 }
  0x27   :  { %664 = vmatpush3.bf16.msra.mxu0 %v719_v43 }
  0x28   :  { %665 = vmatprep.subr.bf16.mxu0 %v720_v44 }
  0x2b   :  { %666 = vmatpush3.bf16.msra.mxu0 %v721_v45 }
  0x2c   :  { %667 = vmatprep.subr.bf16.mxu0 %v722_v46 }
  0x2f   :  { %668 = vmatpush3.bf16.msra.mxu0 %v723_v47 }
  0x30   :  { %669 = vmatprep.subr.bf16.mxu0 %v724_v48 }
  0x33   :  { %670 = vmatpush3.bf16.msra.mxu0 %v725_v49 }
  0x34   :  { %671 = vmatprep.subr.bf16.mxu0 %v726_v50 }
  0x37   :  { %672 = vmatpush3.bf16.msra.mxu0 %v727_v53 }
  0x38   :  { %673 = vmatprep.subr.bf16.mxu0 %v728_v54 }
  0x3b   :  { %674 = vmatpush3.bf16.msra.mxu0 %v729_v55 }
  0x3c   :  { %675 = vmatprep.subr.bf16.mxu0 %v730_v56 }
  0x3f   :  { %676 = vmatpush3.bf16.msra.mxu0 %v731_v57 }
  0x42   :  { %537 = vmatmul.mubr.bf16.vlgmr.msra.gmra.mxu0 %v31_v59 }
  0xe2   :  { %v633_v0 = vpop.f32.mrf.mxu0 }
  0xe4   :  { %v634_v1 = vpop.f32.mrf.mxu0  ;;  %v655_v2 = vpop.f32.mrf.mxu1 }
  0xe5   :  { %v635_v8 = vadd.f32 %v634_v1, %v633_v0 }
  0xe6   :  { %v636_v3 = vpop.f32.mrf.mxu0  ;;  %v656_v4 = vpop.f32.mrf.mxu1 }
  0xe7   :  { %v459_v10 = vadd.f32 %v635_v8, %v568_v9  ;;  %v657_v11 = vadd.f32 %v656_v4, %v655_v2 }
  0xe8   :  { %v637_v5 = vpop.f32.mrf.mxu0  ;;  %v658_v6 = vpop.f32.mrf.mxu1 }
  0xe9   :  { %v499_v14 = vadd.f32 %v657_v11, %v459_v10 }
  0xea   :  { %v659_v7 = vpop.f32.mrf.mxu1 }
 0x102   :  { %v677_v12 = vpop.f32.mrf.mxu0 }
 0x104   :  { %v678_v13 = vpop.f32.mrf.mxu0 }
 0x105   :  { %v679_v15 = vadd.f32 %v678_v13, %v677_v12 }
 0x106   :  { %v680_v18 = vpop.f32.mrf.mxu0 }
 0x107   :  { %v539_v19 = vadd.f32 %v679_v15, %v499_v14 }
 0x108   :  { %v681_v20 = vpop.f32.mrf.mxu0 }
 0x109   :  { %v552_v21 = vadd.f32 %v550_v16, %v539_v19  ;;  %v560_v22 = vadd.f32 %v558_v17, %v539_v19 }
 0x10b   :  { %554 = vst.msk [vmem:[%s956_s5 + $0x1] sm:$0xf] %vm553_vm2, %v552_v21 }
 0x10c   :  { %562 = vst.msk [vmem:[%s956_s5 + $0x5] sm:$0xf0] %vm561_vm3, %v560_v22 }

// kernel: _lambda_.6
= control target key start
LH: loop header
LB: loop body
LE: loop exit
PB: predicated region body
PF: predicated region fallthrough
CT: control target
= control target key end

     0   :  { %s3355_s18 = smov 0   ;;  %s3740_s0 = inlined_call_operand.vmem [shape: f32[16,64], index: 0, kind: input, shape index: {}]   ;;  %s3741_s1 = inlined_call_operand.vmem [shape: f32[4,1,64], index: 1, kind: input, shape index: {}, may-alias: {1,7}]   ;;  %s3742_s2 = inlined_call_operand.vmem [shape: f32[4,1,64], index: 2, kind: input, shape index: {}, may-alias: {2,6,8,12}]   ;;  %s3743_s3 = inlined_call_operand.vmem [shape: bf16[4,64,192], index: 3, kind: input, shape index: {}]   ;;  %s3744_s4 = inlined_call_operand.vmem [shape: f32[4,1,192], index: 4, kind: input, shape index: {}]   ;;  %s3745_s5 = inlined_call_operand.vmem [shape: bf16[4,64,64], index: 5, kind: input, shape index: {}]   ;;  %s3746_s6 = inlined_call_operand.vmem [shape: f32[4,1,64], index: 6, kind: input, shape index: {}, may-alias: {2,6,8,12}]   ;;  %s3747_s7 = inlined_call_operand.vmem [shape: f32[4,1,64], index: 7, kind: input, shape index: {}, may-alias: {1,7}]   ;;  %s3748_s8 = inlined_call_operand.vmem [shape: f32[4,1,64], index: 8, kind: input, shape index: {}, may-alias: {2,6,8,12}]   ;;  %s3749_s9 = inlined_call_operand.vmem [shape: bf16[4,64,256], index: 9, kind: input, shape index: {}]   ;;  %s3750_s10 = inlined_call_operand.vmem [shape: f32[4,1,256], index: 10, kind: input, shape index: {}]   ;;  %s3751_s11 = inlined_call_operand.vmem [shape: bf16[4,256,64], index: 11, kind: input, shape index: {}]   ;;  %s3752_s12 = inlined_call_operand.vmem [shape: f32[4,1,64], index: 12, kind: input, shape index: {}, may-alias: {2,6,8,12}]   ;;  %s3753_s13 = inlined_call_operand.vmem [shape: bf16[4,64,32], index: 13, kind: input, shape index: {}]   ;;  %s3754_s14 = inlined_call_operand.vmem [shape: f32[4,1,32], index: 14, kind: input, shape index: {}]   ;;  %s3755_s15 = inlined_call_operand.vmem [shape: f32[4,16,32], index: 15, kind: output, shape index: {}]  }
   0x1 LB: > { %s2807_s19 = sadd.s32 4294967295, %s3262_s18   ;;  %p2811_p0 = scmp.ge.s32.totalorder %s3262_s18, 1  ;;  %s3262_s18 = sphi %s3355_s18, %s25_s18  }
   0x2   : > { %p551_p1 = scmp.lt.s32.totalorder %s3262_s18, 5 }
   0x4   : > { %p552_p2 = pnand %p2811_p0, %p551_p1 }
   0x5   : > { %p648_p3 = scmp.lt.s32.totalorder (!%p552_p2), %s2807_s19, 3  ;;  %s3267_s20 = smov (!%p552_p2), 48  }
   0x6   : > { %555 = sbr.rel (%p552_p2) target bundleno = 5507 (0x1583), region = 80  ;;  %s3268_s22 = smov (!%p552_p2), 64  }
   0x7   : > { %s3269_s23 = smov (!%p552_p2), 112   ;;  %s3272_s25 = smov (!%p552_p2), 32  }
   0xb   : > { %v772_v0 = vld [vmem:[%s3740_s0] sm:$0xff]  ;;  %vm778_vm0 = vcmask 523264   ;;  %v773_v1 = vld [vmem:[%s3740_s0 + $0x8] sm:$0xff]  ;;  %s3757_s19 = smov (!%p648_p3, %s2807_s19), 3  ;;  %v3264_v14 = vmov 0   ;;  %v774_v40 = vlaneseq  ;;  %v3265_v42 = vmov 0.0  }
   0xc   : > { %v779_v2 = vsel %vm778_vm0, %v772_v0, 0.0  ;;  %v782_v3 = vsel %vm778_vm0, %v773_v1, 0.0  ;;  %909 = vmatprep.mubr.bf16.mxu0 %v3264_v14  ;;  %s2902_s24 = sshll.u32 %s3757_s19, 6  ;;  %s2905_s28 = sshll.u32 %s3757_s19, 7  ;;  %2983 = vmatprep.subr.bf16.mxu1 %v3265_v42  ;;  %vm3266_vm1 = vmmov 0   ;;  %vm925_vm2 = vcmask 130048  }
   0xd   : > { %780 = vadd.xlane.f32.xlu0 %v779_v2  ;;  %s658_s27 = scalar_lea.vmem %s3743_s3, %s2902_s24  ;;  %s3384_s16 = scalar_lea.vmem %s3749_s9, %s2902_s24  ;;  %v3401_v41 = vshrl.u32 %v774_v40, 7  ;;  %2985 = vmatprep.mubr.msk.bf16.mxu1 %vm3266_vm1, %v3265_v42  ;;  %vm990_vm3 = vcmask 1043456   ;;  %vm974_vm5 = vcmask 64512   ;;  %vm2614_vm6 = vcmask 261120  }
   0xe   : > { %v3158_v15 = vld [vmem:[%s658_s27 + $0x34] ss:$8 sps:$4 sm:$0xff]   ;;  %v3160_v16 = vld [vmem:[%s658_s27 + $0x30] ss:$8 sps:$4 sm:$0xff]   ;;  %v3161_v17 = vld [vmem:[%s658_s27 + $0x24] ss:$8 sps:$4 sm:$0xff]   ;;  %s3389_s21 = scalar_lea.vmem %s3751_s11, %s2905_s28  ;;  %s650_s24 = scalar_lea.vmem %s3741_s1, %s3757_s19 }
   0xf   : > { %885 = vmatprep.subr.bf16.mxu0 %v3158_v15  ;;  %v3163_v18 = vld [vmem:[%s658_s27 + $0x20] ss:$8 sps:$4 sm:$0xff]   ;;  %v3164_v19 = vld [vmem:[%s658_s27 + $0x14] ss:$8 sps:$4 sm:$0xff]   ;;  %v3166_v20 = vld [vmem:[%s658_s27 + $0x10] ss:$8 sps:$4 sm:$0xff]  }
  0x10   : > { %886 = vmatpush1.bf16.msra.mxu0 %v3160_v16  ;;  %v3167_v21 = vld [vmem:[%s658_s27 + $0x4] ss:$8 sps:$4 sm:$0xff]   ;;  %v3169_v22 = vld [vmem:[%s658_s27] ss:$8 sps:$4 sm:$0xff]   ;;  %s653_s27 = scalar_lea.vmem %s3742_s2, %s3757_s19  ;;  %s2814_s28 = sshll.u32 %s3757_s19, 1  ;;  %v826_v43 = vsub.s32 0, %v3401_v41 }
  0x11   : > { %783 = vadd.xlane.f32.xlu0 %v782_v3  ;;  %887 = vmatprep.subr.bf16.mxu0 %v3161_v17  ;;  %v2826_v31 = vld [vmem:[%s650_s24] ss:$0 sm:$0xff]  ;;  %s662_s17 = scalar_lea.vmem %s3744_s4, %s2814_s28  ;;  %v830_v52 = vsub.s32 1, %v3401_v41  ;;  %s3271_s24 = smov 96  }
  0x12   : > { %v2827_v35 = vld [vmem:[%s653_s27] ss:$0 sm:$0xff]  ;;  %s2903_s26 = sshll.u32 %s3757_s19, 5  ;;  %s3274_s27 = smov 80  }
  0x13   : > { %v718_v44 = vld [vmem:[%s662_s17] sm:$0x3]  ;;  %s3472_s30 = scalar_lea.vmem %s3745_s5, %s2903_s26  ;;  %s3273_s17 = smov 16  }
  0x14   : > { %888 = vmatpush1.bf16.msra.mxu0 %v3163_v18  ;;  %v827_v46 = vrot.slane %v718_v44, %v826_v43  ;;  %v831_v54 = vrot.slane %v718_v44, %v830_v52  ;;  %s685_s29 = scalar_lea.vmem %s3750_s10, %s2814_s28 }
  0x15   : > { %889 = vmatprep.subr.bf16.mxu0 %v3164_v19 }
  0x18   : > { %890 = vmatpush1.bf16.msra.mxu0 %v3166_v20 }
  0x19   : > { %891 = vmatprep.subr.bf16.mxu0 %v3167_v21 }
  0x1c   : > { %892 = vmatpush1.bf16.msra.mxu0 %v3169_v22 }
  0x1d   : > { %2995 = vmatprep.subr.bf16.mxu0 %v3265_v42 }
  0x96   : > { %v781_v4 = vpop.xlane.xlu0 %780 }
  0x97   : > { %v786_v5 = vmul.f32 0.015625, %v781_v4 }
  0x99   : > { %v788_v6 = vsub.f32 %v772_v0, %v786_v5  ;;  %v775_v0 = vand.u32 127, %v774_v40 }
  0x9a   : > { %v784_v7 = vpop.xlane.xlu0 %783 }
  0x9b   : > { %v787_v8 = vmul.f32 0.015625, %v784_v7  ;;  %v790_v9 = vmul.f32 %v788_v6, %v788_v6  ;;  %vm776_vm4 = vcmp.lt.s32.totalorder %v775_v0, 5 }
  0x9d   : > { %v789_v10 = vsub.f32 %v773_v1, %v787_v8  ;;  %v792_v11 = vsel %vm778_vm0, %v790_v9, 0.0  ;;  %v3270_v1 = vmov -1e+30  }
  0x9e   : > { %793 = vadd.xlane.f32.xlu1 %v792_v11  ;;  %v3444_v2 = vsel %vm776_vm4, 0.0, %v3270_v1 }
  0x9f   : > { %v791_v12 = vmul.f32 %v789_v10, %v789_v10 }
  0xa1   : > { %v795_v13 = vsel %vm778_vm0, %v791_v12, 0.0 }
  0xa2   : > { %796 = vadd.xlane.f32.xlu1 %v795_v13 }
 0x127   : > { %v794_v23 = vpop.xlane.xlu1 %793 }
 0x128   : > { %v798_v24 = vmul.f32 0.015625, %v794_v23 }
 0x12a   : > { %v800_v25 = vadd.f32 1e-06, %v798_v24 }
 0x12b   : > { %v797_v26 = vpop.xlane.xlu1 %796 }
 0x12c   : > { %3206 = vrsqrt.f32 %v800_v25  ;;  %v799_v27 = vmul.f32 0.015625, %v797_v26 }
 0x12e   : > { %v801_v28 = vadd.f32 1e-06, %v799_v27 }
 0x130   : > { %3208 = vrsqrt.f32 %v801_v28 }
 0x139   : > { %v3207_v29 = vpop.eup %3206 }
 0x13a   : > { %v804_v30 = vmul.f32 %v3207_v29, %v788_v6 }
 0x13c   : > { %v812_v34 = vmul.f32 %v2826_v31, %v804_v30 }
 0x13d   : > { %v3209_v32 = vpop.eup %3208 }
 0x13e   : > { %v805_v33 = vmul.f32 %v3209_v32, %v789_v10  ;;  %v820_v37 = vadd.f32 %v2827_v35, %v812_v34 }
 0x140   : > { %v813_v36 = vmul.f32 %v2826_v31, %v805_v33 }
 0x142   : > { %v821_v38 = vadd.f32 %v2827_v35, %v813_v36 }
 0x144   : > { %v822_v39 = vpack.c.bf16 %v821_v38, %v820_v37  ;;  %v3475_v38 = vld [vmem:[%s3472_s30] sm:$0xff]  }
 0x146   : > { %2836 = vmatmul.mubr.msk.bf16.vlgmr.msra.gmra.mxu0 %vm778_vm0, %v822_v39  ;;  %v3479_v39 = vld [vmem:[%s3472_s30 + $0x8] sm:$0xff]  }
 0x147   : > { %2997 = vmatprep.mubr.msk.bf16.mxu0 %vm3266_vm1, %v3265_v42 }
 0x206   : > { %v911_v45 = vpop.f32.mrf.mxu0 }
 0x207   : > { %v912_v49 = vadd.f32 %v911_v45, %v827_v46 }
 0x208   : > { %v913_v47 = vpop.f32.mrf.mxu0 }
 0x209   : > { %v914_v60 = vadd.f32 %v913_v47, %v831_v54 }
 0x20a   : > { %v915_v48 = vpop.f32.mrf.mxu0 }
 0x20b   : > { %v916_v50 = vadd.f32 %v915_v48, %v827_v46 }
 0x20c   : > { %v917_v53 = vpop.f32.mrf.mxu0 }
 0x20d   : > { %v3417_v51 = vpack.c.bf16 %v916_v50, %v912_v49  ;;  %v918_v57 = vadd.f32 %v917_v53, %v831_v54 }
 0x20f   : > { %1037 = vrot.lane.b32.xlu1 %v3417_v51, %s3267_s20  ;;  %923 = vrot.lane.b32.xlu0 %v3417_v51, %s3268_s22  ;;  %v3432_v61 = vpack.c.bf16 %v918_v57, %v914_v60 }
 0x211   : > { %v992_v63 = vsel %vm990_vm3, %v3432_v61, 0 }
 0x213   : > { %1035 = vrot.lane.b32.xlu1 %v3417_v51, %s3269_s23 }
 0x281   : > { %v1038_v55 = vpop.permute.xlu1 %1037  ;;  %v924_v56 = vpop.permute.xlu0 %923 }
 0x282   : > { %v1043_v58 = vsel %vm925_vm2, %v1038_v55, 0  ;;  %v930_v59 = vsel %vm925_vm2, %v924_v56, 0 }
 0x283   : > { %2984 = vmatpush3.bf16.xpose.msra.mxu1 %v930_v59  ;;  %2996 = vmatpush3.bf16.xpose.msra.mxu0 %v1043_v58 }
 0x284   : > { %2989 = vmatprep.subr.bf16.mxu1 %v3265_v42  ;;  %3007 = vmatprep.subr.bf16.mxu0 %v3265_v42 }
 0x285   : > { %v1036_v62 = vpop.permute.xlu1 %1035 }
 0x28a   : > { %2986 = vmatmul.mubr.msk.bf16.vlgmr.msra.gmra.mxu1 %vm925_vm2, %v3417_v51  ;;  %2998 = vmatmul.mubr.msk.bf16.vlgmr.msra.gmra.mxu0 %vm925_vm2, %v1036_v62 }
 0x28b   : > { %2990 = vmatpush3.bf16.msra.mxu1 %v992_v63  ;;  %2991 = vmatprep.mubr.msk.bf16.mxu1 %vm3266_vm1, %v3265_v42 }
 0x28c   : > { %3001 = vmatprep.subr.bf16.mxu1 %v3265_v42  ;;  %3009 = vmatprep.mubr.msk.bf16.mxu0 %vm3266_vm1, %v3265_v42 }
 0x28d   : > { %3008 = vmatpush3.bf16.msra.mxu0 %v3479_v39 }
 0x28e   : > { %3019 = vmatprep.subr.bf16.mxu0 %v3265_v42 }
 0x34a   : > { %v966_v3 = vpop.f32.mrf.mxu1  ;;  %v1079_v4 = vpop.f32.mrf.mxu0 }
 0x34b   : > { %v972_v5 = vmul.f32 0.25, %v966_v3  ;;  %v1085_v6 = vmul.f32 0.25, %v1079_v4 }
 0x34c   : > { %v2987_v7 = vpop.f32.mrf.mxu1  ;;  %v2999_v8 = vpop.f32.mrf.mxu0 }
 0x34d   : > { %v1086_v9 = vadd.f32 %v1085_v6, %v3444_v2  ;;  %v973_v10 = vadd.f32 %v972_v5, %v3444_v2 }
 0x34e   : > { %v969_v11 = vpop.f32.mrf.mxu1  ;;  %v1082_v12 = vpop.f32.mrf.mxu0 }
 0x34f   : > { %v1087_v13 = vsel %vm974_vm5, %v1086_v9, -inf  ;;  %v975_v15 = vsel %vm974_vm5, %v973_v10, -inf }
 0x350   : > { %v3000_v16 = vpop.f32.mrf.mxu0  ;;  %1088 = vmax.xlane.f32.xlu0 %v1087_v13  ;;  %976 = vmax.xlane.f32.xlu1 %v975_v15  ;;  %v2988_v17 = vpop.f32.mrf.mxu1 }
 0x361   : > { %1100 = vrot.lane.b32.xlu1 %v3432_v61, %s3269_s23 }
 0x365   : > { %1247 = vrot.lane.b32.xlu1 %v3417_v51, %s3271_s24 }
 0x3d9   : > { %v977_v18 = vpop.xlane.xlu1 %976  ;;  %v1089_v19 = vpop.xlane.xlu0 %1088 }
 0x3da   : > { %v978_v20 = vsub.f32 %v973_v10, %v977_v18  ;;  %v1090_v21 = vsub.f32 %v1086_v9, %v1089_v19 }
 0x3dc   : > { %v979_v22 = vmul.f32 1.442695, %v978_v20  ;;  %v1091_v23 = vmul.f32 1.442695, %v1090_v21 }
 0x3dd   : > { %v1101_v32 = vpop.permute.xlu1 %1100 }
 0x3de   : > { %3210 = vpow2.f32 %v979_v22  ;;  %v1106_v35 = vsel %vm990_vm3, %v1101_v32, 0 }
 0x3df   : > { %3212 = vpow2.f32 %v1091_v23 }
 0x3e1   : > { %v1248_v57 = vpop.permute.xlu1 %1247 }
 0x3eb   : > { %v3211_v24 = vpop.eup %3210 }
 0x3ec   : > { %v981_v25 = vsel %vm974_vm5, %v3211_v24, 0.0  ;;  %v3213_v26 = vpop.eup %3212 }
 0x3ed   : > { %982 = vadd.xlane.f32.xlu0 %v981_v25  ;;  %v1093_v27 = vsel %vm974_vm5, %v3213_v26, 0.0 }
 0x3f1   : > { %1094 = vadd.xlane.f32.xlu0 %v1093_v27  ;;  %v3517_v27 = vld [vmem:[%s3472_s30 + $0x10] sm:$0xff]  }
 0x407   : > { %1249 = vrot.lane.b32.xlu0 %v3417_v51, %s3272_s25 }
 0x476   : > { %v983_v28 = vpop.xlane.xlu0 %982 }
 0x477   : > { %3214 = vrcp.f32 %v983_v28 }
 0x47a   : > { %v1095_v29 = vpop.xlane.xlu0 %1094 }
 0x47b   : > { %3216 = vrcp.f32 %v1095_v29 }
 0x47e   : > { %v1250_v48 = vpop.permute.xlu0 %1249 }
 0x47f   : > { %v1255_v54 = vsel %vm925_vm2, %v1250_v48, 0 }
 0x484   : > { %v3215_v30 = vpop.eup %3214 }
 0x485   : > { %v985_v31 = vmul.f32 %v3215_v30, %v3211_v24 }
 0x487   : > { %v986_v33 = vpack.c.bf16 %v985_v31, %v985_v31 }
 0x488   : > { %v3217_v34 = vpop.eup %3216 }
 0x489   : > { %2992 = vmatmul.mubr.msk.bf16.vlgmr.msra.gmra.mxu1 %vm974_vm5, %v986_v33  ;;  %v1097_v36 = vmul.f32 %v3217_v34, %v3213_v26 }
 0x48a   : > { %3002 = vmatpush3.bf16.msra.mxu1 %v1106_v35  ;;  %3003 = vmatprep.mubr.msk.bf16.mxu1 %vm3266_vm1, %v3265_v42 }
 0x48b   : > { %3013 = vmatprep.subr.bf16.mxu1 %v3265_v42  ;;  %v1098_v37 = vpack.c.bf16 %v1097_v36, %v1097_v36 }
 0x491   : > { %3004 = vmatmul.mubr.msk.bf16.vlgmr.msra.gmra.mxu1 %vm974_vm5, %v1098_v37 }
 0x492   : > { %3015 = vmatprep.mubr.msk.bf16.mxu1 %vm3266_vm1, %v3265_v42  ;;  %3014 = vmatpush3.bf16.msra.mxu1 %v3475_v38 }
 0x493   : > { %3025 = vmatprep.subr.bf16.mxu1 %v3265_v42 }
 0x549   : > { %v1028_v40 = vpop.f32.mrf.mxu1 }
 0x54a   : > { %v1034_v44 = vpack.c.bf16 %v1028_v40, %v1028_v40 }
 0x54b   : > { %v2993_v45 = vpop.f32.mrf.mxu1 }
 0x54c   : > { %3016 = vmatmul.mubr.msk.bf16.vlgmr.msra.gmra.mxu1 %vm925_vm2, %v1034_v44  ;;  %v3527_v45 = vrot.slane %v3417_v51, 4 }
 0x54d   : > { %v1031_v46 = vpop.f32.mrf.mxu1  ;;  %3027 = vmatprep.mubr.msk.bf16.mxu1 %vm3266_vm1, %v3265_v42 }
 0x54f   : > { %v2994_v47 = vpop.f32.mrf.mxu1 }
 0x551   : > { %v1142_v49 = vpop.f32.mrf.mxu1 }
 0x552   : > { %v1148_v50 = vpack.c.bf16 %v1142_v49, %v1142_v49 }
 0x553   : > { %v3005_v53 = vpop.f32.mrf.mxu1 }
 0x554   : > { %3010 = vmatmul.mubr.msk.bf16.vlgmr.msra.gmra.mxu0 %vm925_vm2, %v1148_v50 }
 0x555   : > { %3020 = vmatpush3.bf16.xpose.msra.mxu0 %v1255_v54  ;;  %v1145_v55 = vpop.f32.mrf.mxu1  ;;  %3021 = vmatprep.mubr.msk.bf16.mxu0 %vm3266_vm1, %v3265_v42 }
 0x556   : > { %3031 = vmatprep.subr.bf16.mxu0 %v3265_v42 }
 0x557   : > { %v3006_v56 = vpop.f32.mrf.mxu1 }
 0x55c   : > { %3022 = vmatmul.mubr.msk.bf16.vlgmr.msra.gmra.mxu0 %vm925_vm2, %v1248_v57  ;;  %v3542_v57 = vld [vmem:[%s3472_s30 + $0x18] sm:$0xff]   ;;  %s698_s30 = scalar_lea.vmem %s3753_s13, %s2903_s26  ;;  %s693_s26 = scalar_lea.vmem %s3752_s12, %s3757_s19 }
 0x55d   : > { %3033 = vmatprep.mubr.msk.bf16.mxu0 %vm3266_vm1, %v3265_v42  ;;  %3032 = vmatpush3.bf16.msra.mxu0 %v3517_v27 }
 0x55e   : > { %3043 = vmatprep.subr.bf16.mxu0 %v3265_v42 }
 0x60c   : > { %v1241_v58 = vpop.f32.mrf.mxu1 }
 0x60e   : > { %v3017_v59 = vpop.f32.mrf.mxu1 }
 0x610   : > { %v1244_v60 = vpop.f32.mrf.mxu1 }
 0x612   : > { %v3018_v62 = vpop.f32.mrf.mxu1 }
 0x614   : > { %v1192_v63 = vpop.f32.mrf.mxu0 }
 0x615   : > { %v3495_v0 = vadd.f32 %v1241_v58, %v1192_v63 }
 0x616   : > { %v3011_v1 = vpop.f32.mrf.mxu0 }
 0x618   : > { %v1195_v3 = vpop.f32.mrf.mxu0 }
 0x61a   : > { %v3012_v4 = vpop.f32.mrf.mxu0 }
 0x61c   : > { %v1291_v5 = vpop.f32.mrf.mxu0 }
 0x61d   : > { %v1297_v6 = vmul.f32 0.25, %v1291_v5 }
 0x61e   : > { %v3023_v7 = vpop.f32.mrf.mxu0 }
 0x61f   : > { %v1298_v8 = vadd.f32 %v1297_v6, %v3444_v2  ;;  %v3565_v7 = vrot.slane %v3432_v61, 4 }
 0x620   : > { %v1294_v9 = vpop.f32.mrf.mxu0 }
 0x621   : > { %v1299_v10 = vsel %vm974_vm5, %v1298_v8, -inf }
 0x622   : > { %1300 = vmax.xlane.f32.xlu1 %v1299_v10  ;;  %v3024_v11 = vpop.f32.mrf.mxu0 }
 0x623   : > { %v1641_v11 = vsel %vm990_vm3, %v3565_v7, 0 }
 0x633   : > { %1412 = vrot.lane.b32.xlu1 %v3417_v51, %s3273_s17 }
 0x637   : > { %1410 = vrot.lane.b32.xlu1 %v3417_v51, %s3274_s27 }
 0x6ab   : > { %v1301_v12 = vpop.xlane.xlu1 %1300 }
 0x6ac   : > { %v1302_v13 = vsub.f32 %v1298_v8, %v1301_v12 }
 0x6ae   : > { %v1303_v15 = vmul.f32 1.442695, %v1302_v13 }
 0x6af   : > { %v1413_v23 = vpop.permute.xlu1 %1412 }
 0x6b0   : > { %3218 = vpow2.f32 %v1303_v15  ;;  %v1418_v25 = vsel %vm925_vm2, %v1413_v23, 0 }
 0x6b3   : > { %v1411_v26 = vpop.permute.xlu1 %1410 }
 0x6bd   : > { %v3219_v16 = vpop.eup %3218 }
 0x6be   : > { %v1305_v17 = vsel %vm974_vm5, %v3219_v16, 0.0 }
 0x6bf   : > { %1306 = vadd.xlane.f32.xlu0 %v1305_v17 }
 0x6d5   : > { %1311 = vrot.lane.b32.xlu0 %v3432_v61, %s3271_s24 }
 0x748   : > { %v1307_v18 = vpop.xlane.xlu0 %1306 }
 0x749   : > { %3220 = vrcp.f32 %v1307_v18 }
 0x74c   : > { %v1312_v19 = vpop.permute.xlu0 %1311 }
 0x74d   : > { %v1317_v20 = vsel %vm990_vm3, %v1312_v19, 0 }
 0x74e   : > { %3026 = vmatpush3.bf16.msra.mxu1 %v1317_v20 }
 0x74f   : > { %3037 = vmatprep.subr.bf16.mxu1 %v3265_v42 }
 0x756   : > { %v3221_v21 = vpop.eup %3220 }
 0x757   : > { %v1309_v22 = vmul.f32 %v3221_v21, %v3219_v16 }
 0x759   : > { %v1310_v24 = vpack.c.bf16 %v1309_v22, %v1309_v22 }
 0x75b   : > { %3028 = vmatmul.mubr.msk.bf16.vlgmr.msra.gmra.mxu1 %vm974_vm5, %v1310_v24 }
 0x75c   : > { %3038 = vmatpush3.bf16.xpose.msra.mxu1 %v1418_v25  ;;  %3039 = vmatprep.mubr.msk.bf16.mxu1 %vm3266_vm1, %v3265_v42 }
 0x75d   : > { %3049 = vmatprep.subr.bf16.mxu1 %v3265_v42 }
 0x763   : > { %3040 = vmatmul.mubr.msk.bf16.vlgmr.msra.gmra.mxu1 %vm925_vm2, %v1411_v26 }
 0x764   : > { %3051 = vmatprep.mubr.msk.bf16.mxu1 %vm3266_vm1, %v3265_v42  ;;  %3050 = vmatpush3.bf16.msra.mxu1 %v3542_v57 }
 0x765   : > { %3061 = vmatprep.subr.bf16.mxu1 %v3265_v42 }
 0x81b   : > { %v1353_v28 = vpop.f32.mrf.mxu1 }
 0x81c   : > { %v1359_v29 = vpack.c.bf16 %v1353_v28, %v1353_v28 }
 0x81d   : > { %v3029_v30 = vpop.f32.mrf.mxu1 }
 0x81e   : > { %3034 = vmatmul.mubr.msk.bf16.vlgmr.msra.gmra.mxu0 %vm925_vm2, %v1359_v29 }
 0x81f   : > { %v1356_v31 = vpop.f32.mrf.mxu1  ;;  %3045 = vmatprep.mubr.msk.bf16.mxu0 %vm3266_vm1, %v3265_v42 }
 0x821   : > { %v3030_v32 = vpop.f32.mrf.mxu1 }
 0x823   : > { %v1454_v33 = vpop.f32.mrf.mxu1 }
 0x824   : > { %v1460_v34 = vmul.f32 0.25, %v1454_v33 }
 0x825   : > { %v3041_v35 = vpop.f32.mrf.mxu1 }
 0x826   : > { %v1461_v36 = vadd.f32 %v1460_v34, %v3444_v2 }
 0x827   : > { %v1457_v37 = vpop.f32.mrf.mxu1 }
 0x828   : > { %v1462_v40 = vsel %vm974_vm5, %v1461_v36, -inf }
 0x829   : > { %1463 = vmax.xlane.f32.xlu1 %v1462_v40  ;;  %v3042_v44 = vpop.f32.mrf.mxu1 }
 0x83a   : > { %1574 = vrot.lane.b32.xlu1 %v3527_v45, %s3268_s22  ;;  %s701_s22 = scalar_lea.vmem %s3754_s14, %s3757_s19 }
 0x83e   : > { %1686 = vrot.lane.b32.xlu1 %v3527_v45, %s3267_s20 }
 0x8b2   : > { %v1464_v46 = vpop.xlane.xlu1 %1463 }
 0x8b3   : > { %v1465_v47 = vsub.f32 %v1461_v36, %v1464_v46 }
 0x8b5   : > { %v1466_v48 = vmul.f32 1.442695, %v1465_v47 }
 0x8b7   : > { %3222 = vpow2.f32 %v1466_v48 }
 0x8c4   : > { %v3223_v49 = vpop.eup %3222 }
 0x8c5   : > { %v1468_v50 = vsel %vm974_vm5, %v3223_v49, 0.0 }
 0x8c6   : > { %1469 = vadd.xlane.f32.xlu0 %v1468_v50 }
 0x8dc   : > { %1474 = vrot.lane.b32.xlu0 %v3432_v61, %s3274_s27 }
 0x8de   : > { %v1403_v51 = vpop.f32.mrf.mxu0 }
 0x8df   : > { %v3537_v53 = vadd.f32 %v1403_v51, %v3495_v0  ;;  %v1575_v0 = vpop.permute.xlu1 %1574 }
 0x8e0   : > { %v3035_v54 = vpop.f32.mrf.mxu0  ;;  %1684 = vrot.lane.b32.xlu0 %v3527_v45, %s3269_s23  ;;  %v1580_v3 = vsel %vm925_vm2, %v1575_v0, 0 }
 0x8e2   : > { %v1406_v55 = vpop.f32.mrf.mxu0 }
 0x8e3   : > { %v1687_v4 = vpop.permute.xlu1 %1686 }
 0x8e4   : > { %v3036_v56 = vpop.f32.mrf.mxu0  ;;  %v1692_v5 = vsel %vm925_vm2, %v1687_v4, 0 }
 0x94f   : > { %v1470_v58 = vpop.xlane.xlu0 %1469 }
 0x950   : > { %3224 = vrcp.f32 %v1470_v58 }
 0x953   : > { %v1475_v59 = vpop.permute.xlu0 %1474 }
 0x954   : > { %v1480_v60 = vsel %vm990_vm3, %v1475_v59, 0 }
 0x955   : > { %3044 = vmatpush3.bf16.msra.mxu0 %v1480_v60 }
 0x956   : > { %3055 = vmatprep.subr.bf16.mxu0 %v3265_v42 }
 0x957   : > { %v1685_v6 = vpop.permute.xlu0 %1684 }
 0x95d   : > { %v3225_v62 = vpop.eup %3224 }
 0x95e   : > { %v1472_v63 = vmul.f32 %v3225_v62, %v3223_v49 }
 0x960   : > { %v1473_v1 = vpack.c.bf16 %v1472_v63, %v1472_v63 }
 0x962   : > { %3046 = vmatmul.mubr.msk.bf16.vlgmr.msra.gmra.mxu0 %vm974_vm5, %v1473_v1 }
 0x963   : > { %3056 = vmatpush3.bf16.xpose.msra.mxu0 %v1580_v3  ;;  %3057 = vmatprep.mubr.msk.bf16.mxu0 %vm3266_vm1, %v3265_v42 }
 0x964   : > { %3067 = vmatprep.subr.bf16.mxu0 %v3265_v42 }
 0x96a   : > { %3058 = vmatmul.mubr.msk.bf16.vlgmr.msra.gmra.mxu0 %vm925_vm2, %v3527_v45 }
 0x96b   : > { %3068 = vmatpush3.bf16.xpose.msra.mxu0 %v1692_v5  ;;  %3069 = vmatprep.mubr.msk.bf16.mxu0 %vm3266_vm1, %v3265_v42 }
 0x96c   : > { %3079 = vmatprep.subr.bf16.mxu0 %v3265_v42 }
 0x972   : > { %3070 = vmatmul.mubr.msk.bf16.vlgmr.msra.gmra.mxu0 %vm925_vm2, %v1685_v6 }
 0x973   : > { %3080 = vmatpush3.bf16.msra.mxu0 %v3479_v39  ;;  %3081 = vmatprep.mubr.msk.bf16.mxu0 %vm3266_vm1, %v3265_v42 }
 0x974   : > { %3091 = vmatprep.subr.bf16.mxu0 %v3265_v42 }
 0xa22   : > { %v1516_v8 = vpop.f32.mrf.mxu0 }
 0xa23   : > { %v1522_v9 = vpack.c.bf16 %v1516_v8, %v1516_v8 }
 0xa24   : > { %v3047_v10 = vpop.f32.mrf.mxu0 }
 0xa25   : > { %3052 = vmatmul.mubr.msk.bf16.vlgmr.msra.gmra.mxu1 %vm925_vm2, %v1522_v9 }
 0xa26   : > { %3062 = vmatpush3.bf16.msra.mxu1 %v1641_v11  ;;  %v1519_v12 = vpop.f32.mrf.mxu0  ;;  %3063 = vmatprep.mubr.msk.bf16.mxu1 %vm3266_vm1, %v3265_v42 }
 0xa27   : > { %3073 = vmatprep.subr.bf16.mxu1 %v3265_v42 }
 0xa28   : > { %v3048_v39 = vpop.f32.mrf.mxu0 }
 0xa2a   : > { %v1616_v13 = vpop.f32.mrf.mxu0 }
 0xa2b   : > { %v1622_v15 = vmul.f32 0.25, %v1616_v13 }
 0xa2c   : > { %v3059_v61 = vpop.f32.mrf.mxu0 }
 0xa2d   : > { %v1623_v16 = vadd.f32 %v1622_v15, %v3444_v2 }
 0xa2e   : > { %v1619_v17 = vpop.f32.mrf.mxu0 }
 0xa2f   : > { %v1624_v18 = vsel %vm974_vm5, %v1623_v16, -inf }
 0xa30   : > { %1625 = vmax.xlane.f32.xlu1 %v1624_v18  ;;  %v3060_v19 = vpop.f32.mrf.mxu0 }
 0xa32   : > { %v1728_v20 = vpop.f32.mrf.mxu0 }
 0xa33   : > { %v1734_v21 = vmul.f32 0.25, %v1728_v20 }
 0xa34   : > { %v3071_v22 = vpop.f32.mrf.mxu0 }
 0xa35   : > { %v1735_v23 = vadd.f32 %v1734_v21, %v3444_v2 }
 0xa36   : > { %v1731_v24 = vpop.f32.mrf.mxu0 }
 0xa37   : > { %v1736_v25 = vsel %vm974_vm5, %v1735_v23, -inf }
 0xa38   : > { %1737 = vmax.xlane.f32.xlu0 %v1736_v25  ;;  %v3072_v26 = vpop.f32.mrf.mxu0 }
 0xa41   : > { %1748 = vrot.lane.b32.xlu1 %v3565_v7, %s3269_s23  ;;  %s670_s23 = scalar_lea.vmem %s3746_s6, %s3757_s19 }
 0xa45   : > { %1883 = vrot.lane.b32.xlu1 %v3527_v45, %s3271_s24 }
 0xab9   : > { %v1626_v28 = vpop.xlane.xlu1 %1625 }
 0xaba   : > { %v1627_v29 = vsub.f32 %v1623_v16, %v1626_v28 }
 0xabc   : > { %v1628_v30 = vmul.f32 1.442695, %v1627_v29 }
 0xabd   : > { %v1749_v55 = vpop.permute.xlu1 %1748 }
 0xabe   : > { %3226 = vpow2.f32 %v1628_v30  ;;  %v1754_v58 = vsel %vm990_vm3, %v1749_v55, 0 }
 0xac1   : > { %v1738_v31 = vpop.xlane.xlu0 %1737  ;;  %v1884_v11 = vpop.permute.xlu1 %1883 }
 0xac2   : > { %v1739_v32 = vsub.f32 %v1735_v23, %v1738_v31 }
 0xac4   : > { %v1740_v33 = vmul.f32 1.442695, %v1739_v32 }
 0xac6   : > { %3228 = vpow2.f32 %v1740_v33 }
 0xacb   : > { %v3227_v34 = vpop.eup %3226 }
 0xacc   : > { %v1630_v35 = vsel %vm974_vm5, %v3227_v34, 0.0 }
 0xacd   : > { %1631 = vadd.xlane.f32.xlu0 %v1630_v35 }
 0xad3   : > { %v3229_v36 = vpop.eup %3228 }
 0xad4   : > { %v1742_v37 = vsel %vm974_vm5, %v3229_v36, 0.0 }
 0xad5   : > { %1743 = vadd.xlane.f32.xlu0 %v1742_v37 }
 0xae5   : > { %v1566_v40 = vpop.f32.mrf.mxu1 }
 0xae6   : > { %v3584_v44 = vadd.f32 %v1566_v40, %v3537_v53 }
 0xae7   : > { %v3053_v46 = vpop.f32.mrf.mxu1 }
 0xae9   : > { %v1569_v47 = vpop.f32.mrf.mxu1 }
 0xaeb   : > { %v3054_v48 = vpop.f32.mrf.mxu1  ;;  %1885 = vrot.lane.b32.xlu0 %v3527_v45, %s3272_s25 }
 0xb56   : > { %v1632_v49 = vpop.xlane.xlu0 %1631 }
 0xb57   : > { %3230 = vrcp.f32 %v1632_v49 }
 0xb5e   : > { %v1744_v50 = vpop.xlane.xlu0 %1743 }
 0xb5f   : > { %3232 = vrcp.f32 %v1744_v50 }
 0xb62   : > { %v1886_v4 = vpop.permute.xlu0 %1885 }
 0xb64   : > { %v3231_v51 = vpop.eup %3230 }
 0xb65   : > { %v1634_v54 = vmul.f32 %v3231_v51, %v3227_v34 }
 0xb67   : > { %v1635_v56 = vpack.c.bf16 %v1634_v54, %v1634_v54 }
 0xb69   : > { %3064 = vmatmul.mubr.msk.bf16.vlgmr.msra.gmra.mxu1 %vm974_vm5, %v1635_v56 }
 0xb6a   : > { %3074 = vmatpush3.bf16.msra.mxu1 %v1754_v58  ;;  %3075 = vmatprep.mubr.msk.bf16.mxu1 %vm3266_vm1, %v3265_v42  ;;  %v2865_v58 = vld [vmem:[%s670_s23] ss:$0 sm:$0xff]  ;;  %s676_s23 = scalar_lea.vmem %s3748_s8, %s3757_s19 }
 0xb6b   : > { %3085 = vmatprep.subr.bf16.mxu1 %v3265_v42 }
 0xb6c   : > { %v3233_v53 = vpop.eup %3232 }
 0xb6d   : > { %v1746_v59 = vmul.f32 %v3233_v53, %v3229_v36 }
 0xb6f   : > { %v1747_v60 = vpack.c.bf16 %v1746_v59, %v1746_v59 }
 0xb71   : > { %3076 = vmatmul.mubr.msk.bf16.vlgmr.msra.gmra.mxu1 %vm974_vm5, %v1747_v60 }
 0xb72   : > { %3086 = vmatpush3.bf16.msra.mxu1 %v3475_v38  ;;  %3087 = vmatprep.mubr.msk.bf16.mxu1 %vm3266_vm1, %v3265_v42  ;;  %v1891_v38 = vsel %vm925_vm2, %v1886_v4, 0 }
 0xb73   : > { %3097 = vmatprep.subr.bf16.mxu1 %v3265_v42 }
 0xc29   : > { %v1677_v62 = vpop.f32.mrf.mxu1 }
 0xc2a   : > { %v1683_v63 = vpack.c.bf16 %v1677_v62, %v1677_v62 }
 0xc2b   : > { %v3065_v0 = vpop.f32.mrf.mxu1 }
 0xc2c   : > { %3088 = vmatmul.mubr.msk.bf16.vlgmr.msra.gmra.mxu1 %vm925_vm2, %v1683_v63 }
 0xc2d   : > { %v1680_v1 = vpop.f32.mrf.mxu1  ;;  %3099 = vmatprep.mubr.msk.bf16.mxu1 %vm3266_vm1, %v3265_v42 }
 0xc2f   : > { %v3066_v3 = vpop.f32.mrf.mxu1 }
 0xc31   : > { %v1790_v5 = vpop.f32.mrf.mxu1 }
 0xc32   : > { %v1796_v6 = vpack.c.bf16 %v1790_v5, %v1790_v5 }
 0xc33   : > { %v3077_v8 = vpop.f32.mrf.mxu1 }
 0xc34   : > { %3082 = vmatmul.mubr.msk.bf16.vlgmr.msra.gmra.mxu0 %vm925_vm2, %v1796_v6 }
 0xc35   : > { %3092 = vmatpush3.bf16.xpose.msra.mxu0 %v1891_v38  ;;  %v1793_v9 = vpop.f32.mrf.mxu1  ;;  %3093 = vmatprep.mubr.msk.bf16.mxu0 %vm3266_vm1, %v3265_v42 }
 0xc36   : > { %3103 = vmatprep.subr.bf16.mxu0 %v3265_v42 }
 0xc37   : > { %v3078_v10 = vpop.f32.mrf.mxu1 }
 0xc3c   : > { %3094 = vmatmul.mubr.msk.bf16.vlgmr.msra.gmra.mxu0 %vm925_vm2, %v1884_v11 }
 0xc3d   : > { %3104 = vmatpush3.bf16.msra.mxu0 %v3517_v27  ;;  %3105 = vmatprep.mubr.msk.bf16.mxu0 %vm3266_vm1, %v3265_v42 }
 0xc3e   : > { %3115 = vmatprep.subr.bf16.mxu0 %v3265_v42 }
 0xcec   : > { %v1877_v12 = vpop.f32.mrf.mxu1 }
 0xcee   : > { %v3089_v39 = vpop.f32.mrf.mxu1 }
 0xcf0   : > { %v1880_v13 = vpop.f32.mrf.mxu1 }
 0xcf2   : > { %v3090_v15 = vpop.f32.mrf.mxu1 }
 0xcf4   : > { %v1834_v61 = vpop.f32.mrf.mxu0 }
 0xcf5   : > { %v3611_v16 = vadd.f32 %v1877_v12, %v1834_v61 }
 0xcf6   : > { %v3083_v17 = vpop.f32.mrf.mxu0 }
 0xcf8   : > { %v1837_v18 = vpop.f32.mrf.mxu0 }
 0xcfa   : > { %v3084_v19 = vpop.f32.mrf.mxu0 }
 0xcfc   : > { %v1927_v20 = vpop.f32.mrf.mxu0 }
 0xcfd   : > { %v1933_v21 = vmul.f32 0.25, %v1927_v20 }
 0xcfe   : > { %v3095_v22 = vpop.f32.mrf.mxu0 }
 0xcff   : > { %v1934_v27 = vadd.f32 %v1933_v21, %v3444_v2 }
 0xd00   : > { %v1930_v23 = vpop.f32.mrf.mxu0 }
 0xd01   : > { %v1935_v24 = vsel %vm974_vm5, %v1934_v27, -inf }
 0xd02   : > { %1936 = vmax.xlane.f32.xlu1 %v1935_v24  ;;  %v3096_v25 = vpop.f32.mrf.mxu0 }
 0xd03   : > { %v3255_v25 = vld [vmem:[%s3740_s0 + $0x8] sm:$0xff] }
 0xd13   : > { %2042 = vrot.lane.b32.xlu1 %v3527_v45, %s3273_s17 }
 0xd17   : > { %2040 = vrot.lane.b32.xlu1 %v3527_v45, %s3274_s27 }
 0xd8b   : > { %v1937_v26 = vpop.xlane.xlu1 %1936 }
 0xd8c   : > { %v1938_v28 = vsub.f32 %v1934_v27, %v1937_v26 }
 0xd8e   : > { %v1939_v29 = vmul.f32 1.442695, %v1938_v28 }
 0xd8f   : > { %v2043_v36 = vpop.permute.xlu1 %2042 }
 0xd90   : > { %3234 = vpow2.f32 %v1939_v29  ;;  %v2048_v40 = vsel %vm925_vm2, %v2043_v36, 0 }
 0xd93   : > { %v2041_v46 = vpop.permute.xlu1 %2040 }
 0xd9d   : > { %v3235_v30 = vpop.eup %3234 }
 0xd9e   : > { %v1941_v31 = vsel %vm974_vm5, %v3235_v30, 0.0 }
 0xd9f   : > { %1942 = vadd.xlane.f32.xlu0 %v1941_v31 }
 0xdb5   : > { %1947 = vrot.lane.b32.xlu0 %v3565_v7, %s3271_s24 }
 0xe28   : > { %v1943_v32 = vpop.xlane.xlu0 %1942 }
 0xe29   : > { %3236 = vrcp.f32 %v1943_v32 }
 0xe2c   : > { %v1948_v33 = vpop.permute.xlu0 %1947 }
 0xe2d   : > { %v1953_v34 = vsel %vm990_vm3, %v1948_v33, 0 }
 0xe2e   : > { %3098 = vmatpush3.bf16.msra.mxu1 %v1953_v34 }
 0xe2f   : > { %3109 = vmatprep.subr.bf16.mxu1 %v3265_v42 }
 0xe36   : > { %v3237_v45 = vpop.eup %3236 }
 0xe37   : > { %v1945_v35 = vmul.f32 %v3237_v45, %v3235_v30 }
 0xe39   : > { %v1946_v37 = vpack.c.bf16 %v1945_v35, %v1945_v35 }
 0xe3b   : > { %3100 = vmatmul.mubr.msk.bf16.vlgmr.msra.gmra.mxu1 %vm974_vm5, %v1946_v37  ;;  %v3176_v37 = vld [vmem:[%s3384_s16 + $0x34] ss:$8 sps:$4 sm:$0xff]  }
 0xe3c   : > { %3110 = vmatpush3.bf16.xpose.msra.mxu1 %v2048_v40  ;;  %3111 = vmatprep.mubr.msk.bf16.mxu1 %vm3266_vm1, %v3265_v42  ;;  %v3174_v40 = vld [vmem:[%s3384_s16 + $0x30] ss:$8 sps:$4 sm:$0xff]  }
 0xe3d   : > { %3121 = vmatprep.subr.bf16.mxu1 %v3265_v42 }
 0xe43   : > { %3112 = vmatmul.mubr.msk.bf16.vlgmr.msra.gmra.mxu1 %vm925_vm2, %v2041_v46  ;;  %v3179_v46 = vld [vmem:[%s3384_s16 + $0x24] ss:$8 sps:$4 sm:$0xff]  }
 0xe44   : > { %3122 = vmatpush3.bf16.msra.mxu1 %v3542_v57  ;;  %3123 = vmatprep.mubr.msk.bf16.mxu1 %vm3266_vm1, %v3265_v42  ;;  %v3254_v57 = vld [vmem:[%s3740_s0] sm:$0xff] }
 0xe45   : > { %v2197_v55 = vadd.f32 %v3254_v57, %v3584_v44 }
 0xe47   : > { %v3645_v62 = vadd.f32 %v2865_v58, %v2197_v55 }
 0xe49   : > { %v2207_v1 = vsel %vm778_vm0, %v3645_v62, 0.0 }
 0xefb   : > { %v1989_v47 = vpop.f32.mrf.mxu1 }
 0xefc   : > { %v1995_v48 = vpack.c.bf16 %v1989_v47, %v1989_v47  ;;  %v3177_v47 = vld [vmem:[%s3384_s16 + $0x20] ss:$8 sps:$4 sm:$0xff]  }
 0xefd   : > { %v3101_v49 = vpop.f32.mrf.mxu1 }
 0xefe   : > { %3106 = vmatmul.mubr.msk.bf16.vlgmr.msra.gmra.mxu0 %vm925_vm2, %v1995_v48  ;;  %v3182_v48 = vld [vmem:[%s3384_s16 + $0x14] ss:$8 sps:$4 sm:$0xff]   ;;  %v3180_v49 = vld [vmem:[%s3384_s16 + $0x10] ss:$8 sps:$4 sm:$0xff]  }
 0xeff   : > { %v1992_v50 = vpop.f32.mrf.mxu1  ;;  %3117 = vmatprep.mubr.msk.bf16.mxu0 %vm3266_vm1, %v3265_v42 }
 0xf00   : > { %v3185_v50 = vld [vmem:[%s3384_s16 + $0x4] ss:$8 sps:$4 sm:$0xff]  }
 0xf01   : > { %v3102_v51 = vpop.f32.mrf.mxu1 }
 0xf02   : > { %v3183_v51 = vld [vmem:[%s3384_s16] ss:$8 sps:$4 sm:$0xff]   ;;  %s673_s16 = scalar_lea.vmem %s3747_s7, %s3757_s19 }
 0xf03   : > { %v2084_v54 = vpop.f32.mrf.mxu1 }
 0xf04   : > { %v2090_v56 = vmul.f32 0.25, %v2084_v54 }
 0xf05   : > { %v3113_v53 = vpop.f32.mrf.mxu1 }
 0xf06   : > { %v2091_v59 = vadd.f32 %v2090_v56, %v3444_v2 }
 0xf07   : > { %v2087_v60 = vpop.f32.mrf.mxu1 }
 0xf08   : > { %v2092_v63 = vsel %vm974_vm5, %v2091_v59, -inf }
 0xf09   : > { %2093 = vmax.xlane.f32.xlu1 %v2092_v63  ;;  %v3114_v0 = vpop.f32.mrf.mxu1  ;;  %v2866_v63 = vld [vmem:[%s673_s16] ss:$0 sm:$0xff] }
 0xf0d   : > { %2208 = vadd.xlane.f32.xlu1 %v2207_v1 }
 0xf92   : > { %v2094_v3 = vpop.xlane.xlu1 %2093 }
 0xf93   : > { %v2095_v4 = vsub.f32 %v2091_v59, %v2094_v3 }
 0xf95   : > { %v2096_v5 = vmul.f32 1.442695, %v2095_v4  ;;  %v2867_v4 = vld [vmem:[%s676_s23] ss:$0 sm:$0xff]  ;;  %s2907_s23 = sshll.u32 %s3757_s19, 4 }
 0xf96   : > { %v2209_v20 = vpop.xlane.xlu1 %2208 }
 0xf97   : > { %3238 = vpow2.f32 %v2096_v5  ;;  %v2213_v21 = vmul.f32 0.015625, %v2209_v20  ;;  %v3201_v20 = vld [vmem:[%s3389_s21] sm:$0xff]  }
 0xf99   : > { %v2215_v24 = vsub.f32 %v3645_v62, %v2213_v21  ;;  %v738_v21 = vld [vmem:[%s685_s29] sm:$0x3]  ;;  %s706_s29 = scalar_lea.vmem %s3755_s15, %s2907_s23 }
 0xf9b   : > { %v2217_v31 = vmul.f32 %v2215_v24, %v2215_v24 }
 0xf9d   : > { %v2219_v32 = vsel %vm778_vm0, %v2217_v31, 0.0 }
 0xfa4   : > { %v3239_v44 = vpop.eup %3238 }
 0xfa5   : > { %v2098_v6 = vsel %vm974_vm5, %v3239_v44, 0.0 }
 0xfa6   : > { %2099 = vadd.xlane.f32.xlu0 %v2098_v6 }
 0xfbc   : > { %2104 = vrot.lane.b32.xlu0 %v3565_v7, %s3274_s27 }
 0xfbe   : > { %v2033_v2 = vpop.f32.mrf.mxu0 }
 0xfbf   : > { %v2039_v8 = vadd.f32 %v2033_v2, %v3611_v16 }
 0xfc0   : > { %v3107_v38 = vpop.f32.mrf.mxu0 }
 0xfc1   : > { %v3187_v38 = vld [vmem:[%s3389_s21 + $0x38] sm:$0xff]  }
 0xfc2   : > { %v2036_v9 = vpop.f32.mrf.mxu0 }
 0xfc3   : > { %v3188_v9 = vld [vmem:[%s3389_s21 + $0x70] sm:$0xff]  }
 0xfc4   : > { %v3108_v10 = vpop.f32.mrf.mxu0 }
 0xfc5   : > { %v3189_v10 = vld [vmem:[%s3389_s21 + $0x30] sm:$0xff]  }
0x102f   : > { %v2100_v11 = vpop.xlane.xlu0 %2099 }
0x1030   : > { %3240 = vrcp.f32 %v2100_v11  ;;  %v3190_v11 = vld [vmem:[%s3389_s21 + $0x68] sm:$0xff]  }
0x1033   : > { %v2105_v12 = vpop.permute.xlu0 %2104 }
0x1034   : > { %v2110_v39 = vsel %vm990_vm3, %v2105_v12, 0  ;;  %v3191_v12 = vld [vmem:[%s3389_s21 + $0x28] sm:$0xff]  }
0x1035   : > { %3116 = vmatpush3.bf16.msra.mxu0 %v2110_v39  ;;  %v3192_v39 = vld [vmem:[%s3389_s21 + $0x60] sm:$0xff]  }
0x1036   : > { %2312 = vmatprep.subr.bf16.mxu0 %v3176_v37 }
0x103d   : > { %v3241_v13 = vpop.eup %3240 }
0x103e   : > { %v2102_v15 = vmul.f32 %v3241_v13, %v3239_v44  ;;  %v3193_v13 = vld [vmem:[%s3389_s21 + $0x20] sm:$0xff]  }
0x1040   : > { %v2103_v61 = vpack.c.bf16 %v2102_v15, %v2102_v15  ;;  %v3194_v15 = vld [vmem:[%s3389_s21 + $0x58] sm:$0xff]  }
0x1042   : > { %3118 = vmatmul.mubr.msk.bf16.vlgmr.msra.gmra.mxu0 %vm974_vm5, %v2103_v61  ;;  %v3195_v61 = vld [vmem:[%s3389_s21 + $0x18] sm:$0xff]  }
0x1043   : > { %2336 = vmatprep.mubr.bf16.mxu0 %v3264_v14  ;;  %2313 = vmatpush1.bf16.msra.mxu0 %v3174_v40 }
0x1044   : > { %2314 = vmatprep.subr.bf16.mxu0 %v3179_v46 }
0x1047   : > { %2315 = vmatpush1.bf16.msra.mxu0 %v3177_v47 }
0x1048   : > { %2316 = vmatprep.subr.bf16.mxu0 %v3182_v48 }
0x104b   : > { %2317 = vmatpush1.bf16.msra.mxu0 %v3180_v49 }
0x104c   : > { %2318 = vmatprep.subr.bf16.mxu0 %v3185_v50 }
0x104f   : > { %2319 = vmatpush1.bf16.msra.mxu0 %v3183_v51 }
0x1050   : > { %3127 = vmatprep.subr.bf16.mxu0 %v3265_v42 }
0x1102   : > { %v2146_v7 = vpop.f32.mrf.mxu0 }
0x1103   : > { %v2152_v17 = vpack.c.bf16 %v2146_v7, %v2146_v7  ;;  %v3196_v7 = vld [vmem:[%s3389_s21 + $0x50] sm:$0xff]  }
0x1104   : > { %v3119_v18 = vpop.f32.mrf.mxu0 }
0x1105   : > { %3124 = vmatmul.mubr.msk.bf16.vlgmr.msra.gmra.mxu1 %vm925_vm2, %v2152_v17  ;;  %v3197_v17 = vld [vmem:[%s3389_s21 + $0x10] sm:$0xff]   ;;  %v3198_v18 = vld [vmem:[%s3389_s21 + $0x48] sm:$0xff]  }
0x1106   : > { %v2149_v16 = vpop.f32.mrf.mxu0 }
0x1107   : > { %v3199_v16 = vld [vmem:[%s3389_s21 + $0x8] sm:$0xff]  }
0x1108   : > { %v3120_v19 = vpop.f32.mrf.mxu0 }
0x1109   : > { %v3200_v19 = vld [vmem:[%s3389_s21 + $0x40] sm:$0xff]  }
0x11c5   : > { %v2190_v22 = vpop.f32.mrf.mxu1 }
0x11c6   : > { %v2196_v27 = vadd.f32 %v2190_v22, %v2039_v8  ;;  %v3186_v8 = vld [vmem:[%s3389_s21 + $0x78] sm:$0xff]   ;;  %v2254_v22 = vrot.slane %v738_v21, %v826_v43 }
0x11c7   : > { %v3125_v23 = vpop.f32.mrf.mxu1  ;;  %2956 = vmatprep.subr.bf16.mxu1 %v3186_v8 }
0x11c8   : > { %v2198_v14 = vadd.f32 %v3255_v25, %v2196_v27  ;;  %2957 = vmatpush3.bf16.msra.mxu1 %v3187_v38  ;;  %v2258_v27 = vrot.slane %v738_v21, %v830_v52 }
0x11c9   : > { %v2193_v26 = vpop.f32.mrf.mxu1  ;;  %2958 = vmatprep.subr.bf16.mxu1 %v3188_v9 }
0x11ca   : > { %v3662_v28 = vadd.f32 %v2865_v58, %v2198_v14 }
0x11cb   : > { %v3126_v29 = vpop.f32.mrf.mxu1 }
0x11cc   : > { %v2210_v30 = vsel %vm778_vm0, %v3662_v28, 0.0  ;;  %2959 = vmatpush3.bf16.msra.mxu1 %v3189_v10 }
0x11cd   : > { %2211 = vadd.xlane.f32.xlu1 %v2210_v30  ;;  %2960 = vmatprep.subr.bf16.mxu1 %v3190_v11  ;;  %v3202_v11 = vld [vmem:[%s698_s30 + $0x18] sm:$0xff]  }
0x11d0   : > { %2961 = vmatpush3.bf16.msra.mxu1 %v3191_v12  ;;  %v3203_v12 = vld [vmem:[%s698_s30 + $0x10] sm:$0xff]  }
0x11d1   : > { %2220 = vadd.xlane.f32.xlu1 %v2219_v32  ;;  %2962 = vmatprep.subr.bf16.mxu1 %v3192_v39  ;;  %v3204_v39 = vld [vmem:[%s698_s30 + $0x8] sm:$0xff]  }
0x11d4   : > { %2963 = vmatpush3.bf16.msra.mxu1 %v3193_v13  ;;  %v3205_v13 = vld [vmem:[%s698_s30] sm:$0xff]  }
0x11d5   : > { %2964 = vmatprep.subr.bf16.mxu1 %v3194_v15 }
0x11d8   : > { %2965 = vmatpush3.bf16.msra.mxu1 %v3195_v61 }
0x11d9   : > { %2966 = vmatprep.subr.bf16.mxu1 %v3196_v7 }
0x11dc   : > { %2967 = vmatpush3.bf16.msra.mxu1 %v3197_v17  ;;  %v2877_v17 = vld [vmem:[%s693_s26] ss:$0 sm:$0xff] }
0x11dd   : > { %2968 = vmatprep.subr.bf16.mxu1 %v3198_v18 }
0x11e0   : > { %2969 = vmatpush3.bf16.msra.mxu1 %v3199_v16 }
0x11e1   : > { %2970 = vmatprep.subr.bf16.mxu1 %v3200_v19 }
0x11e4   : > { %2971 = vmatpush3.bf16.msra.mxu1 %v3201_v20 }
0x1256   : > { %v2212_v33 = vpop.xlane.xlu1 %2211 }
0x1257   : > { %v2214_v34 = vmul.f32 0.015625, %v2212_v33 }
0x1259   : > { %v2216_v45 = vsub.f32 %v3662_v28, %v2214_v34 }
0x125a   : > { %v2221_v54 = vpop.xlane.xlu1 %2220 }
0x125b   : > { %v2218_v35 = vmul.f32 %v2216_v45, %v2216_v45  ;;  %v2225_v57 = vmul.f32 0.015625, %v2221_v54 }
0x125d   : > { %v2222_v36 = vsel %vm778_vm0, %v2218_v35, 0.0  ;;  %v2227_v55 = vadd.f32 1e-06, %v2225_v57 }
0x125e   : > { %2223 = vadd.xlane.f32.xlu1 %v2222_v36 }
0x125f   : > { %3242 = vrsqrt.f32 %v2227_v55 }
0x126c   : > { %v3243_v59 = vpop.eup %3242 }
0x126d   : > { %v2231_v60 = vmul.f32 %v3243_v59, %v2215_v24 }
0x126f   : > { %v2239_v3 = vmul.f32 %v2866_v63, %v2231_v60 }
0x1271   : > { %v2247_v44 = vadd.f32 %v2867_v4, %v2239_v3 }
0x12e7   : > { %v2224_v56 = vpop.xlane.xlu1 %2223 }
0x12e8   : > { %v2226_v58 = vmul.f32 0.015625, %v2224_v56 }
0x12ea   : > { %v2228_v53 = vadd.f32 1e-06, %v2226_v58 }
0x12ec   : > { %3244 = vrsqrt.f32 %v2228_v53 }
0x12f9   : > { %v3245_v0 = vpop.eup %3244 }
0x12fa   : > { %v2232_v1 = vmul.f32 %v3245_v0, %v2216_v45 }
0x12fc   : > { %v2240_v5 = vmul.f32 %v2866_v63, %v2232_v1 }
0x12fe   : > { %v2248_v6 = vadd.f32 %v2867_v4, %v2240_v5 }
0x1300   : > { %v2249_v2 = vpack.c.bf16 %v2248_v6, %v2247_v44 }
0x1302   : > { %2876 = vmatmul.mubr.msk.bf16.vlgmr.msra.gmra.mxu0 %vm778_vm0, %v2249_v2 }
0x1303   : > { %3135 = vmatprep.mubr.msk.bf16.mxu0 %vm3266_vm1, %v3265_v42  ;;  %3128 = vmatpush3.bf16.msra.mxu0 %v3202_v11 }
0x1304   : > { %3129 = vmatprep.subr.bf16.mxu0 %v3265_v42 }
0x1307   : > { %3130 = vmatpush3.bf16.msra.mxu0 %v3203_v12 }
0x1308   : > { %3131 = vmatprep.subr.bf16.mxu0 %v3265_v42 }
0x130b   : > { %3132 = vmatpush3.bf16.msra.mxu0 %v3204_v39 }
0x130c   : > { %3133 = vmatprep.subr.bf16.mxu0 %v3265_v42 }
0x130f   : > { %3134 = vmatpush3.bf16.msra.mxu0 %v3205_v13 }
0x13c2   : > { %v2338_v23 = vpop.f32.mrf.mxu0 }
0x13c3   : > { %v2339_v24 = vadd.f32 %v2338_v23, %v2254_v22  ;;  %v2894_v23 = vld [vmem:[%s701_s22] ss:$0 sm:$0xff] }
0x13c4   : > { %v2340_v25 = vpop.f32.mrf.mxu0 }
0x13c5   : > { %v2347_v14 = vmul.f32 %v2339_v24, %v2339_v24  ;;  %v2341_v26 = vadd.f32 %v2340_v25, %v2258_v27 }
0x13c6   : > { %v2342_v29 = vpop.f32.mrf.mxu0 }
0x13c7   : > { %v2351_v30 = vmul.f32 %v2347_v14, %v2339_v24  ;;  %v2348_v31 = vmul.f32 %v2341_v26, %v2341_v26  ;;  %v2343_v32 = vadd.f32 %v2342_v29, %v2254_v22 }
0x13c8   : > { %v2344_v33 = vpop.f32.mrf.mxu0 }
0x13c9   : > { %v2355_v34 = vmul.f32 0.044715, %v2351_v30  ;;  %v2352_v45 = vmul.f32 %v2348_v31, %v2341_v26  ;;  %v2349_v35 = vmul.f32 %v2343_v32, %v2343_v32  ;;  %v2345_v36 = vadd.f32 %v2344_v33, %v2258_v27 }
0x13cb   : > { %v2359_v37 = vadd.f32 %v2355_v34, %v2339_v24  ;;  %v2356_v40 = vmul.f32 0.044715, %v2352_v45  ;;  %v2353_v43 = vmul.f32 %v2349_v35, %v2343_v32  ;;  %v2350_v46 = vmul.f32 %v2345_v36, %v2345_v36 }
0x13cd   : > { %v2363_v41 = vmul.f32 0.7978846, %v2359_v37  ;;  %v2360_v52 = vadd.f32 %v2356_v40, %v2341_v26  ;;  %v2357_v47 = vmul.f32 0.044715, %v2353_v43  ;;  %v2354_v48 = vmul.f32 %v2350_v46, %v2345_v36 }
0x13cf   : > { %v2364_v49 = vmul.f32 0.7978846, %v2360_v52  ;;  %v2361_v50 = vadd.f32 %v2357_v47, %v2343_v32  ;;  %v2358_v51 = vmul.f32 0.044715, %v2354_v48  ;;  %3246 = vtanh.f32 %v2363_v41 }
0x13d1   : > { %3248 = vtanh.f32 %v2364_v49  ;;  %v2365_v54 = vmul.f32 0.7978846, %v2361_v50  ;;  %v2362_v57 = vadd.f32 %v2358_v51, %v2345_v36 }
0x13d3   : > { %3250 = vtanh.f32 %v2365_v54  ;;  %v2366_v55 = vmul.f32 0.7978846, %v2362_v57 }
0x13d5   : > { %3252 = vtanh.f32 %v2366_v55 }
0x13dc   : > { %v3247_v56 = vpop.eup %3246 }
0x13dd   : > { %v2371_v60 = vadd.f32 1.0, %v3247_v56 }
0x13de   : > { %v3249_v58 = vpop.eup %3248 }
0x13df   : > { %v2372_v53 = vadd.f32 1.0, %v3249_v58  ;;  %v2375_v5 = vmul.f32 0.5, %v2371_v60 }
0x13e0   : > { %v3251_v59 = vpop.eup %3250 }
0x13e1   : > { %v2373_v63 = vadd.f32 1.0, %v3251_v59  ;;  %v2376_v4 = vmul.f32 0.5, %v2372_v53  ;;  %v2379_v38 = vmul.f32 %v2375_v5, %v2339_v24 }
0x13e2   : > { %v3253_v0 = vpop.eup %3252 }
0x13e3   : > { %v2377_v1 = vmul.f32 0.5, %v2373_v63  ;;  %v2374_v3 = vadd.f32 1.0, %v3253_v0  ;;  %v2380_v2 = vmul.f32 %v2376_v4, %v2341_v26 }
0x13e5   : > { %v2378_v44 = vmul.f32 0.5, %v2374_v3  ;;  %v2381_v6 = vmul.f32 %v2377_v1, %v2343_v32 }
0x13e7   : > { %v2382_v8 = vmul.f32 %v2378_v44, %v2345_v36  ;;  %v2383_v10 = vpack.c.bf16 %v2381_v6, %v2379_v38 }
0x13e9   : > { %v2384_v9 = vpack.c.bf16 %v2382_v8, %v2380_v2 }
0x13eb   : > { %2519 = vmatprep.mubr.bf16.mxu1 %v2384_v9 }
0x13ec   : > { %2520 = vmatmul.mubr.bf16.vlgmr.msra.gmra.mxu1 %v2383_v10 }
0x14ac   : > { %v2972_v15 = vpop.f32.mrf.mxu1 }
0x14ae   : > { %v2973_v61 = vpop.f32.mrf.mxu1 }
0x14af   : > { %v2974_v7 = vadd.f32 %v2973_v61, %v2972_v15 }
0x14b0   : > { %v2975_v18 = vpop.f32.mrf.mxu1 }
0x14b1   : > { %v2522_v19 = vadd.f32 %v2974_v7, %v2877_v17 }
0x14b2   : > { %v2976_v16 = vpop.f32.mrf.mxu1 }
0x14b3   : > { %v2977_v20 = vadd.f32 %v2976_v16, %v2975_v18  ;;  %v2528_v22 = vadd.f32 %v2522_v19, %v3645_v62 }
0x14b5   : > { %v2525_v21 = vadd.f32 %v2977_v20, %v2877_v17 }
0x14b7   : > { %v2529_v42 = vadd.f32 %v2525_v21, %v3662_v28 }
0x14b9   : > { %v2530_v27 = vpack.c.bf16 %v2529_v42, %v2528_v22 }
0x14bb   : > { %3136 = vmatmul.mubr.msk.bf16.vlgmr.msra.gmra.mxu0 %vm778_vm0, %v2530_v27 }
0x157b   : > { %v2607_v24 = vpop.f32.mrf.mxu0 }
0x157c   : > { %v2608_v25 = vadd.f32 %v2894_v23, %v2607_v24 }
0x157d   : > { %v3137_v14 = vpop.f32.mrf.mxu0 }
0x157e   : > { %2615 = vst.msk [vmem:[%s706_s29] sm:$0xff] %vm2614_vm6, %v2608_v25 }
0x157f   : > { %v2610_v62 = vpop.f32.mrf.mxu0 }
0x1580   : > { %v2611_v28 = vadd.f32 %v2894_v23, %v2610_v62 }
0x1581   : > { %v3138_v26 = vpop.f32.mrf.mxu0 }
0x1582   : > { %2616 = vst.msk [vmem:[%s706_s29 + $0x8] sm:$0xff] %vm2614_vm6, %v2611_v28 }
0x1583 PF: > { %s25_s18 = sadd.s32 1, %s3262_s18  }
0x1584   : > { %p22_p4 = scmp.ge.s32.totalorder %s25_s18, 6  }
0x1586   :  { %24 = sbr.rel (!%p22_p4) target bundleno = 1 (0x1), region = 149 }

// kernel: _lambda_.5
= control target key start
LH: loop header
LB: loop body
LE: loop exit
PB: predicated region body
PF: predicated region fallthrough
CT: control target
= control target key end

     0   :  { %s3207_s18 = smov 0   ;;  %s3637_s0 = inlined_call_operand.vmem [shape: f32[16,64], index: 0, kind: input, shape index: {}]   ;;  %s3638_s1 = inlined_call_operand.vmem [shape: f32[2,1,64], index: 1, kind: input, shape index: {}, may-alias: {1,7}]   ;;  %s3639_s2 = inlined_call_operand.vmem [shape: f32[2,1,64], index: 2, kind: input, shape index: {}, may-alias: {2,6,8,12}]   ;;  %s3640_s3 = inlined_call_operand.vmem [shape: bf16[2,64,192], index: 3, kind: input, shape index: {}]   ;;  %s3641_s4 = inlined_call_operand.vmem [shape: f32[2,1,192], index: 4, kind: input, shape index: {}]   ;;  %s3642_s5 = inlined_call_operand.vmem [shape: bf16[2,64,64], index: 5, kind: input, shape index: {}]   ;;  %s3643_s6 = inlined_call_operand.vmem [shape: f32[2,1,64], index: 6, kind: input, shape index: {}, may-alias: {2,6,8,12}]   ;;  %s3644_s7 = inlined_call_operand.vmem [shape: f32[2,1,64], index: 7, kind: input, shape index: {}, may-alias: {1,7}]   ;;  %s3645_s8 = inlined_call_operand.vmem [shape: f32[2,1,64], index: 8, kind: input, shape index: {}, may-alias: {2,6,8,12}]   ;;  %s3646_s9 = inlined_call_operand.vmem [shape: bf16[2,64,256], index: 9, kind: input, shape index: {}]   ;;  %s3647_s10 = inlined_call_operand.vmem [shape: f32[2,1,256], index: 10, kind: input, shape index: {}]   ;;  %s3648_s11 = inlined_call_operand.vmem [shape: bf16[2,256,64], index: 11, kind: input, shape index: {}]   ;;  %s3649_s12 = inlined_call_operand.vmem [shape: f32[2,1,64], index: 12, kind: input, shape index: {}, may-alias: {2,6,8,12}]   ;;  %s3650_s13 = inlined_call_operand.vmem [shape: f32[1,64], index: 13, kind: input, shape index: {}]   ;;  %s3651_s14 = inlined_call_operand.vmem [shape: f32[1,64], index: 14, kind: input, shape index: {}]   ;;  %s3652_s15 = inlined_call_operand.vmem [shape: f32[16,64], index: 15, kind: output, shape index: {}]  }
   0x1   :  { %3655 = sst [smem:[#allocation5_spill]] %s3639_s2 }
   0x2   :  { %3656 = sst [smem:[#allocation6_spill]] %s3640_s3 }
   0x3   :  { %3657 = sst [smem:[#allocation7_spill]] %s3641_s4 }
   0x4   :  { %3658 = sst [smem:[#allocation8_spill]] %s3650_s13 }
   0x5   :  { %3659 = sst [smem:[#allocation9_spill]] %s3651_s14 }
   0x6   :  { %3660 = sst [smem:[#allocation10_spill]] %s3652_s15 }
   0x7 LB: > { %3661 = sst [smem:[#allocation3_spill]] %s3114_s18  ;;  %s3213_s19 = sadd.s32 4294967295, %s3114_s18   ;;  %s3114_s18 = sphi %s3207_s18, %s25_s18  }
   0x8   : > { %p2689_p0 = scmp.ge.s32.totalorder %s3114_s18, 1  ;;  %p528_p1 = scmp.lt.s32.totalorder %s3114_s18, 3 }
   0xa   : > { %p529_p2 = pnand %p2689_p0, %p528_p1 }
   0xc   : > { %532 = sbr.rel (%p529_p2) target bundleno = 5651 (0x1613), region = 80 }
  0x11   : > { %p612_p3 = scmp.lt.s32.totalorder %s3213_s19, 1  ;;  %s3663_s3 = sld [smem:[#allocation6_spill]] }
  0x12   : > { %s3664_s4 = sld [smem:[#allocation7_spill]]  ;;  %p2700_p4 = scmp.ne.s32.totalorder %s3213_s19, 0 }
  0x13   : > { %s3219_s20 = scalar_select %p612_p3, %s3213_s19, 1 }
  0x15   : > { %s2774_s27 = sshll.u32 %s3219_s20, 6  ;;  %s2692_s28 = sshll.u32 %s3219_s20, 1 }
  0x16   : > { %s2775_s18 = sshll.u32 %s3219_s20, 5  ;;  %s640_s17 = scalar_lea.vmem %s3645_s8, %s3219_s20 }
  0x17   : > { %s3234_s16 = scalar_lea.vmem %s3663_s3, %s2774_s27  ;;  %s3249_s25 = scalar_lea.vmem %s3642_s5, %s2775_s18 }
  0x18   : > { %s3239_s22 = scalar_lea.vmem %s3664_s4, %s2692_s28  ;;  %s3267_s23 = scalar_lea.vmem %s3647_s10, %s2692_s28 }
  0x19   : > { %3665 = sst [smem:[#allocation4_spill]] %s3239_s22  ;;  %s3262_s22 = scalar_lea.vmem %s3646_s9, %s2774_s27 }
  0x1a   : > { %s2777_s13 = sshll.u32 %s3219_s20, 7  ;;  %s657_s3 = scalar_lea.vmem %s3649_s12, %s3219_s20 }
  0x1b   : > { %s3273_s2 = scalar_lea.vmem %s3648_s11, %s2777_s13  ;;  %662 = sbr.rel (%p2700_p4) target bundleno = 34 (0x22), region = 84 }
  0x20   : > { %v663_v0 = vld [vmem:[%s3637_s0] sm:$0xff]  ;;  %vm665_vm0 = vcmask 523264   ;;  %v664_v1 = vld [vmem:[%s3637_s0 + $0x8] sm:$0xff] }
  0x21   : > { %666 = vst.msk [vmem:[#allocation2] sm:$0xff] %vm665_vm0, %v663_v0  ;;  %667 = vst.msk [vmem:[#allocation2 + $0x8] sm:$0xff] %vm665_vm0, %v664_v1 }
  0x22 PF: > { %vm738_vm1 = vcmask 523264   ;;  %v3011_v16 = vld [vmem:[%s3234_s16 + $0x34] ss:$8 sps:$4 sm:$0xff]   ;;  %v3013_v17 = vld [vmem:[%s3234_s16 + $0x30] ss:$8 sps:$4 sm:$0xff]   ;;  %v3116_v20 = vmov 0   ;;  %s3666_s14 = scalar_lea.vmem %s3638_s1, %s3219_s20  ;;  %v734_v43 = vlaneseq }
  0x23   : > { %v3014_v18 = vld [vmem:[%s3234_s16 + $0x24] ss:$8 sps:$4 sm:$0xff]   ;;  %845 = vmatprep.subr.bf16.mxu0 %v3011_v16  ;;  %v3016_v19 = vld [vmem:[%s3234_s16 + $0x20] ss:$8 sps:$4 sm:$0xff]   ;;  %869 = vmatprep.mubr.bf16.mxu0 %v3116_v20  ;;  %v3017_v21 = vld [vmem:[%s3234_s16 + $0x14] ss:$8 sps:$4 sm:$0xff]  }
  0x24   : > { %846 = vmatpush1.bf16.msra.mxu0 %v3013_v17  ;;  %v3019_v22 = vld [vmem:[%s3234_s16 + $0x10] ss:$8 sps:$4 sm:$0xff]   ;;  %v3020_v23 = vld [vmem:[%s3234_s16 + $0x4] ss:$8 sps:$4 sm:$0xff]   ;;  %v3022_v24 = vld [vmem:[%s3234_s16] ss:$8 sps:$4 sm:$0xff]  }
  0x25   : > { %847 = vmatprep.subr.bf16.mxu0 %v3014_v18  ;;  %v2701_v33 = vld [vmem:[%s3666_s14] ss:$0 sm:$0xff]  ;;  %s3667_s15 = sld [smem:[#allocation4_spill]]  ;;  %v3117_v42 = vmov 0.0   ;;  %v3316_v44 = vshrl.u32 %v734_v43, 7  ;;  %vm3118_vm2 = vmmov 0  }
  0x26   : > { %s3668_s18 = sld [smem:[#allocation5_spill]]  ;;  %2854 = vmatprep.subr.bf16.mxu1 %v3117_v42  ;;  %2856 = vmatprep.mubr.msk.bf16.mxu1 %vm3118_vm2, %v3117_v42  ;;  %vm950_vm3 = vcmask 1043456   ;;  %s3119_s26 = smov 48   ;;  %vm885_vm4 = vcmask 130048   ;;  %vm934_vm6 = vcmask 64512  }
  0x27   : > { %v786_v45 = vsub.s32 0, %v3316_v44  ;;  %v790_v47 = vsub.s32 1, %v3316_v44  ;;  %s3120_s4 = smov 64   ;;  %s3121_s27 = smov 112  }
  0x28   : > { %v3286_v2 = vld [vmem:[#allocation2] sm:$0xff]  ;;  %v733_v3 = vld [vmem:[#allocation2 + $0x8] sm:$0xff]  ;;  %848 = vmatpush1.bf16.msra.mxu0 %v3016_v19  ;;  %s3123_s28 = smov 96   ;;  %s3124_s30 = smov 32  }
  0x29   : > { %v739_v4 = vsel %vm738_vm1, %v3286_v2, 0.0  ;;  %v742_v5 = vsel %vm738_vm1, %v733_v3, 0.0  ;;  %849 = vmatprep.subr.bf16.mxu0 %v3017_v21  ;;  %s3125_s29 = smov 16   ;;  %s3126_s21 = smov 80  }
  0x2a   : > { %740 = vadd.xlane.f32.xlu0 %v739_v4  ;;  %v3122_v4 = vmov -1e+30   ;;  %p2769_p5 = scmp.ne.s32.totalorder %s3213_s19, 1 }
  0x2b   : > { %v678_v46 = vld [vmem:[%s3667_s15] sm:$0x3]  ;;  %s3670_s15 = scalar_lea.vmem %s3643_s6, %s3219_s20 }
  0x2c   : > { %850 = vmatpush1.bf16.msra.mxu0 %v3019_v22  ;;  %s3669_s24 = scalar_lea.vmem %s3668_s18, %s3219_s20  ;;  %v787_v49 = vrot.slane %v678_v46, %v786_v45  ;;  %v791_v51 = vrot.slane %v678_v46, %v790_v47 }
  0x2d   : > { %851 = vmatprep.subr.bf16.mxu0 %v3020_v23  ;;  %v2702_v37 = vld [vmem:[%s3669_s24] ss:$0 sm:$0xff] }
  0x2e   : > { %743 = vadd.xlane.f32.xlu0 %v742_v5 }
  0x30   : > { %852 = vmatpush1.bf16.msra.mxu0 %v3022_v24 }
  0x31   : > { %2848 = vmatprep.subr.bf16.mxu0 %v3117_v42 }
  0xb3   : > { %v741_v6 = vpop.xlane.xlu0 %740 }
  0xb4   : > { %v746_v7 = vmul.f32 0.015625, %v741_v6 }
  0xb6   : > { %v748_v8 = vsub.f32 %v3286_v2, %v746_v7 }
  0xb7   : > { %v744_v9 = vpop.xlane.xlu0 %743 }
  0xb8   : > { %v747_v10 = vmul.f32 0.015625, %v744_v9  ;;  %v750_v11 = vmul.f32 %v748_v8, %v748_v8 }
  0xba   : > { %v749_v12 = vsub.f32 %v733_v3, %v747_v10  ;;  %v752_v13 = vsel %vm738_vm1, %v750_v11, 0.0  ;;  %v735_v3 = vand.u32 127, %v734_v43  ;;  %v3381_v43 = vld [vmem:[%s3249_s25 + $0x8] sm:$0xff]  }
  0xbb   : > { %753 = vadd.xlane.f32.xlu1 %v752_v13 }
  0xbc   : > { %v751_v14 = vmul.f32 %v749_v12, %v749_v12  ;;  %vm736_vm5 = vcmp.lt.s32.totalorder %v735_v3, 5 }
  0xbd   : > { %v3353_v5 = vsel %vm736_vm5, 0.0, %v3122_v4 }
  0xbe   : > { %v755_v15 = vsel %vm738_vm1, %v751_v14, 0.0 }
  0xbf   : > { %756 = vadd.xlane.f32.xlu1 %v755_v15 }
 0x144   : > { %v754_v25 = vpop.xlane.xlu1 %753 }
 0x145   : > { %v758_v26 = vmul.f32 0.015625, %v754_v25 }
 0x147   : > { %v760_v27 = vadd.f32 1e-06, %v758_v26 }
 0x148   : > { %v757_v28 = vpop.xlane.xlu1 %756 }
 0x149   : > { %3055 = vrsqrt.f32 %v760_v27  ;;  %v759_v29 = vmul.f32 0.015625, %v757_v28 }
 0x14b   : > { %v761_v30 = vadd.f32 1e-06, %v759_v29 }
 0x14d   : > { %3057 = vrsqrt.f32 %v761_v30 }
 0x156   : > { %v3056_v31 = vpop.eup %3055 }
 0x157   : > { %v764_v32 = vmul.f32 %v3056_v31, %v748_v8 }
 0x159   : > { %v772_v36 = vmul.f32 %v2701_v33, %v764_v32 }
 0x15a   : > { %v3058_v34 = vpop.eup %3057 }
 0x15b   : > { %v765_v35 = vmul.f32 %v3058_v34, %v749_v12  ;;  %v780_v39 = vadd.f32 %v2702_v37, %v772_v36 }
 0x15d   : > { %v773_v38 = vmul.f32 %v2701_v33, %v765_v35 }
 0x15f   : > { %v781_v40 = vadd.f32 %v2702_v37, %v773_v38 }
 0x161   : > { %v782_v41 = vpack.c.bf16 %v781_v40, %v780_v39 }
 0x163   : > { %2711 = vmatmul.mubr.msk.bf16.vlgmr.msra.gmra.mxu0 %vm738_vm1, %v782_v41  ;;  %v3376_v41 = vld [vmem:[%s3249_s25] sm:$0xff]  }
 0x164   : > { %2850 = vmatprep.mubr.msk.bf16.mxu0 %vm3118_vm2, %v3117_v42 }
 0x223   : > { %v871_v48 = vpop.f32.mrf.mxu0 }
 0x224   : > { %v872_v53 = vadd.f32 %v871_v48, %v787_v49 }
 0x225   : > { %v873_v50 = vpop.f32.mrf.mxu0 }
 0x226   : > { %v874_v56 = vadd.f32 %v873_v50, %v791_v51 }
 0x227   : > { %v875_v52 = vpop.f32.mrf.mxu0 }
 0x228   : > { %v876_v54 = vadd.f32 %v875_v52, %v787_v49 }
 0x229   : > { %v877_v55 = vpop.f32.mrf.mxu0 }
 0x22a   : > { %v3329_v57 = vpack.c.bf16 %v876_v54, %v872_v53  ;;  %v878_v58 = vadd.f32 %v877_v55, %v791_v51 }
 0x22c   : > { %v3331_v59 = vpack.c.bf16 %v878_v58, %v874_v56  ;;  %997 = vrot.lane.b32.xlu1 %v3329_v57, %s3119_s26  ;;  %883 = vrot.lane.b32.xlu0 %v3329_v57, %s3120_s4 }
 0x22e   : > { %v952_v60 = vsel %vm950_vm3, %v3331_v59, 0 }
 0x22f   : > { %2855 = vmatpush3.bf16.msra.mxu1 %v952_v60 }
 0x230   : > { %995 = vrot.lane.b32.xlu1 %v3329_v57, %s3121_s27  ;;  %2866 = vmatprep.subr.bf16.mxu1 %v3117_v42 }
 0x29e   : > { %v884_v61 = vpop.permute.xlu0 %883  ;;  %v998_v63 = vpop.permute.xlu1 %997 }
 0x29f   : > { %v890_v62 = vsel %vm885_vm4, %v884_v61, 0  ;;  %v1003_v0 = vsel %vm885_vm4, %v998_v63, 0 }
 0x2a0   : > { %2849 = vmatpush3.bf16.xpose.msra.mxu0 %v890_v62 }
 0x2a1   : > { %2860 = vmatprep.subr.bf16.mxu0 %v3117_v42 }
 0x2a2   : > { %v996_v1 = vpop.permute.xlu1 %995 }
 0x2a7   : > { %2851 = vmatmul.mubr.msk.bf16.vlgmr.msra.gmra.mxu0 %vm885_vm4, %v3329_v57 }
 0x2a8   : > { %2861 = vmatpush3.bf16.xpose.msra.mxu0 %v1003_v0  ;;  %2862 = vmatprep.mubr.msk.bf16.mxu0 %vm3118_vm2, %v3117_v42 }
 0x2a9   : > { %2872 = vmatprep.subr.bf16.mxu0 %v3117_v42 }
 0x2af   : > { %2863 = vmatmul.mubr.msk.bf16.vlgmr.msra.gmra.mxu0 %vm885_vm4, %v996_v1 }
 0x2b0   : > { %2874 = vmatprep.mubr.msk.bf16.mxu0 %vm3118_vm2, %v3117_v42  ;;  %2873 = vmatpush3.bf16.msra.mxu0 %v3381_v43 }
 0x2b1   : > { %2884 = vmatprep.subr.bf16.mxu0 %v3117_v42 }
 0x367   : > { %v926_v6 = vpop.f32.mrf.mxu0 }
 0x368   : > { %v932_v7 = vmul.f32 0.25, %v926_v6 }
 0x369   : > { %v2852_v8 = vpop.f32.mrf.mxu0 }
 0x36a   : > { %v933_v9 = vadd.f32 %v932_v7, %v3353_v5 }
 0x36b   : > { %v929_v10 = vpop.f32.mrf.mxu0 }
 0x36c   : > { %v935_v11 = vsel %vm934_vm6, %v933_v9, -inf }
 0x36d   : > { %936 = vmax.xlane.f32.xlu1 %v935_v11  ;;  %v2853_v12 = vpop.f32.mrf.mxu0 }
 0x36f   : > { %v1039_v13 = vpop.f32.mrf.mxu0 }
 0x370   : > { %v1045_v14 = vmul.f32 0.25, %v1039_v13 }
 0x371   : > { %v2864_v15 = vpop.f32.mrf.mxu0 }
 0x372   : > { %v1046_v16 = vadd.f32 %v1045_v14, %v3353_v5 }
 0x373   : > { %v1042_v17 = vpop.f32.mrf.mxu0 }
 0x374   : > { %v1047_v18 = vsel %vm934_vm6, %v1046_v16, -inf }
 0x375   : > { %1048 = vmax.xlane.f32.xlu0 %v1047_v18  ;;  %v2865_v19 = vpop.f32.mrf.mxu0 }
 0x37e   : > { %1060 = vrot.lane.b32.xlu1 %v3331_v59, %s3121_s27 }
 0x382   : > { %1207 = vrot.lane.b32.xlu1 %v3329_v57, %s3123_s28 }
 0x3f6   : > { %v937_v21 = vpop.xlane.xlu1 %936 }
 0x3f7   : > { %v938_v22 = vsub.f32 %v933_v9, %v937_v21 }
 0x3f9   : > { %v939_v23 = vmul.f32 1.442695, %v938_v22 }
 0x3fa   : > { %v1061_v35 = vpop.permute.xlu1 %1060 }
 0x3fb   : > { %3059 = vpow2.f32 %v939_v23  ;;  %v1066_v37 = vsel %vm950_vm3, %v1061_v35, 0 }
 0x3fe   : > { %v1049_v24 = vpop.xlane.xlu0 %1048  ;;  %v1208_v61 = vpop.permute.xlu1 %1207 }
 0x3ff   : > { %v1050_v25 = vsub.f32 %v1046_v16, %v1049_v24 }
 0x401   : > { %v1051_v26 = vmul.f32 1.442695, %v1050_v25 }
 0x403   : > { %3061 = vpow2.f32 %v1051_v26 }
 0x408   : > { %v3060_v27 = vpop.eup %3059 }
 0x409   : > { %v941_v28 = vsel %vm934_vm6, %v3060_v27, 0.0 }
 0x40a   : > { %942 = vadd.xlane.f32.xlu0 %v941_v28 }
 0x410   : > { %v3062_v29 = vpop.eup %3061 }
 0x411   : > { %v1053_v30 = vsel %vm934_vm6, %v3062_v29, 0.0 }
 0x412   : > { %1054 = vadd.xlane.f32.xlu0 %v1053_v30 }
 0x428   : > { %1209 = vrot.lane.b32.xlu0 %v3329_v57, %s3124_s30 }
 0x493   : > { %v943_v31 = vpop.xlane.xlu0 %942 }
 0x494   : > { %3063 = vrcp.f32 %v943_v31  ;;  %v3418_v31 = vld [vmem:[%s3249_s25 + $0x10] sm:$0xff]  }
 0x49b   : > { %v1055_v32 = vpop.xlane.xlu0 %1054 }
 0x49c   : > { %3065 = vrcp.f32 %v1055_v32 }
 0x49f   : > { %v1210_v52 = vpop.permute.xlu0 %1209 }
 0x4a0   : > { %v1215_v56 = vsel %vm885_vm4, %v1210_v52, 0 }
 0x4a1   : > { %v3064_v33 = vpop.eup %3063 }
 0x4a2   : > { %v945_v34 = vmul.f32 %v3064_v33, %v3060_v27 }
 0x4a4   : > { %v946_v36 = vpack.c.bf16 %v945_v34, %v945_v34 }
 0x4a6   : > { %2857 = vmatmul.mubr.msk.bf16.vlgmr.msra.gmra.mxu1 %vm934_vm6, %v946_v36 }
 0x4a7   : > { %2867 = vmatpush3.bf16.msra.mxu1 %v1066_v37  ;;  %2868 = vmatprep.mubr.msk.bf16.mxu1 %vm3118_vm2, %v3117_v42 }
 0x4a8   : > { %2878 = vmatprep.subr.bf16.mxu1 %v3117_v42 }
 0x4a9   : > { %v3066_v38 = vpop.eup %3065 }
 0x4aa   : > { %v1057_v39 = vmul.f32 %v3066_v38, %v3062_v29 }
 0x4ac   : > { %v1058_v40 = vpack.c.bf16 %v1057_v39, %v1057_v39 }
 0x4ae   : > { %2869 = vmatmul.mubr.msk.bf16.vlgmr.msra.gmra.mxu1 %vm934_vm6, %v1058_v40 }
 0x4af   : > { %2880 = vmatprep.mubr.msk.bf16.mxu1 %vm3118_vm2, %v3117_v42  ;;  %2879 = vmatpush3.bf16.msra.mxu1 %v3376_v41 }
 0x4b0   : > { %2890 = vmatprep.subr.bf16.mxu1 %v3117_v42 }
 0x566   : > { %v988_v46 = vpop.f32.mrf.mxu1 }
 0x567   : > { %v994_v48 = vpack.c.bf16 %v988_v46, %v988_v46 }
 0x568   : > { %v2858_v49 = vpop.f32.mrf.mxu1 }
 0x569   : > { %2881 = vmatmul.mubr.msk.bf16.vlgmr.msra.gmra.mxu1 %vm885_vm4, %v994_v48 }
 0x56a   : > { %v991_v50 = vpop.f32.mrf.mxu1  ;;  %2892 = vmatprep.mubr.msk.bf16.mxu1 %vm3118_vm2, %v3117_v42 }
 0x56b   : > { %v3428_v50 = vrot.slane %v3329_v57, 4 }
 0x56c   : > { %v2859_v51 = vpop.f32.mrf.mxu1 }
 0x56e   : > { %v1102_v53 = vpop.f32.mrf.mxu1 }
 0x56f   : > { %v1108_v54 = vpack.c.bf16 %v1102_v53, %v1102_v53 }
 0x570   : > { %v2870_v55 = vpop.f32.mrf.mxu1 }
 0x571   : > { %2875 = vmatmul.mubr.msk.bf16.vlgmr.msra.gmra.mxu0 %vm885_vm4, %v1108_v54 }
 0x572   : > { %2885 = vmatpush3.bf16.xpose.msra.mxu0 %v1215_v56  ;;  %v1105_v58 = vpop.f32.mrf.mxu1  ;;  %2886 = vmatprep.mubr.msk.bf16.mxu0 %vm3118_vm2, %v3117_v42 }
 0x573   : > { %2896 = vmatprep.subr.bf16.mxu0 %v3117_v42 }
 0x574   : > { %v2871_v60 = vpop.f32.mrf.mxu1 }
 0x579   : > { %2887 = vmatmul.mubr.msk.bf16.vlgmr.msra.gmra.mxu0 %vm885_vm4, %v1208_v61 }
 0x57a   : > { %2898 = vmatprep.mubr.msk.bf16.mxu0 %vm3118_vm2, %v3117_v42  ;;  %2897 = vmatpush3.bf16.msra.mxu0 %v3418_v31 }
 0x57b   : > { %2908 = vmatprep.subr.bf16.mxu0 %v3117_v42 }
 0x629   : > { %v1201_v62 = vpop.f32.mrf.mxu1 }
 0x62b   : > { %v2882_v63 = vpop.f32.mrf.mxu1 }
 0x62d   : > { %v1204_v0 = vpop.f32.mrf.mxu1 }
 0x62f   : > { %v2883_v1 = vpop.f32.mrf.mxu1 }
 0x631   : > { %v1152_v3 = vpop.f32.mrf.mxu0 }
 0x632   : > { %v3396_v4 = vadd.f32 %v1201_v62, %v1152_v3  ;;  %v3443_v62 = vld [vmem:[%s3249_s25 + $0x18] sm:$0xff]  }
 0x633   : > { %v2876_v6 = vpop.f32.mrf.mxu0 }
 0x635   : > { %v1155_v7 = vpop.f32.mrf.mxu0 }
 0x637   : > { %v2877_v8 = vpop.f32.mrf.mxu0 }
 0x639   : > { %v1251_v9 = vpop.f32.mrf.mxu0 }
 0x63a   : > { %v1257_v10 = vmul.f32 0.25, %v1251_v9 }
 0x63b   : > { %v2888_v11 = vpop.f32.mrf.mxu0 }
 0x63c   : > { %v1258_v12 = vadd.f32 %v1257_v10, %v3353_v5 }
 0x63d   : > { %v1254_v13 = vpop.f32.mrf.mxu0 }
 0x63e   : > { %v1259_v14 = vsel %vm934_vm6, %v1258_v12, -inf }
 0x63f   : > { %1260 = vmax.xlane.f32.xlu1 %v1259_v14  ;;  %v2889_v15 = vpop.f32.mrf.mxu0 }
 0x650   : > { %1372 = vrot.lane.b32.xlu1 %v3329_v57, %s3125_s29 }
 0x654   : > { %1370 = vrot.lane.b32.xlu1 %v3329_v57, %s3126_s21 }
 0x6c8   : > { %v1261_v16 = vpop.xlane.xlu1 %1260 }
 0x6c9   : > { %v1262_v17 = vsub.f32 %v1258_v12, %v1261_v16  ;;  %v3466_v12 = vrot.slane %v3331_v59, 4 }
 0x6cb   : > { %v1263_v18 = vmul.f32 1.442695, %v1262_v17  ;;  %v1601_v16 = vsel %vm950_vm3, %v3466_v12, 0 }
 0x6cc   : > { %v1373_v27 = vpop.permute.xlu1 %1372 }
 0x6cd   : > { %3067 = vpow2.f32 %v1263_v18  ;;  %v1378_v29 = vsel %vm885_vm4, %v1373_v27, 0 }
 0x6d0   : > { %v1371_v30 = vpop.permute.xlu1 %1370 }
 0x6da   : > { %v3068_v19 = vpop.eup %3067 }
 0x6db   : > { %v1265_v21 = vsel %vm934_vm6, %v3068_v19, 0.0 }
 0x6dc   : > { %1266 = vadd.xlane.f32.xlu0 %v1265_v21 }
 0x6f2   : > { %1271 = vrot.lane.b32.xlu0 %v3331_v59, %s3123_s28 }
 0x765   : > { %v1267_v22 = vpop.xlane.xlu0 %1266 }
 0x766   : > { %3069 = vrcp.f32 %v1267_v22 }
 0x769   : > { %v1272_v23 = vpop.permute.xlu0 %1271 }
 0x76a   : > { %v1277_v24 = vsel %vm950_vm3, %v1272_v23, 0 }
 0x76b   : > { %2891 = vmatpush3.bf16.msra.mxu1 %v1277_v24 }
 0x76c   : > { %2902 = vmatprep.subr.bf16.mxu1 %v3117_v42 }
 0x773   : > { %v3070_v25 = vpop.eup %3069 }
 0x774   : > { %v1269_v26 = vmul.f32 %v3070_v25, %v3068_v19 }
 0x776   : > { %v1270_v28 = vpack.c.bf16 %v1269_v26, %v1269_v26 }
 0x778   : > { %2893 = vmatmul.mubr.msk.bf16.vlgmr.msra.gmra.mxu1 %vm934_vm6, %v1270_v28 }
 0x779   : > { %2903 = vmatpush3.bf16.xpose.msra.mxu1 %v1378_v29  ;;  %2904 = vmatprep.mubr.msk.bf16.mxu1 %vm3118_vm2, %v3117_v42 }
 0x77a   : > { %2914 = vmatprep.subr.bf16.mxu1 %v3117_v42 }
 0x780   : > { %2905 = vmatmul.mubr.msk.bf16.vlgmr.msra.gmra.mxu1 %vm885_vm4, %v1371_v30 }
 0x781   : > { %2916 = vmatprep.mubr.msk.bf16.mxu1 %vm3118_vm2, %v3117_v42  ;;  %2915 = vmatpush3.bf16.msra.mxu1 %v3443_v62 }
 0x782   : > { %2926 = vmatprep.subr.bf16.mxu1 %v3117_v42 }
 0x838   : > { %v1313_v32 = vpop.f32.mrf.mxu1 }
 0x839   : > { %v1319_v33 = vpack.c.bf16 %v1313_v32, %v1313_v32 }
 0x83a   : > { %v2894_v34 = vpop.f32.mrf.mxu1 }
 0x83b   : > { %2899 = vmatmul.mubr.msk.bf16.vlgmr.msra.gmra.mxu0 %vm885_vm4, %v1319_v33 }
 0x83c   : > { %v1316_v35 = vpop.f32.mrf.mxu1  ;;  %2910 = vmatprep.mubr.msk.bf16.mxu0 %vm3118_vm2, %v3117_v42 }
 0x83e   : > { %v2895_v36 = vpop.f32.mrf.mxu1 }
 0x840   : > { %v1414_v37 = vpop.f32.mrf.mxu1 }
 0x841   : > { %v1420_v38 = vmul.f32 0.25, %v1414_v37 }
 0x842   : > { %v2906_v39 = vpop.f32.mrf.mxu1 }
 0x843   : > { %v1421_v40 = vadd.f32 %v1420_v38, %v3353_v5 }
 0x844   : > { %v1417_v46 = vpop.f32.mrf.mxu1 }
 0x845   : > { %v1422_v48 = vsel %vm934_vm6, %v1421_v40, -inf }
 0x846   : > { %1423 = vmax.xlane.f32.xlu1 %v1422_v48  ;;  %v2907_v49 = vpop.f32.mrf.mxu1 }
 0x857   : > { %1534 = vrot.lane.b32.xlu1 %v3428_v50, %s3120_s4  ;;  %s3673_s4 = sld [smem:[#allocation9_spill]] (!%p2769_p5) }
 0x85b   : > { %1646 = vrot.lane.b32.xlu1 %v3428_v50, %s3119_s26 }
 0x8cf   : > { %v1424_v51 = vpop.xlane.xlu1 %1423 }
 0x8d0   : > { %v1425_v52 = vsub.f32 %v1421_v40, %v1424_v51 }
 0x8d2   : > { %v1426_v53 = vmul.f32 1.442695, %v1425_v52 }
 0x8d3   : > { %v1535_v6 = vpop.permute.xlu1 %1534 }
 0x8d4   : > { %3071 = vpow2.f32 %v1426_v53  ;;  %v1540_v8 = vsel %vm885_vm4, %v1535_v6, 0 }
 0x8d7   : > { %v1647_v9 = vpop.permute.xlu1 %1646 }
 0x8d8   : > { %v1652_v10 = vsel %vm885_vm4, %v1647_v9, 0 }
 0x8e1   : > { %v3072_v54 = vpop.eup %3071 }
 0x8e2   : > { %v1428_v55 = vsel %vm934_vm6, %v3072_v54, 0.0 }
 0x8e3   : > { %1429 = vadd.xlane.f32.xlu0 %v1428_v55 }
 0x8f9   : > { %1434 = vrot.lane.b32.xlu0 %v3331_v59, %s3126_s21 }
 0x8fb   : > { %v1363_v57 = vpop.f32.mrf.mxu0 }
 0x8fc   : > { %v3438_v56 = vadd.f32 %v1363_v57, %v3396_v4 }
 0x8fd   : > { %v2900_v58 = vpop.f32.mrf.mxu0  ;;  %1644 = vrot.lane.b32.xlu0 %v3428_v50, %s3121_s27 }
 0x8ff   : > { %v1366_v60 = vpop.f32.mrf.mxu0 }
 0x901   : > { %v2901_v61 = vpop.f32.mrf.mxu0 }
 0x96c   : > { %v1430_v63 = vpop.xlane.xlu0 %1429 }
 0x96d   : > { %3073 = vrcp.f32 %v1430_v63 }
 0x970   : > { %v1435_v0 = vpop.permute.xlu0 %1434 }
 0x971   : > { %v1440_v1 = vsel %vm950_vm3, %v1435_v0, 0 }
 0x972   : > { %2909 = vmatpush3.bf16.msra.mxu0 %v1440_v1 }
 0x973   : > { %2920 = vmatprep.subr.bf16.mxu0 %v3117_v42 }
 0x974   : > { %v1645_v11 = vpop.permute.xlu0 %1644 }
 0x97a   : > { %v3074_v3 = vpop.eup %3073 }
 0x97b   : > { %v1432_v4 = vmul.f32 %v3074_v3, %v3072_v54 }
 0x97d   : > { %v1433_v7 = vpack.c.bf16 %v1432_v4, %v1432_v4 }
 0x97f   : > { %2911 = vmatmul.mubr.msk.bf16.vlgmr.msra.gmra.mxu0 %vm934_vm6, %v1433_v7 }
 0x980   : > { %2921 = vmatpush3.bf16.xpose.msra.mxu0 %v1540_v8  ;;  %2922 = vmatprep.mubr.msk.bf16.mxu0 %vm3118_vm2, %v3117_v42 }
 0x981   : > { %2932 = vmatprep.subr.bf16.mxu0 %v3117_v42 }
 0x987   : > { %2923 = vmatmul.mubr.msk.bf16.vlgmr.msra.gmra.mxu0 %vm885_vm4, %v3428_v50 }
 0x988   : > { %2933 = vmatpush3.bf16.xpose.msra.mxu0 %v1652_v10  ;;  %2934 = vmatprep.mubr.msk.bf16.mxu0 %vm3118_vm2, %v3117_v42 }
 0x989   : > { %2944 = vmatprep.subr.bf16.mxu0 %v3117_v42 }
 0x98f   : > { %2935 = vmatmul.mubr.msk.bf16.vlgmr.msra.gmra.mxu0 %vm885_vm4, %v1645_v11 }
 0x990   : > { %2945 = vmatpush3.bf16.msra.mxu0 %v3381_v43  ;;  %2946 = vmatprep.mubr.msk.bf16.mxu0 %vm3118_vm2, %v3117_v42 }
 0x991   : > { %2956 = vmatprep.subr.bf16.mxu0 %v3117_v42 }
 0xa3f   : > { %v1476_v13 = vpop.f32.mrf.mxu0 }
 0xa40   : > { %v1482_v14 = vpack.c.bf16 %v1476_v13, %v1476_v13 }
 0xa41   : > { %v2912_v15 = vpop.f32.mrf.mxu0 }
 0xa42   : > { %2917 = vmatmul.mubr.msk.bf16.vlgmr.msra.gmra.mxu1 %vm885_vm4, %v1482_v14 }
 0xa43   : > { %2927 = vmatpush3.bf16.msra.mxu1 %v1601_v16  ;;  %v1479_v17 = vpop.f32.mrf.mxu0  ;;  %2928 = vmatprep.mubr.msk.bf16.mxu1 %vm3118_vm2, %v3117_v42 }
 0xa44   : > { %2938 = vmatprep.subr.bf16.mxu1 %v3117_v42 }
 0xa45   : > { %v2913_v43 = vpop.f32.mrf.mxu0 }
 0xa47   : > { %v1576_v18 = vpop.f32.mrf.mxu0 }
 0xa48   : > { %v1582_v19 = vmul.f32 0.25, %v1576_v18 }
 0xa49   : > { %v2924_v59 = vpop.f32.mrf.mxu0 }
 0xa4a   : > { %v1583_v21 = vadd.f32 %v1582_v19, %v3353_v5 }
 0xa4b   : > { %v1579_v22 = vpop.f32.mrf.mxu0 }
 0xa4c   : > { %v1584_v23 = vsel %vm934_vm6, %v1583_v21, -inf }
 0xa4d   : > { %1585 = vmax.xlane.f32.xlu1 %v1584_v23  ;;  %v2925_v24 = vpop.f32.mrf.mxu0 }
 0xa4f   : > { %v1688_v25 = vpop.f32.mrf.mxu0 }
 0xa50   : > { %v1694_v26 = vmul.f32 0.25, %v1688_v25 }
 0xa51   : > { %v2936_v27 = vpop.f32.mrf.mxu0 }
 0xa52   : > { %v1695_v28 = vadd.f32 %v1694_v26, %v3353_v5 }
 0xa53   : > { %v1691_v29 = vpop.f32.mrf.mxu0 }
 0xa54   : > { %v1696_v30 = vsel %vm934_vm6, %v1695_v28, -inf }
 0xa55   : > { %1697 = vmax.xlane.f32.xlu0 %v1696_v30  ;;  %v2937_v32 = vpop.f32.mrf.mxu0 }
 0xa5e   : > { %1708 = vrot.lane.b32.xlu1 %v3466_v12, %s3121_s27 }
 0xa62   : > { %1843 = vrot.lane.b32.xlu1 %v3428_v50, %s3123_s28 }
 0xad6   : > { %v1586_v33 = vpop.xlane.xlu1 %1585 }
 0xad7   : > { %v1587_v34 = vsub.f32 %v1583_v21, %v1586_v33 }
 0xad9   : > { %v1588_v35 = vmul.f32 1.442695, %v1587_v34 }
 0xada   : > { %v1709_v61 = vpop.permute.xlu1 %1708 }
 0xadb   : > { %3075 = vpow2.f32 %v1588_v35  ;;  %v1714_v0 = vsel %vm950_vm3, %v1709_v61, 0 }
 0xade   : > { %v1698_v36 = vpop.xlane.xlu0 %1697  ;;  %v1844_v17 = vpop.permute.xlu1 %1843 }
 0xadf   : > { %v1699_v37 = vsub.f32 %v1695_v28, %v1698_v36 }
 0xae1   : > { %v1700_v38 = vmul.f32 1.442695, %v1699_v37 }
 0xae3   : > { %3077 = vpow2.f32 %v1700_v38 }
 0xae8   : > { %v3076_v39 = vpop.eup %3075 }
 0xae9   : > { %v1590_v40 = vsel %vm934_vm6, %v3076_v39, 0.0 }
 0xaea   : > { %1591 = vadd.xlane.f32.xlu0 %v1590_v40 }
 0xaf0   : > { %v3078_v46 = vpop.eup %3077 }
 0xaf1   : > { %v1702_v48 = vsel %vm934_vm6, %v3078_v46, 0.0 }
 0xaf2   : > { %1703 = vadd.xlane.f32.xlu0 %v1702_v48 }
 0xb02   : > { %v1526_v49 = vpop.f32.mrf.mxu1 }
 0xb03   : > { %v3485_v51 = vadd.f32 %v1526_v49, %v3438_v56 }
 0xb04   : > { %v2918_v52 = vpop.f32.mrf.mxu1 }
 0xb06   : > { %v1529_v53 = vpop.f32.mrf.mxu1 }
 0xb08   : > { %v2919_v54 = vpop.f32.mrf.mxu1  ;;  %1845 = vrot.lane.b32.xlu0 %v3428_v50, %s3124_s30  ;;  %s3674_s30 = sld [smem:[#allocation10_spill]] (!%p2769_p5) }
 0xb73   : > { %v1592_v55 = vpop.xlane.xlu0 %1591 }
 0xb74   : > { %3079 = vrcp.f32 %v1592_v55 }
 0xb7b   : > { %v1704_v57 = vpop.xlane.xlu0 %1703 }
 0xb7c   : > { %3081 = vrcp.f32 %v1704_v57 }
 0xb7f   : > { %v1846_v10 = vpop.permute.xlu0 %1845 }
 0xb81   : > { %v3080_v58 = vpop.eup %3079 }
 0xb82   : > { %v1594_v60 = vmul.f32 %v3080_v58, %v3076_v39 }
 0xb84   : > { %v1595_v63 = vpack.c.bf16 %v1594_v60, %v1594_v60 }
 0xb86   : > { %2929 = vmatmul.mubr.msk.bf16.vlgmr.msra.gmra.mxu1 %vm934_vm6, %v1595_v63  ;;  %v2157_v63 = vadd.f32 %v3485_v51, %v3286_v2 }
 0xb87   : > { %2939 = vmatpush3.bf16.msra.mxu1 %v1714_v0  ;;  %2940 = vmatprep.mubr.msk.bf16.mxu1 %vm3118_vm2, %v3117_v42 }
 0xb88   : > { %2950 = vmatprep.subr.bf16.mxu1 %v3117_v42 }
 0xb89   : > { %v3082_v56 = vpop.eup %3081 }
 0xb8a   : > { %v1706_v1 = vmul.f32 %v3082_v56, %v3078_v46 }
 0xb8c   : > { %v1707_v3 = vpack.c.bf16 %v1706_v1, %v1706_v1 }
 0xb8e   : > { %2941 = vmatmul.mubr.msk.bf16.vlgmr.msra.gmra.mxu1 %vm934_vm6, %v1707_v3 }
 0xb8f   : > { %2951 = vmatpush3.bf16.msra.mxu1 %v3376_v41  ;;  %2952 = vmatprep.mubr.msk.bf16.mxu1 %vm3118_vm2, %v3117_v42  ;;  %v1851_v41 = vsel %vm885_vm4, %v1846_v10, 0 }
 0xb90   : > { %2962 = vmatprep.subr.bf16.mxu1 %v3117_v42 }
 0xc46   : > { %v1637_v4 = vpop.f32.mrf.mxu1 }
 0xc47   : > { %v1643_v6 = vpack.c.bf16 %v1637_v4, %v1637_v4 }
 0xc48   : > { %v2930_v7 = vpop.f32.mrf.mxu1 }
 0xc49   : > { %2953 = vmatmul.mubr.msk.bf16.vlgmr.msra.gmra.mxu1 %vm885_vm4, %v1643_v6 }
 0xc4a   : > { %v1640_v8 = vpop.f32.mrf.mxu1  ;;  %2964 = vmatprep.mubr.msk.bf16.mxu1 %vm3118_vm2, %v3117_v42 }
 0xc4c   : > { %v2931_v9 = vpop.f32.mrf.mxu1 }
 0xc4e   : > { %v1750_v11 = vpop.f32.mrf.mxu1 }
 0xc4f   : > { %v1756_v13 = vpack.c.bf16 %v1750_v11, %v1750_v11 }
 0xc50   : > { %v2942_v14 = vpop.f32.mrf.mxu1 }
 0xc51   : > { %2947 = vmatmul.mubr.msk.bf16.vlgmr.msra.gmra.mxu0 %vm885_vm4, %v1756_v13 }
 0xc52   : > { %2957 = vmatpush3.bf16.xpose.msra.mxu0 %v1851_v41  ;;  %v1753_v15 = vpop.f32.mrf.mxu1  ;;  %2958 = vmatprep.mubr.msk.bf16.mxu0 %vm3118_vm2, %v3117_v42 }
 0xc53   : > { %2968 = vmatprep.subr.bf16.mxu0 %v3117_v42 }
 0xc54   : > { %v2943_v16 = vpop.f32.mrf.mxu1 }
 0xc59   : > { %2959 = vmatmul.mubr.msk.bf16.vlgmr.msra.gmra.mxu0 %vm885_vm4, %v1844_v17 }
 0xc5a   : > { %2969 = vmatpush3.bf16.msra.mxu0 %v3418_v31  ;;  %2970 = vmatprep.mubr.msk.bf16.mxu0 %vm3118_vm2, %v3117_v42 }
 0xc5b   : > { %2980 = vmatprep.subr.bf16.mxu0 %v3117_v42 }
 0xd09   : > { %v1837_v43 = vpop.f32.mrf.mxu1 }
 0xd0b   : > { %v2954_v18 = vpop.f32.mrf.mxu1 }
 0xd0d   : > { %v1840_v19 = vpop.f32.mrf.mxu1 }
 0xd0f   : > { %v2955_v59 = vpop.f32.mrf.mxu1 }
 0xd11   : > { %v1794_v21 = vpop.f32.mrf.mxu0 }
 0xd12   : > { %v3512_v22 = vadd.f32 %v1837_v43, %v1794_v21 }
 0xd13   : > { %v2948_v23 = vpop.f32.mrf.mxu0 }
 0xd15   : > { %v1797_v24 = vpop.f32.mrf.mxu0 }
 0xd17   : > { %v2949_v25 = vpop.f32.mrf.mxu0 }
 0xd19   : > { %v1887_v26 = vpop.f32.mrf.mxu0 }
 0xd1a   : > { %v1893_v27 = vmul.f32 0.25, %v1887_v26 }
 0xd1b   : > { %v2960_v28 = vpop.f32.mrf.mxu0 }
 0xd1c   : > { %v1894_v31 = vadd.f32 %v1893_v27, %v3353_v5 }
 0xd1d   : > { %v1890_v29 = vpop.f32.mrf.mxu0 }
 0xd1e   : > { %v1895_v30 = vsel %vm934_vm6, %v1894_v31, -inf  ;;  %v3103_v29 = vld [vmem:[#allocation2 + $0x8] sm:$0xff] }
 0xd1f   : > { %1896 = vmax.xlane.f32.xlu1 %v1895_v30  ;;  %v2961_v32 = vpop.f32.mrf.mxu0 }
 0xd30   : > { %2002 = vrot.lane.b32.xlu1 %v3428_v50, %s3125_s29 }
 0xd34   : > { %2000 = vrot.lane.b32.xlu1 %v3428_v50, %s3126_s21 }
 0xda8   : > { %v1897_v33 = vpop.xlane.xlu1 %1896 }
 0xda9   : > { %v1898_v34 = vsub.f32 %v1894_v31, %v1897_v33 }
 0xdab   : > { %v1899_v35 = vmul.f32 1.442695, %v1898_v34 }
 0xdac   : > { %v2003_v48 = vpop.permute.xlu1 %2002 }
 0xdad   : > { %3083 = vpow2.f32 %v1899_v35  ;;  %v2008_v52 = vsel %vm885_vm4, %v2003_v48, 0  ;;  %v3027_v48 = vld [vmem:[%s3262_s22 + $0x30] ss:$8 sps:$4 sm:$0xff]  }
 0xdb0   : > { %v2001_v53 = vpop.permute.xlu1 %2000 }
 0xdba   : > { %v3084_v36 = vpop.eup %3083 }
 0xdbb   : > { %v1901_v37 = vsel %vm934_vm6, %v3084_v36, 0.0 }
 0xdbc   : > { %1902 = vadd.xlane.f32.xlu0 %v1901_v37 }
 0xdd2   : > { %1907 = vrot.lane.b32.xlu0 %v3466_v12, %s3123_s28 }
 0xe45   : > { %v1903_v38 = vpop.xlane.xlu0 %1902 }
 0xe46   : > { %3085 = vrcp.f32 %v1903_v38 }
 0xe49   : > { %v1908_v39 = vpop.permute.xlu0 %1907 }
 0xe4a   : > { %v1913_v40 = vsel %vm950_vm3, %v1908_v39, 0 }
 0xe4b   : > { %2963 = vmatpush3.bf16.msra.mxu1 %v1913_v40 }
 0xe4c   : > { %2974 = vmatprep.subr.bf16.mxu1 %v3117_v42 }
 0xe53   : > { %v3086_v50 = vpop.eup %3085 }
 0xe54   : > { %v1905_v46 = vmul.f32 %v3086_v50, %v3084_v36 }
 0xe56   : > { %v1906_v49 = vpack.c.bf16 %v1905_v46, %v1905_v46  ;;  %v3029_v46 = vld [vmem:[%s3262_s22 + $0x34] ss:$8 sps:$4 sm:$0xff]  }
 0xe58   : > { %2965 = vmatmul.mubr.msk.bf16.vlgmr.msra.gmra.mxu1 %vm934_vm6, %v1906_v49  ;;  %v3032_v49 = vld [vmem:[%s3262_s22 + $0x24] ss:$8 sps:$4 sm:$0xff]  }
 0xe59   : > { %2975 = vmatpush3.bf16.xpose.msra.mxu1 %v2008_v52  ;;  %2976 = vmatprep.mubr.msk.bf16.mxu1 %vm3118_vm2, %v3117_v42  ;;  %v3030_v52 = vld [vmem:[%s3262_s22 + $0x20] ss:$8 sps:$4 sm:$0xff]  }
 0xe5a   : > { %2986 = vmatprep.subr.bf16.mxu1 %v3117_v42 }
 0xe60   : > { %2977 = vmatmul.mubr.msk.bf16.vlgmr.msra.gmra.mxu1 %vm885_vm4, %v2001_v53  ;;  %v3035_v53 = vld [vmem:[%s3262_s22 + $0x14] ss:$8 sps:$4 sm:$0xff]  }
 0xe61   : > { %2987 = vmatpush3.bf16.msra.mxu1 %v3443_v62  ;;  %2988 = vmatprep.mubr.msk.bf16.mxu1 %vm3118_vm2, %v3117_v42  ;;  %v2740_v62 = vld [vmem:[%s3670_s15] ss:$0 sm:$0xff] }
 0xe62   : > { %v3545_v4 = vadd.f32 %v2740_v62, %v2157_v63 }
 0xe64   : > { %v2167_v7 = vsel %vm738_vm1, %v3545_v4, 0.0 }
 0xf18   : > { %v1949_v54 = vpop.f32.mrf.mxu1 }
 0xf19   : > { %v1955_v55 = vpack.c.bf16 %v1949_v54, %v1949_v54  ;;  %v3033_v54 = vld [vmem:[%s3262_s22 + $0x10] ss:$8 sps:$4 sm:$0xff]  }
 0xf1a   : > { %v2966_v57 = vpop.f32.mrf.mxu1 }
 0xf1b   : > { %2971 = vmatmul.mubr.msk.bf16.vlgmr.msra.gmra.mxu0 %vm885_vm4, %v1955_v55  ;;  %v3038_v55 = vld [vmem:[%s3262_s22 + $0x4] ss:$8 sps:$4 sm:$0xff]   ;;  %v3036_v57 = vld [vmem:[%s3262_s22] ss:$8 sps:$4 sm:$0xff]   ;;  %s3671_s22 = scalar_lea.vmem %s3644_s7, %s3219_s20 }
 0xf1c   : > { %v1952_v58 = vpop.f32.mrf.mxu1  ;;  %2982 = vmatprep.mubr.msk.bf16.mxu0 %vm3118_vm2, %v3117_v42 }
 0xf1e   : > { %v2967_v60 = vpop.f32.mrf.mxu1 }
 0xf20   : > { %v2044_v61 = vpop.f32.mrf.mxu1 }
 0xf21   : > { %v2050_v0 = vmul.f32 0.25, %v2044_v61 }
 0xf22   : > { %v2978_v56 = vpop.f32.mrf.mxu1 }
 0xf23   : > { %v2051_v1 = vadd.f32 %v2050_v0, %v3353_v5 }
 0xf24   : > { %v2047_v3 = vpop.f32.mrf.mxu1 }
 0xf25   : > { %v2052_v6 = vsel %vm934_vm6, %v2051_v1, -inf  ;;  %v2741_v3 = vld [vmem:[%s3671_s22] ss:$0 sm:$0xff] }
 0xf26   : > { %2053 = vmax.xlane.f32.xlu1 %v2052_v6  ;;  %v2979_v42 = vpop.f32.mrf.mxu1 }
 0xf2a   : > { %2168 = vadd.xlane.f32.xlu1 %v2167_v7 }
 0xfaf   : > { %v2054_v2 = vpop.xlane.xlu1 %2053 }
 0xfb0   : > { %v2055_v51 = vsub.f32 %v2051_v1, %v2054_v2  ;;  %v2742_v2 = vld [vmem:[%s640_s17] ss:$0 sm:$0xff] }
 0xfb2   : > { %v2056_v8 = vmul.f32 1.442695, %v2055_v51 }
 0xfb3   : > { %v2169_v24 = vpop.xlane.xlu1 %2168 }
 0xfb4   : > { %3087 = vpow2.f32 %v2056_v8  ;;  %v2173_v25 = vmul.f32 0.015625, %v2169_v24  ;;  %v698_v24 = vld [vmem:[%s3267_s23] sm:$0x3] }
 0xfb6   : > { %v2175_v31 = vsub.f32 %v3545_v4, %v2173_v25  ;;  %v2214_v25 = vrot.slane %v698_v24, %v786_v45 }
 0xfb8   : > { %v2177_v35 = vmul.f32 %v2175_v31, %v2175_v31 }
 0xfba   : > { %v2179_v36 = vsel %vm738_vm1, %v2177_v35, 0.0 }
 0xfc1   : > { %v3088_v9 = vpop.eup %3087 }
 0xfc2   : > { %v2058_v10 = vsel %vm934_vm6, %v3088_v9, 0.0 }
 0xfc3   : > { %2059 = vadd.xlane.f32.xlu0 %v2058_v10 }
 0xfd9   : > { %2064 = vrot.lane.b32.xlu0 %v3466_v12, %s3126_s21 }
 0xfdb   : > { %v1993_v5 = vpop.f32.mrf.mxu0 }
 0xfdc   : > { %v1999_v11 = vadd.f32 %v1993_v5, %v3512_v22  ;;  %v3039_v5 = vld [vmem:[%s3273_s2 + $0x78] sm:$0xff]  }
 0xfdd   : > { %v2972_v13 = vpop.f32.mrf.mxu0  ;;  %2826 = vmatprep.subr.bf16.mxu1 %v3039_v5 }
 0xfde   : > { %v3041_v13 = vld [vmem:[%s3273_s2 + $0x70] sm:$0xff]  }
 0xfdf   : > { %v1996_v14 = vpop.f32.mrf.mxu0 }
 0xfe0   : > { %v3042_v14 = vld [vmem:[%s3273_s2 + $0x30] sm:$0xff]  }
 0xfe1   : > { %v2973_v41 = vpop.f32.mrf.mxu0 }
 0xfe2   : > { %v3043_v41 = vld [vmem:[%s3273_s2 + $0x68] sm:$0xff]  }
0x104c   : > { %v2060_v15 = vpop.xlane.xlu0 %2059 }
0x104d   : > { %3089 = vrcp.f32 %v2060_v15  ;;  %v3044_v15 = vld [vmem:[%s3273_s2 + $0x28] sm:$0xff]  }
0x1050   : > { %v2065_v16 = vpop.permute.xlu0 %2064 }
0x1051   : > { %v2070_v17 = vsel %vm950_vm3, %v2065_v16, 0  ;;  %v3045_v16 = vld [vmem:[%s3273_s2 + $0x60] sm:$0xff]  }
0x1052   : > { %2981 = vmatpush3.bf16.msra.mxu0 %v2070_v17  ;;  %v3046_v17 = vld [vmem:[%s3273_s2 + $0x20] sm:$0xff]  }
0x1053   : > { %2272 = vmatprep.subr.bf16.mxu0 %v3029_v46 }
0x105a   : > { %v3090_v43 = vpop.eup %3089 }
0x105b   : > { %v2062_v18 = vmul.f32 %v3090_v43, %v3088_v9  ;;  %v3047_v43 = vld [vmem:[%s3273_s2 + $0x58] sm:$0xff]  }
0x105d   : > { %v2063_v19 = vpack.c.bf16 %v2062_v18, %v2062_v18  ;;  %v3048_v18 = vld [vmem:[%s3273_s2 + $0x18] sm:$0xff]  }
0x105f   : > { %2983 = vmatmul.mubr.msk.bf16.vlgmr.msra.gmra.mxu0 %vm934_vm6, %v2063_v19  ;;  %v3049_v19 = vld [vmem:[%s3273_s2 + $0x50] sm:$0xff]  }
0x1060   : > { %2296 = vmatprep.mubr.bf16.mxu0 %v3116_v20  ;;  %2273 = vmatpush1.bf16.msra.mxu0 %v3027_v48 }
0x1061   : > { %2274 = vmatprep.subr.bf16.mxu0 %v3032_v49 }
0x1064   : > { %2275 = vmatpush1.bf16.msra.mxu0 %v3030_v52 }
0x1065   : > { %2276 = vmatprep.subr.bf16.mxu0 %v3035_v53 }
0x1068   : > { %2277 = vmatpush1.bf16.msra.mxu0 %v3033_v54 }
0x1069   : > { %2278 = vmatprep.subr.bf16.mxu0 %v3038_v55 }
0x106c   : > { %2279 = vmatpush1.bf16.msra.mxu0 %v3036_v57 }
0x111f   : > { %v2106_v12 = vpop.f32.mrf.mxu0 }
0x1120   : > { %v2112_v59 = vpack.c.bf16 %v2106_v12, %v2106_v12  ;;  %v3050_v12 = vld [vmem:[%s3273_s2 + $0x10] sm:$0xff]  }
0x1121   : > { %v2984_v21 = vpop.f32.mrf.mxu0 }
0x1122   : > { %2989 = vmatmul.mubr.msk.bf16.vlgmr.msra.gmra.mxu1 %vm885_vm4, %v2112_v59  ;;  %v3051_v59 = vld [vmem:[%s3273_s2 + $0x48] sm:$0xff]  }
0x1123   : > { %v2109_v22 = vpop.f32.mrf.mxu0  ;;  %v3052_v21 = vld [vmem:[%s3273_s2 + $0x8] sm:$0xff]  }
0x1124   : > { %v3053_v22 = vld [vmem:[%s3273_s2 + $0x40] sm:$0xff]  }
0x1125   : > { %v2985_v23 = vpop.f32.mrf.mxu0 }
0x1126   : > { %v3054_v23 = vld [vmem:[%s3273_s2] sm:$0xff]  }
0x11e2   : > { %v2150_v26 = vpop.f32.mrf.mxu1 }
0x11e3   : > { %v2156_v27 = vadd.f32 %v2150_v26, %v1999_v11  ;;  %v3040_v11 = vld [vmem:[%s3273_s2 + $0x38] sm:$0xff]   ;;  %v2218_v26 = vrot.slane %v698_v24, %v790_v47  ;;  %s3672_s2 = sld [smem:[#allocation8_spill]] (!%p2769_p5) }
0x11e4   : > { %v2990_v28 = vpop.f32.mrf.mxu1  ;;  %2827 = vmatpush3.bf16.msra.mxu1 %v3040_v11 }
0x11e5   : > { %v2158_v30 = vadd.f32 %v3103_v29, %v2156_v27  ;;  %2828 = vmatprep.subr.bf16.mxu1 %v3041_v13 }
0x11e6   : > { %v2153_v32 = vpop.f32.mrf.mxu1 }
0x11e7   : > { %v3559_v20 = vadd.f32 %v2740_v62, %v2158_v30 }
0x11e8   : > { %v2991_v33 = vpop.f32.mrf.mxu1  ;;  %2829 = vmatpush3.bf16.msra.mxu1 %v3042_v14 }
0x11e9   : > { %v2170_v34 = vsel %vm738_vm1, %v3559_v20, 0.0  ;;  %2830 = vmatprep.subr.bf16.mxu1 %v3043_v41  ;;  %v2752_v41 = vld [vmem:[%s657_s3] ss:$0 sm:$0xff] }
0x11ea   : > { %2171 = vadd.xlane.f32.xlu1 %v2170_v34 }
0x11ec   : > { %2831 = vmatpush3.bf16.msra.mxu1 %v3044_v15 }
0x11ed   : > { %2832 = vmatprep.subr.bf16.mxu1 %v3045_v16 }
0x11ee   : > { %2180 = vadd.xlane.f32.xlu1 %v2179_v36 }
0x11f0   : > { %2833 = vmatpush3.bf16.msra.mxu1 %v3046_v17 }
0x11f1   : > { %2834 = vmatprep.subr.bf16.mxu1 %v3047_v43 }
0x11f4   : > { %2835 = vmatpush3.bf16.msra.mxu1 %v3048_v18 }
0x11f5   : > { %2836 = vmatprep.subr.bf16.mxu1 %v3049_v19 }
0x11f8   : > { %2837 = vmatpush3.bf16.msra.mxu1 %v3050_v12 }
0x11f9   : > { %2838 = vmatprep.subr.bf16.mxu1 %v3051_v59 }
0x11fc   : > { %2839 = vmatpush3.bf16.msra.mxu1 %v3052_v21 }
0x11fd   : > { %2840 = vmatprep.subr.bf16.mxu1 %v3053_v22 }
0x1200   : > { %2841 = vmatpush3.bf16.msra.mxu1 %v3054_v23 }
0x1273   : > { %v2172_v37 = vpop.xlane.xlu1 %2171 }
0x1274   : > { %v2174_v38 = vmul.f32 0.015625, %v2172_v37 }
0x1276   : > { %v2176_v39 = vsub.f32 %v3559_v20, %v2174_v38 }
0x1277   : > { %v2181_v58 = vpop.xlane.xlu1 %2180 }
0x1278   : > { %v2178_v40 = vmul.f32 %v2176_v39, %v2176_v39  ;;  %v2185_v60 = vmul.f32 0.015625, %v2181_v58 }
0x127a   : > { %v2182_v50 = vsel %vm738_vm1, %v2178_v40, 0.0  ;;  %v2187_v61 = vadd.f32 1e-06, %v2185_v60 }
0x127b   : > { %2183 = vadd.xlane.f32.xlu1 %v2182_v50 }
0x127c   : > { %3091 = vrsqrt.f32 %v2187_v61 }
0x1289   : > { %v3092_v56 = vpop.eup %3091 }
0x128a   : > { %v2191_v1 = vmul.f32 %v3092_v56, %v2175_v31 }
0x128c   : > { %v2199_v7 = vmul.f32 %v2741_v3, %v2191_v1 }
0x128e   : > { %v2207_v8 = vadd.f32 %v2742_v2, %v2199_v7 }
0x1304   : > { %v2184_v63 = vpop.xlane.xlu1 %2183 }
0x1305   : > { %v2186_v0 = vmul.f32 0.015625, %v2184_v63 }
0x1307   : > { %v2188_v62 = vadd.f32 1e-06, %v2186_v0 }
0x1309   : > { %3093 = vrsqrt.f32 %v2188_v62 }
0x1316   : > { %v3094_v6 = vpop.eup %3093 }
0x1317   : > { %v2192_v42 = vmul.f32 %v3094_v6, %v2176_v39 }
0x1319   : > { %v2200_v51 = vmul.f32 %v2741_v3, %v2192_v42 }
0x131b   : > { %v2208_v9 = vadd.f32 %v2742_v2, %v2200_v51 }
0x131d   : > { %v2209_v10 = vpack.c.bf16 %v2208_v9, %v2207_v8 }
0x131f   : > { %2751 = vmatmul.mubr.msk.bf16.vlgmr.msra.gmra.mxu0 %vm738_vm1, %v2209_v10 }
0x13df   : > { %v2298_v27 = vpop.f32.mrf.mxu0 }
0x13e0   : > { %v2299_v28 = vadd.f32 %v2298_v27, %v2214_v25 }
0x13e1   : > { %v2300_v31 = vpop.f32.mrf.mxu0 }
0x13e2   : > { %v2307_v29 = vmul.f32 %v2299_v28, %v2299_v28  ;;  %v2301_v30 = vadd.f32 %v2300_v31, %v2218_v26 }
0x13e3   : > { %v2302_v32 = vpop.f32.mrf.mxu0 }
0x13e4   : > { %v2311_v33 = vmul.f32 %v2307_v29, %v2299_v28  ;;  %v2308_v34 = vmul.f32 %v2301_v30, %v2301_v30  ;;  %v2303_v35 = vadd.f32 %v2302_v32, %v2214_v25 }
0x13e5   : > { %v2304_v36 = vpop.f32.mrf.mxu0 }
0x13e6   : > { %v2315_v37 = vmul.f32 0.044715, %v2311_v33  ;;  %v2312_v38 = vmul.f32 %v2308_v34, %v2301_v30  ;;  %v2309_v39 = vmul.f32 %v2303_v35, %v2303_v35  ;;  %v2305_v40 = vadd.f32 %v2304_v36, %v2218_v26 }
0x13e8   : > { %v2319_v50 = vadd.f32 %v2315_v37, %v2299_v28  ;;  %v2316_v46 = vmul.f32 0.044715, %v2312_v38  ;;  %v2313_v45 = vmul.f32 %v2309_v39, %v2303_v35  ;;  %v2310_v48 = vmul.f32 %v2305_v40, %v2305_v40 }
0x13ea   : > { %v2323_v44 = vmul.f32 0.7978846, %v2319_v50  ;;  %v2320_v47 = vadd.f32 %v2316_v46, %v2301_v30  ;;  %v2317_v49 = vmul.f32 0.044715, %v2313_v45  ;;  %v2314_v52 = vmul.f32 %v2310_v48, %v2305_v40 }
0x13ec   : > { %v2324_v53 = vmul.f32 0.7978846, %v2320_v47  ;;  %v2321_v54 = vadd.f32 %v2317_v49, %v2303_v35  ;;  %v2318_v55 = vmul.f32 0.044715, %v2314_v52  ;;  %3095 = vtanh.f32 %v2323_v44 }
0x13ee   : > { %3097 = vtanh.f32 %v2324_v53  ;;  %v2325_v57 = vmul.f32 0.7978846, %v2321_v54  ;;  %v2322_v58 = vadd.f32 %v2318_v55, %v2305_v40 }
0x13f0   : > { %3099 = vtanh.f32 %v2325_v57  ;;  %v2326_v60 = vmul.f32 0.7978846, %v2322_v58 }
0x13f2   : > { %3101 = vtanh.f32 %v2326_v60 }
0x13f9   : > { %v3096_v61 = vpop.eup %3095 }
0x13fa   : > { %v2331_v56 = vadd.f32 1.0, %v3096_v61 }
0x13fb   : > { %v3098_v63 = vpop.eup %3097 }
0x13fc   : > { %v2332_v0 = vadd.f32 1.0, %v3098_v63  ;;  %v2335_v2 = vmul.f32 0.5, %v2331_v56 }
0x13fd   : > { %v3100_v62 = vpop.eup %3099 }
0x13fe   : > { %v2333_v1 = vadd.f32 1.0, %v3100_v62  ;;  %v2336_v7 = vmul.f32 0.5, %v2332_v0  ;;  %v2339_v5 = vmul.f32 %v2335_v2, %v2299_v28 }
0x13ff   : > { %v3102_v3 = vpop.eup %3101 }
0x1400   : > { %v2337_v6 = vmul.f32 0.5, %v2333_v1  ;;  %v2334_v42 = vadd.f32 1.0, %v3102_v3  ;;  %v2340_v9 = vmul.f32 %v2336_v7, %v2301_v30 }
0x1402   : > { %v2338_v51 = vmul.f32 0.5, %v2334_v42  ;;  %v2341_v8 = vmul.f32 %v2337_v6, %v2303_v35 }
0x1404   : > { %v2342_v10 = vmul.f32 %v2338_v51, %v2305_v40  ;;  %v2343_v13 = vpack.c.bf16 %v2341_v8, %v2339_v5 }
0x1406   : > { %v2344_v11 = vpack.c.bf16 %v2342_v10, %v2340_v9 }
0x1408   : > { %2479 = vmatprep.mubr.bf16.mxu1 %v2344_v11 }
0x1409   : > { %2480 = vmatmul.mubr.bf16.vlgmr.msra.gmra.mxu1 %v2343_v13 }
0x14c9   : > { %v2842_v14 = vpop.f32.mrf.mxu1 }
0x14cb   : > { %v2843_v15 = vpop.f32.mrf.mxu1 }
0x14cc   : > { %v2844_v16 = vadd.f32 %v2843_v15, %v2842_v14 }
0x14cd   : > { %v2845_v17 = vpop.f32.mrf.mxu1 }
0x14ce   : > { %v2482_v43 = vadd.f32 %v2844_v16, %v2752_v41 }
0x14cf   : > { %v2846_v18 = vpop.f32.mrf.mxu1 }
0x14d0   : > { %v2488_v19 = vadd.f32 %v2482_v43, %v3545_v4  ;;  %v2847_v12 = vadd.f32 %v2846_v18, %v2845_v17 }
0x14d2   : > { %2490 = vst.msk [vmem:[#allocation2] sm:$0xff] %vm738_vm1, %v2488_v19  ;;  %v2485_v59 = vadd.f32 %v2847_v12, %v2752_v41  ;;  %2495 = sbr.rel (%p2769_p5) target bundleno = 5651 (0x1613), region = 88 }
0x14d4   : > { %v2489_v21 = vadd.f32 %v2485_v59, %v3559_v20 }
0x14d6   : > { %2491 = vst.msk [vmem:[#allocation2 + $0x8] sm:$0xff] %vm738_vm1, %v2489_v21 }
0x14d7   : > { %v2770_v50 = vld [vmem:[%s3672_s2] ss:$0 sm:$0xff] }
0x14d8   : > { %v2771_v45 = vld [vmem:[%s3673_s4] ss:$0 sm:$0xff] }
0x14d9   : > { %v2496_v22 = vld [vmem:[#allocation2] sm:$0xff] }
0x14da   : > { %v2500_v24 = vsel %vm738_vm1, %v2496_v22, 0.0 }
0x14db   : > { %2501 = vadd.xlane.f32.xlu0 %v2500_v24 }
0x14dd   : > { %v2497_v23 = vld [vmem:[#allocation2 + $0x8] sm:$0xff] }
0x14de   : > { %v2503_v25 = vsel %vm738_vm1, %v2497_v23, 0.0 }
0x14df   : > { %2504 = vadd.xlane.f32.xlu0 %v2503_v25 }
0x1564   : > { %v2502_v4 = vpop.xlane.xlu0 %2501 }
0x1565   : > { %v2506_v26 = vmul.f32 0.015625, %v2502_v4 }
0x1567   : > { %v2508_v27 = vsub.f32 %v2496_v22, %v2506_v26 }
0x1568   : > { %v2505_v28 = vpop.xlane.xlu0 %2504 }
0x1569   : > { %v2507_v31 = vmul.f32 0.015625, %v2505_v28  ;;  %v2510_v29 = vmul.f32 %v2508_v27, %v2508_v27 }
0x156b   : > { %v2509_v20 = vsub.f32 %v2497_v23, %v2507_v31  ;;  %v2512_v30 = vsel %vm738_vm1, %v2510_v29, 0.0 }
0x156c   : > { %2513 = vadd.xlane.f32.xlu1 %v2512_v30 }
0x156d   : > { %v2511_v32 = vmul.f32 %v2509_v20, %v2509_v20 }
0x156f   : > { %v2515_v33 = vsel %vm738_vm1, %v2511_v32, 0.0 }
0x1570   : > { %2516 = vadd.xlane.f32.xlu1 %v2515_v33 }
0x15f5   : > { %v2514_v34 = vpop.xlane.xlu1 %2513 }
0x15f6   : > { %v2518_v35 = vmul.f32 0.015625, %v2514_v34 }
0x15f8   : > { %v2520_v36 = vadd.f32 1e-06, %v2518_v35 }
0x15f9   : > { %v2517_v37 = vpop.xlane.xlu1 %2516 }
0x15fa   : > { %3104 = vrsqrt.f32 %v2520_v36  ;;  %v2519_v38 = vmul.f32 0.015625, %v2517_v37 }
0x15fc   : > { %v2521_v39 = vadd.f32 1e-06, %v2519_v38 }
0x15fe   : > { %3106 = vrsqrt.f32 %v2521_v39 }
0x1607   : > { %v3105_v40 = vpop.eup %3104 }
0x1608   : > { %v2524_v46 = vmul.f32 %v3105_v40, %v2508_v27 }
0x160a   : > { %v2532_v48 = vmul.f32 %v2770_v50, %v2524_v46 }
0x160b   : > { %v3107_v44 = vpop.eup %3106 }
0x160c   : > { %v2540_v47 = vadd.f32 %v2771_v45, %v2532_v48  ;;  %v2525_v49 = vmul.f32 %v3107_v44, %v2509_v20 }
0x160e   : > { %2542 = vst.msk [vmem:[%s3674_s30] sm:$0xff] %vm738_vm1, %v2540_v47  ;;  %v2533_v52 = vmul.f32 %v2770_v50, %v2525_v49 }
0x1610   : > { %v2541_v53 = vadd.f32 %v2771_v45, %v2533_v52 }
0x1612   : > { %2543 = vst.msk [vmem:[%s3674_s30 + $0x8] sm:$0xff] %vm738_vm1, %v2541_v53 }
0x1613 PF: > { %s3675_s25 = sld [smem:[#allocation3_spill]] }
0x1619   : > { %s25_s18 = sadd.s32 1, %s3675_s25  }
0x161a   : > { %p22_p6 = scmp.ge.s32.totalorder %s25_s18, 4  }
0x161c   :  { %24 = sbr.rel (!%p22_p6) target bundleno = 7 (0x7), region = 147 }

// kernel: _lambda_.7
= control target key start
LH: loop header
LB: loop body
LE: loop exit
PB: predicated region body
PF: predicated region fallthrough
CT: control target
= control target key end

     0   :  { %s2854_s21 = smov 0   ;;  %s3237_s0 = inlined_call_operand.vmem [shape: f32[4,16,32], index: 0, kind: input, shape index: {}]   ;;  %s3238_s1 = inlined_call_operand.vmem [shape: f32[1,32], index: 1, kind: input, shape index: {}, may-alias: {1,7}]   ;;  %s3239_s2 = inlined_call_operand.vmem [shape: f32[1,32], index: 2, kind: input, shape index: {}, may-alias: {2,6,8,12}]   ;;  %s3240_s3 = inlined_call_operand.vmem [shape: bf16[32,96], index: 3, kind: input, shape index: {}]   ;;  %s3241_s4 = inlined_call_operand.vmem [shape: f32[1,96], index: 4, kind: input, shape index: {}]   ;;  %s3242_s5 = inlined_call_operand.vmem [shape: bf16[32,32], index: 5, kind: input, shape index: {}]   ;;  %s3243_s6 = inlined_call_operand.vmem [shape: f32[1,32], index: 6, kind: input, shape index: {}, may-alias: {2,6,8,12}]   ;;  %s3244_s7 = inlined_call_operand.vmem [shape: f32[1,32], index: 7, kind: input, shape index: {}, may-alias: {1,7}]   ;;  %s3245_s8 = inlined_call_operand.vmem [shape: f32[1,32], index: 8, kind: input, shape index: {}, may-alias: {2,6,8,12}]   ;;  %s3246_s9 = inlined_call_operand.vmem [shape: bf16[32,128], index: 9, kind: input, shape index: {}]   ;;  %s3247_s10 = inlined_call_operand.vmem [shape: f32[1,128], index: 10, kind: input, shape index: {}]   ;;  %s3248_s11 = inlined_call_operand.vmem [shape: bf16[128,32], index: 11, kind: input, shape index: {}]   ;;  %s3249_s12 = inlined_call_operand.vmem [shape: f32[1,32], index: 12, kind: input, shape index: {}, may-alias: {2,6,8,12}]   ;;  %s3250_s13 = inlined_call_operand.vmem [shape: bf16[32,14], index: 13, kind: input, shape index: {}]   ;;  %s3251_s14 = inlined_call_operand.vmem [shape: f32[1,14], index: 14, kind: input, shape index: {}]   ;;  %s3252_s15 = inlined_call_operand.vmem [shape: f32[4,2,14], index: 15, kind: output, shape index: {0}]   ;;  %s3253_s16 = inlined_call_operand.vmem [shape: f32[4,2,14], index: 16, kind: output, shape index: {1}]  }
   0x1   :  { %3254 = sst [smem:[#allocation2_spill]] %s3237_s0 }
   0x2 LB: > { %s2347_s22 = sadd.s32 4294967295, %s2753_s21   ;;  %p2351_p0 = scmp.ge.s32.totalorder %s2753_s21, 1  ;;  %s2753_s21 = sphi %s2854_s21, %s27_s21  }
   0x3   : > { %p465_p1 = scmp.lt.s32.totalorder %s2753_s21, 5 }
   0x5   : > { %p466_p2 = pnand %p2351_p0, %p465_p1 }
   0x6   : > { %p518_p3 = scmp.lt.s32.totalorder (!%p466_p2), %s2347_s22, 3  ;;  %s3255_s26 = sld [smem:[#allocation2_spill]] (!%p466_p2) }
   0x7   : > { %469 = sbr.rel (%p466_p2) target bundleno = 5815 (0x16b7), region = 80  ;;  %s2757_s25 = smov (!%p466_p2), 88  }
   0x8   : > { %s2761_s28 = smov (!%p466_p2), 64   ;;  %s2762_s29 = smov (!%p466_p2), 80  }
   0x9   : > { %s2763_s30 = smov (!%p466_p2), 112   ;;  %s2764_s0 = smov (!%p466_p2), 56  }
   0xa   : > { %s2766_s24 = smov (!%p466_p2), 104   ;;  %s2767_s17 = smov (!%p466_p2), 48  }
   0xb   : > { %s2768_s20 = smov (!%p466_p2), 40  }
   0xc   : > { %s3257_s22 = smov (!%p518_p3, %s2347_s22), 3  ;;  %vm574_vm0 = vcmask 261120   ;;  %v2685_v14 = vld [vmem:[%s3240_s3 + $0x8] sm:$0xff]   ;;  %v2755_v15 = vmov 0.0   ;;  %vm2756_vm1 = vmmov 0   ;;  %v2686_v16 = vld [vmem:[%s3240_s3] sm:$0xff]   ;;  %v570_v47 = vlaneseq }
   0xd   : > { %s2408_s23 = sshll.u32 %s3257_s22, 4  ;;  %2475 = vmatprep.subr.bf16.mxu1 %v2755_v15  ;;  %2479 = vmatprep.mubr.msk.bf16.mxu1 %vm2756_vm1, %v2755_v15  ;;  %v2356_v25 = vld [vmem:[%s3238_s1] ss:$0 sm:$0xff]  ;;  %vm685_vm2 = vcmask 64512   ;;  %v2760_v50 = vmov -1e+30  }
   0xe   : > { %s522_s27 = scalar_lea.vmem %s3255_s26, %s2408_s23  ;;  %2476 = vmatpush3.bf16.msra.mxu1 %v2685_v14  ;;  %2489 = vmatprep.subr.bf16.mxu0 %v2755_v15  ;;  %v2357_v29 = vld [vmem:[%s3239_s2] ss:$0 sm:$0xff]  ;;  %s2758_s26 = smov 96   ;;  %v571_v48 = vand.u32 127, %v570_v47  ;;  %vm751_vm4 = vcmask 1043456   ;;  %vm2180_vm5 = vcmask 1040384  }
   0xf   : > { %v2868_v0 = vld [vmem:[%s522_s27] sm:$0xff]  ;;  %v2870_v1 = vld [vmem:[%s522_s27 + $0x8] sm:$0xff]  ;;  %2477 = vmatprep.subr.bf16.mxu1 %v2755_v15  ;;  %2491 = vmatprep.mubr.msk.bf16.mxu0 %vm2756_vm1, %v2755_v15  ;;  %s2759_s27 = smov 120   ;;  %s2765_s23 = smov 72   ;;  %vm2249_vm6 = vcmask 107520  }
  0x10   : > { %v575_v2 = vsel %vm574_vm0, %v2868_v0, 0.0  ;;  %v578_v3 = vsel %vm574_vm0, %v2870_v1, 0.0  ;;  %v2358_v35 = vld [vmem:[%s3241_s4] ss:$0 sm:$0xff]  ;;  %vm572_vm3 = vcmp.lt.s32.totalorder %v571_v48, 5  ;;  %s2354_s18 = sshll.u32 %s3257_s22, 1 }
  0x11   : > { %576 = vadd.xlane.f32.xlu0 %v575_v2  ;;  %v2925_v51 = vsel %vm572_vm3, 0.0, %v2760_v50 }
  0x12   : > { %2478 = vmatpush3.bf16.msra.mxu1 %v2686_v16 }
  0x13   : > { %2483 = vmatprep.subr.bf16.mxu1 %v2755_v15 }
  0x15   : > { %579 = vadd.xlane.f32.xlu0 %v578_v3 }
  0x9a   : > { %v577_v4 = vpop.xlane.xlu0 %576 }
  0x9b   : > { %v582_v5 = vmul.f32 0.03125, %v577_v4 }
  0x9d   : > { %v584_v6 = vsub.f32 %v2868_v0, %v582_v5 }
  0x9e   : > { %v580_v7 = vpop.xlane.xlu0 %579 }
  0x9f   : > { %v583_v8 = vmul.f32 0.03125, %v580_v7  ;;  %v586_v9 = vmul.f32 %v584_v6, %v584_v6 }
  0xa1   : > { %v585_v10 = vsub.f32 %v2870_v1, %v583_v8  ;;  %v588_v11 = vsel %vm574_vm0, %v586_v9, 0.0 }
  0xa2   : > { %589 = vadd.xlane.f32.xlu1 %v588_v11 }
  0xa3   : > { %v587_v12 = vmul.f32 %v585_v10, %v585_v10 }
  0xa5   : > { %v591_v13 = vsel %vm574_vm0, %v587_v12, 0.0 }
  0xa6   : > { %592 = vadd.xlane.f32.xlu1 %v591_v13 }
 0x12b   : > { %v590_v17 = vpop.xlane.xlu1 %589 }
 0x12c   : > { %v594_v18 = vmul.f32 0.03125, %v590_v17 }
 0x12e   : > { %v596_v19 = vadd.f32 1e-06, %v594_v18 }
 0x12f   : > { %v593_v20 = vpop.xlane.xlu1 %592 }
 0x130   : > { %2699 = vrsqrt.f32 %v596_v19  ;;  %v595_v21 = vmul.f32 0.03125, %v593_v20 }
 0x132   : > { %v597_v22 = vadd.f32 1e-06, %v595_v21 }
 0x134   : > { %2701 = vrsqrt.f32 %v597_v22 }
 0x13d   : > { %v2700_v23 = vpop.eup %2699 }
 0x13e   : > { %v600_v24 = vmul.f32 %v2700_v23, %v584_v6 }
 0x140   : > { %v608_v28 = vmul.f32 %v2356_v25, %v600_v24 }
 0x141   : > { %v2702_v26 = vpop.eup %2701 }
 0x142   : > { %v601_v27 = vmul.f32 %v2702_v26, %v585_v10  ;;  %v616_v31 = vadd.f32 %v2357_v29, %v608_v28  ;;  %v539_v26 = vld [vmem:[%s3242_s5] sm:$0xf]  ;;  %v540_v28 = vld [vmem:[%s3242_s5 + $0x4] sm:$0xf] }
 0x144   : > { %v609_v30 = vmul.f32 %v2356_v25, %v601_v27  ;;  %v2955_v27 = vsel %vm751_vm4, %v539_v26, 0 }
 0x146   : > { %v617_v32 = vadd.f32 %v2357_v29, %v609_v30  ;;  %v2963_v29 = vsel %vm751_vm4, %v540_v28, 0 }
 0x148   : > { %v618_v33 = vpack.c.bf16 %v617_v32, %v616_v31 }
 0x14a   : > { %2480 = vmatmul.mubr.msk.bf16.vlgmr.msra.gmra.mxu1 %vm574_vm0, %v618_v33 }
 0x14b   : > { %2485 = vmatprep.mubr.msk.bf16.mxu1 %vm2756_vm1, %v2755_v15 }
 0x20a   : > { %v674_v34 = vpop.f32.mrf.mxu1 }
 0x20b   : > { %v675_v38 = vadd.f32 %v2358_v35, %v674_v34 }
 0x20c   : > { %v2481_v36 = vpop.f32.mrf.mxu1 }
 0x20e   : > { %v677_v37 = vpop.f32.mrf.mxu1 }
 0x20f   : > { %v678_v39 = vadd.f32 %v2358_v35, %v677_v37 }
 0x210   : > { %v2482_v40 = vpop.f32.mrf.mxu1 }
 0x211   : > { %v2906_v41 = vpack.c.bf16 %v678_v39, %v675_v38 }
 0x213   : > { %798 = vrot.lane.b32.xlu1 %v2906_v41, %s2757_s25  ;;  %683 = vrot.lane.b32.xlu0 %v2906_v41, %s2758_s26 }
 0x217   : > { %796 = vrot.lane.b32.xlu1 %v2906_v41, %s2759_s27 }
 0x285   : > { %v684_v42 = vpop.permute.xlu0 %683  ;;  %v799_v44 = vpop.permute.xlu1 %798 }
 0x286   : > { %v690_v43 = vsel %vm685_vm2, %v684_v42, 0  ;;  %v804_v45 = vsel %vm685_vm2, %v799_v44, 0 }
 0x287   : > { %2484 = vmatpush3.bf16.xpose.msra.mxu1 %v690_v43 }
 0x288   : > { %2495 = vmatprep.subr.bf16.mxu1 %v2755_v15 }
 0x289   : > { %v797_v46 = vpop.permute.xlu1 %796 }
 0x28e   : > { %2486 = vmatmul.mubr.msk.bf16.vlgmr.msra.gmra.mxu1 %vm685_vm2, %v2906_v41 }
 0x28f   : > { %2496 = vmatpush3.bf16.xpose.msra.mxu1 %v804_v45  ;;  %2497 = vmatprep.mubr.msk.bf16.mxu1 %vm2756_vm1, %v2755_v15 }
 0x290   : > { %2507 = vmatprep.subr.bf16.mxu1 %v2755_v15 }
 0x296   : > { %2498 = vmatmul.mubr.msk.bf16.vlgmr.msra.gmra.mxu1 %vm685_vm2, %v797_v46 }
 0x297   : > { %2509 = vmatprep.mubr.msk.bf16.mxu1 %vm2756_vm1, %v2755_v15  ;;  %2508 = vmatpush3.bf16.msra.mxu1 %v2963_v29 }
 0x298   : > { %2519 = vmatprep.subr.bf16.mxu1 %v2755_v15 }
 0x34e   : > { %v726_v49 = vpop.f32.mrf.mxu1 }
 0x34f   : > { %v732_v52 = vmul.f32 0.35355338, %v726_v49 }
 0x350   : > { %v2487_v53 = vpop.f32.mrf.mxu1 }
 0x351   : > { %v733_v54 = vadd.f32 %v732_v52, %v2925_v51 }
 0x352   : > { %v729_v55 = vpop.f32.mrf.mxu1 }
 0x353   : > { %v734_v56 = vsel %vm685_vm2, %v733_v54, -inf }
 0x354   : > { %735 = vmax.xlane.f32.xlu1 %v734_v56  ;;  %v2488_v57 = vpop.f32.mrf.mxu1 }
 0x356   : > { %v840_v58 = vpop.f32.mrf.mxu1 }
 0x357   : > { %v846_v59 = vmul.f32 0.35355338, %v840_v58 }
 0x358   : > { %v2499_v60 = vpop.f32.mrf.mxu1 }
 0x359   : > { %v847_v61 = vadd.f32 %v846_v59, %v2925_v51 }
 0x35a   : > { %v843_v62 = vpop.f32.mrf.mxu1 }
 0x35b   : > { %v848_v63 = vsel %vm685_vm2, %v847_v61, -inf }
 0x35c   : > { %849 = vmax.xlane.f32.xlu0 %v848_v63  ;;  %v2500_v2 = vpop.f32.mrf.mxu1 }
 0x365   : > { %746 = vrot.lane.b32.xlu1 %v2906_v41, %s2761_s28 }
 0x369   : > { %1003 = vrot.lane.b32.xlu1 %v2906_v41, %s2762_s29 }
 0x36d   : > { %1001 = vrot.lane.b32.xlu1 %v2906_v41, %s2763_s30 }
 0x3dd   : > { %v736_v3 = vpop.xlane.xlu1 %735 }
 0x3de   : > { %v737_v4 = vsub.f32 %v733_v54, %v736_v3 }
 0x3e0   : > { %v738_v5 = vmul.f32 1.442695, %v737_v4 }
 0x3e1   : > { %v747_v6 = vpop.permute.xlu1 %746 }
 0x3e2   : > { %2703 = vpow2.f32 %v738_v5  ;;  %v753_v7 = vsel %vm751_vm4, %v747_v6, 0 }
 0x3e3   : > { %2490 = vmatpush3.bf16.msra.mxu0 %v753_v7 }
 0x3e4   : > { %2501 = vmatprep.subr.bf16.mxu0 %v2755_v15 }
 0x3e5   : > { %v850_v8 = vpop.xlane.xlu0 %849  ;;  %v1004_v35 = vpop.permute.xlu1 %1003 }
 0x3e6   : > { %v851_v9 = vsub.f32 %v847_v61, %v850_v8  ;;  %v1009_v39 = vsel %vm685_vm2, %v1004_v35, 0 }
 0x3e8   : > { %v852_v10 = vmul.f32 1.442695, %v851_v9 }
 0x3e9   : > { %v1002_v43 = vpop.permute.xlu1 %1001 }
 0x3ea   : > { %2705 = vpow2.f32 %v852_v10 }
 0x3ef   : > { %v2704_v11 = vpop.eup %2703 }
 0x3f0   : > { %v740_v12 = vsel %vm685_vm2, %v2704_v11, 0.0 }
 0x3f1   : > { %741 = vadd.xlane.f32.xlu0 %v740_v12 }
 0x3f7   : > { %v2706_v13 = vpop.eup %2705 }
 0x3f8   : > { %v854_v14 = vsel %vm685_vm2, %v2706_v13, 0.0 }
 0x3f9   : > { %855 = vadd.xlane.f32.xlu0 %v854_v14 }
 0x40f   : > { %860 = vrot.lane.b32.xlu0 %v2906_v41, %s2764_s0 }
 0x47a   : > { %v742_v16 = vpop.xlane.xlu0 %741 }
 0x47b   : > { %2707 = vrcp.f32 %v742_v16 }
 0x482   : > { %v856_v17 = vpop.xlane.xlu0 %855 }
 0x483   : > { %2709 = vrcp.f32 %v856_v17 }
 0x486   : > { %v861_v20 = vpop.permute.xlu0 %860 }
 0x487   : > { %v866_v22 = vsel %vm751_vm4, %v861_v20, 0 }
 0x488   : > { %v2708_v18 = vpop.eup %2707 }
 0x489   : > { %v744_v19 = vmul.f32 %v2708_v18, %v2704_v11 }
 0x48b   : > { %v745_v21 = vpack.c.bf16 %v744_v19, %v744_v19 }
 0x48d   : > { %2492 = vmatmul.mubr.msk.bf16.vlgmr.msra.gmra.mxu0 %vm685_vm2, %v745_v21 }
 0x48e   : > { %2502 = vmatpush3.bf16.msra.mxu0 %v866_v22  ;;  %2503 = vmatprep.mubr.msk.bf16.mxu0 %vm2756_vm1, %v2755_v15 }
 0x48f   : > { %2513 = vmatprep.subr.bf16.mxu0 %v2755_v15 }
 0x490   : > { %v2710_v23 = vpop.eup %2709 }
 0x491   : > { %v858_v24 = vmul.f32 %v2710_v23, %v2706_v13  ;;  %v541_v13 = vld [vmem:[%s3242_s5 + $0x8] sm:$0xf] }
 0x492   : > { %v3003_v14 = vsel %vm751_vm4, %v541_v13, 0 }
 0x493   : > { %v859_v25 = vpack.c.bf16 %v858_v24, %v858_v24 }
 0x495   : > { %2504 = vmatmul.mubr.msk.bf16.vlgmr.msra.gmra.mxu0 %vm685_vm2, %v859_v25 }
 0x496   : > { %2515 = vmatprep.mubr.msk.bf16.mxu0 %vm2756_vm1, %v2755_v15  ;;  %2514 = vmatpush3.bf16.msra.mxu0 %v2955_v27 }
 0x497   : > { %2525 = vmatprep.subr.bf16.mxu0 %v2755_v15 }
 0x54d   : > { %v789_v30 = vpop.f32.mrf.mxu0 }
 0x54e   : > { %v795_v31 = vpack.c.bf16 %v789_v30, %v789_v30  ;;  %v3015_v30 = vrot.slane %v2906_v41, 4 }
 0x54f   : > { %v2493_v32 = vpop.f32.mrf.mxu0 }
 0x550   : > { %2516 = vmatmul.mubr.msk.bf16.vlgmr.msra.gmra.mxu0 %vm685_vm2, %v795_v31 }
 0x551   : > { %v792_v33 = vpop.f32.mrf.mxu0  ;;  %2527 = vmatprep.mubr.msk.bf16.mxu0 %vm2756_vm1, %v2755_v15 }
 0x553   : > { %v2494_v34 = vpop.f32.mrf.mxu0 }
 0x555   : > { %v902_v36 = vpop.f32.mrf.mxu0 }
 0x556   : > { %v908_v37 = vpack.c.bf16 %v902_v36, %v902_v36 }
 0x557   : > { %v2505_v38 = vpop.f32.mrf.mxu0 }
 0x558   : > { %2510 = vmatmul.mubr.msk.bf16.vlgmr.msra.gmra.mxu1 %vm685_vm2, %v908_v37 }
 0x559   : > { %2520 = vmatpush3.bf16.xpose.msra.mxu1 %v1009_v39  ;;  %v905_v40 = vpop.f32.mrf.mxu0  ;;  %2521 = vmatprep.mubr.msk.bf16.mxu1 %vm2756_vm1, %v2755_v15 }
 0x55a   : > { %2531 = vmatprep.subr.bf16.mxu1 %v2755_v15 }
 0x55b   : > { %v2506_v42 = vpop.f32.mrf.mxu0 }
 0x560   : > { %2522 = vmatmul.mubr.msk.bf16.vlgmr.msra.gmra.mxu1 %vm685_vm2, %v1002_v43 }
 0x561   : > { %2533 = vmatprep.mubr.msk.bf16.mxu1 %vm2756_vm1, %v2755_v15  ;;  %2532 = vmatpush3.bf16.msra.mxu1 %v3003_v14 }
 0x562   : > { %2543 = vmatprep.subr.bf16.mxu1 %v2755_v15 }
 0x610   : > { %v995_v44 = vpop.f32.mrf.mxu0 }
 0x612   : > { %v2517_v45 = vpop.f32.mrf.mxu0 }
 0x614   : > { %v998_v46 = vpop.f32.mrf.mxu0 }
 0x616   : > { %v2518_v47 = vpop.f32.mrf.mxu0 }
 0x618   : > { %v949_v48 = vpop.f32.mrf.mxu1 }
 0x619   : > { %v2978_v49 = vadd.f32 %v995_v44, %v949_v48 }
 0x61a   : > { %v2511_v50 = vpop.f32.mrf.mxu1 }
 0x61c   : > { %v952_v52 = vpop.f32.mrf.mxu1 }
 0x61e   : > { %v2512_v53 = vpop.f32.mrf.mxu1 }
 0x61f   : > { %v542_v53 = vld [vmem:[%s3242_s5 + $0xc] sm:$0xf] }
 0x620   : > { %v1045_v54 = vpop.f32.mrf.mxu1 }
 0x621   : > { %v1051_v55 = vmul.f32 0.35355338, %v1045_v54  ;;  %v3049_v54 = vsel %vm751_vm4, %v542_v53, 0 }
 0x622   : > { %v2523_v56 = vpop.f32.mrf.mxu1 }
 0x623   : > { %v1052_v57 = vadd.f32 %v1051_v55, %v2925_v51 }
 0x624   : > { %v1048_v58 = vpop.f32.mrf.mxu1 }
 0x625   : > { %v1053_v59 = vsel %vm685_vm2, %v1052_v57, -inf }
 0x626   : > { %1054 = vmax.xlane.f32.xlu1 %v1053_v59  ;;  %v2524_v60 = vpop.f32.mrf.mxu1 }
 0x637   : > { %1163 = vrot.lane.b32.xlu1 %v2906_v41, %s2765_s23 }
 0x63b   : > { %1161 = vrot.lane.b32.xlu1 %v2906_v41, %s2766_s24 }
 0x6af   : > { %v1055_v61 = vpop.xlane.xlu1 %1054 }
 0x6b0   : > { %v1056_v62 = vsub.f32 %v1052_v57, %v1055_v61 }
 0x6b2   : > { %v1057_v63 = vmul.f32 1.442695, %v1056_v62 }
 0x6b3   : > { %v1164_v9 = vpop.permute.xlu1 %1163 }
 0x6b4   : > { %2711 = vpow2.f32 %v1057_v63  ;;  %v1169_v11 = vsel %vm685_vm2, %v1164_v9, 0 }
 0x6b7   : > { %v1162_v12 = vpop.permute.xlu1 %1161 }
 0x6c1   : > { %v2712_v2 = vpop.eup %2711 }
 0x6c2   : > { %v1059_v3 = vsel %vm685_vm2, %v2712_v2, 0.0 }
 0x6c3   : > { %1060 = vadd.xlane.f32.xlu0 %v1059_v3 }
 0x6d9   : > { %1065 = vrot.lane.b32.xlu0 %v2906_v41, %s2767_s17 }
 0x74c   : > { %v1061_v4 = vpop.xlane.xlu0 %1060 }
 0x74d   : > { %2713 = vrcp.f32 %v1061_v4 }
 0x750   : > { %v1066_v5 = vpop.permute.xlu0 %1065 }
 0x751   : > { %v1071_v6 = vsel %vm751_vm4, %v1066_v5, 0 }
 0x752   : > { %2526 = vmatpush3.bf16.msra.mxu0 %v1071_v6 }
 0x753   : > { %2537 = vmatprep.subr.bf16.mxu0 %v2755_v15 }
 0x75a   : > { %v2714_v7 = vpop.eup %2713 }
 0x75b   : > { %v1063_v8 = vmul.f32 %v2714_v7, %v2712_v2 }
 0x75d   : > { %v1064_v10 = vpack.c.bf16 %v1063_v8, %v1063_v8 }
 0x75f   : > { %2528 = vmatmul.mubr.msk.bf16.vlgmr.msra.gmra.mxu0 %vm685_vm2, %v1064_v10 }
 0x760   : > { %2538 = vmatpush3.bf16.xpose.msra.mxu0 %v1169_v11  ;;  %2539 = vmatprep.mubr.msk.bf16.mxu0 %vm2756_vm1, %v2755_v15 }
 0x761   : > { %2549 = vmatprep.subr.bf16.mxu0 %v2755_v15 }
 0x767   : > { %2540 = vmatmul.mubr.msk.bf16.vlgmr.msra.gmra.mxu0 %vm685_vm2, %v1162_v12 }
 0x768   : > { %2551 = vmatprep.mubr.msk.bf16.mxu0 %vm2756_vm1, %v2755_v15  ;;  %2550 = vmatpush3.bf16.msra.mxu0 %v3049_v54 }
 0x769   : > { %2561 = vmatprep.subr.bf16.mxu0 %v2755_v15 }
 0x81f   : > { %v1107_v16 = vpop.f32.mrf.mxu0 }
 0x820   : > { %v1113_v17 = vpack.c.bf16 %v1107_v16, %v1107_v16 }
 0x821   : > { %v2529_v18 = vpop.f32.mrf.mxu0 }
 0x822   : > { %2534 = vmatmul.mubr.msk.bf16.vlgmr.msra.gmra.mxu1 %vm685_vm2, %v1113_v17 }
 0x823   : > { %v1110_v19 = vpop.f32.mrf.mxu0  ;;  %2545 = vmatprep.mubr.msk.bf16.mxu1 %vm2756_vm1, %v2755_v15 }
 0x825   : > { %v2530_v20 = vpop.f32.mrf.mxu0 }
 0x827   : > { %v1205_v21 = vpop.f32.mrf.mxu0 }
 0x828   : > { %v1211_v22 = vmul.f32 0.35355338, %v1205_v21 }
 0x829   : > { %v2541_v23 = vpop.f32.mrf.mxu0 }
 0x82a   : > { %v1212_v24 = vadd.f32 %v1211_v22, %v2925_v51 }
 0x82b   : > { %v1208_v25 = vpop.f32.mrf.mxu0 }
 0x82c   : > { %v1213_v26 = vsel %vm685_vm2, %v1212_v24, -inf }
 0x82d   : > { %1214 = vmax.xlane.f32.xlu0 %v1213_v26  ;;  %v2542_v28 = vpop.f32.mrf.mxu0 }
 0x843   : > { %1225 = vrot.lane.b32.xlu0 %v2906_v41, %s2768_s20 }
 0x847   : > { %1435 = vrot.lane.b32.xlu0 %v3015_v30, %s2757_s25 }
 0x8b6   : > { %v1215_v31 = vpop.xlane.xlu0 %1214 }
 0x8b7   : > { %v1216_v32 = vsub.f32 %v1212_v24, %v1215_v31 }
 0x8b9   : > { %v1217_v33 = vmul.f32 1.442695, %v1216_v32 }
 0x8ba   : > { %v1226_v34 = vpop.permute.xlu0 %1225 }
 0x8bb   : > { %2715 = vpow2.f32 %v1217_v33  ;;  %v1231_v35 = vsel %vm751_vm4, %v1226_v34, 0 }
 0x8bc   : > { %2544 = vmatpush3.bf16.msra.mxu1 %v1231_v35 }
 0x8bd   : > { %2555 = vmatprep.subr.bf16.mxu1 %v2755_v15 }
 0x8c8   : > { %v2716_v36 = vpop.eup %2715 }
 0x8c9   : > { %v1219_v37 = vsel %vm685_vm2, %v2716_v36, 0.0 }
 0x8ca   : > { %1220 = vadd.xlane.f32.xlu1 %v1219_v37 }
 0x8db   : > { %1322 = vrot.lane.b32.xlu1 %v3015_v30, %s2758_s26 }
 0x8df   : > { %1433 = vrot.lane.b32.xlu1 %v3015_v30, %s2759_s27  ;;  %s526_s27 = scalar_lea.vmem %s3252_s15, %s2354_s18 }
 0x8e2   : > { %v1154_v41 = vpop.f32.mrf.mxu1 }
 0x8e3   : > { %v3027_v38 = vadd.f32 %v1154_v41, %v2978_v49  ;;  %v1436_v49 = vpop.permute.xlu0 %1435 }
 0x8e4   : > { %v2535_v39 = vpop.f32.mrf.mxu1  ;;  %v1441_v50 = vsel %vm685_vm2, %v1436_v49, 0 }
 0x8e6   : > { %v1157_v40 = vpop.f32.mrf.mxu1 }
 0x8e8   : > { %v2536_v42 = vpop.f32.mrf.mxu1 }
 0x953   : > { %v1221_v43 = vpop.xlane.xlu1 %1220 }
 0x954   : > { %2717 = vrcp.f32 %v1221_v43 }
 0x957   : > { %v1323_v46 = vpop.permute.xlu1 %1322 }
 0x958   : > { %v1328_v48 = vsel %vm685_vm2, %v1323_v46, 0 }
 0x95b   : > { %v1434_v52 = vpop.permute.xlu1 %1433 }
 0x961   : > { %v2718_v44 = vpop.eup %2717 }
 0x962   : > { %v1223_v45 = vmul.f32 %v2718_v44, %v2716_v36 }
 0x964   : > { %v1224_v47 = vpack.c.bf16 %v1223_v45, %v1223_v45 }
 0x966   : > { %2546 = vmatmul.mubr.msk.bf16.vlgmr.msra.gmra.mxu1 %vm685_vm2, %v1224_v47 }
 0x967   : > { %2556 = vmatpush3.bf16.xpose.msra.mxu1 %v1328_v48  ;;  %2557 = vmatprep.mubr.msk.bf16.mxu1 %vm2756_vm1, %v2755_v15 }
 0x968   : > { %2567 = vmatprep.subr.bf16.mxu1 %v2755_v15 }
 0x96e   : > { %2558 = vmatmul.mubr.msk.bf16.vlgmr.msra.gmra.mxu1 %vm685_vm2, %v3015_v30 }
 0x96f   : > { %2568 = vmatpush3.bf16.xpose.msra.mxu1 %v1441_v50  ;;  %2569 = vmatprep.mubr.msk.bf16.mxu1 %vm2756_vm1, %v2755_v15 }
 0x970   : > { %2579 = vmatprep.subr.bf16.mxu1 %v2755_v15 }
 0x976   : > { %2570 = vmatmul.mubr.msk.bf16.vlgmr.msra.gmra.mxu1 %vm685_vm2, %v1434_v52 }
 0x977   : > { %2580 = vmatpush3.bf16.msra.mxu1 %v2963_v29  ;;  %2581 = vmatprep.mubr.msk.bf16.mxu1 %vm2756_vm1, %v2755_v15 }
 0x978   : > { %2591 = vmatprep.subr.bf16.mxu1 %v2755_v15 }
 0xa26   : > { %v1267_v55 = vpop.f32.mrf.mxu1 }
 0xa27   : > { %v1273_v56 = vpack.c.bf16 %v1267_v55, %v1267_v55 }
 0xa28   : > { %v2547_v57 = vpop.f32.mrf.mxu1 }
 0xa29   : > { %2552 = vmatmul.mubr.msk.bf16.vlgmr.msra.gmra.mxu0 %vm685_vm2, %v1273_v56 }
 0xa2a   : > { %v1270_v29 = vpop.f32.mrf.mxu1  ;;  %2563 = vmatprep.mubr.msk.bf16.mxu0 %vm2756_vm1, %v2755_v15 }
 0xa2c   : > { %v2548_v58 = vpop.f32.mrf.mxu1 }
 0xa2e   : > { %v1364_v59 = vpop.f32.mrf.mxu1 }
 0xa2f   : > { %v1370_v60 = vmul.f32 0.35355338, %v1364_v59 }
 0xa30   : > { %v2559_v61 = vpop.f32.mrf.mxu1 }
 0xa31   : > { %v1371_v62 = vadd.f32 %v1370_v60, %v2925_v51 }
 0xa32   : > { %v1367_v63 = vpop.f32.mrf.mxu1 }
 0xa33   : > { %v1372_v2 = vsel %vm685_vm2, %v1371_v62, -inf }
 0xa34   : > { %1373 = vmax.xlane.f32.xlu0 %v1372_v2  ;;  %v2560_v3 = vpop.f32.mrf.mxu1 }
 0xa36   : > { %v1477_v4 = vpop.f32.mrf.mxu1 }
 0xa37   : > { %v1483_v5 = vmul.f32 0.35355338, %v1477_v4 }
 0xa38   : > { %v2571_v6 = vpop.f32.mrf.mxu1 }
 0xa39   : > { %v1484_v7 = vadd.f32 %v1483_v5, %v2925_v51 }
 0xa3a   : > { %v1480_v8 = vpop.f32.mrf.mxu1 }
 0xa3b   : > { %v1485_v9 = vsel %vm685_vm2, %v1484_v7, -inf }
 0xa3c   : > { %1486 = vmax.xlane.f32.xlu1 %v1485_v9  ;;  %v2572_v10 = vpop.f32.mrf.mxu1 }
 0xa4d   : > { %1497 = vrot.lane.b32.xlu1 %v3015_v30, %s2764_s0 }
 0xa51   : > { %1634 = vrot.lane.b32.xlu1 %v3015_v30, %s2762_s29  ;;  %s530_s29 = scalar_lea.vmem %s3253_s16, %s2354_s18 }
 0xa55   : > { %1632 = vrot.lane.b32.xlu1 %v3015_v30, %s2763_s30 }
 0xabd   : > { %v1374_v11 = vpop.xlane.xlu0 %1373 }
 0xabe   : > { %v1375_v12 = vsub.f32 %v1371_v62, %v1374_v11 }
 0xac0   : > { %v1376_v13 = vmul.f32 1.442695, %v1375_v12 }
 0xac2   : > { %2719 = vpow2.f32 %v1376_v13 }
 0xac5   : > { %v1487_v16 = vpop.xlane.xlu1 %1486 }
 0xac6   : > { %v1488_v17 = vsub.f32 %v1484_v7, %v1487_v16 }
 0xac8   : > { %v1489_v18 = vmul.f32 1.442695, %v1488_v17 }
 0xac9   : > { %v1498_v37 = vpop.permute.xlu1 %1497 }
 0xaca   : > { %2721 = vpow2.f32 %v1489_v18 }
 0xacd   : > { %v1635_v48 = vpop.permute.xlu1 %1634 }
 0xacf   : > { %v2720_v19 = vpop.eup %2719 }
 0xad0   : > { %v1378_v20 = vsel %vm685_vm2, %v2720_v19, 0.0 }
 0xad1   : > { %1379 = vadd.xlane.f32.xlu0 %v1378_v20  ;;  %v1633_v56 = vpop.permute.xlu1 %1632 }
 0xad7   : > { %v2722_v21 = vpop.eup %2721 }
 0xad8   : > { %v1491_v22 = vsel %vm685_vm2, %v2722_v21, 0.0 }
 0xad9   : > { %1492 = vadd.xlane.f32.xlu0 %v1491_v22 }
 0xae9   : > { %v1314_v23 = vpop.f32.mrf.mxu0 }
 0xaea   : > { %v3069_v24 = vadd.f32 %v1314_v23, %v3027_v38  ;;  %v1503_v38 = vsel %vm751_vm4, %v1498_v37, 0 }
 0xaeb   : > { %v2553_v25 = vpop.f32.mrf.mxu0 }
 0xaed   : > { %v1317_v26 = vpop.f32.mrf.mxu0 }
 0xaef   : > { %v2554_v28 = vpop.f32.mrf.mxu0  ;;  %1384 = vrot.lane.b32.xlu0 %v3015_v30, %s2761_s28 }
 0xb5a   : > { %v1380_v31 = vpop.xlane.xlu0 %1379 }
 0xb5b   : > { %2723 = vrcp.f32 %v1380_v31 }
 0xb62   : > { %v1493_v32 = vpop.xlane.xlu0 %1492 }
 0xb63   : > { %2725 = vrcp.f32 %v1493_v32 }
 0xb66   : > { %v1385_v33 = vpop.permute.xlu0 %1384 }
 0xb67   : > { %v1390_v34 = vsel %vm751_vm4, %v1385_v33, 0 }
 0xb68   : > { %v2724_v35 = vpop.eup %2723  ;;  %2562 = vmatpush3.bf16.msra.mxu0 %v1390_v34 }
 0xb69   : > { %2573 = vmatprep.subr.bf16.mxu0 %v2755_v15  ;;  %v1382_v36 = vmul.f32 %v2724_v35, %v2720_v19  ;;  %v1946_v35 = vadd.f32 %v3069_v24, %v2868_v0 }
 0xb6b   : > { %v1383_v41 = vpack.c.bf16 %v1382_v36, %v1382_v36  ;;  %v2386_v36 = vld [vmem:[%s3243_s6] ss:$0 sm:$0xff] }
 0xb6d   : > { %2564 = vmatmul.mubr.msk.bf16.vlgmr.msra.gmra.mxu0 %vm685_vm2, %v1383_v41 }
 0xb6e   : > { %2574 = vmatpush3.bf16.msra.mxu0 %v1503_v38  ;;  %2575 = vmatprep.mubr.msk.bf16.mxu0 %vm2756_vm1, %v2755_v15 }
 0xb6f   : > { %2585 = vmatprep.subr.bf16.mxu0 %v2755_v15 }
 0xb70   : > { %v2726_v39 = vpop.eup %2725 }
 0xb71   : > { %v1495_v40 = vmul.f32 %v2726_v39, %v2722_v21  ;;  %v3130_v39 = vadd.f32 %v2386_v36, %v1946_v35  ;;  %v2388_v35 = vld [vmem:[%s3245_s8] ss:$0 sm:$0xff] }
 0xb73   : > { %v1496_v42 = vpack.c.bf16 %v1495_v40, %v1495_v40 }
 0xb75   : > { %2576 = vmatmul.mubr.msk.bf16.vlgmr.msra.gmra.mxu0 %vm685_vm2, %v1496_v42 }
 0xb76   : > { %2586 = vmatpush3.bf16.msra.mxu0 %v2955_v27  ;;  %2587 = vmatprep.mubr.msk.bf16.mxu0 %vm2756_vm1, %v2755_v15  ;;  %v1640_v27 = vsel %vm685_vm2, %v1635_v48, 0 }
 0xb77   : > { %2597 = vmatprep.subr.bf16.mxu0 %v2755_v15 }
 0xc2d   : > { %v1426_v43 = vpop.f32.mrf.mxu0 }
 0xc2e   : > { %v1432_v44 = vpack.c.bf16 %v1426_v43, %v1426_v43  ;;  %v1956_v43 = vsel %vm574_vm0, %v3130_v39, 0.0 }
 0xc2f   : > { %v2565_v45 = vpop.f32.mrf.mxu0 }
 0xc30   : > { %2588 = vmatmul.mubr.msk.bf16.vlgmr.msra.gmra.mxu0 %vm685_vm2, %v1432_v44 }
 0xc31   : > { %v1429_v46 = vpop.f32.mrf.mxu0  ;;  %2599 = vmatprep.mubr.msk.bf16.mxu0 %vm2756_vm1, %v2755_v15 }
 0xc33   : > { %v2566_v47 = vpop.f32.mrf.mxu0 }
 0xc35   : > { %v1539_v49 = vpop.f32.mrf.mxu0 }
 0xc36   : > { %v1545_v50 = vpack.c.bf16 %v1539_v49, %v1539_v49 }
 0xc37   : > { %v2577_v52 = vpop.f32.mrf.mxu0 }
 0xc38   : > { %2582 = vmatmul.mubr.msk.bf16.vlgmr.msra.gmra.mxu1 %vm685_vm2, %v1545_v50 }
 0xc39   : > { %2592 = vmatpush3.bf16.xpose.msra.mxu1 %v1640_v27  ;;  %v1542_v53 = vpop.f32.mrf.mxu0  ;;  %2593 = vmatprep.mubr.msk.bf16.mxu1 %vm2756_vm1, %v2755_v15 }
 0xc3a   : > { %2603 = vmatprep.subr.bf16.mxu1 %v2755_v15 }
 0xc3b   : > { %v2578_v55 = vpop.f32.mrf.mxu0 }
 0xc40   : > { %2594 = vmatmul.mubr.msk.bf16.vlgmr.msra.gmra.mxu1 %vm685_vm2, %v1633_v56 }
 0xc41   : > { %2604 = vmatpush3.bf16.msra.mxu1 %v3003_v14  ;;  %2605 = vmatprep.mubr.msk.bf16.mxu1 %vm2756_vm1, %v2755_v15 }
 0xc42   : > { %2615 = vmatprep.subr.bf16.mxu1 %v2755_v15 }
 0xcf0   : > { %v1626_v57 = vpop.f32.mrf.mxu0 }
 0xcf2   : > { %v2589_v29 = vpop.f32.mrf.mxu0 }
 0xcf4   : > { %v1629_v58 = vpop.f32.mrf.mxu0 }
 0xcf6   : > { %v2590_v59 = vpop.f32.mrf.mxu0 }
 0xcf8   : > { %v1583_v60 = vpop.f32.mrf.mxu1 }
 0xcf9   : > { %v3098_v61 = vadd.f32 %v1626_v57, %v1583_v60 }
 0xcfa   : > { %v2583_v62 = vpop.f32.mrf.mxu1 }
 0xcfc   : > { %v1586_v63 = vpop.f32.mrf.mxu1 }
 0xcfe   : > { %v2584_v2 = vpop.f32.mrf.mxu1 }
 0xd00   : > { %v1676_v3 = vpop.f32.mrf.mxu1 }
 0xd01   : > { %v1682_v4 = vmul.f32 0.35355338, %v1676_v3 }
 0xd02   : > { %v2595_v5 = vpop.f32.mrf.mxu1 }
 0xd03   : > { %v1683_v14 = vadd.f32 %v1682_v4, %v2925_v51 }
 0xd04   : > { %v1679_v6 = vpop.f32.mrf.mxu1 }
 0xd05   : > { %v1684_v7 = vsel %vm685_vm2, %v1683_v14, -inf }
 0xd06   : > { %1685 = vmax.xlane.f32.xlu0 %v1684_v7  ;;  %v2596_v8 = vpop.f32.mrf.mxu1 }
 0xd1c   : > { %1696 = vrot.lane.b32.xlu0 %v3015_v30, %s2767_s17 }
 0xd20   : > { %1789 = vrot.lane.b32.xlu0 %v3015_v30, %s2766_s24 }
 0xd8f   : > { %v1686_v9 = vpop.xlane.xlu0 %1685 }
 0xd90   : > { %v1687_v10 = vsub.f32 %v1683_v14, %v1686_v9 }
 0xd92   : > { %v1688_v11 = vmul.f32 1.442695, %v1687_v10 }
 0xd93   : > { %v1697_v12 = vpop.permute.xlu0 %1696 }
 0xd94   : > { %2727 = vpow2.f32 %v1688_v11  ;;  %v1702_v13 = vsel %vm751_vm4, %v1697_v12, 0 }
 0xd95   : > { %2598 = vmatpush3.bf16.msra.mxu0 %v1702_v13 }
 0xd96   : > { %2609 = vmatprep.subr.bf16.mxu0 %v2755_v15 }
 0xd97   : > { %v1790_v25 = vpop.permute.xlu0 %1789 }
 0xda1   : > { %v2728_v16 = vpop.eup %2727 }
 0xda2   : > { %v1690_v17 = vsel %vm685_vm2, %v2728_v16, 0.0 }
 0xda3   : > { %1691 = vadd.xlane.f32.xlu1 %v1690_v17 }
 0xdb4   : > { %1791 = vrot.lane.b32.xlu1 %v3015_v30, %s2765_s23 }
 0xe2c   : > { %v1692_v18 = vpop.xlane.xlu1 %1691 }
 0xe2d   : > { %2729 = vrcp.f32 %v1692_v18  ;;  %v2688_v18 = vld [vmem:[%s3246_s9] sm:$0xff]  }
 0xe30   : > { %v1792_v21 = vpop.permute.xlu1 %1791 }
 0xe31   : > { %v1797_v23 = vsel %vm685_vm2, %v1792_v21, 0 }
 0xe3a   : > { %v2730_v19 = vpop.eup %2729 }
 0xe3b   : > { %v1694_v20 = vmul.f32 %v2730_v19, %v2728_v16 }
 0xe3d   : > { %v1695_v22 = vpack.c.bf16 %v1694_v20, %v1694_v20 }
 0xe3f   : > { %2600 = vmatmul.mubr.msk.bf16.vlgmr.msra.gmra.mxu0 %vm685_vm2, %v1695_v22 }
 0xe40   : > { %2610 = vmatpush3.bf16.xpose.msra.mxu0 %v1797_v23  ;;  %2611 = vmatprep.mubr.msk.bf16.mxu0 %vm2756_vm1, %v2755_v15 }
 0xe41   : > { %2621 = vmatprep.subr.bf16.mxu0 %v2755_v15 }
 0xe47   : > { %2612 = vmatmul.mubr.msk.bf16.vlgmr.msra.gmra.mxu0 %vm685_vm2, %v1790_v25 }
 0xe48   : > { %2622 = vmatpush3.bf16.msra.mxu0 %v3049_v54  ;;  %2623 = vmatprep.mubr.msk.bf16.mxu0 %vm2756_vm1, %v2755_v15 }
 0xe49   : > { %2635 = vmatprep.subr.bf16.mxu0 %v2755_v15 }
 0xeff   : > { %v1738_v26 = vpop.f32.mrf.mxu0 }
 0xf00   : > { %v1744_v28 = vpack.c.bf16 %v1738_v26, %v1738_v26 }
 0xf01   : > { %v2601_v31 = vpop.f32.mrf.mxu0 }
 0xf02   : > { %2606 = vmatmul.mubr.msk.bf16.vlgmr.msra.gmra.mxu1 %vm685_vm2, %v1744_v28  ;;  %v2387_v31 = vld [vmem:[%s3244_s7] ss:$0 sm:$0xff] }
 0xf03   : > { %v1741_v32 = vpop.f32.mrf.mxu0  ;;  %2617 = vmatprep.mubr.msk.bf16.mxu1 %vm2756_vm1, %v2755_v15 }
 0xf05   : > { %v2602_v33 = vpop.f32.mrf.mxu0 }
 0xf07   : > { %v1833_v34 = vpop.f32.mrf.mxu0 }
 0xf08   : > { %v1839_v54 = vmul.f32 0.35355338, %v1833_v34 }
 0xf09   : > { %v2613_v37 = vpop.f32.mrf.mxu0 }
 0xf0a   : > { %v1840_v41 = vadd.f32 %v1839_v54, %v2925_v51 }
 0xf0b   : > { %v1836_v38 = vpop.f32.mrf.mxu0 }
 0xf0c   : > { %v1841_v40 = vsel %vm685_vm2, %v1840_v41, -inf  ;;  %v2689_v38 = vld [vmem:[%s3248_s11 + $0x38] sm:$0xff]  }
 0xf0d   : > { %1842 = vmax.xlane.f32.xlu1 %v1841_v40  ;;  %v2614_v42 = vpop.f32.mrf.mxu0  ;;  %v2690_v40 = vld [vmem:[%s3248_s11 + $0x30] sm:$0xff]  }
 0xf0e   : > { %v2691_v42 = vld [vmem:[%s3248_s11 + $0x28] sm:$0xff]  }
 0xf11   : > { %1957 = vadd.xlane.f32.xlu1 %v1956_v43  ;;  %v2692_v43 = vld [vmem:[%s3248_s11 + $0x20] sm:$0xff]  }
 0xf96   : > { %v1843_v0 = vpop.xlane.xlu1 %1842 }
 0xf97   : > { %v1844_v24 = vsub.f32 %v1840_v41, %v1843_v0  ;;  %v2693_v0 = vld [vmem:[%s3248_s11 + $0x18] sm:$0xff]  }
 0xf99   : > { %v1845_v44 = vmul.f32 1.442695, %v1844_v24  ;;  %v2694_v24 = vld [vmem:[%s3248_s11 + $0x10] sm:$0xff]  }
 0xf9b   : > { %2731 = vpow2.f32 %v1845_v44  ;;  %v2695_v44 = vld [vmem:[%s3248_s11 + $0x8] sm:$0xff]  }
 0xfa8   : > { %v2732_v45 = vpop.eup %2731 }
 0xfa9   : > { %v1847_v46 = vsel %vm685_vm2, %v2732_v45, 0.0 }
 0xfaa   : > { %1848 = vadd.xlane.f32.xlu0 %v1847_v46  ;;  %v2389_v46 = vld [vmem:[%s3247_s10] ss:$0 sm:$0xff] }
 0xfc0   : > { %1853 = vrot.lane.b32.xlu0 %v3015_v30, %s2768_s20 }
 0xfc2   : > { %v1782_v51 = vpop.f32.mrf.mxu1 }
 0xfc3   : > { %v1788_v47 = vadd.f32 %v1782_v51, %v3098_v61  ;;  %v1958_v61 = vpop.xlane.xlu1 %1957 }
 0xfc4   : > { %v2607_v48 = vpop.f32.mrf.mxu1  ;;  %v1962_v62 = vmul.f32 0.03125, %v1958_v61 }
 0xfc6   : > { %v1785_v49 = vpop.f32.mrf.mxu1  ;;  %v1964_v4 = vsub.f32 %v3130_v39, %v1962_v62 }
 0xfc8   : > { %v2608_v50 = vpop.f32.mrf.mxu1  ;;  %v1966_v9 = vmul.f32 %v1964_v4, %v1964_v4 }
 0xfca   : > { %v1968_v10 = vsel %vm574_vm0, %v1966_v9, 0.0  ;;  %v2698_v9 = vld [vmem:[%s3250_s13] sm:$0xff]  }
0x1033   : > { %v1849_v52 = vpop.xlane.xlu0 %1848 }
0x1034   : > { %2733 = vrcp.f32 %v1849_v52 }
0x1037   : > { %v1854_v27 = vpop.permute.xlu0 %1853 }
0x1038   : > { %v1859_v53 = vsel %vm751_vm4, %v1854_v27, 0 }
0x1039   : > { %2616 = vmatpush3.bf16.msra.mxu1 %v1859_v53 }
0x103a   : > { %2627 = vmatprep.subr.bf16.mxu1 %v2755_v15 }
0x1041   : > { %v2734_v55 = vpop.eup %2733 }
0x1042   : > { %v1851_v56 = vmul.f32 %v2734_v55, %v2732_v45  ;;  %v2696_v45 = vld [vmem:[%s3248_s11] sm:$0xff]  }
0x1044   : > { %v1852_v57 = vpack.c.bf16 %v1851_v56, %v1851_v56 }
0x1046   : > { %2618 = vmatmul.mubr.msk.bf16.vlgmr.msra.gmra.mxu1 %vm685_vm2, %v1852_v57 }
0x1047   : > { %2631 = vmatprep.mubr.msk.bf16.mxu1 %vm2756_vm1, %v2755_v15 }
0x1106   : > { %v1895_v30 = vpop.f32.mrf.mxu1 }
0x1107   : > { %v1901_v29 = vpack.c.bf16 %v1895_v30, %v1895_v30 }
0x1108   : > { %v2619_v58 = vpop.f32.mrf.mxu1 }
0x1109   : > { %2624 = vmatmul.mubr.msk.bf16.vlgmr.msra.gmra.mxu0 %vm685_vm2, %v1901_v29 }
0x110a   : > { %v1898_v59 = vpop.f32.mrf.mxu1  ;;  %2651 = vmatprep.mubr.msk.bf16.mxu0 %vm2756_vm1, %v2755_v15  ;;  %2636 = vmatpush3.bf16.msra.mxu0 %v2689_v38 }
0x110b   : > { %2637 = vmatprep.subr.bf16.mxu0 %v2755_v15 }
0x110c   : > { %v2620_v60 = vpop.f32.mrf.mxu1 }
0x110e   : > { %2638 = vmatpush3.bf16.msra.mxu0 %v2690_v40 }
0x110f   : > { %2639 = vmatprep.subr.bf16.mxu0 %v2755_v15 }
0x1112   : > { %2640 = vmatpush3.bf16.msra.mxu0 %v2691_v42 }
0x1113   : > { %2641 = vmatprep.subr.bf16.mxu0 %v2755_v15 }
0x1116   : > { %2642 = vmatpush3.bf16.msra.mxu0 %v2692_v43 }
0x1117   : > { %2643 = vmatprep.subr.bf16.mxu0 %v2755_v15 }
0x111a   : > { %2644 = vmatpush3.bf16.msra.mxu0 %v2693_v0 }
0x111b   : > { %2645 = vmatprep.subr.bf16.mxu0 %v2755_v15 }
0x111e   : > { %2646 = vmatpush3.bf16.msra.mxu0 %v2694_v24 }
0x111f   : > { %2647 = vmatprep.subr.bf16.mxu0 %v2755_v15 }
0x1122   : > { %2648 = vmatpush3.bf16.msra.mxu0 %v2695_v44 }
0x1123   : > { %2649 = vmatprep.subr.bf16.mxu0 %v2755_v15 }
0x1126   : > { %2650 = vmatpush3.bf16.msra.mxu0 %v2696_v45 }
0x11c9   : > { %v1939_v63 = vpop.f32.mrf.mxu0 }
0x11ca   : > { %v1945_v2 = vadd.f32 %v1939_v63, %v1788_v47 }
0x11cb   : > { %v2625_v3 = vpop.f32.mrf.mxu0 }
0x11cc   : > { %v1947_v5 = vadd.f32 %v1945_v2, %v2870_v1  ;;  %v2687_v1 = vld [vmem:[%s3246_s9 + $0x8] sm:$0xff]  }
0x11cd   : > { %v1942_v14 = vpop.f32.mrf.mxu0  ;;  %2628 = vmatpush3.bf16.msra.mxu1 %v2687_v1 }
0x11ce   : > { %v3149_v6 = vadd.f32 %v2386_v36, %v1947_v5  ;;  %2629 = vmatprep.subr.bf16.mxu1 %v2755_v15 }
0x11cf   : > { %v2626_v7 = vpop.f32.mrf.mxu0 }
0x11d0   : > { %v1959_v8 = vsel %vm574_vm0, %v3149_v6, 0.0 }
0x11d1   : > { %1960 = vadd.xlane.f32.xlu1 %v1959_v8  ;;  %2630 = vmatpush3.bf16.msra.mxu1 %v2688_v18  ;;  %v2697_v8 = vld [vmem:[%s3250_s13 + $0x8] sm:$0xff]  }
0x11d2   : > { %2655 = vmatprep.subr.bf16.mxu1 %v2755_v15 }
0x11d5   : > { %1969 = vadd.xlane.f32.xlu1 %v1968_v10 }
0x125a   : > { %v1961_v11 = vpop.xlane.xlu1 %1960 }
0x125b   : > { %v1963_v12 = vmul.f32 0.03125, %v1961_v11  ;;  %v2393_v11 = vld [vmem:[%s3249_s12] ss:$0 sm:$0xff] }
0x125d   : > { %v1965_v13 = vsub.f32 %v3149_v6, %v1963_v12 }
0x125e   : > { %v1970_v19 = vpop.xlane.xlu1 %1969 }
0x125f   : > { %v1967_v16 = vmul.f32 %v1965_v13, %v1965_v13  ;;  %v1974_v20 = vmul.f32 0.03125, %v1970_v19 }
0x1261   : > { %v1971_v17 = vsel %vm574_vm0, %v1967_v16, 0.0  ;;  %v1976_v21 = vadd.f32 1e-06, %v1974_v20 }
0x1262   : > { %1972 = vadd.xlane.f32.xlu1 %v1971_v17 }
0x1263   : > { %2735 = vrsqrt.f32 %v1976_v21 }
0x1270   : > { %v2736_v26 = vpop.eup %2735 }
0x1271   : > { %v1980_v28 = vmul.f32 %v2736_v26, %v1964_v4 }
0x1273   : > { %v1988_v34 = vmul.f32 %v2387_v31, %v1980_v28 }
0x1275   : > { %v1996_v36 = vadd.f32 %v2388_v35, %v1988_v34 }
0x12eb   : > { %v1973_v22 = vpop.xlane.xlu1 %1972 }
0x12ec   : > { %v1975_v23 = vmul.f32 0.03125, %v1973_v22  ;;  %v2402_v22 = vld [vmem:[%s3251_s14] ss:$0 sm:$0xff] }
0x12ee   : > { %v1977_v25 = vadd.f32 1e-06, %v1975_v23 }
0x12f0   : > { %2737 = vrsqrt.f32 %v1977_v25 }
0x12fd   : > { %v2738_v32 = vpop.eup %2737 }
0x12fe   : > { %v1981_v33 = vmul.f32 %v2738_v32, %v1965_v13 }
0x1300   : > { %v1989_v54 = vmul.f32 %v2387_v31, %v1981_v33 }
0x1302   : > { %v1997_v37 = vadd.f32 %v2388_v35, %v1989_v54 }
0x1304   : > { %v1998_v41 = vpack.c.bf16 %v1997_v37, %v1996_v36 }
0x1306   : > { %2632 = vmatmul.mubr.msk.bf16.vlgmr.msra.gmra.mxu1 %vm574_vm0, %v1998_v41 }
0x1307   : > { %2659 = vmatprep.mubr.msk.bf16.mxu1 %vm2756_vm1, %v2755_v15  ;;  %2656 = vmatpush3.bf16.msra.mxu1 %v2697_v8 }
0x1308   : > { %2657 = vmatprep.subr.bf16.mxu1 %v2755_v15 }
0x130b   : > { %2658 = vmatpush3.bf16.msra.mxu1 %v2698_v9 }
0x13c6   : > { %v2054_v51 = vpop.f32.mrf.mxu1 }
0x13c7   : > { %v2055_v47 = vadd.f32 %v2389_v46, %v2054_v51 }
0x13c8   : > { %v2633_v48 = vpop.f32.mrf.mxu1 }
0x13c9   : > { %v2061_v49 = vmul.f32 %v2055_v47, %v2055_v47 }
0x13ca   : > { %v2057_v50 = vpop.f32.mrf.mxu1 }
0x13cb   : > { %v2063_v52 = vmul.f32 %v2061_v49, %v2055_v47  ;;  %v2058_v27 = vadd.f32 %v2389_v46, %v2057_v50 }
0x13cc   : > { %v2634_v53 = vpop.f32.mrf.mxu1 }
0x13cd   : > { %v2065_v55 = vmul.f32 0.044715, %v2063_v52  ;;  %v2062_v56 = vmul.f32 %v2058_v27, %v2058_v27 }
0x13cf   : > { %v2067_v57 = vadd.f32 %v2065_v55, %v2055_v47  ;;  %v2064_v30 = vmul.f32 %v2062_v56, %v2058_v27 }
0x13d1   : > { %v2069_v29 = vmul.f32 0.7978846, %v2067_v57  ;;  %v2066_v58 = vmul.f32 0.044715, %v2064_v30 }
0x13d3   : > { %2739 = vtanh.f32 %v2069_v29  ;;  %v2068_v59 = vadd.f32 %v2066_v58, %v2058_v27 }
0x13d5   : > { %v2070_v60 = vmul.f32 0.7978846, %v2068_v59 }
0x13d7   : > { %2741 = vtanh.f32 %v2070_v60 }
0x13e0   : > { %v2740_v61 = vpop.eup %2739 }
0x13e1   : > { %v2073_v62 = vadd.f32 1.0, %v2740_v61 }
0x13e3   : > { %v2075_v2 = vmul.f32 0.5, %v2073_v62 }
0x13e4   : > { %v2742_v63 = vpop.eup %2741 }
0x13e5   : > { %v2074_v3 = vadd.f32 1.0, %v2742_v63  ;;  %v2077_v5 = vmul.f32 %v2075_v2, %v2055_v47 }
0x13e7   : > { %v2076_v4 = vmul.f32 0.5, %v2074_v3 }
0x13e9   : > { %v2078_v14 = vmul.f32 %v2076_v4, %v2058_v27 }
0x13eb   : > { %v2079_v7 = vpack.c.bf16 %v2078_v14, %v2077_v5 }
0x13ed   : > { %2652 = vmatmul.mubr.bf16.vlgmr.msra.gmra.mxu0 %v2079_v7 }
0x14ad   : > { %v2168_v10 = vpop.f32.mrf.mxu0 }
0x14ae   : > { %v2169_v16 = vadd.f32 %v2393_v11, %v2168_v10 }
0x14af   : > { %v2653_v12 = vpop.f32.mrf.mxu0 }
0x14b0   : > { %v2175_v15 = vadd.f32 %v2169_v16, %v3130_v39 }
0x14b1   : > { %v2171_v13 = vpop.f32.mrf.mxu0 }
0x14b2   : > { %v2172_v17 = vadd.f32 %v2393_v11, %v2171_v13 }
0x14b3   : > { %v2654_v1 = vpop.f32.mrf.mxu0 }
0x14b4   : > { %v2176_v18 = vadd.f32 %v2172_v17, %v3149_v6 }
0x14b6   : > { %v2178_v19 = vrot.slane %v2176_v18, 7 }
0x14b8   : > { %v2181_v20 = vsel %vm2180_vm5, %v2175_v15, %v2178_v19 }
0x14b9   : > { %v2182_v21 = vpack.c.bf16 %v2181_v20, %v2181_v20 }
0x14bb   : > { %2660 = vmatmul.mubr.msk.bf16.vlgmr.msra.gmra.mxu1 %vm574_vm0, %v2182_v21 }
0x157b   : > { %v2243_v23 = vpop.f32.mrf.mxu1 }
0x157c   : > { %v2244_v6 = vadd.f32 %v2402_v22, %v2243_v23 }
0x157d   : > { %v2661_v25 = vpop.f32.mrf.mxu1 }
0x157e   : > { %v2251_v39 = vsel %vm2249_vm6, %v2244_v6, -inf  ;;  %2250 = vst.msk [vmem:[%s526_s27] sm:$0x3] %vm2249_vm6, %v2244_v6 }
0x157f   : > { %2252 = vmax.xlane.f32.xlu1 %v2251_v39  ;;  %v2246_v26 = vpop.f32.mrf.mxu1 }
0x1581   : > { %v2662_v28 = vpop.f32.mrf.mxu1 }
0x1608   : > { %v2253_v31 = vpop.xlane.xlu1 %2252 }
0x1609   : > { %v2254_v32 = vsub.f32 %v2244_v6, %v2253_v31 }
0x160b   : > { %v2255_v33 = vmul.f32 1.442695, %v2254_v32 }
0x160d   : > { %2743 = vpow2.f32 %v2255_v33 }
0x161a   : > { %v2744_v34 = vpop.eup %2743 }
0x161b   : > { %v2257_v35 = vsel %vm2249_vm6, %v2744_v34, 0.0 }
0x161c   : > { %2258 = vadd.xlane.f32.xlu0 %v2257_v35 }
0x16a5   : > { %v2259_v54 = vpop.xlane.xlu0 %2258 }
0x16a6   : > { %2745 = vrcp.f32 %v2259_v54 }
0x16b3   : > { %v2746_v36 = vpop.eup %2745 }
0x16b4   : > { %v2261_v37 = vmul.f32 %v2746_v36, %v2744_v34 }
0x16b6   : > { %2262 = vst.msk [vmem:[%s530_s29] sm:$0x3] %vm2249_vm6, %v2261_v37 }
0x16b7 PF: > { %s27_s21 = sadd.s32 1, %s2753_s21  }
0x16b8   : > { %p24_p4 = scmp.ge.s32.totalorder %s27_s21, 6  }
0x16ba   :  { %26 = sbr.rel (!%p24_p4) target bundleno = 2 (0x2), region = 122 }

</bundles_post_ra>
